<compile_context>
chip_gen: v7x
topology: tpu7x:2x2x1
jax: 0.10.0
libtpu: 0.0.40
codegen_flags: <defaults>
</compile_context>

<pallas_src>
import functools

import jax
import jax.numpy as jnp
from jax import lax
from jax.experimental import pallas as pl
from jax.experimental.pallas import tpu as pltpu


# ----------------------------- Pallas kernels ----------------------------------------------------

def conv_relu_pool_kernel(xcat_ref, wb_ref, b_ref, o_ref):
    # xcat_ref: (2, TB*14, 90) bf16  row-pool-phase pi in {0,1}; row m = b*14 + v;
    #                                col di*30 + k holds xpad[b, 2v+pi+di, k]
    # wb_ref  : (2, 90, 448)   bf16  col-pool-phase pj; wb[pj, di*30+k, u*32+c] = w[c,di,dj]
    #                                iff k == 2u+pj+dj  (banded conv-as-matmul weights)
    # b_ref   : (1, 448)       f32   conv bias tiled over the 14 u positions
    # o_ref   : (TB*14, 448)   bf16  pooled+relu activations; row b*14+v, col u*32+c
    acc = None
    for pi in range(2):
        x_pi = xcat_ref[pi]                                           # (TB*14, 90)
        for pj in range(2):
            m = jnp.dot(x_pi, wb_ref[pj], preferred_element_type=jnp.float32)
            acc = m if acc is None else jnp.maximum(acc, m)
    # relu(max_phases(conv) + bias) == maxpool(relu(conv + bias))  (bias const, relu monotone)
    o_ref[...] = jnp.maximum(acc + b_ref[...], 0.0).astype(o_ref.dtype)


def fc_kernel(x_ref, w1_ref, b1_ref, w2_ref, b2_ref, o_ref):
    # x_ref: (TBF, 6272) bf16, w1_ref: (6272, 512) bf16, b1_ref: (1, 512) f32
    # w2_ref: (512, Cp)  bf16, b2_ref: (1, Cp)  f32,  o_ref: (TBF, Cp) f32
    h = jnp.dot(x_ref[...], w1_ref[...], preferred_element_type=jnp.float32) + b1_ref[...]
    h = jnp.maximum(h, 0.0).astype(jnp.bfloat16)
    o_ref[...] = jnp.dot(h, w2_ref[...], preferred_element_type=jnp.float32) + b2_ref[...]


# ----------------------------- one-time parameter preprocessing ----------------------------------

def preprocess_params(params, num_classes):
    """Convert PyTorch-layout params into kernel-ready tensors (called once, not per forward)."""
    conv_w, conv_b, fc1_w, fc1_b, fc2_w, fc2_b = params

    # Banded conv-as-matmul weights: wb[pj, di*30+k, u*32+c] = conv_w[c,0,di,dj] iff k == 2u+pj+dj
    p_ = jnp.arange(2)[:, None, None, None]
    d_ = jnp.arange(3)[None, :, None, None]
    k_ = jnp.arange(30)[None, None, :, None]
    u_ = jnp.arange(14)[None, None, None, :]
    sel = (k_ == 2 * u_ + p_ + d_).astype(jnp.float32)              # (2, 3, 30, 14)  [pj, dj, k, u]
    w3 = conv_w.reshape(32, 3, 3).astype(jnp.float32)               # (c, di, dj)
    wb = jnp.einsum('pdku,cid->pikuc', sel, w3)                     # (2, 3, 30, 14, 32)
    wb = wb.reshape(2, 90, 448).astype(jnp.bfloat16)

    cb = jnp.tile(conv_b.astype(jnp.float32), 14).reshape(1, 448)   # bias[u*32 + c] = conv_b[c]

    # fc1 expects NCHW-flatten order c*196 + (v*14+u); our features are (v*14+u)*32 + c.
    w1r = (fc1_w.reshape(512, 32, 196).transpose(2, 1, 0)
           .reshape(6272, 512).astype(jnp.bfloat16))
    b1r = fc1_b.reshape(1, 512).astype(jnp.float32)

    cp = max(128, ((num_classes + 127) // 128) * 128)               # lane-dense padded classes
    w2p = jnp.zeros((512, cp), jnp.float32).at[:, :num_classes].set(fc2_w.T.astype(jnp.float32))
    w2p = w2p.astype(jnp.bfloat16)
    b2p = jnp.zeros((1, cp), jnp.float32).at[0, :num_classes].set(fc2_b.astype(jnp.float32))

    return wb, cb, w1r, b1r, w2p, b2p


# ----------------------------- forward ------------------------------------------------------------

def _round_up(n, m):
    return ((n + m - 1) // m) * m


@functools.partial(jax.jit, static_argnums=(2,))
def vanilla_cnn_forward(x, prep, num_classes):
    wb, cb, w1r, b1r, w2p, b2p = prep
    B = x.shape[0]
    assert x.shape == (B, 1, 28, 28)
    cp = w2p.shape[1]

    TBc = 16                                   # images per conv grid step
    if B >= 64:
        Bp, TBF = _round_up(B, 64), 64         # activation rows per fc grid step
    else:
        Bp = _round_up(B, TBc)
        TBF = Bp

    # zero-pad (conv padding=1 + batch padding), cast to bf16
    xp = jnp.pad(x[:, 0].astype(jnp.float32),
                 ((0, Bp - B), (1, 1), (1, 1))).astype(jnp.bfloat16)          # (Bp, 30, 30)

    # Row-pool-phase decomposition + 3-row-tap concat (only ~3x of a tiny image, no 9x im2col):
    # xcat[pi, b*14+v, di*30+k] = xpad[b, 2v+pi+di, k]
    xcat = jnp.stack(
        [jnp.concatenate([xp[:, pi + di: pi + di + 27: 2, :] for di in range(3)], axis=-1)
         for pi in range(2)], axis=0).reshape(2, Bp * 14, 90)

    pooled = pl.pallas_call(
        conv_relu_pool_kernel,
        out_shape=jax.ShapeDtypeStruct((Bp * 14, 448), jnp.bfloat16),
        grid=(Bp // TBc,),
        in_specs=[
            pl.BlockSpec((2, TBc * 14, 90), lambda g: (0, g, 0)),
            pl.BlockSpec((2, 90, 448), lambda g: (0, 0, 0)),
            pl.BlockSpec((1, 448), lambda g: (0, 0)),
        ],
        out_specs=pl.BlockSpec((TBc * 14, 448), lambda g: (g, 0)),
        compiler_params=pltpu.CompilerParams(dimension_semantics=("parallel",)),
    )(xcat, wb, cb)

    # (Bp*14, 448) -> (Bp, 6272) is a contiguous row-major reshape (free); feature = (v*14+u)*32 + c
    flat = pooled.reshape(Bp, 6272)

    # nn.Dropout(p=0.5) is identity at inference time.
    # TODO(synk): training-mode dropout (random mask + 1/(1-p) scaling) not implemented.

    logits = pl.pallas_call(
        fc_kernel,
        out_shape=jax.ShapeDtypeStruct((Bp, cp), jnp.float32),
        grid=(Bp // TBF,),
        in_specs=[
            pl.BlockSpec((TBF, 6272), lambda i: (i, 0)),
            pl.BlockSpec((6272, 512), lambda i: (0, 0)),
            pl.BlockSpec((1, 512), lambda i: (0, 0)),
            pl.BlockSpec((512, cp), lambda i: (0, 0)),
            pl.BlockSpec((1, cp), lambda i: (0, 0)),
        ],
        out_specs=pl.BlockSpec((TBF, cp), lambda i: (i, 0)),
        compiler_params=pltpu.CompilerParams(
            dimension_semantics=("parallel",),
            vmem_limit_bytes=32 * 1024 * 1024),
    )(flat, w1r, b1r, w2p, b2p)

    return logits[:B, :num_classes]


# ----------------------------- pure-JAX reference (for verification only) ------------------------

def reference_forward(x, params):
    conv_w, conv_b, fc1_w, fc1_b, fc2_w, fc2_b = params
    y = lax.conv_general_dilated(x, conv_w, (1, 1), ((1, 1), (1, 1)),
                                 dimension_numbers=("NCHW", "OIHW", "NCHW"))
    y = y + conv_b[None, :, None, None]
    y = jnp.maximum(y, 0.0)
    y = lax.reduce_window(y, -jnp.inf, lax.max, (1, 1, 2, 2), (1, 1, 2, 2), "VALID")
    f = y.reshape(y.shape[0], -1)                      # NCHW flatten
    h = jnp.maximum(f @ fc1_w.T + fc1_b, 0.0)
    return h @ fc2_w.T + fc2_b


# ----------------------------- main ---------------------------------------------------------------

if __name__ == "__main__":
    num_classes = 10
    B = 2

    key = jax.random.PRNGKey(0)
    ks = jax.random.split(key, 7)
    conv_w = 0.10 * jax.random.normal(ks[0], (32, 1, 3, 3), jnp.float32)
    conv_b = 0.10 * jax.random.normal(ks[1], (32,), jnp.float32)
    fc1_w = 0.02 * jax.random.normal(ks[2], (512, 14 * 14 * 32), jnp.float32)
    fc1_b = 0.02 * jax.random.normal(ks[3], (512,), jnp.float32)
    fc2_w = 0.05 * jax.random.normal(ks[4], (num_classes, 512), jnp.float32)
    fc2_b = 0.05 * jax.random.normal(ks[5], (num_classes,), jnp.float32)
    params = (conv_w, conv_b, fc1_w, fc1_b, fc2_w, fc2_b)

    x = jax.random.normal(ks[6], (B, 1, 28, 28), jnp.float32)

    prep = preprocess_params(params, num_classes)      # one-time weight re-layout / bf16 cast
    out = jax.block_until_ready(vanilla_cnn_forward(x, prep, num_classes))

    ref = jax.block_until_ready(reference_forward(x, params))
    assert out.shape == (B, num_classes)
    # bf16 weights/activations (f32 accumulation) -> looser tolerance than a pure-f32 comparison
    assert jnp.allclose(out, ref, atol=3e-2, rtol=3e-2), (out, ref)

    print("KERNEL_OK")
</pallas_src>

<mosaic_0001>
module attributes {stable_mosaic.version = 11 : i64} {
  func.func @conv_relu_pool_kernel(%arg0: i32, %arg1: memref<2x224x90xbf16, #tpu.memory_space<vmem>>, %arg2: memref<2x90x448xbf16, #tpu.memory_space<vmem>>, %arg3: memref<1x448xf32, #tpu.memory_space<vmem>>, %arg4: memref<224x448xbf16, #tpu.memory_space<vmem>>) attributes {dimension_semantics = [#tpu.dimension_semantics<parallel>], iteration_bounds = array<i64: 1>, scalar_prefetch = 0 : i64, scratch_operands = 0 : i64, tpu.core_type = #tpu.core_type<tc>, window_params = [{transform_indices = @transform_0, window_bounds = array<i64: 2, 224, 90>}, {pipeline_mode = #tpu.pipeline_mode<synchronous>, transform_indices = @transform_1, window_bounds = array<i64: 2, 90, 448>}, {pipeline_mode = #tpu.pipeline_mode<synchronous>, transform_indices = @transform_2, window_bounds = array<i64: 1, 448>}, {transform_indices = @transform_3, window_bounds = array<i64: 224, 448>}]} {
    %c0 = arith.constant 0 : index
    %c0_0 = arith.constant 0 : index
    %c0_1 = arith.constant 0 : index
    %0 = vector.load %arg1[%c0, %c0_0, %c0_1] : memref<2x224x90xbf16, #tpu.memory_space<vmem>>, vector<1x224x90xbf16>
    %1 = vector.shape_cast %0 : vector<1x224x90xbf16> to vector<224x90xbf16>
    %c0_2 = arith.constant 0 : index
    %c0_3 = arith.constant 0 : index
    %c0_4 = arith.constant 0 : index
    %2 = vector.load %arg2[%c0_2, %c0_3, %c0_4] : memref<2x90x448xbf16, #tpu.memory_space<vmem>>, vector<1x90x448xbf16>
    %3 = vector.shape_cast %2 : vector<1x90x448xbf16> to vector<90x448xbf16>
    %cst = arith.constant dense<0.000000e+00> : vector<224x448xf32>
    %4 = tpu.matmul %1, %3, %cst {dimension_numbers = #tpu.dot_dimension_numbers<[1], [0], [0], [1], [0, 0, 1, 1], [], []>} : vector<224x90xbf16>, vector<90x448xbf16>, vector<224x448xf32> -> vector<224x448xf32>
    %c1 = arith.constant 1 : index
    %c0_5 = arith.constant 0 : index
    %c0_6 = arith.constant 0 : index
    %5 = vector.load %arg2[%c1, %c0_5, %c0_6] : memref<2x90x448xbf16, #tpu.memory_space<vmem>>, vector<1x90x448xbf16>
    %6 = vector.shape_cast %5 : vector<1x90x448xbf16> to vector<90x448xbf16>
    %cst_7 = arith.constant dense<0.000000e+00> : vector<224x448xf32>
    %7 = tpu.matmul %1, %6, %cst_7 {dimension_numbers = #tpu.dot_dimension_numbers<[1], [0], [0], [1], [0, 0, 1, 1], [], []>} : vector<224x90xbf16>, vector<90x448xbf16>, vector<224x448xf32> -> vector<224x448xf32>
    %8 = arith.maximumf %4, %7 : vector<224x448xf32>
    %c1_8 = arith.constant 1 : index
    %c0_9 = arith.constant 0 : index
    %c0_10 = arith.constant 0 : index
    %9 = vector.load %arg1[%c1_8, %c0_9, %c0_10] : memref<2x224x90xbf16, #tpu.memory_space<vmem>>, vector<1x224x90xbf16>
    %10 = vector.shape_cast %9 : vector<1x224x90xbf16> to vector<224x90xbf16>
    %c0_11 = arith.constant 0 : index
    %c0_12 = arith.constant 0 : index
    %c0_13 = arith.constant 0 : index
    %11 = vector.load %arg2[%c0_11, %c0_12, %c0_13] : memref<2x90x448xbf16, #tpu.memory_space<vmem>>, vector<1x90x448xbf16>
    %12 = vector.shape_cast %11 : vector<1x90x448xbf16> to vector<90x448xbf16>
    %cst_14 = arith.constant dense<0.000000e+00> : vector<224x448xf32>
    %13 = tpu.matmul %10, %12, %cst_14 {dimension_numbers = #tpu.dot_dimension_numbers<[1], [0], [0], [1], [0, 0, 1, 1], [], []>} : vector<224x90xbf16>, vector<90x448xbf16>, vector<224x448xf32> -> vector<224x448xf32>
    %14 = arith.maximumf %8, %13 : vector<224x448xf32>
    %c1_15 = arith.constant 1 : index
    %c0_16 = arith.constant 0 : index
    %c0_17 = arith.constant 0 : index
    %15 = vector.load %arg2[%c1_15, %c0_16, %c0_17] : memref<2x90x448xbf16, #tpu.memory_space<vmem>>, vector<1x90x448xbf16>
    %16 = vector.shape_cast %15 : vector<1x90x448xbf16> to vector<90x448xbf16>
    %cst_18 = arith.constant dense<0.000000e+00> : vector<224x448xf32>
    %17 = tpu.matmul %10, %16, %cst_18 {dimension_numbers = #tpu.dot_dimension_numbers<[1], [0], [0], [1], [0, 0, 1, 1], [], []>} : vector<224x90xbf16>, vector<90x448xbf16>, vector<224x448xf32> -> vector<224x448xf32>
    %18 = arith.maximumf %14, %17 : vector<224x448xf32>
    %c0_19 = arith.constant 0 : index
    %c0_20 = arith.constant 0 : index
    %19 = vector.load %arg3[%c0_19, %c0_20] : memref<1x448xf32, #tpu.memory_space<vmem>>, vector<1x448xf32>
    %20 = vector.broadcast %19 : vector<1x448xf32> to vector<224x448xf32>
    %21 = arith.addf %18, %20 : vector<224x448xf32>
    %cst_21 = arith.constant 0.000000e+00 : f32
    %22 = vector.broadcast %cst_21 : f32 to vector<224x448xf32>
    %23 = arith.maximumf %21, %22 : vector<224x448xf32>
    %24 = arith.truncf %23 : vector<224x448xf32> to vector<224x448xbf16>
    %c0_22 = arith.constant 0 : index
    %c0_23 = arith.constant 0 : index
    %25 = vector.load %arg4[%c0_22, %c0_23] : memref<224x448xbf16, #tpu.memory_space<vmem>>, vector<224x448xbf16>
    tpu.vector_store %arg4[%c0_22, %c0_23], %24 {strides = array<i32>} : memref<224x448xbf16, #tpu.memory_space<vmem>>, vector<224x448xbf16>,
    return
  }
  func.func @transform_0(%arg0: i32) -> (i32, i32, i32) {
    %c0_i32 = arith.constant 0 : i32
    %c0_i32_0 = arith.constant 0 : i32
    %c0_i32_1 = arith.constant 0 : i32
    return %c0_i32, %arg0, %c0_i32_0 : i32, i32, i32
  }
  func.func @transform_1(%arg0: i32) -> (i32, i32, i32) {
    %c0_i32 = arith.constant 0 : i32
    %c0_i32_0 = arith.constant 0 : i32
    %c0_i32_1 = arith.constant 0 : i32
    %c0_i32_2 = arith.constant 0 : i32
    return %c0_i32, %c0_i32_0, %c0_i32_1 : i32, i32, i32
  }
  func.func @transform_2(%arg0: i32) -> (i32, i32) {
    %c0_i32 = arith.constant 0 : i32
    %c0_i32_0 = arith.constant 0 : i32
    %c0_i32_1 = arith.constant 0 : i32
    return %c0_i32, %c0_i32_0 : i32, i32
  }
  func.func @transform_3(%arg0: i32) -> (i32, i32) {
    %c0_i32 = arith.constant 0 : i32
    %c0_i32_0 = arith.constant 0 : i32
    return %arg0, %c0_i32 : i32, i32
  }
}

module attributes {stable_mosaic.version = 11 : i64} {
  func.func @fc_kernel(%arg0: i32, %arg1: memref<16x6272xbf16, #tpu.memory_space<vmem>>, %arg2: memref<6272x512xbf16, #tpu.memory_space<vmem>>, %arg3: memref<1x512xf32, #tpu.memory_space<vmem>>, %arg4: memref<512x128xbf16, #tpu.memory_space<vmem>>, %arg5: memref<1x128xf32, #tpu.memory_space<vmem>>, %arg6: memref<16x128xf32, #tpu.memory_space<vmem>>) attributes {dimension_semantics = [#tpu.dimension_semantics<parallel>], iteration_bounds = array<i64: 1>, scalar_prefetch = 0 : i64, scratch_operands = 0 : i64, tpu.core_type = #tpu.core_type<tc>, window_params = [{transform_indices = @transform_0, window_bounds = array<i64: 16, 6272>}, {pipeline_mode = #tpu.pipeline_mode<synchronous>, transform_indices = @transform_1, window_bounds = array<i64: 6272, 512>}, {pipeline_mode = #tpu.pipeline_mode<synchronous>, transform_indices = @transform_2, window_bounds = array<i64: 1, 512>}, {pipeline_mode = #tpu.pipeline_mode<synchronous>, transform_indices = @transform_3, window_bounds = array<i64: 512, 128>}, {pipeline_mode = #tpu.pipeline_mode<synchronous>, transform_indices = @transform_4, window_bounds = array<i64: 1, 128>}, {transform_indices = @transform_5, window_bounds = array<i64: 16, 128>}]} {
    %c0 = arith.constant 0 : index
    %c0_0 = arith.constant 0 : index
    %0 = vector.load %arg1[%c0, %c0_0] : memref<16x6272xbf16, #tpu.memory_space<vmem>>, vector<16x6272xbf16>
    %c0_1 = arith.constant 0 : index
    %c0_2 = arith.constant 0 : index
    %1 = vector.load %arg2[%c0_1, %c0_2] : memref<6272x512xbf16, #tpu.memory_space<vmem>>, vector<6272x512xbf16>
    %cst = arith.constant dense<0.000000e+00> : vector<16x512xf32>
    %2 = tpu.matmul %0, %1, %cst {dimension_numbers = #tpu.dot_dimension_numbers<[1], [0], [0], [1], [0, 0, 1, 1], [], []>} : vector<16x6272xbf16>, vector<6272x512xbf16>, vector<16x512xf32> -> vector<16x512xf32>
    %c0_3 = arith.constant 0 : index
    %c0_4 = arith.constant 0 : index
    %3 = vector.load %arg3[%c0_3, %c0_4] : memref<1x512xf32, #tpu.memory_space<vmem>>, vector<1x512xf32>
    %4 = vector.broadcast %3 : vector<1x512xf32> to vector<16x512xf32>
    %5 = arith.addf %2, %4 : vector<16x512xf32>
    %cst_5 = arith.constant 0.000000e+00 : f32
    %6 = vector.broadcast %cst_5 : f32 to vector<16x512xf32>
    %7 = arith.maximumf %5, %6 : vector<16x512xf32>
    %8 = arith.truncf %7 : vector<16x512xf32> to vector<16x512xbf16>
    %c0_6 = arith.constant 0 : index
    %c0_7 = arith.constant 0 : index
    %9 = vector.load %arg4[%c0_6, %c0_7] : memref<512x128xbf16, #tpu.memory_space<vmem>>, vector<512x128xbf16>
    %cst_8 = arith.constant dense<0.000000e+00> : vector<16x128xf32>
    %10 = tpu.matmul %8, %9, %cst_8 {dimension_numbers = #tpu.dot_dimension_numbers<[1], [0], [0], [1], [0, 0, 1, 1], [], []>} : vector<16x512xbf16>, vector<512x128xbf16>, vector<16x128xf32> -> vector<16x128xf32>
    %c0_9 = arith.constant 0 : index
    %c0_10 = arith.constant 0 : index
    %11 = vector.load %arg5[%c0_9, %c0_10] : memref<1x128xf32, #tpu.memory_space<vmem>>, vector<1x128xf32>
    %12 = vector.broadcast %11 : vector<1x128xf32> to vector<16x128xf32>
    %13 = arith.addf %10, %12 : vector<16x128xf32>
    %c0_11 = arith.constant 0 : index
    %c0_12 = arith.constant 0 : index
    %14 = vector.load %arg6[%c0_11, %c0_12] : memref<16x128xf32, #tpu.memory_space<vmem>>, vector<16x128xf32>
    tpu.vector_store %arg6[%c0_11, %c0_12], %13 {strides = array<i32>} : memref<16x128xf32, #tpu.memory_space<vmem>>, vector<16x128xf32>,
    return
  }
  func.func @transform_0(%arg0: i32) -> (i32, i32) {
    %c0_i32 = arith.constant 0 : i32
    %c0_i32_0 = arith.constant 0 : i32
    return %arg0, %c0_i32 : i32, i32
  }
  func.func @transform_1(%arg0: i32) -> (i32, i32) {
    %c0_i32 = arith.constant 0 : i32
    %c0_i32_0 = arith.constant 0 : i32
    %c0_i32_1 = arith.constant 0 : i32
    return %c0_i32, %c0_i32_0 : i32, i32
  }
  func.func @transform_2(%arg0: i32) -> (i32, i32) {
    %c0_i32 = arith.constant 0 : i32
    %c0_i32_0 = arith.constant 0 : i32
    %c0_i32_1 = arith.constant 0 : i32
    return %c0_i32, %c0_i32_0 : i32, i32
  }
  func.func @transform_3(%arg0: i32) -> (i32, i32) {
    %c0_i32 = arith.constant 0 : i32
    %c0_i32_0 = arith.constant 0 : i32
    %c0_i32_1 = arith.constant 0 : i32
    return %c0_i32, %c0_i32_0 : i32, i32
  }
  func.func @transform_4(%arg0: i32) -> (i32, i32) {
    %c0_i32 = arith.constant 0 : i32
    %c0_i32_0 = arith.constant 0 : i32
    %c0_i32_1 = arith.constant 0 : i32
    return %c0_i32, %c0_i32_0 : i32, i32
  }
  func.func @transform_5(%arg0: i32) -> (i32, i32) {
    %c0_i32 = arith.constant 0 : i32
    %c0_i32_0 = arith.constant 0 : i32
    return %arg0, %c0_i32 : i32, i32
  }
}

</mosaic_0001>

<bundles_post_ra>
// kernel: vanilla_cnn_forward.2
= control target key start
LH: loop header
LB: loop body
LE: loop exit
PB: predicated region body
PF: predicated region fallthrough
CT: control target
= control target key end

     0   :  { %8 = vsyncpa [#allocation3], 0  ;;  %s3467_s12 = smov [#allocation2]   ;;  %s6019_s0 = inlined_call_operand.vmem [shape: bf16[2,224,90], index: 0, kind: input, shape index: {}]   ;;  %s6020_s1 = inlined_call_operand.vmem [shape: bf16[2,90,448], index: 1, kind: input, shape index: {}]   ;;  %s6021_s2 = inlined_call_operand.hbm [shape: f32[1,448], index: 2, kind: input, shape index: {}]   ;;  %s6022_s3 = inlined_call_operand.vmem [shape: bf16[224,448], index: 3, kind: output, shape index: {}]  }
   0x1   :  { %s19_s13 = sshll.u32 %s3467_s12, 4  ;;  %s3443_s16 = scalar_lea.hbm %s6021_s2, 64  ;;  %s20_s13 = int_to_ptr.vmem [resolvable:$true] %s19_s13 }
   0x2   :  { %p3444_p0 = scmp.ne.s32.totalorder %s6021_s2, %s3443_s16  ;;  %p3447_p1 = scmp.lt.u32.totalorder %s3443_s16, %s6021_s2 }
   0x4   :  { %p3449_p2 = pnand %p3447_p1, %p3444_p0 }
   0x6   :  { %3452 = shalt.err (!%p3449_p2)
}
   0x7   :  { %s3453_s21 = scalar_lea.vmem %s20_s13, 64  ;;  %p3458_p4 = scmp.lt.s32.totalorder %s20_s13, %s20_s13 }
   0x8   :  { %p3454_p3 = scmp.ne.s32.totalorder %s20_s13, %s3453_s21  ;;  %p3459_p5 = scmp.lt.s32.totalorder %s3453_s21, %s3453_s21 }
   0xa   :  { %p3460_p6 = por %p3459_p5, %p3458_p4 }
   0xc   :  { %p3461_p7 = pnand %p3460_p6, %p3454_p3 }
   0xe   :  { %3464 = shalt.err (!%p3461_p7)
}
   0xf   :  { %22 = dma.hbm_to_vmem [thread:$0]  %s6021_s2, 64, %s20_s13, [#allocation3]  }
  0x10   :  { %3465 = dma.done.wait [#allocation3], 64  }
  0x11   :  { %3466 = vsyncadd [#allocation3], 4294967232  ;;  %v6031_v0 = vmov 0   ;;  %v3506_v1 = vld [vmem:[%s6020_s1 + $0x4] ss:$16 sps:$4 sm:$0xff]   ;;  %vm308_vm0 = vcmask 1044480  }
  0x12   :  { %353 = vmatprep.mubr.bf16.mxu0 %v6031_v0  ;;  %526 = vmatprep.mubr.bf16.mxu1 %v6031_v0  ;;  %v3511_v2 = vld [vmem:[%s6020_s1 + $0xc] ss:$16 sps:$4 sm:$0xff]   ;;  %v3517_v3 = vld [vmem:[%s6020_s1] ss:$16 sps:$4 sm:$0xff]   ;;  %v3522_v4 = vld [vmem:[%s6020_s1 + $0x8] ss:$16 sps:$4 sm:$0xff]  }
  0x13   :  { %321 = vmatprep.subr.bf16.mxu0 %v3506_v1  ;;  %494 = vmatprep.subr.bf16.mxu1 %v3511_v2  ;;  %v3528_v5 = vld [vmem:[%s6020_s1 + $0x24] ss:$16 sps:$4 sm:$0xff]   ;;  %v3535_v6 = vld [vmem:[%s6020_s1 + $0x2c] ss:$16 sps:$4 sm:$0xff]   ;;  %v3540_v7 = vld [vmem:[%s6020_s1 + $0x20] ss:$16 sps:$4 sm:$0xff]  }
  0x14   :  { %322 = vmatpush1.bf16.msra.mxu0 %v3517_v3  ;;  %495 = vmatpush1.bf16.msra.mxu1 %v3522_v4  ;;  %v3546_v8 = vld [vmem:[%s6020_s1 + $0x28] ss:$16 sps:$4 sm:$0xff]   ;;  %v3552_v9 = vld [vmem:[%s6020_s1 + $0x44] ss:$16 sps:$4 sm:$0xff]   ;;  %v3557_v10 = vld [vmem:[%s6020_s1 + $0x4c] ss:$16 sps:$4 sm:$0xff]  }
  0x15   :  { %323 = vmatprep.subr.bf16.mxu0 %v3528_v5  ;;  %496 = vmatprep.subr.bf16.mxu1 %v3535_v6  ;;  %v3562_v11 = vld [vmem:[%s6020_s1 + $0x40] ss:$16 sps:$4 sm:$0xff]   ;;  %v3567_v12 = vld [vmem:[%s6020_s1 + $0x48] ss:$16 sps:$4 sm:$0xff]   ;;  %v3574_v13 = vld [vmem:[%s6020_s1 + $0x64] ss:$16 sps:$4 sm:$0xff]  }
  0x16   :  { %v3581_v14 = vld [vmem:[%s6020_s1 + $0x6c] ss:$16 sps:$4 sm:$0xff]   ;;  %v3586_v15 = vld [vmem:[%s6020_s1 + $0x60] ss:$16 sps:$4 sm:$0xff]   ;;  %v3593_v16 = vld [vmem:[%s6020_s1 + $0x68] ss:$16 sps:$4 sm:$0xff]  }
  0x17   :  { %v3598_v17 = vld [vmem:[%s6020_s1 + $0x84] ss:$16 sps:$4 sm:$0xff]   ;;  %v3605_v18 = vld [vmem:[%s6020_s1 + $0x8c] ss:$16 sps:$4 sm:$0xff]   ;;  %v3610_v19 = vld [vmem:[%s6020_s1 + $0x80] ss:$16 sps:$4 sm:$0xff]  }
  0x18   :  { %324 = vmatpush1.bf16.msra.mxu0 %v3540_v7  ;;  %497 = vmatpush1.bf16.msra.mxu1 %v3546_v8  ;;  %v3615_v20 = vld [vmem:[%s6020_s1 + $0x88] ss:$16 sps:$4 sm:$0xff]   ;;  %v3620_v21 = vld [vmem:[%s6020_s1 + $0xa4] ss:$16 sps:$4 sm:$0x1f]   ;;  %vm265_vm1 = vcmask 736256  }
  0x19   :  { %325 = vmatprep.subr.bf16.mxu0 %v3552_v9  ;;  %498 = vmatprep.subr.bf16.mxu1 %v3557_v10  ;;  %v3625_v22 = vld [vmem:[%s6020_s1 + $0xac] ss:$16 sps:$4 sm:$0x1f]   ;;  %v3377_v23 = vld [vmem:[%s6020_s1 + $0xa0] ss:$16 sps:$4 sm:$0x1f]  }
  0x1a   :  { %v3378_v24 = vld [vmem:[%s6020_s1 + $0xa8] ss:$16 sps:$4 sm:$0x1f]   ;;  %v3638_v25 = vsel %vm308_vm0, %v3377_v23, 0  ;;  %v3648_v27 = vld [vmem:[%s6020_s1 + $0xc4] ss:$16 sps:$4 sm:$0xff]  }
  0x1b   :  { %v3641_v26 = vsel %vm308_vm0, %v3378_v24, 0  ;;  %v3657_v28 = vld [vmem:[%s6020_s1 + $0xcc] ss:$16 sps:$4 sm:$0xff]   ;;  %v3662_v29 = vld [vmem:[%s6019_s0] sm:$0xff]   ;;  %v3674_v31 = vld [vmem:[%s6020_s1 + $0xc8] ss:$16 sps:$4 sm:$0xff]  }
  0x1c   :  { %326 = vmatpush1.bf16.msra.mxu0 %v3562_v11  ;;  %499 = vmatpush1.bf16.msra.mxu1 %v3567_v12  ;;  %v3669_v30 = vld [vmem:[%s6020_s1 + $0xc0] ss:$16 sps:$4 sm:$0xff]   ;;  %v3681_v32 = vld [vmem:[%s6020_s1 + $0xe4] ss:$16 sps:$4 sm:$0xff]   ;;  %v3686_v33 = vld [vmem:[%s6020_s1 + $0xec] ss:$16 sps:$4 sm:$0xff]  }
  0x1d   :  { %327 = vmatprep.subr.bf16.mxu0 %v3574_v13  ;;  %500 = vmatprep.subr.bf16.mxu1 %v3581_v14  ;;  %v3695_v34 = vld [vmem:[%s6020_s1 + $0xe0] ss:$16 sps:$4 sm:$0xff]   ;;  %v3700_v35 = vld [vmem:[%s6020_s1 + $0xe8] ss:$16 sps:$4 sm:$0xff]   ;;  %v3707_v36 = vld [vmem:[%s6020_s1 + $0x104] ss:$16 sps:$4 sm:$0xff]  }
  0x1e   :  { %v3714_v37 = vld [vmem:[%s6020_s1 + $0x10c] ss:$16 sps:$4 sm:$0xff]   ;;  %v3728_v39 = vld [vmem:[%s6020_s1 + $0x100] ss:$16 sps:$4 sm:$0xff]   ;;  %v3734_v40 = vld [vmem:[%s6020_s1 + $0x108] ss:$16 sps:$4 sm:$0xff]  }
  0x1f   :  { %v3721_v38 = vld [vmem:[%s6019_s0 + $0x8] sm:$0xff]   ;;  %v3740_v41 = vld [vmem:[%s6020_s1 + $0x124] ss:$16 sps:$4 sm:$0xff]   ;;  %v3756_v43 = vld [vmem:[%s6020_s1 + $0x120] ss:$16 sps:$4 sm:$0xff]   ;;  %vm2918_vm2 = vcmask 1043456  }
  0x20   :  { %328 = vmatpush1.bf16.msra.mxu0 %v3586_v15  ;;  %501 = vmatpush1.bf16.msra.mxu1 %v3593_v16  ;;  %v3745_v42 = vld [vmem:[%s6020_s1 + $0x12c] ss:$16 sps:$4 sm:$0xff]   ;;  %v3763_v44 = vld [vmem:[%s6020_s1 + $0x128] ss:$16 sps:$4 sm:$0xff]   ;;  %v3770_v45 = vld [vmem:[%s6020_s1 + $0x144] ss:$16 sps:$4 sm:$0xff]  }
  0x21   :  { %329 = vmatprep.subr.bf16.mxu0 %v3598_v17  ;;  %502 = vmatprep.subr.bf16.mxu1 %v3605_v18  ;;  %v3775_v46 = vld [vmem:[%s6019_s0 + $0x10] sm:$0xff]   ;;  %v3780_v47 = vld [vmem:[%s6020_s1 + $0x14c] ss:$16 sps:$4 sm:$0xff]   ;;  %v3792_v49 = vld [vmem:[%s6020_s1 + $0x148] ss:$16 sps:$4 sm:$0xff]   ;;  %vm2919_vm3 = vcmask 523268  }
  0x22   :  { %v3785_v48 = vld [vmem:[%s6020_s1 + $0x140] ss:$16 sps:$4 sm:$0xff]   ;;  %v3799_v50 = vld [vmem:[%s6020_s1 + $0x164] ss:$16 sps:$4 sm:$0x1f]   ;;  %v3823_v54 = vld [vmem:[%s6019_s0 + $0x18] sm:$0xff]  }
  0x23   :  { %v3808_v51 = vld [vmem:[%s6020_s1 + $0x16c] ss:$16 sps:$4 sm:$0x1f]   ;;  %v3425_v52 = vld [vmem:[%s6020_s1 + $0x160] ss:$16 sps:$4 sm:$0x1f]   ;;  %vm5583_vm4 = vmor %vm2919_vm3, %vm2918_vm2 }
  0x24   :  { %330 = vmatpush1.bf16.msra.mxu0 %v3610_v19  ;;  %503 = vmatpush1.bf16.msra.mxu1 %v3615_v20  ;;  %v3426_v53 = vld [vmem:[%s6020_s1 + $0x168] ss:$16 sps:$4 sm:$0x1f]   ;;  %v3830_v55 = vsel %vm308_vm0, %v3425_v52, 0  ;;  %v3848_v57 = vld [vmem:[%s6019_s0 + $0x20] sm:$0xff]   ;;  %v3870_v59 = vld [vmem:[%s6019_s0 + $0x30] sm:$0xff]  }
  0x25   :  { %3019 = vmatprep.subr.msk.bf16.mxu0 %vm308_vm0, %v3620_v21  ;;  %3034 = vmatprep.subr.msk.bf16.mxu1 %vm308_vm0, %v3625_v22  ;;  %v3833_v56 = vsel %vm308_vm0, %v3426_v53, 0  ;;  %v3859_v58 = vld [vmem:[%s6019_s0 + $0x28] sm:$0xff]   ;;  %v3881_v60 = vld [vmem:[%s6019_s0 + $0x38] sm:$0xff]   ;;  %v3892_v61 = vld [vmem:[%s6019_s0 + $0x40] sm:$0xff]  }
  0x26   :  { %v3903_v62 = vld [vmem:[%s6019_s0 + $0x48] sm:$0xff]   ;;  %v3914_v63 = vld [vmem:[%s6019_s0 + $0x50] sm:$0xff]  }
  0x27   :  { %v3947_v23 = vld [vmem:[%s6019_s0 + $0x68] sm:$0xff]   ;;  %v4224_v52 = vld [vmem:[%s6019_s0 + $0x90] sm:$0xff]  }
  0x28   :  { %332 = vmatpush1.bf16.msra.mxu0 %v3638_v25  ;;  %505 = vmatpush1.bf16.msra.mxu1 %v3641_v26 }
  0x29   :  { %820 = vmatprep.subr.bf16.mxu0 %v3648_v27  ;;  %993 = vmatprep.subr.bf16.mxu1 %v3657_v28 }
  0x2b   :  { %3020 = vmatmul.mubr.msk.bf16.vlgmr.msra.gmra.mrb[0].mxu0 %vm265_vm1, %v3662_v29  ;;  %3035 = vmatmul.mubr.msk.bf16.vlgmr.msra.gmra.mrb[0].mxu1 %vm265_vm1, %v3662_v29 }
  0x2c   :  { %821 = vmatpush1.bf16.msra.mxu0 %v3669_v30  ;;  %994 = vmatpush1.bf16.msra.mxu1 %v3674_v31 }
  0x2d   :  { %363 = vmatprep.mubr.bf16.mxu0 %v6031_v0  ;;  %536 = vmatprep.mubr.bf16.mxu1 %v6031_v0 }
  0x2e   :  { %822 = vmatprep.subr.bf16.mxu0 %v3681_v32  ;;  %995 = vmatprep.subr.bf16.mxu1 %v3686_v33 }
  0x30   :  { %823 = vmatpush1.bf16.msra.mxu0 %v3695_v34  ;;  %996 = vmatpush1.bf16.msra.mxu1 %v3700_v35 }
  0x31   :  { %824 = vmatprep.subr.bf16.mxu0 %v3707_v36  ;;  %997 = vmatprep.subr.bf16.mxu1 %v3714_v37 }
  0x33   :  { %3021 = vmatmul.mubr.msk.bf16.gmra.mrb[4].mxu0 %vm265_vm1, %v3721_v38  ;;  %3036 = vmatmul.mubr.msk.bf16.gmra.mrb[4].mxu1 %vm265_vm1, %v3721_v38 }
  0x34   :  { %373 = vmatprep.mubr.bf16.mxu0 %v6031_v0  ;;  %546 = vmatprep.mubr.bf16.mxu1 %v6031_v0 }
  0x35   :  { %825 = vmatpush1.bf16.msra.mxu0 %v3728_v39  ;;  %998 = vmatpush1.bf16.msra.mxu1 %v3734_v40 }
  0x36   :  { %826 = vmatprep.subr.bf16.mxu0 %v3740_v41  ;;  %999 = vmatprep.subr.bf16.mxu1 %v3745_v42 }
  0x39   :  { %827 = vmatpush1.bf16.msra.mxu0 %v3756_v43  ;;  %1000 = vmatpush1.bf16.msra.mxu1 %v3763_v44 }
  0x3a   :  { %828 = vmatprep.subr.bf16.mxu0 %v3770_v45  ;;  %1001 = vmatprep.subr.bf16.mxu1 %v3780_v47 }
  0x3b   :  { %3022 = vmatmul.mubr.msk.bf16.gmra.mrb[8].mxu0 %vm265_vm1, %v3775_v46  ;;  %3037 = vmatmul.mubr.msk.bf16.gmra.mrb[8].mxu1 %vm265_vm1, %v3775_v46 }
  0x3c   :  { %383 = vmatprep.mubr.bf16.mxu0 %v6031_v0  ;;  %556 = vmatprep.mubr.bf16.mxu1 %v6031_v0 }
  0x3d   :  { %829 = vmatpush1.bf16.msra.mxu0 %v3785_v48  ;;  %1002 = vmatpush1.bf16.msra.mxu1 %v3792_v49 }
  0x3e   :  { %3097 = vmatprep.subr.msk.bf16.mxu0 %vm308_vm0, %v3799_v50  ;;  %3112 = vmatprep.subr.msk.bf16.mxu1 %vm308_vm0, %v3808_v51 }
  0x41   :  { %831 = vmatpush1.bf16.msra.mxu0 %v3830_v55  ;;  %1004 = vmatpush1.bf16.msra.mxu1 %v3833_v56 }
  0x42   :  { %1419 = vmatprep.subr.bf16.mxu0 %v3506_v1  ;;  %1592 = vmatprep.subr.bf16.mxu1 %v3511_v2  ;;  %v3925_v1 = vld [vmem:[%s6019_s0 + $0x58] sm:$0xff]   ;;  %v3936_v2 = vld [vmem:[%s6019_s0 + $0x60] sm:$0xff]  }
  0x43   :  { %3023 = vmatmul.mubr.msk.bf16.gmra.mrb[12].mxu0 %vm265_vm1, %v3823_v54  ;;  %3038 = vmatmul.mubr.msk.bf16.gmra.mrb[12].mxu1 %vm265_vm1, %v3823_v54 }
  0x44   :  { %393 = vmatprep.mubr.bf16.mxu0 %v6031_v0  ;;  %566 = vmatprep.mubr.bf16.mxu1 %v6031_v0 }
  0x4b   :  { %3024 = vmatmul.mubr.msk.bf16.gmra.mrb[16].mxu0 %vm265_vm1, %v3848_v57  ;;  %3039 = vmatmul.mubr.msk.bf16.gmra.mrb[16].mxu1 %vm265_vm1, %v3848_v57 }
  0x4c   :  { %403 = vmatprep.mubr.bf16.mxu0 %v6031_v0  ;;  %576 = vmatprep.mubr.bf16.mxu1 %v6031_v0 }
  0x53   :  { %3025 = vmatmul.mubr.msk.bf16.gmra.mrb[20].mxu0 %vm265_vm1, %v3859_v58  ;;  %3040 = vmatmul.mubr.msk.bf16.gmra.mrb[20].mxu1 %vm265_vm1, %v3859_v58 }
  0x54   :  { %413 = vmatprep.mubr.bf16.mxu0 %v6031_v0  ;;  %586 = vmatprep.mubr.bf16.mxu1 %v6031_v0 }
  0x5b   :  { %3026 = vmatmul.mubr.msk.bf16.gmra.mrb[24].mxu0 %vm265_vm1, %v3870_v59  ;;  %3041 = vmatmul.mubr.msk.bf16.gmra.mrb[24].mxu1 %vm265_vm1, %v3870_v59 }
  0x5c   :  { %423 = vmatprep.mubr.bf16.mxu0 %v6031_v0  ;;  %596 = vmatprep.mubr.bf16.mxu1 %v6031_v0 }
  0x63   :  { %3027 = vmatmul.mubr.msk.bf16.gmra.mrb[28].mxu0 %vm265_vm1, %v3881_v60  ;;  %3042 = vmatmul.mubr.msk.bf16.gmra.mrb[28].mxu1 %vm265_vm1, %v3881_v60 }
  0x64   :  { %433 = vmatprep.mubr.bf16.mxu0 %v6031_v0  ;;  %606 = vmatprep.mubr.bf16.mxu1 %v6031_v0 }
  0x6b   :  { %3028 = vmatmul.mubr.msk.bf16.gmra.mrb[32].mxu0 %vm265_vm1, %v3892_v61  ;;  %3043 = vmatmul.mubr.msk.bf16.gmra.mrb[32].mxu1 %vm265_vm1, %v3892_v61 }
  0x6c   :  { %443 = vmatprep.mubr.bf16.mxu0 %v6031_v0  ;;  %616 = vmatprep.mubr.bf16.mxu1 %v6031_v0 }
  0x73   :  { %3029 = vmatmul.mubr.msk.bf16.gmra.mrb[36].mxu0 %vm265_vm1, %v3903_v62  ;;  %3044 = vmatmul.mubr.msk.bf16.gmra.mrb[36].mxu1 %vm265_vm1, %v3903_v62 }
  0x74   :  { %453 = vmatprep.mubr.bf16.mxu0 %v6031_v0  ;;  %626 = vmatprep.mubr.bf16.mxu1 %v6031_v0 }
  0x7b   :  { %3030 = vmatmul.mubr.msk.bf16.gmra.mrb[40].mxu0 %vm265_vm1, %v3914_v63  ;;  %3045 = vmatmul.mubr.msk.bf16.gmra.mrb[40].mxu1 %vm265_vm1, %v3914_v63 }
  0x7c   :  { %463 = vmatprep.mubr.bf16.mxu0 %v6031_v0  ;;  %636 = vmatprep.mubr.bf16.mxu1 %v6031_v0 }
  0x83   :  { %3031 = vmatmul.mubr.msk.bf16.gmra.mrb[44].mxu0 %vm265_vm1, %v3925_v1  ;;  %3046 = vmatmul.mubr.msk.bf16.gmra.mrb[44].mxu1 %vm265_vm1, %v3925_v1 }
  0x84   :  { %473 = vmatprep.mubr.bf16.mxu0 %v6031_v0  ;;  %646 = vmatprep.mubr.bf16.mxu1 %v6031_v0 }
  0x8b   :  { %3032 = vmatmul.mubr.msk.bf16.gmra.mrb[48].mxu0 %vm265_vm1, %v3936_v2  ;;  %3047 = vmatmul.mubr.msk.bf16.gmra.mrb[48].mxu1 %vm265_vm1, %v3936_v2 }
  0x8c   :  { %483 = vmatprep.mubr.bf16.mxu0 %v6031_v0  ;;  %656 = vmatprep.mubr.bf16.mxu1 %v6031_v0 }
  0x93   :  { %3033 = vmatmul.mubr.msk.bf16.gmra.mrb[52].mxu0 %vm265_vm1, %v3947_v23  ;;  %3048 = vmatmul.mubr.msk.bf16.gmra.mrb[52].mxu1 %vm265_vm1, %v3947_v23 }
  0x94   :  { %852 = vmatprep.mubr.bf16.mxu0 %v6031_v0  ;;  %1025 = vmatprep.mubr.bf16.mxu1 %v6031_v0 }
  0x9b   :  { %3098 = vmatmul.mubr.msk.bf16.vlgmr.msra.gmra.mrb[56].mxu0 %vm265_vm1, %v3662_v29  ;;  %3113 = vmatmul.mubr.msk.bf16.vlgmr.msra.gmra.mrb[56].mxu1 %vm265_vm1, %v3662_v29 }
  0x9c   :  { %1420 = vmatpush1.bf16.msra.mxu0 %v3517_v3  ;;  %1593 = vmatpush1.bf16.msra.mxu1 %v3522_v4 }
  0x9d   :  { %862 = vmatprep.mubr.bf16.mxu0 %v6031_v0  ;;  %1035 = vmatprep.mubr.bf16.mxu1 %v6031_v0 }
  0x9e   :  { %1421 = vmatprep.subr.bf16.mxu0 %v3528_v5  ;;  %1594 = vmatprep.subr.bf16.mxu1 %v3535_v6 }
  0xa0   :  { %1422 = vmatpush1.bf16.msra.mxu0 %v3540_v7  ;;  %1595 = vmatpush1.bf16.msra.mxu1 %v3546_v8 }
  0xa1   :  { %1423 = vmatprep.subr.bf16.mxu0 %v3552_v9  ;;  %1596 = vmatprep.subr.bf16.mxu1 %v3557_v10 }
  0xa3   :  { %3099 = vmatmul.mubr.msk.bf16.gmra.mrb[60].mxu0 %vm265_vm1, %v3721_v38  ;;  %3114 = vmatmul.mubr.msk.bf16.gmra.mrb[60].mxu1 %vm265_vm1, %v3721_v38 }
  0xa4   :  { %872 = vmatprep.mubr.bf16.mxu0 %v6031_v0  ;;  %1045 = vmatprep.mubr.bf16.mxu1 %v6031_v0 }
  0xa5   :  { %1424 = vmatpush1.bf16.msra.mxu0 %v3562_v11  ;;  %1597 = vmatpush1.bf16.msra.mxu1 %v3567_v12 }
  0xa6   :  { %1425 = vmatprep.subr.bf16.mxu0 %v3574_v13  ;;  %1598 = vmatprep.subr.bf16.mxu1 %v3581_v14 }
  0xa9   :  { %1426 = vmatpush1.bf16.msra.mxu0 %v3586_v15  ;;  %1599 = vmatpush1.bf16.msra.mxu1 %v3593_v16  ;;  %v4092_v15 = vld [vmem:[%s6019_s0 + $0x70] sm:$0xff]  }
  0xaa   :  { %1427 = vmatprep.subr.bf16.mxu0 %v3598_v17  ;;  %1600 = vmatprep.subr.bf16.mxu1 %v3605_v18 }
  0xab   :  { %3100 = vmatmul.mubr.msk.bf16.gmra.mrb[64].mxu0 %vm265_vm1, %v3775_v46  ;;  %3115 = vmatmul.mubr.msk.bf16.gmra.mrb[64].mxu1 %vm265_vm1, %v3775_v46 }
  0xac   :  { %882 = vmatprep.mubr.bf16.mxu0 %v6031_v0  ;;  %1055 = vmatprep.mubr.bf16.mxu1 %v6031_v0 }
  0xad   :  { %1428 = vmatpush1.bf16.msra.mxu0 %v3610_v19  ;;  %1601 = vmatpush1.bf16.msra.mxu1 %v3615_v20 }
  0xae   :  { %3169 = vmatprep.subr.msk.bf16.mxu0 %vm308_vm0, %v3620_v21  ;;  %3184 = vmatprep.subr.msk.bf16.mxu1 %vm308_vm0, %v3625_v22 }
  0xb1   :  { %1430 = vmatpush1.bf16.msra.mxu0 %v3638_v25  ;;  %1603 = vmatpush1.bf16.msra.mxu1 %v3641_v26  ;;  %v4123_v25 = vld [vmem:[%s6019_s0 + $0x78] sm:$0xff]  }
  0xb2   :  { %1877 = vmatprep.subr.bf16.mxu0 %v3648_v27  ;;  %2050 = vmatprep.subr.bf16.mxu1 %v3657_v28 }
  0xb3   :  { %3101 = vmatmul.mubr.msk.bf16.gmra.mrb[68].mxu0 %vm265_vm1, %v3823_v54  ;;  %3116 = vmatmul.mubr.msk.bf16.gmra.mrb[68].mxu1 %vm265_vm1, %v3823_v54 }
  0xb4   :  { %892 = vmatprep.mubr.bf16.mxu0 %v6031_v0  ;;  %1065 = vmatprep.mubr.bf16.mxu1 %v6031_v0 }
  0xbb   :  { %3102 = vmatmul.mubr.msk.bf16.gmra.mrb[72].mxu0 %vm265_vm1, %v3848_v57  ;;  %3117 = vmatmul.mubr.msk.bf16.gmra.mrb[72].mxu1 %vm265_vm1, %v3848_v57 }
  0xbc   :  { %902 = vmatprep.mubr.bf16.mxu0 %v6031_v0  ;;  %1075 = vmatprep.mubr.bf16.mxu1 %v6031_v0 }
  0xc3   :  { %3103 = vmatmul.mubr.msk.bf16.gmra.mrb[76].mxu0 %vm265_vm1, %v3859_v58  ;;  %3118 = vmatmul.mubr.msk.bf16.gmra.mrb[76].mxu1 %vm265_vm1, %v3859_v58 }
  0xc4   :  { %912 = vmatprep.mubr.bf16.mxu0 %v6031_v0  ;;  %1085 = vmatprep.mubr.bf16.mxu1 %v6031_v0 }
  0xcb   :  { %3104 = vmatmul.mubr.msk.bf16.gmra.mrb[80].mxu0 %vm265_vm1, %v3870_v59  ;;  %3119 = vmatmul.mubr.msk.bf16.gmra.mrb[80].mxu1 %vm265_vm1, %v3870_v59 }
  0xcc   :  { %922 = vmatprep.mubr.bf16.mxu0 %v6031_v0  ;;  %1095 = vmatprep.mubr.bf16.mxu1 %v6031_v0 }
  0xd3   :  { %3105 = vmatmul.mubr.msk.bf16.gmra.mrb[84].mxu0 %vm265_vm1, %v3881_v60  ;;  %3120 = vmatmul.mubr.msk.bf16.gmra.mrb[84].mxu1 %vm265_vm1, %v3881_v60 }
  0xd4   :  { %932 = vmatprep.mubr.bf16.mxu0 %v6031_v0  ;;  %1105 = vmatprep.mubr.bf16.mxu1 %v6031_v0 }
  0xdb   :  { %3106 = vmatmul.mubr.msk.bf16.gmra.mrb[88].mxu0 %vm265_vm1, %v3892_v61  ;;  %3121 = vmatmul.mubr.msk.bf16.gmra.mrb[88].mxu1 %vm265_vm1, %v3892_v61  ;;  %v4251_v61 = vld [vmem:[%s6019_s0 + $0x98] sm:$0xff]  }
  0xdc   :  { %942 = vmatprep.mubr.bf16.mxu0 %v6031_v0  ;;  %1115 = vmatprep.mubr.bf16.mxu1 %v6031_v0  ;;  %6244 = vst [vmem:[#allocation30_spill] sm:$0xff] %v4251_v61 }
  0xe3   :  { %3107 = vmatmul.mubr.msk.bf16.gmra.mrb[92].mxu0 %vm265_vm1, %v3903_v62  ;;  %3122 = vmatmul.mubr.msk.bf16.gmra.mrb[92].mxu1 %vm265_vm1, %v3903_v62 }
  0xe4   :  { %952 = vmatprep.mubr.bf16.mxu0 %v6031_v0  ;;  %1125 = vmatprep.mubr.bf16.mxu1 %v6031_v0 }
  0xeb   :  { %3108 = vmatmul.mubr.msk.bf16.gmra.mrb[96].mxu0 %vm265_vm1, %v3914_v63  ;;  %3123 = vmatmul.mubr.msk.bf16.gmra.mrb[96].mxu1 %vm265_vm1, %v3914_v63 }
  0xec   :  { %962 = vmatprep.mubr.bf16.mxu0 %v6031_v0  ;;  %1135 = vmatprep.mubr.bf16.mxu1 %v6031_v0 }
  0xf3   :  { %3109 = vmatmul.mubr.msk.bf16.gmra.mrb[100].mxu0 %vm265_vm1, %v3925_v1  ;;  %3124 = vmatmul.mubr.msk.bf16.gmra.mrb[100].mxu1 %vm265_vm1, %v3925_v1 }
  0xf4   :  { %972 = vmatprep.mubr.bf16.mxu0 %v6031_v0  ;;  %1145 = vmatprep.mubr.bf16.mxu1 %v6031_v0 }
  0xfb   :  { %3110 = vmatmul.mubr.msk.bf16.gmra.mrb[104].mxu0 %vm265_vm1, %v3936_v2  ;;  %3125 = vmatmul.mubr.msk.bf16.gmra.mrb[104].mxu1 %vm265_vm1, %v3936_v2 }
  0xfc   :  { %982 = vmatprep.mubr.bf16.mxu0 %v6031_v0  ;;  %1155 = vmatprep.mubr.bf16.mxu1 %v6031_v0 }
  0xfe   :  { %v4059_v3 = vpop.f32.mrb[0].mxu0  ;;  %v4061_v4 = vpop.f32.mrb[0].mxu1 }
  0xff   :  { %6219 = vst [vmem:[#allocation5_spill] sm:$0xff] %v4061_v4  ;;  %v4063_v5 = vpop.f32.mrb[1].mxu0  ;;  %v4065_v6 = vpop.f32.mrb[1].mxu1 }
 0x100   :  { %v4067_v7 = vpop.f32.mrb[2].mxu0  ;;  %v4069_v8 = vpop.f32.mrb[2].mxu1 }
 0x101   :  { %v4071_v9 = vpop.f32.mrb[3].mxu0  ;;  %v4073_v10 = vpop.f32.mrb[3].mxu1 }
 0x102   :  { %6220 = vst [vmem:[#allocation6_spill] sm:$0xff] %v4071_v9  ;;  %6221 = vst [vmem:[#allocation7_spill] sm:$0xff] %v4073_v10 }
 0x103   :  { %3111 = vmatmul.mubr.msk.bf16.gmra.mrb[108].mxu0 %vm265_vm1, %v3947_v23  ;;  %3126 = vmatmul.mubr.msk.bf16.gmra.mrb[108].mxu1 %vm265_vm1, %v3947_v23 }
 0x104   :  { %1451 = vmatprep.mubr.bf16.mxu0 %v6031_v0  ;;  %1624 = vmatprep.mubr.bf16.mxu1 %v6031_v0 }
 0x106   :  { %v4081_v11 = vpop.f32.mrb[4].mxu0  ;;  %v4083_v12 = vpop.f32.mrb[4].mxu1 }
 0x107   :  { %6222 = vst [vmem:[#allocation8_spill] sm:$0xff] %v4083_v12  ;;  %v4085_v13 = vpop.f32.mrb[5].mxu0  ;;  %v4087_v14 = vpop.f32.mrb[5].mxu1 }
 0x108   :  { %v4094_v16 = vpop.f32.mrb[6].mxu0  ;;  %v4096_v17 = vpop.f32.mrb[6].mxu1 }
 0x109   :  { %v4098_v18 = vpop.f32.mrb[7].mxu0  ;;  %v4100_v19 = vpop.f32.mrb[7].mxu1 }
 0x10a   :  { %6223 = vst [vmem:[#allocation9_spill] sm:$0xff] %v4098_v18  ;;  %6224 = vst [vmem:[#allocation10_spill] sm:$0xff] %v4100_v19 }
 0x10b   :  { %3170 = vmatmul.mubr.msk.bf16.vlgmr.msra.gmra.mrb[112].mxu0 %vm265_vm1, %v4092_v15  ;;  %3185 = vmatmul.mubr.msk.bf16.vlgmr.msra.gmra.mrb[112].mxu1 %vm265_vm1, %v4092_v15 }
 0x10c   :  { %1878 = vmatpush1.bf16.msra.mxu0 %v3669_v30  ;;  %2051 = vmatpush1.bf16.msra.mxu1 %v3674_v31 }
 0x10d   :  { %1461 = vmatprep.mubr.bf16.mxu0 %v6031_v0  ;;  %1634 = vmatprep.mubr.bf16.mxu1 %v6031_v0 }
 0x10e   :  { %v4110_v20 = vpop.f32.mrb[8].mxu0  ;;  %v4112_v21 = vpop.f32.mrb[8].mxu1  ;;  %1879 = vmatprep.subr.bf16.mxu0 %v3681_v32  ;;  %2052 = vmatprep.subr.bf16.mxu1 %v3686_v33 }
 0x10f   :  { %6225 = vst [vmem:[#allocation11_spill] sm:$0xff] %v4112_v21  ;;  %v4116_v22 = vpop.f32.mrb[9].mxu0  ;;  %v4118_v24 = vpop.f32.mrb[9].mxu1 }
 0x110   :  { %v4125_v26 = vpop.f32.mrb[10].mxu0  ;;  %v4127_v27 = vpop.f32.mrb[10].mxu1  ;;  %1880 = vmatpush1.bf16.msra.mxu0 %v3695_v34  ;;  %2053 = vmatpush1.bf16.msra.mxu1 %v3700_v35  ;;  %v4158_v34 = vld [vmem:[%s6019_s0 + $0x80] sm:$0xff]  }
 0x111   :  { %v4131_v28 = vpop.f32.mrb[11].mxu0  ;;  %v4133_v29 = vpop.f32.mrb[11].mxu1  ;;  %1881 = vmatprep.subr.bf16.mxu0 %v3707_v36  ;;  %2054 = vmatprep.subr.bf16.mxu1 %v3714_v37 }
 0x112   :  { %6226 = vst [vmem:[#allocation12_spill] sm:$0xff] %v4131_v28  ;;  %6227 = vst [vmem:[#allocation13_spill] sm:$0xff] %v4133_v29 }
 0x113   :  { %3171 = vmatmul.mubr.msk.bf16.gmra.mrb[116].mxu0 %vm265_vm1, %v4123_v25  ;;  %3186 = vmatmul.mubr.msk.bf16.gmra.mrb[116].mxu1 %vm265_vm1, %v4123_v25 }
 0x114   :  { %1471 = vmatprep.mubr.bf16.mxu0 %v6031_v0  ;;  %1644 = vmatprep.mubr.bf16.mxu1 %v6031_v0 }
 0x115   :  { %1882 = vmatpush1.bf16.msra.mxu0 %v3728_v39  ;;  %2055 = vmatpush1.bf16.msra.mxu1 %v3734_v40 }
 0x116   :  { %v4145_v30 = vpop.f32.mrb[12].mxu0  ;;  %v4147_v31 = vpop.f32.mrb[12].mxu1  ;;  %1883 = vmatprep.subr.bf16.mxu0 %v3740_v41  ;;  %2056 = vmatprep.subr.bf16.mxu1 %v3745_v42 }
 0x117   :  { %6228 = vst [vmem:[#allocation14_spill] sm:$0xff] %v4147_v31  ;;  %v4151_v32 = vpop.f32.mrb[13].mxu0  ;;  %v4153_v33 = vpop.f32.mrb[13].mxu1 }
 0x118   :  { %v4160_v35 = vpop.f32.mrb[14].mxu0  ;;  %v4162_v36 = vpop.f32.mrb[14].mxu1 }
 0x119   :  { %v4164_v37 = vpop.f32.mrb[15].mxu0  ;;  %v4166_v38 = vpop.f32.mrb[15].mxu1  ;;  %1884 = vmatpush1.bf16.msra.mxu0 %v3756_v43  ;;  %2057 = vmatpush1.bf16.msra.mxu1 %v3763_v44  ;;  %v4195_v43 = vld [vmem:[%s6019_s0 + $0x88] sm:$0xff]  }
 0x11a   :  { %6229 = vst [vmem:[#allocation15_spill] sm:$0xff] %v4164_v37  ;;  %6230 = vst [vmem:[#allocation16_spill] sm:$0xff] %v4166_v38  ;;  %1885 = vmatprep.subr.bf16.mxu0 %v3770_v45  ;;  %2058 = vmatprep.subr.bf16.mxu1 %v3780_v47 }
 0x11b   :  { %3172 = vmatmul.mubr.msk.bf16.gmra.mrb[120].mxu0 %vm265_vm1, %v4158_v34  ;;  %3187 = vmatmul.mubr.msk.bf16.gmra.mrb[120].mxu1 %vm265_vm1, %v4158_v34 }
 0x11c   :  { %1481 = vmatprep.mubr.bf16.mxu0 %v6031_v0  ;;  %1654 = vmatprep.mubr.bf16.mxu1 %v6031_v0 }
 0x11d   :  { %1886 = vmatpush1.bf16.msra.mxu0 %v3785_v48  ;;  %2059 = vmatpush1.bf16.msra.mxu1 %v3792_v49 }
 0x11e   :  { %v4180_v39 = vpop.f32.mrb[16].mxu0  ;;  %v4182_v40 = vpop.f32.mrb[16].mxu1  ;;  %3199 = vmatprep.subr.msk.bf16.mxu0 %vm308_vm0, %v3799_v50  ;;  %3214 = vmatprep.subr.msk.bf16.mxu1 %vm308_vm0, %v3808_v51 }
 0x11f   :  { %6231 = vst [vmem:[#allocation17_spill] sm:$0xff] %v4182_v40  ;;  %v4188_v41 = vpop.f32.mrb[17].mxu0  ;;  %v4190_v42 = vpop.f32.mrb[17].mxu1 }
 0x120   :  { %v4197_v44 = vpop.f32.mrb[18].mxu0  ;;  %v4199_v45 = vpop.f32.mrb[18].mxu1 }
 0x121   :  { %v4201_v46 = vpop.f32.mrb[19].mxu0  ;;  %v4203_v47 = vpop.f32.mrb[19].mxu1  ;;  %1888 = vmatpush1.bf16.msra.mxu0 %v3830_v55  ;;  %2061 = vmatpush1.bf16.msra.mxu1 %v3833_v56 }
 0x122   :  { %6232 = vst [vmem:[#allocation18_spill] sm:$0xff] %v4201_v46  ;;  %6233 = vst [vmem:[#allocation19_spill] sm:$0xff] %v4203_v47 }
 0x123   :  { %3173 = vmatmul.mubr.msk.bf16.gmra.mrb[124].mxu0 %vm265_vm1, %v4195_v43  ;;  %3188 = vmatmul.mubr.msk.bf16.gmra.mrb[124].mxu1 %vm265_vm1, %v4195_v43 }
 0x124   :  { %1491 = vmatprep.mubr.bf16.mxu0 %v6031_v0  ;;  %1664 = vmatprep.mubr.bf16.mxu1 %v6031_v0 }
 0x126   :  { %v4213_v48 = vpop.f32.mrb[20].mxu0  ;;  %v4215_v49 = vpop.f32.mrb[20].mxu1 }
 0x127   :  { %6234 = vst [vmem:[#allocation20_spill] sm:$0xff] %v4215_v49  ;;  %v4217_v50 = vpop.f32.mrb[21].mxu0  ;;  %v4219_v51 = vpop.f32.mrb[21].mxu1 }
 0x128   :  { %6235 = vst [vmem:[#allocation21_spill] sm:$0xff] %v4219_v51  ;;  %v4226_v53 = vpop.f32.mrb[22].mxu0  ;;  %v4228_v54 = vpop.f32.mrb[22].mxu1 }
 0x129   :  { %6236 = vst [vmem:[#allocation22_spill] sm:$0xff] %v4226_v53  ;;  %6237 = vst [vmem:[#allocation23_spill] sm:$0xff] %v4228_v54  ;;  %v4230_v55 = vpop.f32.mrb[23].mxu0  ;;  %v4232_v56 = vpop.f32.mrb[23].mxu1 }
 0x12a   :  { %6238 = vst [vmem:[#allocation24_spill] sm:$0xff] %v4230_v55  ;;  %6239 = vst [vmem:[#allocation25_spill] sm:$0xff] %v4232_v56 }
 0x12b   :  { %3174 = vmatmul.mubr.msk.bf16.gmra.mrb[128].mxu0 %vm265_vm1, %v4224_v52  ;;  %3189 = vmatmul.mubr.msk.bf16.gmra.mrb[128].mxu1 %vm265_vm1, %v4224_v52 }
 0x12c   :  { %1501 = vmatprep.mubr.bf16.mxu0 %v6031_v0  ;;  %1674 = vmatprep.mubr.bf16.mxu1 %v6031_v0 }
 0x12e   :  { %v4240_v57 = vpop.f32.mrb[24].mxu0  ;;  %v4242_v58 = vpop.f32.mrb[24].mxu1 }
 0x12f   :  { %6240 = vst [vmem:[#allocation26_spill] sm:$0xff] %v4240_v57  ;;  %6241 = vst [vmem:[#allocation27_spill] sm:$0xff] %v4242_v58  ;;  %v4244_v59 = vpop.f32.mrb[25].mxu0  ;;  %v4246_v60 = vpop.f32.mrb[25].mxu1 }
 0x130   :  { %6242 = vst [vmem:[#allocation28_spill] sm:$0xff] %v4244_v59  ;;  %6243 = vst [vmem:[#allocation29_spill] sm:$0xff] %v4246_v60  ;;  %v4253_v62 = vpop.f32.mrb[26].mxu0  ;;  %v4255_v63 = vpop.f32.mrb[26].mxu1 }
 0x131   :  { %6245 = vst [vmem:[#allocation31_spill] sm:$0xff] %v4253_v62  ;;  %6246 = vst [vmem:[#allocation32_spill] sm:$0xff] %v4255_v63  ;;  %v4257_v1 = vpop.f32.mrb[27].mxu0  ;;  %v4259_v2 = vpop.f32.mrb[27].mxu1 }
 0x132   :  { %6247 = vst [vmem:[#allocation33_spill] sm:$0xff] %v4257_v1  ;;  %6248 = vst [vmem:[#allocation34_spill] sm:$0xff] %v4259_v2  ;;  %v4278_v2 = vld [vmem:[%s6019_s0 + $0xa0] sm:$0xff]  }
 0x133   :  { %3175 = vmatmul.mubr.msk.bf16.gmra.mrb[132].mxu0 %vm265_vm1, %v4251_v61  ;;  %3190 = vmatmul.mubr.msk.bf16.gmra.mrb[132].mxu1 %vm265_vm1, %v4251_v61  ;;  %6253 = vst [vmem:[#allocation39_spill] sm:$0xff] %v4278_v2 }
 0x134   :  { %1511 = vmatprep.mubr.bf16.mxu0 %v6031_v0  ;;  %1684 = vmatprep.mubr.bf16.mxu1 %v6031_v0 }
 0x136   :  { %v4267_v23 = vpop.f32.mrb[28].mxu0  ;;  %v4269_v60 = vpop.f32.mrb[28].mxu1 }
 0x137   :  { %6249 = vst [vmem:[#allocation35_spill] sm:$0xff] %v4267_v23  ;;  %6250 = vst [vmem:[#allocation36_spill] sm:$0xff] %v4269_v60  ;;  %v4271_v62 = vpop.f32.mrb[29].mxu0  ;;  %v4273_v63 = vpop.f32.mrb[29].mxu1 }
 0x138   :  { %6251 = vst [vmem:[#allocation37_spill] sm:$0xff] %v4271_v62  ;;  %6252 = vst [vmem:[#allocation38_spill] sm:$0xff] %v4273_v63  ;;  %v4280_v1 = vpop.f32.mrb[30].mxu0  ;;  %v4282_v61 = vpop.f32.mrb[30].mxu1  ;;  %v6258_v63 = vmov 0  }
 0x139   :  { %6254 = vst [vmem:[#allocation40_spill] sm:$0xff] %v4280_v1  ;;  %6255 = vst [vmem:[#allocation41_spill] sm:$0xff] %v4282_v61  ;;  %v4284_v59 = vpop.f32.mrb[31].mxu0  ;;  %v4286_v0 = vpop.f32.mrb[31].mxu1 }
 0x13a   :  { %6256 = vst [vmem:[#allocation42_spill] sm:$0xff] %v4284_v59  ;;  %6257 = vst [vmem:[#allocation43_spill] sm:$0xff] %v4286_v0  ;;  %v4305_v0 = vld [vmem:[%s6019_s0 + $0xa8] sm:$0xff]  }
 0x13b   :  { %3176 = vmatmul.mubr.msk.bf16.gmra.mrb[136].mxu0 %vm265_vm1, %v4278_v2  ;;  %3191 = vmatmul.mubr.msk.bf16.gmra.mrb[136].mxu1 %vm265_vm1, %v4278_v2  ;;  %6263 = vst [vmem:[#allocation48_spill] sm:$0xff] %v4305_v0 }
 0x13c   :  { %1521 = vmatprep.mubr.bf16.mxu0 %v6258_v63  ;;  %1694 = vmatprep.mubr.bf16.mxu1 %v6258_v63 }
 0x13e   :  { %v4294_v62 = vpop.f32.mrb[32].mxu0  ;;  %v4296_v60 = vpop.f32.mrb[32].mxu1 }
 0x13f   :  { %6259 = vst [vmem:[#allocation44_spill] sm:$0xff] %v4294_v62  ;;  %6260 = vst [vmem:[#allocation45_spill] sm:$0xff] %v4296_v60  ;;  %v4298_v1 = vpop.f32.mrb[33].mxu0  ;;  %v4300_v61 = vpop.f32.mrb[33].mxu1 }
 0x140   :  { %6261 = vst [vmem:[#allocation46_spill] sm:$0xff] %v4298_v1  ;;  %6262 = vst [vmem:[#allocation47_spill] sm:$0xff] %v4300_v61  ;;  %v4307_v59 = vpop.f32.mrb[34].mxu0  ;;  %v4309_v2 = vpop.f32.mrb[34].mxu1 }
 0x141   :  { %6264 = vst [vmem:[#allocation49_spill] sm:$0xff] %v4307_v59  ;;  %6265 = vst [vmem:[#allocation50_spill] sm:$0xff] %v4309_v2  ;;  %v4311_v23 = vpop.f32.mrb[35].mxu0  ;;  %v4313_v58 = vpop.f32.mrb[35].mxu1 }
 0x142   :  { %6266 = vst [vmem:[#allocation51_spill] sm:$0xff] %v4311_v23  ;;  %6267 = vst [vmem:[#allocation52_spill] sm:$0xff] %v4313_v58  ;;  %v4332_v58 = vld [vmem:[%s6019_s0 + $0xb0] sm:$0xff]  }
 0x143   :  { %3177 = vmatmul.mubr.msk.bf16.gmra.mrb[140].mxu0 %vm265_vm1, %v4305_v0  ;;  %3192 = vmatmul.mubr.msk.bf16.gmra.mrb[140].mxu1 %vm265_vm1, %v4305_v0  ;;  %6272 = vst [vmem:[#allocation57_spill] sm:$0xff] %v4332_v58 }
 0x144   :  { %1531 = vmatprep.mubr.bf16.mxu0 %v6258_v63  ;;  %1704 = vmatprep.mubr.bf16.mxu1 %v6258_v63 }
 0x146   :  { %v4321_v61 = vpop.f32.mrb[36].mxu0  ;;  %v4323_v1 = vpop.f32.mrb[36].mxu1 }
 0x147   :  { %6268 = vst [vmem:[#allocation53_spill] sm:$0xff] %v4321_v61  ;;  %6269 = vst [vmem:[#allocation54_spill] sm:$0xff] %v4323_v1  ;;  %v4325_v59 = vpop.f32.mrb[37].mxu0  ;;  %v4327_v2 = vpop.f32.mrb[37].mxu1 }
 0x148   :  { %6270 = vst [vmem:[#allocation55_spill] sm:$0xff] %v4325_v59  ;;  %6271 = vst [vmem:[#allocation56_spill] sm:$0xff] %v4327_v2  ;;  %v4334_v23 = vpop.f32.mrb[38].mxu0  ;;  %v4336_v0 = vpop.f32.mrb[38].mxu1 }
 0x149   :  { %6273 = vst [vmem:[#allocation58_spill] sm:$0xff] %v4334_v23  ;;  %6274 = vst [vmem:[#allocation59_spill] sm:$0xff] %v4336_v0  ;;  %v4338_v60 = vpop.f32.mrb[39].mxu0  ;;  %v4340_v62 = vpop.f32.mrb[39].mxu1 }
 0x14a   :  { %6275 = vst [vmem:[#allocation60_spill] sm:$0xff] %v4338_v60  ;;  %6276 = vst [vmem:[#allocation61_spill] sm:$0xff] %v4340_v62  ;;  %v4359_v62 = vld [vmem:[%s6019_s0 + $0xb8] sm:$0xff]  }
 0x14b   :  { %3178 = vmatmul.mubr.msk.bf16.gmra.mrb[144].mxu0 %vm265_vm1, %v4332_v58  ;;  %3193 = vmatmul.mubr.msk.bf16.gmra.mrb[144].mxu1 %vm265_vm1, %v4332_v58  ;;  %6281 = vst [vmem:[#allocation66_spill] sm:$0xff] %v4359_v62 }
 0x14c   :  { %1541 = vmatprep.mubr.bf16.mxu0 %v6258_v63  ;;  %1714 = vmatprep.mubr.bf16.mxu1 %v6258_v63 }
 0x14e   :  { %v4348_v2 = vpop.f32.mrb[40].mxu0  ;;  %v4350_v59 = vpop.f32.mrb[40].mxu1 }
 0x14f   :  { %6277 = vst [vmem:[#allocation62_spill] sm:$0xff] %v4348_v2  ;;  %6278 = vst [vmem:[#allocation63_spill] sm:$0xff] %v4350_v59  ;;  %v4352_v23 = vpop.f32.mrb[41].mxu0  ;;  %v4354_v0 = vpop.f32.mrb[41].mxu1 }
 0x150   :  { %6279 = vst [vmem:[#allocation64_spill] sm:$0xff] %v4352_v23  ;;  %6280 = vst [vmem:[#allocation65_spill] sm:$0xff] %v4354_v0  ;;  %v4361_v60 = vpop.f32.mrb[42].mxu0  ;;  %v4363_v58 = vpop.f32.mrb[42].mxu1 }
 0x151   :  { %6282 = vst [vmem:[#allocation67_spill] sm:$0xff] %v4361_v60  ;;  %6283 = vst [vmem:[#allocation68_spill] sm:$0xff] %v4363_v58  ;;  %v4365_v1 = vpop.f32.mrb[43].mxu0  ;;  %v4367_v61 = vpop.f32.mrb[43].mxu1 }
 0x152   :  { %6284 = vst [vmem:[#allocation69_spill] sm:$0xff] %v4365_v1  ;;  %6285 = vst [vmem:[#allocation70_spill] sm:$0xff] %v4367_v61  ;;  %v4386_v61 = vld [vmem:[%s6019_s0 + $0xc0] sm:$0xff]  }
 0x153   :  { %3179 = vmatmul.mubr.msk.bf16.gmra.mrb[148].mxu0 %vm265_vm1, %v4359_v62  ;;  %3194 = vmatmul.mubr.msk.bf16.gmra.mrb[148].mxu1 %vm265_vm1, %v4359_v62  ;;  %6290 = vst [vmem:[#allocation75_spill] sm:$0xff] %v4386_v61 }
 0x154   :  { %1551 = vmatprep.mubr.bf16.mxu0 %v6258_v63  ;;  %1724 = vmatprep.mubr.bf16.mxu1 %v6258_v63 }
 0x156   :  { %v4375_v0 = vpop.f32.mrb[44].mxu0  ;;  %v4377_v23 = vpop.f32.mrb[44].mxu1 }
 0x157   :  { %6286 = vst [vmem:[#allocation71_spill] sm:$0xff] %v4375_v0  ;;  %6287 = vst [vmem:[#allocation72_spill] sm:$0xff] %v4377_v23  ;;  %v4379_v60 = vpop.f32.mrb[45].mxu0  ;;  %v4381_v58 = vpop.f32.mrb[45].mxu1 }
 0x158   :  { %6288 = vst [vmem:[#allocation73_spill] sm:$0xff] %v4379_v60  ;;  %6289 = vst [vmem:[#allocation74_spill] sm:$0xff] %v4381_v58  ;;  %v4388_v1 = vpop.f32.mrb[46].mxu0  ;;  %v4390_v62 = vpop.f32.mrb[46].mxu1 }
 0x159   :  { %6291 = vst [vmem:[#allocation76_spill] sm:$0xff] %v4388_v1  ;;  %6292 = vst [vmem:[#allocation77_spill] sm:$0xff] %v4390_v62  ;;  %v4392_v59 = vpop.f32.mrb[47].mxu0  ;;  %v4394_v2 = vpop.f32.mrb[47].mxu1 }
 0x15a   :  { %6293 = vst [vmem:[#allocation78_spill] sm:$0xff] %v4392_v59  ;;  %6294 = vst [vmem:[#allocation79_spill] sm:$0xff] %v4394_v2  ;;  %v4413_v2 = vld [vmem:[%s6019_s0 + $0xc8] sm:$0xff]  }
 0x15b   :  { %3180 = vmatmul.mubr.msk.bf16.gmra.mrb[152].mxu0 %vm265_vm1, %v4386_v61  ;;  %3195 = vmatmul.mubr.msk.bf16.gmra.mrb[152].mxu1 %vm265_vm1, %v4386_v61  ;;  %6299 = vst [vmem:[#allocation84_spill] sm:$0xff] %v4413_v2 }
 0x15c   :  { %1561 = vmatprep.mubr.bf16.mxu0 %v6258_v63  ;;  %1734 = vmatprep.mubr.bf16.mxu1 %v6258_v63 }
 0x15e   :  { %v4402_v58 = vpop.f32.mrb[48].mxu0  ;;  %v4404_v60 = vpop.f32.mrb[48].mxu1 }
 0x15f   :  { %6295 = vst [vmem:[#allocation80_spill] sm:$0xff] %v4402_v58  ;;  %6296 = vst [vmem:[#allocation81_spill] sm:$0xff] %v4404_v60  ;;  %v4406_v1 = vpop.f32.mrb[49].mxu0  ;;  %v4408_v62 = vpop.f32.mrb[49].mxu1 }
 0x160   :  { %6297 = vst [vmem:[#allocation82_spill] sm:$0xff] %v4406_v1  ;;  %6298 = vst [vmem:[#allocation83_spill] sm:$0xff] %v4408_v62  ;;  %v4415_v59 = vpop.f32.mrb[50].mxu0  ;;  %v4417_v61 = vpop.f32.mrb[50].mxu1 }
 0x161   :  { %6300 = vst [vmem:[#allocation85_spill] sm:$0xff] %v4415_v59  ;;  %6301 = vst [vmem:[#allocation86_spill] sm:$0xff] %v4417_v61  ;;  %v4419_v23 = vpop.f32.mrb[51].mxu0  ;;  %v4421_v0 = vpop.f32.mrb[51].mxu1 }
 0x162   :  { %6302 = vst [vmem:[#allocation87_spill] sm:$0xff] %v4419_v23  ;;  %6303 = vst [vmem:[#allocation88_spill] sm:$0xff] %v4421_v0  ;;  %v4440_v0 = vld [vmem:[%s6019_s0 + $0xd0] sm:$0xff]  }
 0x163   :  { %3181 = vmatmul.mubr.msk.bf16.gmra.mrb[156].mxu0 %vm265_vm1, %v4413_v2  ;;  %3196 = vmatmul.mubr.msk.bf16.gmra.mrb[156].mxu1 %vm265_vm1, %v4413_v2  ;;  %6308 = vst [vmem:[#allocation93_spill] sm:$0xff] %v4440_v0 }
 0x164   :  { %1571 = vmatprep.mubr.bf16.mxu0 %v6258_v63  ;;  %1744 = vmatprep.mubr.bf16.mxu1 %v6258_v63 }
 0x166   :  { %v4429_v62 = vpop.f32.mrb[52].mxu0  ;;  %v4431_v1 = vpop.f32.mrb[52].mxu1 }
 0x167   :  { %6304 = vst [vmem:[#allocation89_spill] sm:$0xff] %v4429_v62  ;;  %6305 = vst [vmem:[#allocation90_spill] sm:$0xff] %v4431_v1  ;;  %v4433_v59 = vpop.f32.mrb[53].mxu0  ;;  %v4435_v61 = vpop.f32.mrb[53].mxu1 }
 0x168   :  { %6306 = vst [vmem:[#allocation91_spill] sm:$0xff] %v4433_v59  ;;  %6307 = vst [vmem:[#allocation92_spill] sm:$0xff] %v4435_v61  ;;  %v4442_v23 = vpop.f32.mrb[54].mxu0  ;;  %v4444_v2 = vpop.f32.mrb[54].mxu1 }
 0x169   :  { %6309 = vst [vmem:[#allocation94_spill] sm:$0xff] %v4442_v23  ;;  %6310 = vst [vmem:[#allocation95_spill] sm:$0xff] %v4444_v2  ;;  %v4446_v60 = vpop.f32.mrb[55].mxu0  ;;  %v4448_v58 = vpop.f32.mrb[55].mxu1 }
 0x16a   :  { %6311 = vst [vmem:[#allocation96_spill] sm:$0xff] %v4446_v60  ;;  %6312 = vst [vmem:[#allocation97_spill] sm:$0xff] %v4448_v58 }
 0x16b   :  { %3182 = vmatmul.mubr.msk.bf16.gmra.mrb[160].mxu0 %vm265_vm1, %v4440_v0  ;;  %3197 = vmatmul.mubr.msk.bf16.gmra.mrb[160].mxu1 %vm265_vm1, %v4440_v0  ;;  %v4471_v0 = vld [vmem:[%s6019_s0 + $0xd8] sm:$0xff]  }
 0x16c   :  { %1581 = vmatprep.mubr.bf16.mxu0 %v6258_v63  ;;  %1754 = vmatprep.mubr.bf16.mxu1 %v6258_v63  ;;  %6315 = vst [vmem:[#allocation100_spill] sm:$0xff] %v4471_v0 }
 0x16e   :  { %v4456_v61 = vpop.f32.mrb[56].mxu0  ;;  %v4458_v59 = vpop.f32.mrb[56].mxu1 }
 0x16f   :  { %6313 = vst [vmem:[#allocation98_spill] sm:$0xff] %v4456_v61  ;;  %6314 = vst [vmem:[#allocation99_spill] sm:$0xff] %v4458_v59  ;;  %v4464_v60 = vpop.f32.mrb[57].mxu0  ;;  %v4466_v23 = vpop.f32.mrb[57].mxu1 }
 0x170   :  { %v4477_v57 = vpop.f32.mrb[58].mxu0  ;;  %v4479_v2 = vpop.f32.mrb[58].mxu1 }
 0x171   :  { %6316 = vst [vmem:[#allocation101_spill] sm:$0xff] %v4479_v2  ;;  %v4485_v4 = vpop.f32.mrb[59].mxu0  ;;  %v4487_v61 = vpop.f32.mrb[59].mxu1 }
 0x172   :  { %6317 = vst [vmem:[#allocation102_spill] sm:$0xff] %v4485_v4  ;;  %6318 = vst [vmem:[#allocation103_spill] sm:$0xff] %v4487_v61 }
 0x173   :  { %3183 = vmatmul.mubr.msk.bf16.gmra.mrb[164].mxu0 %vm265_vm1, %v4471_v0  ;;  %3198 = vmatmul.mubr.msk.bf16.gmra.mrb[164].mxu1 %vm265_vm1, %v4471_v0 }
 0x174   :  { %1909 = vmatprep.mubr.bf16.mxu0 %v6258_v63  ;;  %2082 = vmatprep.mubr.bf16.mxu1 %v6258_v63 }
 0x176   :  { %v4499_v59 = vpop.f32.mrb[60].mxu0  ;;  %v4501_v58 = vpop.f32.mrb[60].mxu1 }
 0x177   :  { %6319 = vst [vmem:[#allocation104_spill] sm:$0xff] %v4501_v58  ;;  %v4507_v61 = vpop.f32.mrb[61].mxu0  ;;  %v4509_v10 = vpop.f32.mrb[61].mxu1 }
 0x178   :  { %v4515_v9 = vpop.f32.mrb[62].mxu0  ;;  %v4517_v2 = vpop.f32.mrb[62].mxu1 }
 0x179   :  { %6320 = vst [vmem:[#allocation105_spill] sm:$0xff] %v4517_v2  ;;  %v4523_v58 = vpop.f32.mrb[63].mxu0  ;;  %v4525_v12 = vpop.f32.mrb[63].mxu1 }
 0x17a   :  { %6321 = vst [vmem:[#allocation106_spill] sm:$0xff] %v4523_v58  ;;  %6322 = vst [vmem:[#allocation107_spill] sm:$0xff] %v4525_v12 }
 0x17b   :  { %3200 = vmatmul.mubr.msk.bf16.vlgmr.msra.gmra.mrb[168].mxu0 %vm265_vm1, %v4092_v15  ;;  %3215 = vmatmul.mubr.msk.bf16.vlgmr.msra.gmra.mrb[168].mxu1 %vm265_vm1, %v4092_v15 }
 0x17c   :  { %1919 = vmatprep.mubr.bf16.mxu0 %v6258_v63  ;;  %2092 = vmatprep.mubr.bf16.mxu1 %v6258_v63 }
 0x17e   :  { %v4537_v62 = vpop.f32.mrb[64].mxu0  ;;  %v4539_v1 = vpop.f32.mrb[64].mxu1 }
 0x17f   :  { %6323 = vst [vmem:[#allocation108_spill] sm:$0xff] %v4539_v1  ;;  %v4545_v12 = vpop.f32.mrb[65].mxu0  ;;  %v4547_v19 = vpop.f32.mrb[65].mxu1 }
 0x180   :  { %v4553_v18 = vpop.f32.mrb[66].mxu0  ;;  %v4555_v2 = vpop.f32.mrb[66].mxu1 }
 0x181   :  { %6324 = vst [vmem:[#allocation109_spill] sm:$0xff] %v4555_v2  ;;  %v4561_v1 = vpop.f32.mrb[67].mxu0  ;;  %v4563_v21 = vpop.f32.mrb[67].mxu1 }
 0x182   :  { %6325 = vst [vmem:[#allocation110_spill] sm:$0xff] %v4561_v1  ;;  %6326 = vst [vmem:[#allocation111_spill] sm:$0xff] %v4563_v21 }
 0x183   :  { %3201 = vmatmul.mubr.msk.bf16.gmra.mrb[172].mxu0 %vm265_vm1, %v4123_v25  ;;  %3216 = vmatmul.mubr.msk.bf16.gmra.mrb[172].mxu1 %vm265_vm1, %v4123_v25 }
 0x184   :  { %1929 = vmatprep.mubr.bf16.mxu0 %v6258_v63  ;;  %2102 = vmatprep.mubr.bf16.mxu1 %v6258_v63 }
 0x186   :  { %v4575_v4 = vpop.f32.mrb[68].mxu0  ;;  %v4577_v0 = vpop.f32.mrb[68].mxu1 }
 0x187   :  { %6327 = vst [vmem:[#allocation112_spill] sm:$0xff] %v4577_v0  ;;  %v4583_v21 = vpop.f32.mrb[69].mxu0  ;;  %v4585_v29 = vpop.f32.mrb[69].mxu1 }
 0x188   :  { %v4591_v28 = vpop.f32.mrb[70].mxu0  ;;  %v4593_v2 = vpop.f32.mrb[70].mxu1 }
 0x189   :  { %6328 = vst [vmem:[#allocation113_spill] sm:$0xff] %v4593_v2  ;;  %v4599_v0 = vpop.f32.mrb[71].mxu0  ;;  %v4601_v31 = vpop.f32.mrb[71].mxu1 }
 0x18a   :  { %6329 = vst [vmem:[#allocation114_spill] sm:$0xff] %v4599_v0  ;;  %6330 = vst [vmem:[#allocation115_spill] sm:$0xff] %v4601_v31 }
 0x18b   :  { %3202 = vmatmul.mubr.msk.bf16.gmra.mrb[176].mxu0 %vm265_vm1, %v4158_v34  ;;  %3217 = vmatmul.mubr.msk.bf16.gmra.mrb[176].mxu1 %vm265_vm1, %v4158_v34 }
 0x18c   :  { %1939 = vmatprep.mubr.bf16.mxu0 %v6258_v63  ;;  %2112 = vmatprep.mubr.bf16.mxu1 %v6258_v63 }
 0x18e   :  { %v4613_v58 = vpop.f32.mrb[72].mxu0  ;;  %v4615_v15 = vpop.f32.mrb[72].mxu1 }
 0x18f   :  { %6331 = vst [vmem:[#allocation116_spill] sm:$0xff] %v4615_v15  ;;  %v4621_v31 = vpop.f32.mrb[73].mxu0  ;;  %v4623_v38 = vpop.f32.mrb[73].mxu1 }
 0x190   :  { %v4629_v37 = vpop.f32.mrb[74].mxu0  ;;  %v4631_v2 = vpop.f32.mrb[74].mxu1 }
 0x191   :  { %6332 = vst [vmem:[#allocation117_spill] sm:$0xff] %v4631_v2  ;;  %v4637_v15 = vpop.f32.mrb[75].mxu0  ;;  %v4639_v40 = vpop.f32.mrb[75].mxu1 }
 0x192   :  { %6333 = vst [vmem:[#allocation118_spill] sm:$0xff] %v4637_v15  ;;  %6334 = vst [vmem:[#allocation119_spill] sm:$0xff] %v4639_v40 }
 0x193   :  { %3203 = vmatmul.mubr.msk.bf16.gmra.mrb[180].mxu0 %vm265_vm1, %v4195_v43  ;;  %3218 = vmatmul.mubr.msk.bf16.gmra.mrb[180].mxu1 %vm265_vm1, %v4195_v43 }
 0x194   :  { %1949 = vmatprep.mubr.bf16.mxu0 %v6258_v63  ;;  %2122 = vmatprep.mubr.bf16.mxu1 %v6258_v63 }
 0x196   :  { %v4651_v1 = vpop.f32.mrb[76].mxu0  ;;  %v4653_v25 = vpop.f32.mrb[76].mxu1 }
 0x197   :  { %6335 = vst [vmem:[#allocation120_spill] sm:$0xff] %v4653_v25  ;;  %v4659_v40 = vpop.f32.mrb[77].mxu0  ;;  %v4661_v47 = vpop.f32.mrb[77].mxu1 }
 0x198   :  { %6336 = vst [vmem:[#allocation121_spill] sm:$0xff] %v4661_v47  ;;  %v4667_v46 = vpop.f32.mrb[78].mxu0  ;;  %v4669_v2 = vpop.f32.mrb[78].mxu1 }
 0x199   :  { %6337 = vst [vmem:[#allocation122_spill] sm:$0xff] %v4667_v46  ;;  %6338 = vst [vmem:[#allocation123_spill] sm:$0xff] %v4669_v2  ;;  %v4675_v25 = vpop.f32.mrb[79].mxu0  ;;  %v4677_v49 = vpop.f32.mrb[79].mxu1 }
 0x19a   :  { %6339 = vst [vmem:[#allocation124_spill] sm:$0xff] %v4675_v25  ;;  %6340 = vst [vmem:[#allocation125_spill] sm:$0xff] %v4677_v49 }
 0x19b   :  { %3204 = vmatmul.mubr.msk.bf16.gmra.mrb[184].mxu0 %vm265_vm1, %v4224_v52  ;;  %3219 = vmatmul.mubr.msk.bf16.gmra.mrb[184].mxu1 %vm265_vm1, %v4224_v52 }
 0x19c   :  { %1959 = vmatprep.mubr.bf16.mxu0 %v6258_v63  ;;  %2132 = vmatprep.mubr.bf16.mxu1 %v6258_v63 }
 0x19e   :  { %v4689_v0 = vpop.f32.mrb[80].mxu0  ;;  %v4691_v34 = vpop.f32.mrb[80].mxu1 }
 0x19f   :  { %6341 = vst [vmem:[#allocation126_spill] sm:$0xff] %v4689_v0  ;;  %6342 = vst [vmem:[#allocation127_spill] sm:$0xff] %v4691_v34  ;;  %v4697_v49 = vpop.f32.mrb[81].mxu0  ;;  %v4699_v56 = vpop.f32.mrb[81].mxu1 }
 0x1a0   :  { %6345 = vst [vmem:[#allocation128_spill] sm:$0xff] %v4697_v49  ;;  %6346 = vst [vmem:[#allocation129_spill] sm:$0xff] %v4699_v56  ;;  %v4705_v53 = vpop.f32.mrb[82].mxu0  ;;  %v4707_v47 = vpop.f32.mrb[82].mxu1  ;;  %v6357_v56 = vld [vmem:[#allocation30_spill] sm:$0xff] }
 0x1a1   :  { %6349 = vst [vmem:[#allocation130_spill] sm:$0xff] %v4705_v53  ;;  %6350 = vst [vmem:[#allocation131_spill] sm:$0xff] %v4707_v47  ;;  %v4713_v34 = vpop.f32.mrb[83].mxu0  ;;  %v4715_v25 = vpop.f32.mrb[83].mxu1 }
 0x1a2   :  { %6353 = vst [vmem:[#allocation132_spill] sm:$0xff] %v4713_v34  ;;  %6354 = vst [vmem:[#allocation133_spill] sm:$0xff] %v4715_v25 }
 0x1a3   :  { %3205 = vmatmul.mubr.msk.bf16.gmra.mrb[188].mxu0 %vm265_vm1, %v6357_v56  ;;  %3220 = vmatmul.mubr.msk.bf16.gmra.mrb[188].mxu1 %vm265_vm1, %v6357_v56 }
 0x1a4   :  { %1969 = vmatprep.mubr.bf16.mxu0 %v6258_v63  ;;  %2142 = vmatprep.mubr.bf16.mxu1 %v6258_v63 }
 0x1a6   :  { %v4727_v15 = vpop.f32.mrb[84].mxu0  ;;  %v4729_v43 = vpop.f32.mrb[84].mxu1 }
 0x1a7   :  { %6358 = vst [vmem:[#allocation30_spill] sm:$0xff] %v4727_v15  ;;  %6359 = vst [vmem:[#allocation134_spill] sm:$0xff] %v4729_v43  ;;  %v4735_v25 = vpop.f32.mrb[85].mxu0  ;;  %v4737_v49 = vpop.f32.mrb[85].mxu1 }
 0x1a8   :  { %6362 = vst [vmem:[#allocation135_spill] sm:$0xff] %v4735_v25  ;;  %6363 = vst [vmem:[#allocation136_spill] sm:$0xff] %v4737_v49  ;;  %v4743_v51 = vpop.f32.mrb[86].mxu0  ;;  %v4745_v54 = vpop.f32.mrb[86].mxu1  ;;  %v6374_v49 = vld [vmem:[#allocation39_spill] sm:$0xff] }
 0x1a9   :  { %6366 = vst [vmem:[#allocation137_spill] sm:$0xff] %v4743_v51  ;;  %6367 = vst [vmem:[#allocation138_spill] sm:$0xff] %v4745_v54  ;;  %v4751_v43 = vpop.f32.mrb[87].mxu0  ;;  %v4753_v34 = vpop.f32.mrb[87].mxu1 }
 0x1aa   :  { %6370 = vst [vmem:[#allocation139_spill] sm:$0xff] %v4751_v43  ;;  %6371 = vst [vmem:[#allocation140_spill] sm:$0xff] %v4753_v34 }
 0x1ab   :  { %3206 = vmatmul.mubr.msk.bf16.gmra.mrb[192].mxu0 %vm265_vm1, %v6374_v49  ;;  %3221 = vmatmul.mubr.msk.bf16.gmra.mrb[192].mxu1 %vm265_vm1, %v6374_v49 }
 0x1ac   :  { %1979 = vmatprep.mubr.bf16.mxu0 %v6258_v63  ;;  %2152 = vmatprep.mubr.bf16.mxu1 %v6258_v63 }
 0x1ae   :  { %v4765_v46 = vpop.f32.mrb[88].mxu0  ;;  %v4767_v55 = vpop.f32.mrb[88].mxu1 }
 0x1af   :  { %6375 = vst [vmem:[#allocation39_spill] sm:$0xff] %v4765_v46  ;;  %6376 = vst [vmem:[#allocation141_spill] sm:$0xff] %v4767_v55  ;;  %v4773_v34 = vpop.f32.mrb[89].mxu0  ;;  %v4775_v25 = vpop.f32.mrb[89].mxu1 }
 0x1b0   :  { %6379 = vst [vmem:[#allocation142_spill] sm:$0xff] %v4773_v34  ;;  %6380 = vst [vmem:[#allocation143_spill] sm:$0xff] %v4775_v25  ;;  %v4781_v52 = vpop.f32.mrb[90].mxu0  ;;  %v4783_v0 = vpop.f32.mrb[90].mxu1  ;;  %v6391_v25 = vld [vmem:[#allocation48_spill] sm:$0xff] }
 0x1b1   :  { %6383 = vst [vmem:[#allocation144_spill] sm:$0xff] %v4781_v52  ;;  %6384 = vst [vmem:[#allocation145_spill] sm:$0xff] %v4783_v0  ;;  %v4789_v55 = vpop.f32.mrb[91].mxu0  ;;  %v4791_v43 = vpop.f32.mrb[91].mxu1 }
 0x1b2   :  { %6387 = vst [vmem:[#allocation146_spill] sm:$0xff] %v4789_v55  ;;  %6388 = vst [vmem:[#allocation147_spill] sm:$0xff] %v4791_v43 }
 0x1b3   :  { %3207 = vmatmul.mubr.msk.bf16.gmra.mrb[196].mxu0 %vm265_vm1, %v6391_v25  ;;  %3222 = vmatmul.mubr.msk.bf16.gmra.mrb[196].mxu1 %vm265_vm1, %v6391_v25 }
 0x1b4   :  { %1989 = vmatprep.mubr.bf16.mxu0 %v6258_v63  ;;  %2162 = vmatprep.mubr.bf16.mxu1 %v6258_v63 }
 0x1b6   :  { %v4803_v53 = vpop.f32.mrb[92].mxu0  ;;  %v4805_v2 = vpop.f32.mrb[92].mxu1 }
 0x1b7   :  { %6392 = vst [vmem:[#allocation48_spill] sm:$0xff] %v4803_v53  ;;  %6393 = vst [vmem:[#allocation148_spill] sm:$0xff] %v4805_v2  ;;  %v4811_v43 = vpop.f32.mrb[93].mxu0  ;;  %v4813_v34 = vpop.f32.mrb[93].mxu1 }
 0x1b8   :  { %6396 = vst [vmem:[#allocation149_spill] sm:$0xff] %v4811_v43  ;;  %6397 = vst [vmem:[#allocation150_spill] sm:$0xff] %v4813_v34  ;;  %v4819_v56 = vpop.f32.mrb[94].mxu0  ;;  %v4821_v15 = vpop.f32.mrb[94].mxu1  ;;  %v6408_v34 = vld [vmem:[#allocation57_spill] sm:$0xff] }
 0x1b9   :  { %6400 = vst [vmem:[#allocation151_spill] sm:$0xff] %v4819_v56  ;;  %6401 = vst [vmem:[#allocation152_spill] sm:$0xff] %v4821_v15  ;;  %v4827_v2 = vpop.f32.mrb[95].mxu0  ;;  %v4829_v55 = vpop.f32.mrb[95].mxu1 }
 0x1ba   :  { %6404 = vst [vmem:[#allocation153_spill] sm:$0xff] %v4827_v2  ;;  %6405 = vst [vmem:[#allocation154_spill] sm:$0xff] %v4829_v55 }
 0x1bb   :  { %3208 = vmatmul.mubr.msk.bf16.gmra.mrb[200].mxu0 %vm265_vm1, %v6408_v34  ;;  %3223 = vmatmul.mubr.msk.bf16.gmra.mrb[200].mxu1 %vm265_vm1, %v6408_v34 }
 0x1bc   :  { %1999 = vmatprep.mubr.bf16.mxu0 %v6258_v63  ;;  %2172 = vmatprep.mubr.bf16.mxu1 %v6258_v63 }
 0x1be   :  { %v4841_v51 = vpop.f32.mrb[96].mxu0  ;;  %v4843_v47 = vpop.f32.mrb[96].mxu1 }
 0x1bf   :  { %6409 = vst [vmem:[#allocation57_spill] sm:$0xff] %v4841_v51  ;;  %6410 = vst [vmem:[#allocation155_spill] sm:$0xff] %v4843_v47  ;;  %v4849_v55 = vpop.f32.mrb[97].mxu0  ;;  %v4851_v43 = vpop.f32.mrb[97].mxu1 }
 0x1c0   :  { %6413 = vst [vmem:[#allocation156_spill] sm:$0xff] %v4849_v55  ;;  %6414 = vst [vmem:[#allocation157_spill] sm:$0xff] %v4851_v43  ;;  %v4857_v49 = vpop.f32.mrb[98].mxu0  ;;  %v4859_v46 = vpop.f32.mrb[98].mxu1  ;;  %v6425_v43 = vld [vmem:[#allocation66_spill] sm:$0xff] }
 0x1c1   :  { %6417 = vst [vmem:[#allocation158_spill] sm:$0xff] %v4857_v49  ;;  %6418 = vst [vmem:[#allocation159_spill] sm:$0xff] %v4859_v46  ;;  %v4865_v47 = vpop.f32.mrb[99].mxu0  ;;  %v4867_v2 = vpop.f32.mrb[99].mxu1 }
 0x1c2   :  { %6421 = vst [vmem:[#allocation160_spill] sm:$0xff] %v4865_v47  ;;  %6422 = vst [vmem:[#allocation161_spill] sm:$0xff] %v4867_v2 }
 0x1c3   :  { %3209 = vmatmul.mubr.msk.bf16.gmra.mrb[204].mxu0 %vm265_vm1, %v6425_v43  ;;  %3224 = vmatmul.mubr.msk.bf16.gmra.mrb[204].mxu1 %vm265_vm1, %v6425_v43 }
 0x1c4   :  { %2009 = vmatprep.mubr.bf16.mxu0 %v6258_v63  ;;  %2182 = vmatprep.mubr.bf16.mxu1 %v6258_v63 }
 0x1c6   :  { %v4879_v52 = vpop.f32.mrb[100].mxu0  ;;  %v4881_v54 = vpop.f32.mrb[100].mxu1 }
 0x1c7   :  { %6426 = vst [vmem:[#allocation66_spill] sm:$0xff] %v4879_v52  ;;  %6427 = vst [vmem:[#allocation162_spill] sm:$0xff] %v4881_v54  ;;  %v4887_v2 = vpop.f32.mrb[101].mxu0  ;;  %v4889_v55 = vpop.f32.mrb[101].mxu1 }
 0x1c8   :  { %6430 = vst [vmem:[#allocation163_spill] sm:$0xff] %v4887_v2  ;;  %6431 = vst [vmem:[#allocation164_spill] sm:$0xff] %v4889_v55  ;;  %v4895_v25 = vpop.f32.mrb[102].mxu0  ;;  %v4897_v53 = vpop.f32.mrb[102].mxu1  ;;  %v6442_v55 = vld [vmem:[#allocation75_spill] sm:$0xff] }
 0x1c9   :  { %6434 = vst [vmem:[#allocation165_spill] sm:$0xff] %v4895_v25  ;;  %6435 = vst [vmem:[#allocation166_spill] sm:$0xff] %v4897_v53  ;;  %v4903_v54 = vpop.f32.mrb[103].mxu0  ;;  %v4905_v47 = vpop.f32.mrb[103].mxu1  ;;  %v6479_v53 = vld [vmem:[#allocation5_spill] sm:$0xff] }
 0x1ca   :  { %6438 = vst [vmem:[#allocation167_spill] sm:$0xff] %v4903_v54  ;;  %6439 = vst [vmem:[#allocation168_spill] sm:$0xff] %v4905_v47 }
 0x1cb   :  { %3210 = vmatmul.mubr.msk.bf16.gmra.mrb[208].mxu0 %vm265_vm1, %v6442_v55  ;;  %3225 = vmatmul.mubr.msk.bf16.gmra.mrb[208].mxu1 %vm265_vm1, %v6442_v55 }
 0x1cc   :  { %2019 = vmatprep.mubr.bf16.mxu0 %v6258_v63  ;;  %2192 = vmatprep.mubr.bf16.mxu1 %v6258_v63 }
 0x1ce   :  { %v4917_v56 = vpop.f32.mrb[104].mxu0  ;;  %v4919_v0 = vpop.f32.mrb[104].mxu1 }
 0x1cf   :  { %6443 = vst [vmem:[#allocation75_spill] sm:$0xff] %v4917_v56  ;;  %6444 = vst [vmem:[#allocation169_spill] sm:$0xff] %v4919_v0  ;;  %v4925_v47 = vpop.f32.mrb[105].mxu0  ;;  %v4927_v2 = vpop.f32.mrb[105].mxu1 }
 0x1d0   :  { %6447 = vst [vmem:[#allocation170_spill] sm:$0xff] %v4925_v47  ;;  %6448 = vst [vmem:[#allocation171_spill] sm:$0xff] %v4927_v2  ;;  %v4933_v34 = vpop.f32.mrb[106].mxu0  ;;  %v4935_v51 = vpop.f32.mrb[106].mxu1  ;;  %v6459_v2 = vld [vmem:[#allocation84_spill] sm:$0xff] }
 0x1d1   :  { %6451 = vst [vmem:[#allocation172_spill] sm:$0xff] %v4933_v34  ;;  %6452 = vst [vmem:[#allocation173_spill] sm:$0xff] %v4935_v51  ;;  %v4941_v0 = vpop.f32.mrb[107].mxu0  ;;  %v4943_v54 = vpop.f32.mrb[107].mxu1 }
 0x1d2   :  { %6455 = vst [vmem:[#allocation174_spill] sm:$0xff] %v4941_v0  ;;  %6456 = vst [vmem:[#allocation175_spill] sm:$0xff] %v4943_v54 }
 0x1d3   :  { %3211 = vmatmul.mubr.msk.bf16.gmra.mrb[212].mxu0 %vm265_vm1, %v6459_v2  ;;  %3226 = vmatmul.mubr.msk.bf16.gmra.mrb[212].mxu1 %vm265_vm1, %v6459_v2  ;;  %v6466_v2 = vld [vmem:[#allocation91_spill] sm:$0xff] }
 0x1d4   :  { %2029 = vmatprep.mubr.bf16.mxu0 %v6258_v63  ;;  %2202 = vmatprep.mubr.bf16.mxu1 %v6258_v63 }
 0x1d6   :  { %v4955_v49 = vpop.f32.mrb[108].mxu0  ;;  %v4957_v15 = vpop.f32.mrb[108].mxu1 }
 0x1d7   :  { %6460 = vst [vmem:[#allocation84_spill] sm:$0xff] %v4955_v49  ;;  %6461 = vst [vmem:[#allocation176_spill] sm:$0xff] %v4957_v15  ;;  %v4963_v54 = vpop.f32.mrb[109].mxu0  ;;  %v4965_v47 = vpop.f32.mrb[109].mxu1 }
 0x1d8   :  { %6464 = vst [vmem:[#allocation177_spill] sm:$0xff] %v4963_v54  ;;  %6465 = vst [vmem:[#allocation178_spill] sm:$0xff] %v4965_v47  ;;  %v4971_v43 = vpop.f32.mrb[110].mxu0  ;;  %v4973_v52 = vpop.f32.mrb[110].mxu1  ;;  %v6476_v47 = vld [vmem:[#allocation93_spill] sm:$0xff] }
 0x1d9   :  { %6468 = vst [vmem:[#allocation91_spill] sm:$0xff] %v4971_v43  ;;  %6469 = vst [vmem:[#allocation179_spill] sm:$0xff] %v4973_v52  ;;  %v4979_v15 = vpop.f32.mrb[111].mxu0  ;;  %v4981_v0 = vpop.f32.mrb[111].mxu1  ;;  %v6477_v52 = vld [vmem:[#allocation98_spill] sm:$0xff] }
 0x1da   :  { %6472 = vst [vmem:[#allocation180_spill] sm:$0xff] %v4979_v15  ;;  %6473 = vst [vmem:[#allocation181_spill] sm:$0xff] %v4981_v0  ;;  %v6478_v49 = vmax.f32 %v4059_v3, %v6477_v52  ;;  %v6480_v15 = vld [vmem:[#allocation99_spill] sm:$0xff] }
 0x1db   :  { %3212 = vmatmul.mubr.msk.bf16.gmra.mrb[216].mxu0 %vm265_vm1, %v6476_v47  ;;  %3227 = vmatmul.mubr.msk.bf16.gmra.mrb[216].mxu1 %vm265_vm1, %v6476_v47  ;;  %v6481_v34 = vmax.f32 %v6479_v53, %v6480_v15  ;;  %v6482_v47 = vmax.f32 %v4063_v5, %v4464_v60  ;;  %v6488_v60 = vld [vmem:[#allocation6_spill] sm:$0xff] }
 0x1dc   :  { %2039 = vmatprep.mubr.bf16.mxu0 %v6258_v63  ;;  %2212 = vmatprep.mubr.bf16.mxu1 %v6258_v63  ;;  %v6483_v63 = vmax.f32 %v4065_v6, %v4466_v23  ;;  %v6492_v23 = vld [vmem:[#allocation103_spill] sm:$0xff] }
 0x1de   :  { %v1453_v25 = vpop.f32.mrb[112].mxu0  ;;  %v1626_v46 = vpop.f32.mrb[112].mxu1 }
 0x1df   :  { %v4996_v43 = vmax.f32 %v6478_v49, %v1453_v25  ;;  %v5001_v0 = vmax.f32 %v6481_v34, %v1626_v46  ;;  %v1455_v54 = vpop.f32.mrb[113].mxu0  ;;  %v1628_v51 = vpop.f32.mrb[113].mxu1  ;;  %v6485_v49 = vmax.f32 %v4067_v7, %v4477_v57  ;;  %v6486_v46 = vld [vmem:[#allocation101_spill] sm:$0xff]  ;;  %v6489_v34 = vld [vmem:[#allocation102_spill] sm:$0xff]  ;;  %v6494_v7 = vld [vmem:[#allocation100_spill] sm:$0xff] }
 0x1e0   :  { %v5006_v55 = vmax.f32 %v6482_v47, %v1455_v54  ;;  %v5011_v56 = vmax.f32 %v6483_v63, %v1628_v51  ;;  %v1457_v3 = vpop.f32.mrb[114].mxu0  ;;  %v1630_v52 = vpop.f32.mrb[114].mxu1  ;;  %v6487_v15 = vmax.f32 %v4069_v8, %v6486_v46  ;;  %v6490_v47 = vmax.f32 %v6488_v60, %v6489_v34  ;;  %v6491_v51 = vld [vmem:[#allocation7_spill] sm:$0xff]  ;;  %v6497_v46 = vld [vmem:[#allocation104_spill] sm:$0xff] }
 0x1e1   :  { %v5016_v53 = vmax.f32 %v6485_v49, %v1457_v3  ;;  %v1459_v5 = vpop.f32.mrb[115].mxu0  ;;  %v1632_v54 = vpop.f32.mrb[115].mxu1  ;;  %v6493_v63 = vmax.f32 %v6491_v51, %v6492_v23  ;;  %v6495_v3 = vmax.f32 %v4081_v11, %v4499_v59  ;;  %v6496_v49 = vld [vmem:[#allocation8_spill] sm:$0xff]  ;;  %v6499_v34 = vmax.f32 %v4085_v13, %v4507_v61 }
 0x1e2   :  { %6484 = vst [vmem:[#allocation93_spill] sm:$0xff] %v5011_v56  ;;  %v5021_v25 = vmax.f32 %v6487_v15, %v1630_v52  ;;  %v5026_v6 = vmax.f32 %v6490_v47, %v1459_v5  ;;  %v6498_v15 = vmax.f32 %v6496_v49, %v6497_v46  ;;  %v6500_v51 = vmax.f32 %v4087_v14, %v4509_v10  ;;  %v6504_v49 = vld [vmem:[#allocation9_spill] sm:$0xff]  ;;  %v6505_v46 = vld [vmem:[#allocation106_spill] sm:$0xff] }
 0x1e3   :  { %v5031_v56 = vmax.f32 %v6493_v63, %v1632_v54  ;;  %3213 = vmatmul.mubr.msk.bf16.gmra.mrb[220].mxu0 %vm265_vm1, %v6494_v7  ;;  %3228 = vmatmul.mubr.msk.bf16.gmra.mrb[220].mxu1 %vm265_vm1, %v6494_v7  ;;  %v6501_v63 = vmax.f32 %v4094_v16, %v4515_v9  ;;  %v6507_v14 = vld [vmem:[#allocation10_spill] sm:$0xff] }
 0x1e6   :  { %v1463_v8 = vpop.f32.mrb[116].mxu0  ;;  %v1636_v57 = vpop.f32.mrb[116].mxu1 }
 0x1e7   :  { %v5040_v52 = vmax.f32 %v6495_v3, %v1463_v8  ;;  %v5045_v5 = vmax.f32 %v6498_v15, %v1636_v57  ;;  %v1465_v54 = vpop.f32.mrb[117].mxu0  ;;  %v1638_v60 = vpop.f32.mrb[117].mxu1  ;;  %v6502_v8 = vld [vmem:[#allocation105_spill] sm:$0xff]  ;;  %v6506_v15 = vmax.f32 %v6504_v49, %v6505_v46  ;;  %v6514_v49 = vmax.f32 %v4116_v22, %v4545_v12 }
 0x1e8   :  { %v5050_v47 = vmax.f32 %v6499_v34, %v1465_v54  ;;  %v5055_v23 = vmax.f32 %v6500_v51, %v1638_v60  ;;  %v1467_v11 = vpop.f32.mrb[118].mxu0  ;;  %v1640_v59 = vpop.f32.mrb[118].mxu1  ;;  %v6503_v57 = vmax.f32 %v4096_v17, %v6502_v8  ;;  %v6508_v54 = vld [vmem:[#allocation107_spill] sm:$0xff]  ;;  %v6510_v51 = vmax.f32 %v4110_v20, %v4537_v62 }
 0x1e9   :  { %v5060_v7 = vmax.f32 %v6501_v63, %v1467_v11  ;;  %v1469_v13 = vpop.f32.mrb[119].mxu0  ;;  %v1642_v61 = vpop.f32.mrb[119].mxu1  ;;  %v6509_v60 = vmax.f32 %v6507_v14, %v6508_v54  ;;  %v6511_v11 = vld [vmem:[#allocation11_spill] sm:$0xff]  ;;  %v6516_v14 = vmax.f32 %v4125_v26, %v4553_v18 }
 0x1ea   :  { %v5065_v3 = vmax.f32 %v6503_v57, %v1640_v59  ;;  %v5070_v10 = vmax.f32 %v6506_v15, %v1469_v13  ;;  %v6512_v59 = vld [vmem:[#allocation108_spill] sm:$0xff] }
 0x1eb   :  { %v5075_v34 = vmax.f32 %v6509_v60, %v1642_v61  ;;  %v6513_v63 = vmax.f32 %v6511_v11, %v6512_v59  ;;  %v6515_v61 = vmax.f32 %v4118_v24, %v4547_v19  ;;  %v6517_v60 = vld [vmem:[#allocation109_spill] sm:$0xff]  ;;  %v6520_v11 = vld [vmem:[#allocation110_spill] sm:$0xff] }
 0x1ec   :  { %v6522_v24 = vld [vmem:[#allocation13_spill] sm:$0xff] }
 0x1ee   :  { %v1473_v9 = vpop.f32.mrb[120].mxu0  ;;  %v1646_v16 = vpop.f32.mrb[120].mxu1 }
 0x1ef   :  { %v5080_v17 = vmax.f32 %v6510_v51, %v1473_v9  ;;  %v5085_v8 = vmax.f32 %v6513_v63, %v1646_v16  ;;  %v1475_v57 = vpop.f32.mrb[121].mxu0  ;;  %v1648_v13 = vpop.f32.mrb[121].mxu1  ;;  %v6518_v9 = vmax.f32 %v4127_v27, %v6517_v60  ;;  %v6519_v51 = vld [vmem:[#allocation12_spill] sm:$0xff]  ;;  %v6523_v63 = vld [vmem:[#allocation111_spill] sm:$0xff] }
 0x1f0   :  { %v5090_v46 = vmax.f32 %v6514_v49, %v1475_v57  ;;  %v5095_v15 = vmax.f32 %v6515_v61, %v1648_v13  ;;  %v1477_v20 = vpop.f32.mrb[122].mxu0  ;;  %v1650_v62 = vpop.f32.mrb[122].mxu1  ;;  %v6521_v59 = vmax.f32 %v6519_v51, %v6520_v11  ;;  %v6524_v57 = vmax.f32 %v6522_v24, %v6523_v63  ;;  %v6526_v61 = vld [vmem:[#allocation14_spill] sm:$0xff]  ;;  %v6532_v63 = vld [vmem:[#allocation113_spill] sm:$0xff] }
 0x1f1   :  { %v5100_v54 = vmax.f32 %v6516_v14, %v1477_v20  ;;  %v5105_v16 = vmax.f32 %v6518_v9, %v1650_v62  ;;  %v1479_v12 = vpop.f32.mrb[123].mxu0  ;;  %v1652_v22 = vpop.f32.mrb[123].mxu1  ;;  %v6525_v49 = vmax.f32 %v4145_v30, %v4575_v4  ;;  %v6527_v20 = vld [vmem:[#allocation112_spill] sm:$0xff] }
 0x1f2   :  { %v5110_v19 = vmax.f32 %v6521_v59, %v1479_v12  ;;  %v5115_v13 = vmax.f32 %v6524_v57, %v1652_v22  ;;  %v6528_v62 = vmax.f32 %v6526_v61, %v6527_v20  ;;  %v6529_v12 = vmax.f32 %v4151_v32, %v4583_v21  ;;  %v6538_v20 = vld [vmem:[#allocation115_spill] sm:$0xff] }
 0x1f3   :  { %v6530_v22 = vmax.f32 %v4153_v33, %v4585_v29  ;;  %v6531_v59 = vmax.f32 %v4160_v35, %v4591_v28  ;;  %v6533_v57 = vmax.f32 %v4162_v36, %v6532_v63  ;;  %v6537_v33 = vld [vmem:[#allocation16_spill] sm:$0xff] }
 0x1f6   :  { %v1483_v18 = vpop.f32.mrb[124].mxu0  ;;  %v1656_v26 = vpop.f32.mrb[124].mxu1 }
 0x1f7   :  { %v5120_v27 = vmax.f32 %v6525_v49, %v1483_v18  ;;  %v5125_v14 = vmax.f32 %v6528_v62, %v1656_v26  ;;  %v1485_v60 = vpop.f32.mrb[125].mxu0  ;;  %v1658_v9 = vpop.f32.mrb[125].mxu1  ;;  %v6534_v26 = vld [vmem:[#allocation15_spill] sm:$0xff]  ;;  %v6535_v49 = vld [vmem:[#allocation114_spill] sm:$0xff]  ;;  %v6539_v62 = vmax.f32 %v6537_v33, %v6538_v20  ;;  %v6547_v33 = vld [vmem:[#allocation117_spill] sm:$0xff] }
 0x1f8   :  { %v5130_v51 = vmax.f32 %v6529_v12, %v1485_v60  ;;  %v5135_v11 = vmax.f32 %v6530_v22, %v1658_v9  ;;  %v1487_v4 = vpop.f32.mrb[126].mxu0  ;;  %v1660_v30 = vpop.f32.mrb[126].mxu1  ;;  %v6536_v61 = vmax.f32 %v6534_v26, %v6535_v49  ;;  %v6540_v9 = vmax.f32 %v4180_v39, %v4613_v58  ;;  %v6541_v12 = vld [vmem:[#allocation17_spill] sm:$0xff]  ;;  %v6542_v22 = vld [vmem:[#allocation116_spill] sm:$0xff] }
 0x1f9   :  { %v5140_v24 = vmax.f32 %v6531_v59, %v1487_v4  ;;  %v5145_v18 = vmax.f32 %v6533_v57, %v1660_v30  ;;  %v1489_v21 = vpop.f32.mrb[127].mxu0  ;;  %v1662_v32 = vpop.f32.mrb[127].mxu1  ;;  %v6543_v4 = vmax.f32 %v6541_v12, %v6542_v22  ;;  %v6544_v57 = vmax.f32 %v4188_v41, %v4621_v31  ;;  %v6553_v12 = vld [vmem:[#allocation119_spill] sm:$0xff] }
 0x1fa   :  { %v5150_v29 = vmax.f32 %v6536_v61, %v1489_v21  ;;  %v5155_v60 = vmax.f32 %v6539_v62, %v1662_v32  ;;  %v6545_v32 = vmax.f32 %v4190_v42, %v4623_v38  ;;  %v6546_v49 = vmax.f32 %v4197_v44, %v4629_v37  ;;  %v6552_v42 = vld [vmem:[#allocation19_spill] sm:$0xff] }
 0x1fb   :  { %v6548_v20 = vmax.f32 %v4199_v45, %v6547_v33  ;;  %v6554_v22 = vmax.f32 %v6552_v42, %v6553_v12  ;;  %v6559_v33 = vmax.f32 %v4217_v50, %v4659_v40  ;;  %v6566_v42 = vld [vmem:[#allocation122_spill] sm:$0xff] }
 0x1fe   :  { %v1493_v28 = vpop.f32.mrb[128].mxu0  ;;  %v1666_v35 = vpop.f32.mrb[128].mxu1 }
 0x1ff   :  { %v5160_v36 = vmax.f32 %v6540_v9, %v1493_v28  ;;  %v5165_v30 = vmax.f32 %v6543_v4, %v1666_v35  ;;  %v1495_v59 = vpop.f32.mrb[129].mxu0  ;;  %v1668_v63 = vpop.f32.mrb[129].mxu1  ;;  %v6549_v28 = vld [vmem:[#allocation18_spill] sm:$0xff] }
 0x200   :  { %v5170_v21 = vmax.f32 %v6544_v57, %v1495_v59  ;;  %v5175_v26 = vmax.f32 %v6545_v32, %v1668_v63  ;;  %v1497_v39 = vpop.f32.mrb[130].mxu0  ;;  %v1670_v58 = vpop.f32.mrb[130].mxu1  ;;  %v6550_v35 = vld [vmem:[#allocation118_spill] sm:$0xff]  ;;  %v6555_v59 = vmax.f32 %v4213_v48, %v4651_v1  ;;  %v6556_v63 = vld [vmem:[#allocation20_spill] sm:$0xff] }
 0x201   :  { %v5180_v61 = vmax.f32 %v6546_v49, %v1497_v39  ;;  %v5185_v62 = vmax.f32 %v6548_v20, %v1670_v58  ;;  %v1499_v31 = vpop.f32.mrb[131].mxu0  ;;  %v1672_v41 = vpop.f32.mrb[131].mxu1  ;;  %v6551_v9 = vmax.f32 %v6549_v28, %v6550_v35  ;;  %v6557_v57 = vld [vmem:[#allocation120_spill] sm:$0xff] }
 0x202   :  { %v5195_v4 = vmax.f32 %v6554_v22, %v1672_v41  ;;  %v6558_v32 = vmax.f32 %v6556_v63, %v6557_v57  ;;  %v6562_v41 = vld [vmem:[#allocation121_spill] sm:$0xff]  ;;  %v6573_v57 = vld [vmem:[#allocation24_spill] sm:$0xff] }
 0x203   :  { %v5190_v38 = vmax.f32 %v6551_v9, %v1499_v31  ;;  %v6561_v31 = vld [vmem:[#allocation21_spill] sm:$0xff]  ;;  %v6565_v9 = vld [vmem:[#allocation22_spill] sm:$0xff] }
 0x204   :  { %v6563_v28 = vmax.f32 %v6561_v31, %v6562_v41  ;;  %v6567_v12 = vmax.f32 %v6565_v9, %v6566_v42  ;;  %v6578_v31 = vld [vmem:[#allocation125_spill] sm:$0xff]  ;;  %v6581_v42 = vld [vmem:[#allocation26_spill] sm:$0xff] }
 0x206   :  { %v1503_v37 = vpop.f32.mrb[132].mxu0  ;;  %v1676_v44 = vpop.f32.mrb[132].mxu1 }
 0x207   :  { %v5200_v45 = vmax.f32 %v6555_v59, %v1503_v37  ;;  %v5205_v39 = vmax.f32 %v6558_v32, %v1676_v44  ;;  %v1505_v58 = vpop.f32.mrb[133].mxu0  ;;  %v1678_v49 = vpop.f32.mrb[133].mxu1  ;;  %v6569_v37 = vld [vmem:[#allocation23_spill] sm:$0xff]  ;;  %v6574_v32 = vld [vmem:[#allocation124_spill] sm:$0xff] }
 0x208   :  { %v5210_v20 = vmax.f32 %v6559_v33, %v1505_v58  ;;  %v5215_v35 = vmax.f32 %v6563_v28, %v1678_v49  ;;  %v1507_v48 = vpop.f32.mrb[134].mxu0  ;;  %v1680_v1 = vpop.f32.mrb[134].mxu1  ;;  %v6570_v44 = vld [vmem:[#allocation123_spill] sm:$0xff]  ;;  %v6575_v58 = vmax.f32 %v6573_v57, %v6574_v32  ;;  %v6577_v49 = vld [vmem:[#allocation25_spill] sm:$0xff]  ;;  %v6589_v32 = vld [vmem:[#allocation28_spill] sm:$0xff] }
 0x209   :  { %v5220_v22 = vmax.f32 %v6567_v12, %v1507_v48  ;;  %v6571_v59 = vmax.f32 %v6569_v37, %v6570_v44  ;;  %v1509_v40 = vpop.f32.mrb[135].mxu0  ;;  %v1682_v50 = vpop.f32.mrb[135].mxu1  ;;  %v6579_v41 = vmax.f32 %v6577_v49, %v6578_v31  ;;  %v6582_v12 = vld [vmem:[#allocation126_spill] sm:$0xff]  ;;  %v6586_v44 = vld [vmem:[#allocation127_spill] sm:$0xff]  ;;  %v6594_v31 = vld [vmem:[#allocation129_spill] sm:$0xff] }
 0x20a   :  { %6560 = vst [vmem:[#allocation98_spill] sm:$0xff] %v5210_v20  ;;  %6564 = vst [vmem:[#allocation5_spill] sm:$0xff] %v5215_v35  ;;  %v5230_v33 = vmax.f32 %v6575_v58, %v1509_v40  ;;  %v6590_v58 = vld [vmem:[#allocation128_spill] sm:$0xff] }
 0x20b   :  { %6568 = vst [vmem:[#allocation99_spill] sm:$0xff] %v5220_v22  ;;  %v5225_v63 = vmax.f32 %v6571_v59, %v1680_v1  ;;  %v5235_v28 = vmax.f32 %v6579_v41, %v1682_v50  ;;  %v6583_v22 = vmax.f32 %v6581_v42, %v6582_v12  ;;  %v6585_v1 = vld [vmem:[#allocation27_spill] sm:$0xff]  ;;  %v6593_v50 = vld [vmem:[#allocation29_spill] sm:$0xff]  ;;  %v6598_v12 = vld [vmem:[#allocation130_spill] sm:$0xff] }
 0x20c   :  { %6576 = vst [vmem:[#allocation6_spill] sm:$0xff] %v5230_v33  ;;  %v6587_v59 = vmax.f32 %v6585_v1, %v6586_v44  ;;  %v6591_v33 = vmax.f32 %v6589_v32, %v6590_v58  ;;  %v6595_v41 = vmax.f32 %v6593_v50, %v6594_v31  ;;  %v6602_v44 = vld [vmem:[#allocation131_spill] sm:$0xff]  ;;  %v6606_v58 = vld [vmem:[#allocation132_spill] sm:$0xff]  ;;  %v6610_v31 = vld [vmem:[#allocation133_spill] sm:$0xff] }
 0x20d   :  { %6572 = vst [vmem:[#allocation101_spill] sm:$0xff] %v5225_v63  ;;  %6580 = vst [vmem:[#allocation102_spill] sm:$0xff] %v5235_v28 }
 0x20e   :  { %v1513_v9 = vpop.f32.mrb[136].mxu0  ;;  %v1686_v48 = vpop.f32.mrb[136].mxu1 }
 0x20f   :  { %v5240_v37 = vmax.f32 %v6583_v22, %v1513_v9  ;;  %v5245_v63 = vmax.f32 %v6587_v59, %v1686_v48  ;;  %v1515_v57 = vpop.f32.mrb[137].mxu0  ;;  %v1688_v40 = vpop.f32.mrb[137].mxu1  ;;  %v6597_v9 = vld [vmem:[#allocation31_spill] sm:$0xff]  ;;  %v6601_v48 = vld [vmem:[#allocation32_spill] sm:$0xff] }
 0x210   :  { %v5250_v49 = vmax.f32 %v6591_v33, %v1515_v57  ;;  %v5255_v28 = vmax.f32 %v6595_v41, %v1688_v40  ;;  %v1517_v42 = vpop.f32.mrb[138].mxu0  ;;  %v1690_v22 = vpop.f32.mrb[138].mxu1  ;;  %v6603_v59 = vmax.f32 %v6601_v48, %v6602_v44  ;;  %v6605_v57 = vld [vmem:[#allocation33_spill] sm:$0xff]  ;;  %v6609_v40 = vld [vmem:[#allocation34_spill] sm:$0xff] }
 0x211   :  { %6584 = vst [vmem:[#allocation7_spill] sm:$0xff] %v5240_v37  ;;  %6588 = vst [vmem:[#allocation103_spill] sm:$0xff] %v5245_v63  ;;  %v6599_v37 = vmax.f32 %v6597_v9, %v6598_v12  ;;  %v1519_v32 = vpop.f32.mrb[139].mxu0  ;;  %v1692_v33 = vpop.f32.mrb[139].mxu1  ;;  %v6611_v41 = vmax.f32 %v6609_v40, %v6610_v31  ;;  %v6614_v12 = vld [vmem:[#allocation30_spill] sm:$0xff]  ;;  %v6626_v31 = vld [vmem:[#allocation136_spill] sm:$0xff] }
 0x212   :  { %6592 = vst [vmem:[#allocation100_spill] sm:$0xff] %v5250_v49  ;;  %6596 = vst [vmem:[#allocation8_spill] sm:$0xff] %v5255_v28  ;;  %v5265_v63 = vmax.f32 %v6603_v59, %v1690_v22  ;;  %v6607_v49 = vmax.f32 %v6605_v57, %v6606_v58  ;;  %v6617_v22 = vld [vmem:[#allocation36_spill] sm:$0xff]  ;;  %v6618_v44 = vld [vmem:[#allocation134_spill] sm:$0xff] }
 0x213   :  { %v5260_v1 = vmax.f32 %v6599_v37, %v1517_v42  ;;  %v5275_v28 = vmax.f32 %v6611_v41, %v1692_v33  ;;  %v6613_v42 = vld [vmem:[#allocation35_spill] sm:$0xff]  ;;  %v6619_v59 = vmax.f32 %v6617_v22, %v6618_v44  ;;  %v6625_v33 = vld [vmem:[#allocation38_spill] sm:$0xff] }
 0x214   :  { %6604 = vst [vmem:[#allocation105_spill] sm:$0xff] %v5265_v63  ;;  %v5270_v50 = vmax.f32 %v6607_v49, %v1519_v32  ;;  %v6621_v32 = vld [vmem:[#allocation37_spill] sm:$0xff]  ;;  %v6622_v58 = vld [vmem:[#allocation135_spill] sm:$0xff]  ;;  %v6627_v41 = vmax.f32 %v6625_v33, %v6626_v31  ;;  %v6634_v44 = vld [vmem:[#allocation138_spill] sm:$0xff] }
 0x215   :  { %6600 = vst [vmem:[#allocation104_spill] sm:$0xff] %v5260_v1  ;;  %6612 = vst [vmem:[#allocation106_spill] sm:$0xff] %v5275_v28  ;;  %v6615_v1 = vmax.f32 %v6613_v42, %v6614_v12  ;;  %v6630_v12 = vld [vmem:[#allocation137_spill] sm:$0xff]  ;;  %v6642_v31 = vld [vmem:[#allocation140_spill] sm:$0xff] }
 0x216   :  { %6608 = vst [vmem:[#allocation9_spill] sm:$0xff] %v5270_v50  ;;  %v1523_v9 = vpop.f32.mrb[140].mxu0  ;;  %v1696_v37 = vpop.f32.mrb[140].mxu1  ;;  %v6623_v50 = vmax.f32 %v6621_v32, %v6622_v58  ;;  %v6638_v58 = vld [vmem:[#allocation139_spill] sm:$0xff] }
 0x217   :  { %v5280_v48 = vmax.f32 %v6615_v1, %v1523_v9  ;;  %v5285_v63 = vmax.f32 %v6619_v59, %v1696_v37  ;;  %v1525_v57 = vpop.f32.mrb[141].mxu0  ;;  %v1698_v49 = vpop.f32.mrb[141].mxu1  ;;  %v6629_v9 = vld [vmem:[#allocation40_spill] sm:$0xff]  ;;  %v6633_v37 = vld [vmem:[#allocation41_spill] sm:$0xff] }
 0x218   :  { %v5290_v40 = vmax.f32 %v6623_v50, %v1525_v57  ;;  %v5295_v28 = vmax.f32 %v6627_v41, %v1698_v49  ;;  %v1527_v42 = vpop.f32.mrb[142].mxu0  ;;  %v1700_v1 = vpop.f32.mrb[142].mxu1  ;;  %v6635_v59 = vmax.f32 %v6633_v37, %v6634_v44  ;;  %v6637_v57 = vld [vmem:[#allocation42_spill] sm:$0xff]  ;;  %v6641_v49 = vld [vmem:[#allocation43_spill] sm:$0xff]  ;;  %v6650_v44 = vld [vmem:[#allocation141_spill] sm:$0xff] }
 0x219   :  { %6616 = vst [vmem:[#allocation10_spill] sm:$0xff] %v5280_v48  ;;  %6620 = vst [vmem:[#allocation107_spill] sm:$0xff] %v5285_v63  ;;  %v6631_v48 = vmax.f32 %v6629_v9, %v6630_v12  ;;  %v1529_v32 = vpop.f32.mrb[143].mxu0  ;;  %v1702_v50 = vpop.f32.mrb[143].mxu1  ;;  %v6643_v41 = vmax.f32 %v6641_v49, %v6642_v31  ;;  %v6646_v12 = vld [vmem:[#allocation39_spill] sm:$0xff] }
 0x21a   :  { %6624 = vst [vmem:[#allocation11_spill] sm:$0xff] %v5290_v40  ;;  %6628 = vst [vmem:[#allocation108_spill] sm:$0xff] %v5295_v28  ;;  %v5305_v63 = vmax.f32 %v6635_v59, %v1700_v1  ;;  %v6639_v40 = vmax.f32 %v6637_v57, %v6638_v58  ;;  %v6649_v1 = vld [vmem:[#allocation45_spill] sm:$0xff]  ;;  %v6654_v58 = vld [vmem:[#allocation142_spill] sm:$0xff] }
 0x21b   :  { %v5300_v22 = vmax.f32 %v6631_v48, %v1527_v42  ;;  %v5315_v28 = vmax.f32 %v6643_v41, %v1702_v50  ;;  %v6645_v42 = vld [vmem:[#allocation44_spill] sm:$0xff]  ;;  %v6651_v59 = vmax.f32 %v6649_v1, %v6650_v44  ;;  %v6657_v50 = vld [vmem:[#allocation47_spill] sm:$0xff]  ;;  %v6666_v44 = vld [vmem:[#allocation145_spill] sm:$0xff] }
 0x21c   :  { %6636 = vst [vmem:[#allocation12_spill] sm:$0xff] %v5305_v63  ;;  %v5310_v33 = vmax.f32 %v6639_v40, %v1529_v32  ;;  %v6653_v32 = vld [vmem:[#allocation46_spill] sm:$0xff]  ;;  %v6658_v31 = vld [vmem:[#allocation143_spill] sm:$0xff] }
 0x21d   :  { %6632 = vst [vmem:[#allocation109_spill] sm:$0xff] %v5300_v22  ;;  %6644 = vst [vmem:[#allocation13_spill] sm:$0xff] %v5315_v28  ;;  %v6647_v22 = vmax.f32 %v6645_v42, %v6646_v12  ;;  %v6659_v41 = vmax.f32 %v6657_v50, %v6658_v31  ;;  %v6662_v12 = vld [vmem:[#allocation144_spill] sm:$0xff]  ;;  %v6674_v31 = vld [vmem:[#allocation147_spill] sm:$0xff] }
 0x21e   :  { %6640 = vst [vmem:[#allocation110_spill] sm:$0xff] %v5310_v33  ;;  %v1533_v9 = vpop.f32.mrb[144].mxu0  ;;  %v1706_v48 = vpop.f32.mrb[144].mxu1  ;;  %v6655_v33 = vmax.f32 %v6653_v32, %v6654_v58  ;;  %v6670_v58 = vld [vmem:[#allocation146_spill] sm:$0xff] }
 0x21f   :  { %v5320_v37 = vmax.f32 %v6647_v22, %v1533_v9  ;;  %v5325_v63 = vmax.f32 %v6651_v59, %v1706_v48  ;;  %v1535_v57 = vpop.f32.mrb[145].mxu0  ;;  %v1708_v40 = vpop.f32.mrb[145].mxu1  ;;  %v6661_v9 = vld [vmem:[#allocation49_spill] sm:$0xff]  ;;  %v6665_v48 = vld [vmem:[#allocation50_spill] sm:$0xff] }
 0x220   :  { %v5330_v49 = vmax.f32 %v6655_v33, %v1535_v57  ;;  %v5335_v28 = vmax.f32 %v6659_v41, %v1708_v40  ;;  %v1537_v42 = vpop.f32.mrb[146].mxu0  ;;  %v1710_v22 = vpop.f32.mrb[146].mxu1  ;;  %v6667_v59 = vmax.f32 %v6665_v48, %v6666_v44  ;;  %v6669_v57 = vld [vmem:[#allocation51_spill] sm:$0xff]  ;;  %v6673_v40 = vld [vmem:[#allocation52_spill] sm:$0xff] }
 0x221   :  { %6648 = vst [vmem:[#allocation111_spill] sm:$0xff] %v5320_v37  ;;  %6652 = vst [vmem:[#allocation14_spill] sm:$0xff] %v5325_v63  ;;  %v6663_v37 = vmax.f32 %v6661_v9, %v6662_v12  ;;  %v1539_v32 = vpop.f32.mrb[147].mxu0  ;;  %v1712_v33 = vpop.f32.mrb[147].mxu1  ;;  %v6675_v41 = vmax.f32 %v6673_v40, %v6674_v31  ;;  %v6678_v12 = vld [vmem:[#allocation48_spill] sm:$0xff]  ;;  %v6690_v31 = vld [vmem:[#allocation150_spill] sm:$0xff] }
 0x222   :  { %6656 = vst [vmem:[#allocation112_spill] sm:$0xff] %v5330_v49  ;;  %6660 = vst [vmem:[#allocation113_spill] sm:$0xff] %v5335_v28  ;;  %v5345_v63 = vmax.f32 %v6667_v59, %v1710_v22  ;;  %v6671_v49 = vmax.f32 %v6669_v57, %v6670_v58  ;;  %v6681_v22 = vld [vmem:[#allocation54_spill] sm:$0xff]  ;;  %v6682_v44 = vld [vmem:[#allocation148_spill] sm:$0xff] }
 0x223   :  { %v5340_v1 = vmax.f32 %v6663_v37, %v1537_v42  ;;  %v5355_v28 = vmax.f32 %v6675_v41, %v1712_v33  ;;  %v6677_v42 = vld [vmem:[#allocation53_spill] sm:$0xff]  ;;  %v6683_v59 = vmax.f32 %v6681_v22, %v6682_v44  ;;  %v6689_v33 = vld [vmem:[#allocation56_spill] sm:$0xff] }
 0x224   :  { %6668 = vst [vmem:[#allocation114_spill] sm:$0xff] %v5345_v63  ;;  %v5350_v50 = vmax.f32 %v6671_v49, %v1539_v32  ;;  %v6685_v32 = vld [vmem:[#allocation55_spill] sm:$0xff]  ;;  %v6686_v58 = vld [vmem:[#allocation149_spill] sm:$0xff]  ;;  %v6691_v41 = vmax.f32 %v6689_v33, %v6690_v31  ;;  %v6698_v44 = vld [vmem:[#allocation152_spill] sm:$0xff] }
 0x225   :  { %6664 = vst [vmem:[#allocation15_spill] sm:$0xff] %v5340_v1  ;;  %6676 = vst [vmem:[#allocation115_spill] sm:$0xff] %v5355_v28  ;;  %v6679_v1 = vmax.f32 %v6677_v42, %v6678_v12  ;;  %v6694_v12 = vld [vmem:[#allocation151_spill] sm:$0xff]  ;;  %v6706_v31 = vld [vmem:[#allocation154_spill] sm:$0xff] }
 0x226   :  { %6672 = vst [vmem:[#allocation16_spill] sm:$0xff] %v5350_v50  ;;  %v1543_v9 = vpop.f32.mrb[148].mxu0  ;;  %v1716_v37 = vpop.f32.mrb[148].mxu1  ;;  %v6687_v50 = vmax.f32 %v6685_v32, %v6686_v58  ;;  %v6702_v58 = vld [vmem:[#allocation153_spill] sm:$0xff] }
 0x227   :  { %v5360_v48 = vmax.f32 %v6679_v1, %v1543_v9  ;;  %v5365_v63 = vmax.f32 %v6683_v59, %v1716_v37  ;;  %v1545_v57 = vpop.f32.mrb[149].mxu0  ;;  %v1718_v49 = vpop.f32.mrb[149].mxu1  ;;  %v6693_v9 = vld [vmem:[#allocation58_spill] sm:$0xff]  ;;  %v6697_v37 = vld [vmem:[#allocation59_spill] sm:$0xff] }
 0x228   :  { %v5370_v40 = vmax.f32 %v6687_v50, %v1545_v57  ;;  %v5375_v28 = vmax.f32 %v6691_v41, %v1718_v49  ;;  %v1547_v42 = vpop.f32.mrb[150].mxu0  ;;  %v1720_v1 = vpop.f32.mrb[150].mxu1  ;;  %v6699_v59 = vmax.f32 %v6697_v37, %v6698_v44  ;;  %v6701_v57 = vld [vmem:[#allocation60_spill] sm:$0xff]  ;;  %v6705_v49 = vld [vmem:[#allocation61_spill] sm:$0xff]  ;;  %v6714_v44 = vld [vmem:[#allocation155_spill] sm:$0xff] }
 0x229   :  { %6680 = vst [vmem:[#allocation17_spill] sm:$0xff] %v5360_v48  ;;  %6684 = vst [vmem:[#allocation116_spill] sm:$0xff] %v5365_v63  ;;  %v6695_v48 = vmax.f32 %v6693_v9, %v6694_v12  ;;  %v1549_v32 = vpop.f32.mrb[151].mxu0  ;;  %v1722_v50 = vpop.f32.mrb[151].mxu1  ;;  %v6707_v41 = vmax.f32 %v6705_v49, %v6706_v31  ;;  %v6710_v12 = vld [vmem:[#allocation57_spill] sm:$0xff] }
 0x22a   :  { %6688 = vst [vmem:[#allocation117_spill] sm:$0xff] %v5370_v40  ;;  %6692 = vst [vmem:[#allocation18_spill] sm:$0xff] %v5375_v28  ;;  %v5385_v63 = vmax.f32 %v6699_v59, %v1720_v1  ;;  %v6703_v40 = vmax.f32 %v6701_v57, %v6702_v58  ;;  %v6713_v1 = vld [vmem:[#allocation63_spill] sm:$0xff]  ;;  %v6718_v58 = vld [vmem:[#allocation156_spill] sm:$0xff] }
 0x22b   :  { %v5380_v22 = vmax.f32 %v6695_v48, %v1547_v42  ;;  %v5395_v28 = vmax.f32 %v6707_v41, %v1722_v50  ;;  %v6709_v42 = vld [vmem:[#allocation62_spill] sm:$0xff]  ;;  %v6715_v59 = vmax.f32 %v6713_v1, %v6714_v44  ;;  %v6721_v50 = vld [vmem:[#allocation65_spill] sm:$0xff]  ;;  %v6730_v44 = vld [vmem:[#allocation159_spill] sm:$0xff] }
 0x22c   :  { %6700 = vst [vmem:[#allocation19_spill] sm:$0xff] %v5385_v63  ;;  %v5390_v33 = vmax.f32 %v6703_v40, %v1549_v32  ;;  %v6717_v32 = vld [vmem:[#allocation64_spill] sm:$0xff]  ;;  %v6722_v31 = vld [vmem:[#allocation157_spill] sm:$0xff] }
 0x22d   :  { %6696 = vst [vmem:[#allocation118_spill] sm:$0xff] %v5380_v22  ;;  %6708 = vst [vmem:[#allocation20_spill] sm:$0xff] %v5395_v28  ;;  %v6711_v22 = vmax.f32 %v6709_v42, %v6710_v12  ;;  %v6723_v41 = vmax.f32 %v6721_v50, %v6722_v31  ;;  %v6726_v12 = vld [vmem:[#allocation158_spill] sm:$0xff]  ;;  %v6738_v31 = vld [vmem:[#allocation161_spill] sm:$0xff] }
 0x22e   :  { %6704 = vst [vmem:[#allocation119_spill] sm:$0xff] %v5390_v33  ;;  %v1553_v9 = vpop.f32.mrb[152].mxu0  ;;  %v1726_v48 = vpop.f32.mrb[152].mxu1  ;;  %v6719_v33 = vmax.f32 %v6717_v32, %v6718_v58  ;;  %v6734_v58 = vld [vmem:[#allocation160_spill] sm:$0xff] }
 0x22f   :  { %v5400_v37 = vmax.f32 %v6711_v22, %v1553_v9  ;;  %v5405_v63 = vmax.f32 %v6715_v59, %v1726_v48  ;;  %v1555_v57 = vpop.f32.mrb[153].mxu0  ;;  %v1728_v40 = vpop.f32.mrb[153].mxu1  ;;  %v6725_v9 = vld [vmem:[#allocation67_spill] sm:$0xff]  ;;  %v6729_v48 = vld [vmem:[#allocation68_spill] sm:$0xff] }
 0x230   :  { %v5410_v49 = vmax.f32 %v6719_v33, %v1555_v57  ;;  %v5415_v28 = vmax.f32 %v6723_v41, %v1728_v40  ;;  %v1557_v42 = vpop.f32.mrb[154].mxu0  ;;  %v1730_v22 = vpop.f32.mrb[154].mxu1  ;;  %v6731_v59 = vmax.f32 %v6729_v48, %v6730_v44  ;;  %v6733_v57 = vld [vmem:[#allocation69_spill] sm:$0xff]  ;;  %v6737_v40 = vld [vmem:[#allocation70_spill] sm:$0xff] }
 0x231   :  { %6712 = vst [vmem:[#allocation120_spill] sm:$0xff] %v5400_v37  ;;  %6716 = vst [vmem:[#allocation21_spill] sm:$0xff] %v5405_v63  ;;  %v6727_v37 = vmax.f32 %v6725_v9, %v6726_v12  ;;  %v1559_v32 = vpop.f32.mrb[155].mxu0  ;;  %v1732_v33 = vpop.f32.mrb[155].mxu1  ;;  %v6739_v41 = vmax.f32 %v6737_v40, %v6738_v31  ;;  %v6742_v12 = vld [vmem:[#allocation66_spill] sm:$0xff]  ;;  %v6754_v31 = vld [vmem:[#allocation164_spill] sm:$0xff] }
 0x232   :  { %6720 = vst [vmem:[#allocation121_spill] sm:$0xff] %v5410_v49  ;;  %6724 = vst [vmem:[#allocation22_spill] sm:$0xff] %v5415_v28  ;;  %v5425_v63 = vmax.f32 %v6731_v59, %v1730_v22  ;;  %v6735_v49 = vmax.f32 %v6733_v57, %v6734_v58  ;;  %v6745_v22 = vld [vmem:[#allocation72_spill] sm:$0xff]  ;;  %v6746_v44 = vld [vmem:[#allocation162_spill] sm:$0xff] }
 0x233   :  { %v5420_v1 = vmax.f32 %v6727_v37, %v1557_v42  ;;  %v5435_v28 = vmax.f32 %v6739_v41, %v1732_v33  ;;  %v6741_v42 = vld [vmem:[#allocation71_spill] sm:$0xff]  ;;  %v6747_v59 = vmax.f32 %v6745_v22, %v6746_v44  ;;  %v6753_v33 = vld [vmem:[#allocation74_spill] sm:$0xff] }
 0x234   :  { %6732 = vst [vmem:[#allocation23_spill] sm:$0xff] %v5425_v63  ;;  %v5430_v50 = vmax.f32 %v6735_v49, %v1559_v32  ;;  %v6749_v32 = vld [vmem:[#allocation73_spill] sm:$0xff]  ;;  %v6750_v58 = vld [vmem:[#allocation163_spill] sm:$0xff]  ;;  %v6755_v41 = vmax.f32 %v6753_v33, %v6754_v31  ;;  %v6762_v44 = vld [vmem:[#allocation166_spill] sm:$0xff] }
 0x235   :  { %6728 = vst [vmem:[#allocation122_spill] sm:$0xff] %v5420_v1  ;;  %6740 = vst [vmem:[#allocation24_spill] sm:$0xff] %v5435_v28  ;;  %v6743_v1 = vmax.f32 %v6741_v42, %v6742_v12  ;;  %v6758_v12 = vld [vmem:[#allocation165_spill] sm:$0xff]  ;;  %v6770_v31 = vld [vmem:[#allocation168_spill] sm:$0xff] }
 0x236   :  { %6736 = vst [vmem:[#allocation123_spill] sm:$0xff] %v5430_v50  ;;  %v1563_v9 = vpop.f32.mrb[156].mxu0  ;;  %v1736_v37 = vpop.f32.mrb[156].mxu1  ;;  %v6751_v50 = vmax.f32 %v6749_v32, %v6750_v58  ;;  %v6766_v58 = vld [vmem:[#allocation167_spill] sm:$0xff] }
 0x237   :  { %v5440_v48 = vmax.f32 %v6743_v1, %v1563_v9  ;;  %v5445_v63 = vmax.f32 %v6747_v59, %v1736_v37  ;;  %v1565_v57 = vpop.f32.mrb[157].mxu0  ;;  %v1738_v49 = vpop.f32.mrb[157].mxu1  ;;  %v6757_v9 = vld [vmem:[#allocation76_spill] sm:$0xff]  ;;  %v6761_v37 = vld [vmem:[#allocation77_spill] sm:$0xff] }
 0x238   :  { %v5450_v40 = vmax.f32 %v6751_v50, %v1565_v57  ;;  %v5455_v28 = vmax.f32 %v6755_v41, %v1738_v49  ;;  %v1567_v42 = vpop.f32.mrb[158].mxu0  ;;  %v1740_v1 = vpop.f32.mrb[158].mxu1  ;;  %v6763_v59 = vmax.f32 %v6761_v37, %v6762_v44  ;;  %v6765_v57 = vld [vmem:[#allocation78_spill] sm:$0xff]  ;;  %v6769_v49 = vld [vmem:[#allocation79_spill] sm:$0xff]  ;;  %v6778_v44 = vld [vmem:[#allocation169_spill] sm:$0xff] }
 0x239   :  { %6744 = vst [vmem:[#allocation124_spill] sm:$0xff] %v5440_v48  ;;  %6748 = vst [vmem:[#allocation25_spill] sm:$0xff] %v5445_v63  ;;  %v6759_v48 = vmax.f32 %v6757_v9, %v6758_v12  ;;  %v1569_v32 = vpop.f32.mrb[159].mxu0  ;;  %v1742_v50 = vpop.f32.mrb[159].mxu1  ;;  %v6771_v41 = vmax.f32 %v6769_v49, %v6770_v31  ;;  %v6774_v12 = vld [vmem:[#allocation75_spill] sm:$0xff] }
 0x23a   :  { %6752 = vst [vmem:[#allocation125_spill] sm:$0xff] %v5450_v40  ;;  %6756 = vst [vmem:[#allocation26_spill] sm:$0xff] %v5455_v28  ;;  %v5465_v63 = vmax.f32 %v6763_v59, %v1740_v1  ;;  %v6767_v40 = vmax.f32 %v6765_v57, %v6766_v58  ;;  %v6777_v1 = vld [vmem:[#allocation81_spill] sm:$0xff]  ;;  %v6782_v58 = vld [vmem:[#allocation170_spill] sm:$0xff] }
 0x23b   :  { %v5460_v22 = vmax.f32 %v6759_v48, %v1567_v42  ;;  %v5475_v28 = vmax.f32 %v6771_v41, %v1742_v50  ;;  %v6773_v42 = vld [vmem:[#allocation80_spill] sm:$0xff]  ;;  %v6779_v59 = vmax.f32 %v6777_v1, %v6778_v44  ;;  %v6785_v50 = vld [vmem:[#allocation83_spill] sm:$0xff]  ;;  %v6794_v44 = vld [vmem:[#allocation173_spill] sm:$0xff] }
 0x23c   :  { %6764 = vst [vmem:[#allocation27_spill] sm:$0xff] %v5465_v63  ;;  %v5470_v33 = vmax.f32 %v6767_v40, %v1569_v32  ;;  %v6781_v32 = vld [vmem:[#allocation82_spill] sm:$0xff]  ;;  %v6786_v31 = vld [vmem:[#allocation171_spill] sm:$0xff] }
 0x23d   :  { %6760 = vst [vmem:[#allocation126_spill] sm:$0xff] %v5460_v22  ;;  %6772 = vst [vmem:[#allocation28_spill] sm:$0xff] %v5475_v28  ;;  %v6775_v22 = vmax.f32 %v6773_v42, %v6774_v12  ;;  %v6787_v41 = vmax.f32 %v6785_v50, %v6786_v31  ;;  %v6790_v12 = vld [vmem:[#allocation172_spill] sm:$0xff] }
 0x23e   :  { %6768 = vst [vmem:[#allocation127_spill] sm:$0xff] %v5470_v33  ;;  %v1573_v9 = vpop.f32.mrb[160].mxu0  ;;  %v1746_v48 = vpop.f32.mrb[160].mxu1  ;;  %v6783_v33 = vmax.f32 %v6781_v32, %v6782_v58  ;;  %v6797_v58 = vld [vmem:[#allocation87_spill] sm:$0xff]  ;;  %v6800_v31 = vld [vmem:[#allocation88_spill] sm:$0xff] }
 0x23f   :  { %v5480_v37 = vmax.f32 %v6775_v22, %v1573_v9  ;;  %v5485_v63 = vmax.f32 %v6779_v59, %v1746_v48  ;;  %v1575_v57 = vpop.f32.mrb[161].mxu0  ;;  %v1748_v40 = vpop.f32.mrb[161].mxu1  ;;  %v6789_v9 = vld [vmem:[#allocation85_spill] sm:$0xff]  ;;  %v6793_v48 = vld [vmem:[#allocation86_spill] sm:$0xff] }
 0x240   :  { %v5490_v49 = vmax.f32 %v6783_v33, %v1575_v57  ;;  %v5495_v28 = vmax.f32 %v6787_v41, %v1748_v40  ;;  %v1577_v42 = vpop.f32.mrb[162].mxu0  ;;  %v1750_v22 = vpop.f32.mrb[162].mxu1  ;;  %v6795_v59 = vmax.f32 %v6793_v48, %v6794_v44  ;;  %v2337_v57 = vlaneseq  ;;  %v6801_v41 = vld [vmem:[#allocation175_spill] sm:$0xff]  ;;  %v6805_v48 = vld [vmem:[#allocation84_spill] sm:$0xff] }
 0x241   :  { %6776 = vst [vmem:[#allocation128_spill] sm:$0xff] %v5480_v37  ;;  %6780 = vst [vmem:[#allocation29_spill] sm:$0xff] %v5485_v63  ;;  %v6791_v37 = vmax.f32 %v6789_v9, %v6790_v12  ;;  %v1579_v32 = vpop.f32.mrb[163].mxu0  ;;  %v1752_v33 = vpop.f32.mrb[163].mxu1  ;;  %v6804_v12 = vld [vmem:[#allocation89_spill] sm:$0xff] }
 0x242   :  { %6784 = vst [vmem:[#allocation129_spill] sm:$0xff] %v5490_v49  ;;  %6788 = vst [vmem:[#allocation31_spill] sm:$0xff] %v5495_v28  ;;  %v5505_v63 = vmax.f32 %v6795_v59, %v1750_v22  ;;  %v6798_v49 = vld [vmem:[#allocation174_spill] sm:$0xff]  ;;  %v6802_v28 = vmax.f32 %v6800_v31, %v6801_v41  ;;  %v6806_v22 = vmax.f32 %v6804_v12, %v6805_v48 }
 0x243   :  { %v5500_v1 = vmax.f32 %v6791_v37, %v1577_v42  ;;  %v6799_v50 = vmax.f32 %v6797_v58, %v6798_v49  ;;  %v2338_v37 = vshrl.u32 %v2337_v57, 7  ;;  %v6808_v59 = vld [vmem:[#allocation90_spill] sm:$0xff]  ;;  %v6812_v58 = vld [vmem:[#allocation177_spill] sm:$0xff] }
 0x244   :  { %6796 = vst [vmem:[#allocation32_spill] sm:$0xff] %v5505_v63  ;;  %v5515_v35 = vmax.f32 %v6802_v28, %v1752_v33  ;;  %v6809_v63 = vld [vmem:[#allocation176_spill] sm:$0xff]  ;;  %v6816_v57 = vld [vmem:[#allocation178_spill] sm:$0xff] }
 0x245   :  { %6792 = vst [vmem:[#allocation130_spill] sm:$0xff] %v5500_v1  ;;  %v5510_v40 = vmax.f32 %v6799_v50, %v1579_v32  ;;  %v6810_v1 = vmax.f32 %v6808_v59, %v6809_v63  ;;  %v6813_v50 = vmax.f32 %v6466_v2, %v6812_v58  ;;  %v6815_v33 = vld [vmem:[#allocation92_spill] sm:$0xff]  ;;  %v6819_v48 = vld [vmem:[#allocation94_spill] sm:$0xff]  ;;  %v2339_v58 = vsub.s32 0, %v2338_v37 }
 0x246   :  { %6803 = vst [vmem:[#allocation131_spill] sm:$0xff] %v5515_v35  ;;  %v1583_v42 = vpop.f32.mrb[164].mxu0  ;;  %v1756_v9 = vpop.f32.mrb[164].mxu1  ;;  %v6817_v31 = vmax.f32 %v6815_v33, %v6816_v57  ;;  %v6828_v33 = vld [vmem:[#allocation180_spill] sm:$0xff] }
 0x247   :  { %v5520_v44 = vmax.f32 %v6806_v22, %v1583_v42  ;;  %v5525_v20 = vmax.f32 %v6810_v1, %v1756_v9  ;;  %v1585_v49 = vpop.f32.mrb[165].mxu0  ;;  %v1758_v32 = vpop.f32.mrb[165].mxu1  ;;  %v6820_v22 = vld [vmem:[#allocation91_spill] sm:$0xff] }
 0x248   :  { %v5530_v28 = vmax.f32 %v6813_v50, %v1585_v49  ;;  %v5535_v41 = vmax.f32 %v6817_v31, %v1758_v32  ;;  %v1587_v12 = vpop.f32.mrb[166].mxu0  ;;  %v1760_v42 = vpop.f32.mrb[166].mxu1  ;;  %v6823_v1 = vld [vmem:[#allocation95_spill] sm:$0xff]  ;;  %v2347_v50 = vsub.s32 2, %v2338_v37  ;;  %v6830_v31 = vld [vmem:[#allocation97_spill] sm:$0xff] }
 0x249   :  { %6807 = vst [vmem:[#allocation33_spill] sm:$0xff] %v5520_v44  ;;  %6811 = vst [vmem:[#allocation132_spill] sm:$0xff] %v5525_v20  ;;  %v6821_v44 = vmax.f32 %v6819_v48, %v6820_v22  ;;  %v6824_v9 = vld [vmem:[#allocation179_spill] sm:$0xff]  ;;  %v1589_v2 = vpop.f32.mrb[167].mxu0  ;;  %v1762_v49 = vpop.f32.mrb[167].mxu1  ;;  %v2351_v22 = vsub.s32 3, %v2338_v37 }
 0x24a   :  { %6814 = vst [vmem:[#allocation34_spill] sm:$0xff] %v5530_v28  ;;  %6818 = vst [vmem:[#allocation133_spill] sm:$0xff] %v5535_v41  ;;  %v6825_v59 = vmax.f32 %v6823_v1, %v6824_v9  ;;  %v6827_v28 = vld [vmem:[#allocation96_spill] sm:$0xff]  ;;  %v6831_v41 = vld [vmem:[#allocation181_spill] sm:$0xff] }
 0x24b   :  { %v5540_v63 = vmax.f32 %v6821_v44, %v1587_v12  ;;  %v6829_v32 = vmax.f32 %v6827_v28, %v6828_v33  ;;  %v6832_v35 = vmax.f32 %v6830_v31, %v6831_v41  ;;  %v2335_v44 = vld [vmem:[#allocation2] sm:$0xf]  ;;  %v2343_v12 = vsub.s32 1, %v2338_v37  ;;  %v6833_v33 = vld [vmem:[#allocation93_spill] sm:$0xff] }
 0x24c   :  { %v5545_v20 = vmax.f32 %v6825_v59, %v1760_v42  ;;  %v5557_v1 = vrot.slane %v2335_v44, %v2339_v58  ;;  %v5559_v42 = vrot.slane %v2335_v44, %v2347_v50 }
 0x24d   :  { %6822 = vst [vmem:[#allocation35_spill] sm:$0xff] %v5540_v63  ;;  %v5550_v57 = vmax.f32 %v6829_v32, %v1589_v2  ;;  %v5555_v48 = vmax.f32 %v6832_v35, %v1762_v49  ;;  %v5563_v63 = vrot.slane %v2335_v44, %v2351_v22 }
 0x24e   :  { %6826 = vst [vmem:[#allocation30_spill] sm:$0xff] %v5545_v20  ;;  %v1911_v9 = vpop.f32.mrb[168].mxu0  ;;  %v2084_v59 = vpop.f32.mrb[168].mxu1  ;;  %v5561_v20 = vrot.slane %v2335_v44, %v2343_v12 }
 0x24f   :  { %v2223_v28 = vmax.f32 %v4996_v43, %v1911_v9  ;;  %v2225_v2 = vmax.f32 %v5001_v0, %v2084_v59  ;;  %v1913_v41 = vpop.f32.mrb[169].mxu0  ;;  %v2086_v35 = vpop.f32.mrb[169].mxu1 }
 0x250   :  { %v2224_v49 = vmax.f32 %v5006_v55, %v1913_v41  ;;  %v2226_v37 = vmax.f32 %v6833_v33, %v2086_v35  ;;  %v1915_v58 = vpop.f32.mrb[170].mxu0  ;;  %v2088_v50 = vpop.f32.mrb[170].mxu1 }
 0x251   :  { %v2357_v32 = vadd.f32 %v5557_v1, %v2223_v28  ;;  %v2359_v31 = vadd.f32 %v5559_v42, %v2225_v2  ;;  %v2227_v44 = vmax.f32 %v5016_v53, %v1915_v58  ;;  %v2229_v43 = vmax.f32 %v5021_v25, %v2088_v50  ;;  %v1917_v12 = vpop.f32.mrb[171].mxu0  ;;  %v2090_v0 = vpop.f32.mrb[171].mxu1 }
 0x252   :  { %v2358_v22 = vadd.f32 %v5561_v20, %v2224_v49  ;;  %v2360_v55 = vadd.f32 %v5563_v63, %v2226_v37  ;;  %v2228_v9 = vmax.f32 %v5026_v6, %v1917_v12  ;;  %v2230_v59 = vmax.f32 %v5031_v56, %v2090_v0 }
 0x253   :  { %v2469_v41 = vmax.f32 %v2357_v32, 0.0  ;;  %v2471_v35 = vmax.f32 %v2359_v31, 0.0  ;;  %v2361_v28 = vadd.f32 %v5557_v1, %v2227_v44  ;;  %v2363_v2 = vadd.f32 %v5559_v42, %v2229_v43 }
 0x254   :  { %v2470_v33 = vmax.f32 %v2358_v22, 0.0  ;;  %v2472_v53 = vmax.f32 %v2360_v55, 0.0  ;;  %v2362_v25 = vadd.f32 %v5561_v20, %v2228_v9  ;;  %v2364_v58 = vadd.f32 %v5563_v63, %v2230_v59 }
 0x255   :  { %v2473_v6 = vmax.f32 %v2361_v28, 0.0  ;;  %v2475_v56 = vmax.f32 %v2363_v2, 0.0 }
 0x256   :  { %v3285_v37 = vpack.c.bf16 %v2470_v33, %v2469_v41  ;;  %v3286_v50 = vpack.c.bf16 %v2472_v53, %v2471_v35  ;;  %v2474_v32 = vmax.f32 %v2362_v25, 0.0  ;;  %v2476_v31 = vmax.f32 %v2364_v58, 0.0  ;;  %v1921_v44 = vpop.f32.mrb[172].mxu0  ;;  %v2094_v43 = vpop.f32.mrb[172].mxu1 }
 0x257   :  { %v2231_v12 = vmax.f32 %v5040_v52, %v1921_v44  ;;  %v2233_v0 = vmax.f32 %v5045_v5, %v2094_v43  ;;  %v1923_v22 = vpop.f32.mrb[173].mxu0  ;;  %v2096_v55 = vpop.f32.mrb[173].mxu1 }
 0x258   :  { %2917 = vst [vmem:[%s6022_s3] sm:$0xff] %v3285_v37  ;;  %2921 = vst.msk [vmem:[%s6022_s3 + $0x8] sm:$0xff] %vm5583_vm4, %v3286_v50  ;;  %v3287_v9 = vpack.c.bf16 %v2474_v32, %v2473_v6  ;;  %v3288_v59 = vpack.c.bf16 %v2476_v31, %v2475_v56  ;;  %v2232_v41 = vmax.f32 %v5050_v47, %v1923_v22  ;;  %v1925_v35 = vpop.f32.mrb[174].mxu0  ;;  %v2098_v5 = vpop.f32.mrb[174].mxu1 }
 0x259   :  { %v2234_v52 = vmax.f32 %v5055_v23, %v2096_v55  ;;  %v2365_v28 = vadd.f32 %v5557_v1, %v2231_v12  ;;  %v2367_v2 = vadd.f32 %v5559_v42, %v2233_v0  ;;  %v2235_v33 = vmax.f32 %v5060_v7, %v1925_v35  ;;  %v1927_v25 = vpop.f32.mrb[175].mxu0  ;;  %v2100_v58 = vpop.f32.mrb[175].mxu1 }
 0x25a   :  { %v2237_v53 = vmax.f32 %v5065_v3, %v2098_v5  ;;  %2922 = vst [vmem:[%s6022_s3 + $0x10] sm:$0xff] %v3287_v9  ;;  %2923 = vst.msk [vmem:[%s6022_s3 + $0x18] sm:$0xff] %vm5583_vm4, %v3288_v59  ;;  %v2366_v47 = vadd.f32 %v5561_v20, %v2232_v41  ;;  %v2236_v7 = vmax.f32 %v5070_v10, %v1927_v25 }
 0x25b   :  { %v2368_v23 = vadd.f32 %v5563_v63, %v2234_v52  ;;  %v2238_v3 = vmax.f32 %v5075_v34, %v2100_v58  ;;  %v2477_v6 = vmax.f32 %v2365_v28, 0.0  ;;  %v2479_v56 = vmax.f32 %v2367_v2, 0.0 }
 0x25c   :  { %v2369_v37 = vadd.f32 %v5557_v1, %v2235_v33  ;;  %v2371_v50 = vadd.f32 %v5559_v42, %v2237_v53  ;;  %v2478_v32 = vmax.f32 %v2366_v47, 0.0  ;;  %v2370_v44 = vadd.f32 %v5561_v20, %v2236_v7 }
 0x25d   :  { %v2480_v31 = vmax.f32 %v2368_v23, 0.0  ;;  %v2372_v43 = vadd.f32 %v5563_v63, %v2238_v3 }
 0x25e   :  { %v2481_v12 = vmax.f32 %v2369_v37, 0.0  ;;  %v2483_v0 = vmax.f32 %v2371_v50, 0.0  ;;  %v3289_v22 = vpack.c.bf16 %v2478_v32, %v2477_v6  ;;  %v2482_v9 = vmax.f32 %v2370_v44, 0.0  ;;  %v1931_v59 = vpop.f32.mrb[176].mxu0  ;;  %v2104_v34 = vpop.f32.mrb[176].mxu1 }
 0x25f   :  { %v3290_v55 = vpack.c.bf16 %v2480_v31, %v2479_v56  ;;  %v2484_v10 = vmax.f32 %v2372_v43, 0.0  ;;  %v2239_v41 = vmax.f32 %v5080_v17, %v1931_v59  ;;  %v2241_v52 = vmax.f32 %v5085_v8, %v2104_v34  ;;  %v1933_v35 = vpop.f32.mrb[177].mxu0  ;;  %v2106_v5 = vpop.f32.mrb[177].mxu1 }
 0x260   :  { %2924 = vst [vmem:[%s6022_s3 + $0x20] sm:$0xff] %v3289_v22  ;;  %v3291_v28 = vpack.c.bf16 %v2482_v9, %v2481_v12  ;;  %v2240_v33 = vmax.f32 %v5090_v46, %v1933_v35  ;;  %v2242_v17 = vmax.f32 %v5095_v15, %v2106_v5  ;;  %v1935_v53 = vpop.f32.mrb[178].mxu0  ;;  %v2108_v8 = vpop.f32.mrb[178].mxu1 }
 0x261   :  { %2925 = vst.msk [vmem:[%s6022_s3 + $0x28] sm:$0xff] %vm5583_vm4, %v3290_v55  ;;  %v3292_v2 = vpack.c.bf16 %v2484_v10, %v2483_v0  ;;  %v2373_v25 = vadd.f32 %v5557_v1, %v2239_v41  ;;  %v2375_v58 = vadd.f32 %v5559_v42, %v2241_v52  ;;  %v2243_v47 = vmax.f32 %v5100_v54, %v1935_v53  ;;  %v1937_v7 = vpop.f32.mrb[179].mxu0  ;;  %v2110_v3 = vpop.f32.mrb[179].mxu1 }
 0x262   :  { %v2245_v23 = vmax.f32 %v5105_v16, %v2108_v8  ;;  %2926 = vst [vmem:[%s6022_s3 + $0x30] sm:$0xff] %v3291_v28  ;;  %v2374_v46 = vadd.f32 %v5561_v20, %v2240_v33  ;;  %v2376_v15 = vadd.f32 %v5563_v63, %v2242_v17  ;;  %v2244_v54 = vmax.f32 %v5110_v19, %v1937_v7 }
 0x263   :  { %2927 = vst.msk [vmem:[%s6022_s3 + $0x38] sm:$0xff] %vm5583_vm4, %v3292_v2  ;;  %v2246_v16 = vmax.f32 %v5115_v13, %v2110_v3  ;;  %v2485_v6 = vmax.f32 %v2373_v25, 0.0  ;;  %v2487_v56 = vmax.f32 %v2375_v58, 0.0  ;;  %v2377_v37 = vadd.f32 %v5557_v1, %v2243_v47 }
 0x264   :  { %v2379_v50 = vadd.f32 %v5559_v42, %v2245_v23  ;;  %v2486_v32 = vmax.f32 %v2374_v46, 0.0  ;;  %v2488_v31 = vmax.f32 %v2376_v15, 0.0  ;;  %v2378_v44 = vadd.f32 %v5561_v20, %v2244_v54 }
 0x265   :  { %v2380_v43 = vadd.f32 %v5563_v63, %v2246_v16  ;;  %v2489_v12 = vmax.f32 %v2377_v37, 0.0 }
 0x266   :  { %v2491_v0 = vmax.f32 %v2379_v50, 0.0  ;;  %v3293_v22 = vpack.c.bf16 %v2486_v32, %v2485_v6  ;;  %v3294_v55 = vpack.c.bf16 %v2488_v31, %v2487_v56  ;;  %v2490_v9 = vmax.f32 %v2378_v44, 0.0  ;;  %v1941_v10 = vpop.f32.mrb[180].mxu0  ;;  %v2114_v13 = vpop.f32.mrb[180].mxu1 }
 0x267   :  { %v2492_v19 = vmax.f32 %v2380_v43, 0.0  ;;  %v2247_v59 = vmax.f32 %v5120_v27, %v1941_v10  ;;  %v2249_v34 = vmax.f32 %v5125_v14, %v2114_v13  ;;  %v1943_v41 = vpop.f32.mrb[181].mxu0  ;;  %v2116_v52 = vpop.f32.mrb[181].mxu1 }
 0x268   :  { %2928 = vst [vmem:[%s6022_s3 + $0x40] sm:$0xff] %v3293_v22  ;;  %2929 = vst.msk [vmem:[%s6022_s3 + $0x48] sm:$0xff] %vm5583_vm4, %v3294_v55  ;;  %v3295_v35 = vpack.c.bf16 %v2490_v9, %v2489_v12  ;;  %v2248_v28 = vmax.f32 %v5130_v51, %v1943_v41  ;;  %v2250_v27 = vmax.f32 %v5135_v11, %v2116_v52  ;;  %v1945_v2 = vpop.f32.mrb[182].mxu0  ;;  %v2118_v14 = vpop.f32.mrb[182].mxu1 }
 0x269   :  { %v3296_v5 = vpack.c.bf16 %v2492_v19, %v2491_v0  ;;  %v2381_v33 = vadd.f32 %v5557_v1, %v2247_v59  ;;  %v2383_v17 = vadd.f32 %v5559_v42, %v2249_v34  ;;  %v2251_v53 = vmax.f32 %v5140_v24, %v1945_v2  ;;  %v1947_v25 = vpop.f32.mrb[183].mxu0  ;;  %v2120_v58 = vpop.f32.mrb[183].mxu1 }
 0x26a   :  { %v2253_v8 = vmax.f32 %v5145_v18, %v2118_v14  ;;  %2930 = vst [vmem:[%s6022_s3 + $0x50] sm:$0xff] %v3295_v35  ;;  %v2382_v51 = vadd.f32 %v5561_v20, %v2248_v28  ;;  %v2384_v11 = vadd.f32 %v5563_v63, %v2250_v27  ;;  %v2252_v24 = vmax.f32 %v5150_v29, %v1947_v25 }
 0x26b   :  { %2931 = vst.msk [vmem:[%s6022_s3 + $0x58] sm:$0xff] %vm5583_vm4, %v3296_v5  ;;  %v2254_v18 = vmax.f32 %v5155_v60, %v2120_v58  ;;  %v2493_v47 = vmax.f32 %v2381_v33, 0.0  ;;  %v2495_v23 = vmax.f32 %v2383_v17, 0.0  ;;  %v2385_v7 = vadd.f32 %v5557_v1, %v2251_v53 }
 0x26c   :  { %v2387_v3 = vadd.f32 %v5559_v42, %v2253_v8  ;;  %v2494_v46 = vmax.f32 %v2382_v51, 0.0  ;;  %v2496_v15 = vmax.f32 %v2384_v11, 0.0  ;;  %v2386_v54 = vadd.f32 %v5561_v20, %v2252_v24 }
 0x26d   :  { %v2388_v16 = vadd.f32 %v5563_v63, %v2254_v18  ;;  %v2497_v6 = vmax.f32 %v2385_v7, 0.0 }
 0x26e   :  { %v2499_v56 = vmax.f32 %v2387_v3, 0.0  ;;  %v3297_v37 = vpack.c.bf16 %v2494_v46, %v2493_v47  ;;  %v3298_v50 = vpack.c.bf16 %v2496_v15, %v2495_v23  ;;  %v2498_v32 = vmax.f32 %v2386_v54, 0.0  ;;  %v1951_v31 = vpop.f32.mrb[184].mxu0  ;;  %v2124_v60 = vpop.f32.mrb[184].mxu1  ;;  %v6836_v46 = vld [vmem:[#allocation98_spill] sm:$0xff]  ;;  %v6837_v54 = vld [vmem:[#allocation5_spill] sm:$0xff] }
 0x26f   :  { %v2500_v29 = vmax.f32 %v2388_v16, 0.0  ;;  %v2255_v44 = vmax.f32 %v5160_v36, %v1951_v31  ;;  %v2257_v43 = vmax.f32 %v5165_v30, %v2124_v60  ;;  %v1953_v12 = vpop.f32.mrb[185].mxu0  ;;  %v2126_v0 = vpop.f32.mrb[185].mxu1 }
 0x270   :  { %2932 = vst [vmem:[%s6022_s3 + $0x60] sm:$0xff] %v3297_v37  ;;  %2933 = vst.msk [vmem:[%s6022_s3 + $0x68] sm:$0xff] %vm5583_vm4, %v3298_v50  ;;  %v3299_v22 = vpack.c.bf16 %v2498_v32, %v2497_v6  ;;  %v2256_v9 = vmax.f32 %v5170_v21, %v1953_v12  ;;  %v2258_v36 = vmax.f32 %v5175_v26, %v2126_v0  ;;  %v1955_v19 = vpop.f32.mrb[186].mxu0  ;;  %v2128_v30 = vpop.f32.mrb[186].mxu1  ;;  %v6838_v37 = vld [vmem:[#allocation99_spill] sm:$0xff]  ;;  %v6839_v32 = vld [vmem:[#allocation101_spill] sm:$0xff] }
 0x271   :  { %v3300_v55 = vpack.c.bf16 %v2500_v29, %v2499_v56  ;;  %v2389_v10 = vadd.f32 %v5557_v1, %v2255_v44  ;;  %v2391_v13 = vadd.f32 %v5559_v42, %v2257_v43  ;;  %v2259_v59 = vmax.f32 %v5180_v61, %v1955_v19  ;;  %v1957_v41 = vpop.f32.mrb[187].mxu0  ;;  %v2130_v52 = vpop.f32.mrb[187].mxu1  ;;  %v6840_v12 = vld [vmem:[#allocation6_spill] sm:$0xff] }
 0x272   :  { %v2261_v34 = vmax.f32 %v5185_v62, %v2128_v30  ;;  %2934 = vst [vmem:[%s6022_s3 + $0x70] sm:$0xff] %v3299_v22  ;;  %v2390_v21 = vadd.f32 %v5561_v20, %v2256_v9  ;;  %v2392_v26 = vadd.f32 %v5563_v63, %v2258_v36  ;;  %v2260_v61 = vmax.f32 %v5190_v38, %v1957_v41  ;;  %v6841_v22 = vld [vmem:[#allocation102_spill] sm:$0xff] }
 0x273   :  { %2935 = vst.msk [vmem:[%s6022_s3 + $0x78] sm:$0xff] %vm5583_vm4, %v3300_v55  ;;  %v2262_v62 = vmax.f32 %v5195_v4, %v2130_v52  ;;  %v2501_v35 = vmax.f32 %v2389_v10, 0.0  ;;  %v2503_v5 = vmax.f32 %v2391_v13, 0.0  ;;  %v2393_v28 = vadd.f32 %v5557_v1, %v2259_v59 }
 0x274   :  { %v2395_v27 = vadd.f32 %v5559_v42, %v2261_v34  ;;  %v2502_v2 = vmax.f32 %v2390_v21, 0.0  ;;  %v2504_v14 = vmax.f32 %v2392_v26, 0.0  ;;  %v2394_v33 = vadd.f32 %v5561_v20, %v2260_v61 }
 0x275   :  { %v2396_v17 = vadd.f32 %v5563_v63, %v2262_v62  ;;  %v2505_v53 = vmax.f32 %v2393_v28, 0.0  ;;  %v6842_v28 = vld [vmem:[#allocation7_spill] sm:$0xff] }
 0x276   :  { %v2507_v8 = vmax.f32 %v2395_v27, 0.0  ;;  %v3301_v25 = vpack.c.bf16 %v2502_v2, %v2501_v35  ;;  %v3302_v58 = vpack.c.bf16 %v2504_v14, %v2503_v5  ;;  %v2506_v51 = vmax.f32 %v2394_v33, 0.0  ;;  %v1961_v11 = vpop.f32.mrb[188].mxu0  ;;  %v2134_v4 = vpop.f32.mrb[188].mxu1  ;;  %v6843_v2 = vld [vmem:[#allocation103_spill] sm:$0xff] }
 0x277   :  { %v2508_v38 = vmax.f32 %v2396_v17, 0.0  ;;  %v2263_v24 = vmax.f32 %v5200_v45, %v1961_v11  ;;  %v2265_v18 = vmax.f32 %v5205_v39, %v2134_v4  ;;  %v1963_v47 = vpop.f32.mrb[189].mxu0  ;;  %v2136_v23 = vpop.f32.mrb[189].mxu1 }
 0x278   :  { %2936 = vst [vmem:[%s6022_s3 + $0x80] sm:$0xff] %v3301_v25  ;;  %2937 = vst.msk [vmem:[%s6022_s3 + $0x88] sm:$0xff] %vm5583_vm4, %v3302_v58  ;;  %v3303_v7 = vpack.c.bf16 %v2506_v51, %v2505_v53  ;;  %v2264_v15 = vmax.f32 %v6836_v46, %v1963_v47  ;;  %v2266_v45 = vmax.f32 %v6837_v54, %v2136_v23  ;;  %v1965_v16 = vpop.f32.mrb[190].mxu0  ;;  %v2138_v39 = vpop.f32.mrb[190].mxu1  ;;  %v6844_v25 = vld [vmem:[#allocation100_spill] sm:$0xff] }
 0x279   :  { %v3304_v3 = vpack.c.bf16 %v2508_v38, %v2507_v8  ;;  %v2397_v6 = vadd.f32 %v5557_v1, %v2263_v24  ;;  %v2399_v56 = vadd.f32 %v5559_v42, %v2265_v18  ;;  %v2267_v50 = vmax.f32 %v6838_v37, %v1965_v16  ;;  %v1967_v31 = vpop.f32.mrb[191].mxu0  ;;  %v2140_v60 = vpop.f32.mrb[191].mxu1  ;;  %v6845_v51 = vld [vmem:[#allocation8_spill] sm:$0xff]  ;;  %v6848_v16 = vld [vmem:[#allocation9_spill] sm:$0xff] }
 0x27a   :  { %v2269_v29 = vmax.f32 %v6839_v32, %v2138_v39  ;;  %2938 = vst [vmem:[%s6022_s3 + $0x90] sm:$0xff] %v3303_v7  ;;  %v2398_v44 = vadd.f32 %v5561_v20, %v2264_v15  ;;  %v2400_v43 = vadd.f32 %v5563_v63, %v2266_v45  ;;  %v2268_v0 = vmax.f32 %v6840_v12, %v1967_v31  ;;  %v6846_v47 = vld [vmem:[#allocation104_spill] sm:$0xff]  ;;  %v6847_v7 = vld [vmem:[#allocation105_spill] sm:$0xff] }
 0x27b   :  { %2939 = vst.msk [vmem:[%s6022_s3 + $0x98] sm:$0xff] %vm5583_vm4, %v3304_v3  ;;  %v2270_v55 = vmax.f32 %v6841_v22, %v2140_v60  ;;  %v2509_v9 = vmax.f32 %v2397_v6, 0.0  ;;  %v2511_v36 = vmax.f32 %v2399_v56, 0.0  ;;  %v2401_v19 = vadd.f32 %v5557_v1, %v2267_v50  ;;  %v6849_v6 = vld [vmem:[#allocation106_spill] sm:$0xff] }
 0x27c   :  { %v2403_v30 = vadd.f32 %v5559_v42, %v2269_v29  ;;  %v2510_v10 = vmax.f32 %v2398_v44, 0.0  ;;  %v2512_v13 = vmax.f32 %v2400_v43, 0.0  ;;  %v2402_v59 = vadd.f32 %v5561_v20, %v2268_v0 }
 0x27d   :  { %v2404_v34 = vadd.f32 %v5563_v63, %v2270_v55  ;;  %v2513_v41 = vmax.f32 %v2401_v19, 0.0 }
 0x27e   :  { %v2515_v52 = vmax.f32 %v2403_v30, 0.0  ;;  %v3305_v21 = vpack.c.bf16 %v2510_v10, %v2509_v9  ;;  %v3306_v26 = vpack.c.bf16 %v2512_v13, %v2511_v36  ;;  %v2514_v61 = vmax.f32 %v2402_v59, 0.0  ;;  %v1971_v35 = vpop.f32.mrb[192].mxu0  ;;  %v2144_v5 = vpop.f32.mrb[192].mxu1  ;;  %v6850_v10 = vld [vmem:[#allocation10_spill] sm:$0xff]  ;;  %v6851_v59 = vld [vmem:[#allocation107_spill] sm:$0xff] }
 0x27f   :  { %v2516_v62 = vmax.f32 %v2404_v34, 0.0  ;;  %v2271_v27 = vmax.f32 %v6842_v28, %v1971_v35  ;;  %v2273_v14 = vmax.f32 %v6843_v2, %v2144_v5  ;;  %v1973_v33 = vpop.f32.mrb[193].mxu0  ;;  %v2146_v17 = vpop.f32.mrb[193].mxu1  ;;  %v6853_v35 = vld [vmem:[#allocation108_spill] sm:$0xff] }
 0x280   :  { %2940 = vst [vmem:[%s6022_s3 + $0xa0] sm:$0xff] %v3305_v21  ;;  %2941 = vst.msk [vmem:[%s6022_s3 + $0xa8] sm:$0xff] %vm5583_vm4, %v3306_v26  ;;  %v3307_v53 = vpack.c.bf16 %v2514_v61, %v2513_v41  ;;  %v2272_v58 = vmax.f32 %v6844_v25, %v1973_v33  ;;  %v2274_v38 = vmax.f32 %v6845_v51, %v2146_v17  ;;  %v1975_v11 = vpop.f32.mrb[194].mxu0  ;;  %v2148_v4 = vpop.f32.mrb[194].mxu1  ;;  %v6852_v61 = vld [vmem:[#allocation11_spill] sm:$0xff]  ;;  %v6854_v33 = vld [vmem:[#allocation109_spill] sm:$0xff] }
 0x281   :  { %v3308_v8 = vpack.c.bf16 %v2516_v62, %v2515_v52  ;;  %v2405_v24 = vadd.f32 %v5557_v1, %v2271_v27  ;;  %v2407_v18 = vadd.f32 %v5559_v42, %v2273_v14  ;;  %v2275_v23 = vmax.f32 %v6846_v47, %v1975_v11  ;;  %v1977_v46 = vpop.f32.mrb[195].mxu0  ;;  %v2150_v15 = vpop.f32.mrb[195].mxu1  ;;  %v6856_v11 = vld [vmem:[#allocation110_spill] sm:$0xff] }
 0x282   :  { %v2277_v3 = vmax.f32 %v6847_v7, %v2148_v4  ;;  %2942 = vst [vmem:[%s6022_s3 + $0xb0] sm:$0xff] %v3307_v53  ;;  %v2406_v54 = vadd.f32 %v5561_v20, %v2272_v58  ;;  %v2408_v45 = vadd.f32 %v5563_v63, %v2274_v38  ;;  %v2276_v39 = vmax.f32 %v6848_v16, %v1977_v46  ;;  %v6855_v53 = vld [vmem:[#allocation12_spill] sm:$0xff] }
 0x283   :  { %2943 = vst.msk [vmem:[%s6022_s3 + $0xb8] sm:$0xff] %vm5583_vm4, %v3308_v8  ;;  %v2278_v56 = vmax.f32 %v6849_v6, %v2150_v15  ;;  %v2517_v37 = vmax.f32 %v2405_v24, 0.0  ;;  %v2519_v50 = vmax.f32 %v2407_v18, 0.0  ;;  %v2409_v32 = vadd.f32 %v5557_v1, %v2275_v23  ;;  %v6857_v24 = vld [vmem:[#allocation13_spill] sm:$0xff] }
 0x284   :  { %v2411_v29 = vadd.f32 %v5559_v42, %v2277_v3  ;;  %v2518_v31 = vmax.f32 %v2406_v54, 0.0  ;;  %v2520_v60 = vmax.f32 %v2408_v45, 0.0  ;;  %v2410_v44 = vadd.f32 %v5561_v20, %v2276_v39 }
 0x285   :  { %v2412_v43 = vadd.f32 %v5563_v63, %v2278_v56  ;;  %v2521_v12 = vmax.f32 %v2409_v32, 0.0 }
 0x286   :  { %v2523_v0 = vmax.f32 %v2411_v29, 0.0  ;;  %v3309_v22 = vpack.c.bf16 %v2518_v31, %v2517_v37  ;;  %v3310_v55 = vpack.c.bf16 %v2520_v60, %v2519_v50  ;;  %v2522_v9 = vmax.f32 %v2410_v44, 0.0  ;;  %v1981_v19 = vpop.f32.mrb[196].mxu0  ;;  %v2154_v30 = vpop.f32.mrb[196].mxu1  ;;  %v6858_v31 = vld [vmem:[#allocation111_spill] sm:$0xff]  ;;  %v6859_v44 = vld [vmem:[#allocation14_spill] sm:$0xff] }
 0x287   :  { %v2524_v36 = vmax.f32 %v2412_v43, 0.0  ;;  %v2279_v13 = vmax.f32 %v6850_v10, %v1981_v19  ;;  %v2281_v34 = vmax.f32 %v6851_v59, %v2154_v30  ;;  %v1983_v41 = vpop.f32.mrb[197].mxu0  ;;  %v2156_v52 = vpop.f32.mrb[197].mxu1  ;;  %v6861_v19 = vld [vmem:[#allocation113_spill] sm:$0xff] }
 0x288   :  { %2944 = vst [vmem:[%s6022_s3 + $0xc0] sm:$0xff] %v3309_v22  ;;  %2945 = vst.msk [vmem:[%s6022_s3 + $0xc8] sm:$0xff] %vm5583_vm4, %v3310_v55  ;;  %v3311_v21 = vpack.c.bf16 %v2522_v9, %v2521_v12  ;;  %v2280_v62 = vmax.f32 %v6852_v61, %v1983_v41  ;;  %v2282_v5 = vmax.f32 %v6853_v35, %v2156_v52  ;;  %v1985_v28 = vpop.f32.mrb[198].mxu0  ;;  %v2158_v27 = vpop.f32.mrb[198].mxu1  ;;  %v6860_v9 = vld [vmem:[#allocation112_spill] sm:$0xff]  ;;  %v6862_v41 = vld [vmem:[#allocation15_spill] sm:$0xff] }
 0x289   :  { %v3312_v26 = vpack.c.bf16 %v2524_v36, %v2523_v0  ;;  %v2413_v2 = vadd.f32 %v5557_v1, %v2279_v13  ;;  %v2415_v14 = vadd.f32 %v5559_v42, %v2281_v34  ;;  %v2283_v17 = vmax.f32 %v6854_v33, %v1985_v28  ;;  %v1987_v25 = vpop.f32.mrb[199].mxu0  ;;  %v2160_v58 = vpop.f32.mrb[199].mxu1  ;;  %v6864_v28 = vld [vmem:[#allocation16_spill] sm:$0xff] }
 0x28a   :  { %v2285_v8 = vmax.f32 %v6855_v53, %v2158_v27  ;;  %2946 = vst [vmem:[%s6022_s3 + $0xd0] sm:$0xff] %v3311_v21  ;;  %v2414_v51 = vadd.f32 %v5561_v20, %v2280_v62  ;;  %v2416_v38 = vadd.f32 %v5563_v63, %v2282_v5  ;;  %v2284_v4 = vmax.f32 %v6856_v11, %v1987_v25  ;;  %v6863_v21 = vld [vmem:[#allocation114_spill] sm:$0xff] }
 0x28b   :  { %2947 = vst.msk [vmem:[%s6022_s3 + $0xd8] sm:$0xff] %vm5583_vm4, %v3312_v26  ;;  %v2286_v18 = vmax.f32 %v6857_v24, %v2160_v58  ;;  %v2525_v47 = vmax.f32 %v2413_v2, 0.0  ;;  %v2527_v23 = vmax.f32 %v2415_v14, 0.0  ;;  %v2417_v7 = vadd.f32 %v5557_v1, %v2283_v17  ;;  %v6865_v2 = vld [vmem:[#allocation115_spill] sm:$0xff] }
 0x28c   :  { %v2419_v3 = vadd.f32 %v5559_v42, %v2285_v8  ;;  %v2526_v46 = vmax.f32 %v2414_v51, 0.0  ;;  %v2528_v15 = vmax.f32 %v2416_v38, 0.0  ;;  %v2418_v54 = vadd.f32 %v5561_v20, %v2284_v4 }
 0x28d   :  { %v2420_v45 = vadd.f32 %v5563_v63, %v2286_v18  ;;  %v2529_v16 = vmax.f32 %v2417_v7, 0.0 }
 0x28e   :  { %v2531_v39 = vmax.f32 %v2419_v3, 0.0  ;;  %v3313_v6 = vpack.c.bf16 %v2526_v46, %v2525_v47  ;;  %v3314_v56 = vpack.c.bf16 %v2528_v15, %v2527_v23  ;;  %v2530_v37 = vmax.f32 %v2418_v54, 0.0  ;;  %v1991_v32 = vpop.f32.mrb[200].mxu0  ;;  %v2164_v29 = vpop.f32.mrb[200].mxu1  ;;  %v6866_v46 = vld [vmem:[#allocation17_spill] sm:$0xff]  ;;  %v6867_v54 = vld [vmem:[#allocation116_spill] sm:$0xff] }
 0x28f   :  { %v2532_v50 = vmax.f32 %v2420_v45, 0.0  ;;  %v2287_v60 = vmax.f32 %v6858_v31, %v1991_v32  ;;  %v2289_v43 = vmax.f32 %v6859_v44, %v2164_v29  ;;  %v1993_v12 = vpop.f32.mrb[201].mxu0  ;;  %v2166_v0 = vpop.f32.mrb[201].mxu1  ;;  %v6869_v32 = vld [vmem:[#allocation18_spill] sm:$0xff] }
 0x290   :  { %2948 = vst [vmem:[%s6022_s3 + $0xe0] sm:$0xff] %v3313_v6  ;;  %2949 = vst.msk [vmem:[%s6022_s3 + $0xe8] sm:$0xff] %vm5583_vm4, %v3314_v56  ;;  %v3315_v22 = vpack.c.bf16 %v2530_v37, %v2529_v16  ;;  %v2288_v36 = vmax.f32 %v6860_v9, %v1993_v12  ;;  %v2290_v30 = vmax.f32 %v6861_v19, %v2166_v0  ;;  %v1995_v10 = vpop.f32.mrb[202].mxu0  ;;  %v2168_v13 = vpop.f32.mrb[202].mxu1  ;;  %v6868_v37 = vld [vmem:[#allocation117_spill] sm:$0xff]  ;;  %v6870_v12 = vld [vmem:[#allocation118_spill] sm:$0xff] }
 0x291   :  { %v3316_v55 = vpack.c.bf16 %v2532_v50, %v2531_v39  ;;  %v2421_v59 = vadd.f32 %v5557_v1, %v2287_v60  ;;  %v2423_v34 = vadd.f32 %v5559_v42, %v2289_v43  ;;  %v2291_v52 = vmax.f32 %v6862_v41, %v1995_v10  ;;  %v1997_v61 = vpop.f32.mrb[203].mxu0  ;;  %v2170_v62 = vpop.f32.mrb[203].mxu1  ;;  %v6872_v10 = vld [vmem:[#allocation119_spill] sm:$0xff] }
 0x292   :  { %v2293_v26 = vmax.f32 %v6863_v21, %v2168_v13  ;;  %2950 = vst [vmem:[%s6022_s3 + $0xf0] sm:$0xff] %v3315_v22  ;;  %v2422_v35 = vadd.f32 %v5561_v20, %v2288_v36  ;;  %v2424_v5 = vadd.f32 %v5563_v63, %v2290_v30  ;;  %v2292_v27 = vmax.f32 %v6864_v28, %v1997_v61  ;;  %v6871_v22 = vld [vmem:[#allocation19_spill] sm:$0xff] }
 0x293   :  { %2951 = vst.msk [vmem:[%s6022_s3 + $0xf8] sm:$0xff] %vm5583_vm4, %v3316_v55  ;;  %v2294_v14 = vmax.f32 %v6865_v2, %v2170_v62  ;;  %v2533_v33 = vmax.f32 %v2421_v59, 0.0  ;;  %v2535_v17 = vmax.f32 %v2423_v34, 0.0  ;;  %v2425_v53 = vadd.f32 %v5557_v1, %v2291_v52  ;;  %v6873_v59 = vld [vmem:[#allocation20_spill] sm:$0xff] }
 0x294   :  { %v2427_v8 = vadd.f32 %v5559_v42, %v2293_v26  ;;  %v2534_v25 = vmax.f32 %v2422_v35, 0.0  ;;  %v2536_v58 = vmax.f32 %v2424_v5, 0.0  ;;  %v2426_v51 = vadd.f32 %v5561_v20, %v2292_v27 }
 0x295   :  { %v2428_v38 = vadd.f32 %v5563_v63, %v2294_v14  ;;  %v2537_v11 = vmax.f32 %v2425_v53, 0.0 }
 0x296   :  { %v2539_v4 = vmax.f32 %v2427_v8, 0.0  ;;  %v3317_v24 = vpack.c.bf16 %v2534_v25, %v2533_v33  ;;  %v3318_v18 = vpack.c.bf16 %v2536_v58, %v2535_v17  ;;  %v2538_v47 = vmax.f32 %v2426_v51, 0.0  ;;  %v2001_v7 = vpop.f32.mrb[204].mxu0  ;;  %v2174_v3 = vpop.f32.mrb[204].mxu1  ;;  %v6874_v25 = vld [vmem:[#allocation120_spill] sm:$0xff]  ;;  %v6875_v51 = vld [vmem:[#allocation21_spill] sm:$0xff] }
 0x297   :  { %v2540_v23 = vmax.f32 %v2428_v38, 0.0  ;;  %v2295_v15 = vmax.f32 %v6866_v46, %v2001_v7  ;;  %v2297_v45 = vmax.f32 %v6867_v54, %v2174_v3  ;;  %v2003_v16 = vpop.f32.mrb[205].mxu0  ;;  %v2176_v39 = vpop.f32.mrb[205].mxu1  ;;  %v6877_v7 = vld [vmem:[#allocation22_spill] sm:$0xff] }
 0x298   :  { %2952 = vst [vmem:[%s6022_s3 + $0x100] sm:$0xff] %v3317_v24  ;;  %2953 = vst.msk [vmem:[%s6022_s3 + $0x108] sm:$0xff] %vm5583_vm4, %v3318_v18  ;;  %v3319_v6 = vpack.c.bf16 %v2538_v47, %v2537_v11  ;;  %v2296_v50 = vmax.f32 %v6868_v37, %v2003_v16  ;;  %v2298_v29 = vmax.f32 %v6869_v32, %v2176_v39  ;;  %v2005_v31 = vpop.f32.mrb[206].mxu0  ;;  %v2178_v60 = vpop.f32.mrb[206].mxu1  ;;  %v6876_v47 = vld [vmem:[#allocation121_spill] sm:$0xff]  ;;  %v6878_v16 = vld [vmem:[#allocation122_spill] sm:$0xff] }
 0x299   :  { %v3320_v56 = vpack.c.bf16 %v2540_v23, %v2539_v4  ;;  %v2429_v44 = vadd.f32 %v5557_v1, %v2295_v15  ;;  %v2431_v43 = vadd.f32 %v5559_v42, %v2297_v45  ;;  %v2299_v0 = vmax.f32 %v6870_v12, %v2005_v31  ;;  %v2007_v9 = vpop.f32.mrb[207].mxu0  ;;  %v2180_v36 = vpop.f32.mrb[207].mxu1  ;;  %v6880_v31 = vld [vmem:[#allocation123_spill] sm:$0xff] }
 0x29a   :  { %v2301_v55 = vmax.f32 %v6871_v22, %v2178_v60  ;;  %2954 = vst [vmem:[%s6022_s3 + $0x110] sm:$0xff] %v3319_v6  ;;  %v2430_v19 = vadd.f32 %v5561_v20, %v2296_v50  ;;  %v2432_v30 = vadd.f32 %v5563_v63, %v2298_v29  ;;  %v2300_v13 = vmax.f32 %v6872_v10, %v2007_v9  ;;  %v6879_v6 = vld [vmem:[#allocation23_spill] sm:$0xff] }
 0x29b   :  { %2955 = vst.msk [vmem:[%s6022_s3 + $0x118] sm:$0xff] %vm5583_vm4, %v3320_v56  ;;  %v2302_v34 = vmax.f32 %v6873_v59, %v2180_v36  ;;  %v2541_v41 = vmax.f32 %v2429_v44, 0.0  ;;  %v2543_v52 = vmax.f32 %v2431_v43, 0.0  ;;  %v2433_v21 = vadd.f32 %v5557_v1, %v2299_v0  ;;  %v6881_v44 = vld [vmem:[#allocation24_spill] sm:$0xff] }
 0x29c   :  { %v2435_v26 = vadd.f32 %v5559_v42, %v2301_v55  ;;  %v2542_v61 = vmax.f32 %v2430_v19, 0.0  ;;  %v2544_v62 = vmax.f32 %v2432_v30, 0.0  ;;  %v2434_v35 = vadd.f32 %v5561_v20, %v2300_v13 }
 0x29d   :  { %v2436_v5 = vadd.f32 %v5563_v63, %v2302_v34  ;;  %v2545_v28 = vmax.f32 %v2433_v21, 0.0 }
 0x29e   :  { %v2547_v27 = vmax.f32 %v2435_v26, 0.0  ;;  %v3321_v2 = vpack.c.bf16 %v2542_v61, %v2541_v41  ;;  %v3322_v14 = vpack.c.bf16 %v2544_v62, %v2543_v52  ;;  %v2546_v33 = vmax.f32 %v2434_v35, 0.0  ;;  %v2011_v53 = vpop.f32.mrb[208].mxu0  ;;  %v2184_v8 = vpop.f32.mrb[208].mxu1  ;;  %v6882_v61 = vld [vmem:[#allocation124_spill] sm:$0xff]  ;;  %v6883_v35 = vld [vmem:[#allocation25_spill] sm:$0xff] }
 0x29f   :  { %v2548_v17 = vmax.f32 %v2436_v5, 0.0  ;;  %v2303_v58 = vmax.f32 %v6874_v25, %v2011_v53  ;;  %v2305_v38 = vmax.f32 %v6875_v51, %v2184_v8  ;;  %v2013_v11 = vpop.f32.mrb[209].mxu0  ;;  %v2186_v4 = vpop.f32.mrb[209].mxu1  ;;  %v6885_v53 = vld [vmem:[#allocation26_spill] sm:$0xff] }
 0x2a0   :  { %2956 = vst [vmem:[%s6022_s3 + $0x120] sm:$0xff] %v3321_v2  ;;  %2957 = vst.msk [vmem:[%s6022_s3 + $0x128] sm:$0xff] %vm5583_vm4, %v3322_v14  ;;  %v3323_v24 = vpack.c.bf16 %v2546_v33, %v2545_v28  ;;  %v2304_v23 = vmax.f32 %v6876_v47, %v2013_v11  ;;  %v2306_v3 = vmax.f32 %v6877_v7, %v2186_v4  ;;  %v2015_v46 = vpop.f32.mrb[210].mxu0  ;;  %v2188_v15 = vpop.f32.mrb[210].mxu1  ;;  %v6884_v33 = vld [vmem:[#allocation125_spill] sm:$0xff]  ;;  %v6886_v11 = vld [vmem:[#allocation126_spill] sm:$0xff] }
 0x2a1   :  { %v3324_v18 = vpack.c.bf16 %v2548_v17, %v2547_v27  ;;  %v2437_v54 = vadd.f32 %v5557_v1, %v2303_v58  ;;  %v2439_v45 = vadd.f32 %v5559_v42, %v2305_v38  ;;  %v2307_v39 = vmax.f32 %v6878_v16, %v2015_v46  ;;  %v2017_v37 = vpop.f32.mrb[211].mxu0  ;;  %v2190_v50 = vpop.f32.mrb[211].mxu1  ;;  %v6888_v46 = vld [vmem:[#allocation127_spill] sm:$0xff] }
 0x2a2   :  { %v2309_v56 = vmax.f32 %v6879_v6, %v2188_v15  ;;  %2958 = vst [vmem:[%s6022_s3 + $0x130] sm:$0xff] %v3323_v24  ;;  %v2438_v32 = vadd.f32 %v5561_v20, %v2304_v23  ;;  %v2440_v29 = vadd.f32 %v5563_v63, %v2306_v3  ;;  %v2308_v60 = vmax.f32 %v6880_v31, %v2017_v37  ;;  %v6887_v24 = vld [vmem:[#allocation27_spill] sm:$0xff] }
 0x2a3   :  { %2959 = vst.msk [vmem:[%s6022_s3 + $0x138] sm:$0xff] %vm5583_vm4, %v3324_v18  ;;  %v2310_v43 = vmax.f32 %v6881_v44, %v2190_v50  ;;  %v2549_v12 = vmax.f32 %v2437_v54, 0.0  ;;  %v2551_v0 = vmax.f32 %v2439_v45, 0.0  ;;  %v2441_v22 = vadd.f32 %v5557_v1, %v2307_v39  ;;  %v6889_v54 = vld [vmem:[#allocation28_spill] sm:$0xff] }
 0x2a4   :  { %v2443_v55 = vadd.f32 %v5559_v42, %v2309_v56  ;;  %v2550_v9 = vmax.f32 %v2438_v32, 0.0  ;;  %v2552_v36 = vmax.f32 %v2440_v29, 0.0  ;;  %v2442_v19 = vadd.f32 %v5561_v20, %v2308_v60 }
 0x2a5   :  { %v2444_v30 = vadd.f32 %v5563_v63, %v2310_v43  ;;  %v2553_v10 = vmax.f32 %v2441_v22, 0.0 }
 0x2a6   :  { %v2555_v13 = vmax.f32 %v2443_v55, 0.0  ;;  %v3325_v59 = vpack.c.bf16 %v2550_v9, %v2549_v12  ;;  %v3326_v34 = vpack.c.bf16 %v2552_v36, %v2551_v0  ;;  %v2554_v41 = vmax.f32 %v2442_v19, 0.0  ;;  %v2021_v21 = vpop.f32.mrb[212].mxu0  ;;  %v2194_v26 = vpop.f32.mrb[212].mxu1  ;;  %v6890_v9 = vld [vmem:[#allocation128_spill] sm:$0xff]  ;;  %v6891_v19 = vld [vmem:[#allocation29_spill] sm:$0xff] }
 0x2a7   :  { %v2556_v52 = vmax.f32 %v2444_v30, 0.0  ;;  %v2311_v62 = vmax.f32 %v6882_v61, %v2021_v21  ;;  %v2313_v5 = vmax.f32 %v6883_v35, %v2194_v26  ;;  %v2023_v28 = vpop.f32.mrb[213].mxu0  ;;  %v2196_v27 = vpop.f32.mrb[213].mxu1  ;;  %v6893_v21 = vld [vmem:[#allocation31_spill] sm:$0xff] }
 0x2a8   :  { %2960 = vst [vmem:[%s6022_s3 + $0x140] sm:$0xff] %v3325_v59  ;;  %2961 = vst.msk [vmem:[%s6022_s3 + $0x148] sm:$0xff] %vm5583_vm4, %v3326_v34  ;;  %v3327_v2 = vpack.c.bf16 %v2554_v41, %v2553_v10  ;;  %v2312_v17 = vmax.f32 %v6884_v33, %v2023_v28  ;;  %v2314_v8 = vmax.f32 %v6885_v53, %v2196_v27  ;;  %v2025_v25 = vpop.f32.mrb[214].mxu0  ;;  %v2198_v58 = vpop.f32.mrb[214].mxu1  ;;  %v6892_v41 = vld [vmem:[#allocation129_spill] sm:$0xff]  ;;  %v6894_v28 = vld [vmem:[#allocation130_spill] sm:$0xff] }
 0x2a9   :  { %v3328_v14 = vpack.c.bf16 %v2556_v52, %v2555_v13  ;;  %v2445_v51 = vadd.f32 %v5557_v1, %v2311_v62  ;;  %v2447_v38 = vadd.f32 %v5559_v42, %v2313_v5  ;;  %v2315_v4 = vmax.f32 %v6886_v11, %v2025_v25  ;;  %v2027_v47 = vpop.f32.mrb[215].mxu0  ;;  %v2200_v23 = vpop.f32.mrb[215].mxu1 }
 0x2aa   :  { %v2317_v18 = vmax.f32 %v6887_v24, %v2198_v58  ;;  %2962 = vst [vmem:[%s6022_s3 + $0x150] sm:$0xff] %v3327_v2  ;;  %v2446_v7 = vadd.f32 %v5561_v20, %v2312_v17  ;;  %v2448_v3 = vadd.f32 %v5563_v63, %v2314_v8  ;;  %v2316_v15 = vmax.f32 %v6888_v46, %v2027_v47  ;;  %v6895_v2 = vld [vmem:[#allocation32_spill] sm:$0xff]  ;;  %v6896_v58 = vld [vmem:[#allocation131_spill] sm:$0xff] }
 0x2ab   :  { %2963 = vst.msk [vmem:[%s6022_s3 + $0x158] sm:$0xff] %vm5583_vm4, %v3328_v14  ;;  %v2318_v45 = vmax.f32 %v6889_v54, %v2200_v23  ;;  %v2557_v16 = vmax.f32 %v2445_v51, 0.0  ;;  %v2559_v39 = vmax.f32 %v2447_v38, 0.0  ;;  %v2449_v6 = vadd.f32 %v5557_v1, %v2315_v4 }
 0x2ac   :  { %v2451_v56 = vadd.f32 %v5559_v42, %v2317_v18  ;;  %v2558_v37 = vmax.f32 %v2446_v7, 0.0  ;;  %v2560_v50 = vmax.f32 %v2448_v3, 0.0  ;;  %v2450_v32 = vadd.f32 %v5561_v20, %v2316_v15 }
 0x2ad   :  { %v2452_v29 = vadd.f32 %v5563_v63, %v2318_v45  ;;  %v2561_v31 = vmax.f32 %v2449_v6, 0.0  ;;  %v6897_v6 = vld [vmem:[#allocation33_spill] sm:$0xff] }
 0x2ae   :  { %v2563_v60 = vmax.f32 %v2451_v56, 0.0  ;;  %v3329_v44 = vpack.c.bf16 %v2558_v37, %v2557_v16  ;;  %v3330_v43 = vpack.c.bf16 %v2560_v50, %v2559_v39  ;;  %v2562_v12 = vmax.f32 %v2450_v32, 0.0  ;;  %v2031_v22 = vpop.f32.mrb[216].mxu0  ;;  %v2204_v55 = vpop.f32.mrb[216].mxu1  ;;  %v6898_v37 = vld [vmem:[#allocation132_spill] sm:$0xff] }
 0x2af   :  { %v2564_v0 = vmax.f32 %v2452_v29, 0.0  ;;  %v2319_v36 = vmax.f32 %v6890_v9, %v2031_v22  ;;  %v2321_v30 = vmax.f32 %v6891_v19, %v2204_v55  ;;  %v2033_v10 = vpop.f32.mrb[217].mxu0  ;;  %v2206_v13 = vpop.f32.mrb[217].mxu1  ;;  %v6901_v19 = vld [vmem:[#allocation35_spill] sm:$0xff] }
 0x2b0   :  { %2964 = vst [vmem:[%s6022_s3 + $0x160] sm:$0xff] %v3329_v44  ;;  %2965 = vst.msk [vmem:[%s6022_s3 + $0x168] sm:$0xff] %vm5583_vm4, %v3330_v43  ;;  %v3331_v59 = vpack.c.bf16 %v2562_v12, %v2561_v31  ;;  %v2320_v52 = vmax.f32 %v6892_v41, %v2033_v10  ;;  %v2322_v26 = vmax.f32 %v6893_v21, %v2206_v13  ;;  %v2035_v61 = vpop.f32.mrb[218].mxu0  ;;  %v2208_v62 = vpop.f32.mrb[218].mxu1  ;;  %v6899_v44 = vld [vmem:[#allocation34_spill] sm:$0xff]  ;;  %v6900_v12 = vld [vmem:[#allocation133_spill] sm:$0xff] }
 0x2b1   :  { %v3332_v34 = vpack.c.bf16 %v2564_v0, %v2563_v60  ;;  %v2453_v35 = vadd.f32 %v5557_v1, %v2319_v36  ;;  %v2455_v5 = vadd.f32 %v5559_v42, %v2321_v30  ;;  %v2323_v27 = vmax.f32 %v6894_v28, %v2035_v61  ;;  %v2037_v33 = vpop.f32.mrb[219].mxu0  ;;  %v2210_v17 = vpop.f32.mrb[219].mxu1  ;;  %v6902_v10 = vld [vmem:[#allocation30_spill] sm:$0xff] }
 0x2b2   :  { %v2325_v14 = vmax.f32 %v6895_v2, %v2208_v62  ;;  %2966 = vst [vmem:[%s6022_s3 + $0x170] sm:$0xff] %v3331_v59  ;;  %v2454_v53 = vadd.f32 %v5561_v20, %v2320_v52  ;;  %v2456_v8 = vadd.f32 %v5563_v63, %v2322_v26  ;;  %v2324_v25 = vmax.f32 %v5510_v40, %v2037_v33 }
 0x2b3   :  { %2967 = vst.msk [vmem:[%s6022_s3 + $0x178] sm:$0xff] %vm5583_vm4, %v3332_v34  ;;  %v2326_v51 = vmax.f32 %v6896_v58, %v2210_v17  ;;  %v2565_v38 = vmax.f32 %v2453_v35, 0.0  ;;  %v2567_v11 = vmax.f32 %v2455_v5, 0.0  ;;  %v2457_v4 = vadd.f32 %v5557_v1, %v2323_v27 }
 0x2b4   :  { %v2459_v24 = vadd.f32 %v5559_v42, %v2325_v14  ;;  %v2566_v18 = vmax.f32 %v2454_v53, 0.0  ;;  %v2568_v47 = vmax.f32 %v2456_v8, 0.0  ;;  %v2458_v23 = vadd.f32 %v5561_v20, %v2324_v25 }
 0x2b5   :  { %v2460_v7 = vadd.f32 %v5563_v63, %v2326_v51  ;;  %v2569_v3 = vmax.f32 %v2457_v4, 0.0 }
 0x2b6   :  { %v2571_v46 = vmax.f32 %v2459_v24, 0.0  ;;  %v3333_v15 = vpack.c.bf16 %v2566_v18, %v2565_v38  ;;  %v3334_v54 = vpack.c.bf16 %v2568_v47, %v2567_v11  ;;  %v2570_v45 = vmax.f32 %v2458_v23, 0.0  ;;  %v2041_v16 = vpop.f32.mrb[220].mxu0  ;;  %v2214_v39 = vpop.f32.mrb[220].mxu1 }
 0x2b7   :  { %v2572_v40 = vmax.f32 %v2460_v7, 0.0  ;;  %v2327_v56 = vmax.f32 %v6897_v6, %v2041_v16  ;;  %v2329_v50 = vmax.f32 %v6898_v37, %v2214_v39  ;;  %v2043_v32 = vpop.f32.mrb[221].mxu0  ;;  %v2216_v29 = vpop.f32.mrb[221].mxu1 }
 0x2b8   :  { %2968 = vst [vmem:[%s6022_s3 + $0x180] sm:$0xff] %v3333_v15  ;;  %2969 = vst.msk [vmem:[%s6022_s3 + $0x188] sm:$0xff] %vm5583_vm4, %v3334_v54  ;;  %v3335_v31 = vpack.c.bf16 %v2570_v45, %v2569_v3  ;;  %v2328_v43 = vmax.f32 %v6899_v44, %v2043_v32  ;;  %v2330_v0 = vmax.f32 %v6900_v12, %v2216_v29  ;;  %v2045_v22 = vpop.f32.mrb[222].mxu0  ;;  %v2218_v55 = vpop.f32.mrb[222].mxu1 }
 0x2b9   :  { %v3336_v60 = vpack.c.bf16 %v2572_v40, %v2571_v46  ;;  %v2461_v9 = vadd.f32 %v5557_v1, %v2327_v56  ;;  %v2463_v36 = vadd.f32 %v5559_v42, %v2329_v50  ;;  %v2331_v30 = vmax.f32 %v6901_v19, %v2045_v22  ;;  %v2047_v59 = vpop.f32.mrb[223].mxu0  ;;  %v2220_v34 = vpop.f32.mrb[223].mxu1 }
 0x2ba   :  { %v2333_v13 = vmax.f32 %v6902_v10, %v2218_v55  ;;  %2970 = vst [vmem:[%s6022_s3 + $0x190] sm:$0xff] %v3335_v31  ;;  %v2462_v41 = vadd.f32 %v5561_v20, %v2328_v43  ;;  %v2464_v52 = vadd.f32 %v5563_v63, %v2330_v0  ;;  %v2332_v21 = vmax.f32 %v5550_v57, %v2047_v59 }
 0x2bb   :  { %2971 = vst.msk [vmem:[%s6022_s3 + $0x198] sm:$0xff] %vm5583_vm4, %v3336_v60  ;;  %v2334_v26 = vmax.f32 %v5555_v48, %v2220_v34  ;;  %v2573_v61 = vmax.f32 %v2461_v9, 0.0  ;;  %v2575_v62 = vmax.f32 %v2463_v36, 0.0  ;;  %v2465_v35 = vadd.f32 %v5557_v1, %v2331_v30 }
 0x2bc   :  { %v2467_v5 = vadd.f32 %v5559_v42, %v2333_v13  ;;  %v2574_v28 = vmax.f32 %v2462_v41, 0.0  ;;  %v2576_v27 = vmax.f32 %v2464_v52, 0.0  ;;  %v2466_v2 = vadd.f32 %v5561_v20, %v2332_v21 }
 0x2bd   :  { %v2468_v14 = vadd.f32 %v5563_v63, %v2334_v26  ;;  %v2577_v33 = vmax.f32 %v2465_v35, 0.0 }
 0x2be   :  { %v2579_v17 = vmax.f32 %v2467_v5, 0.0  ;;  %v3337_v53 = vpack.c.bf16 %v2574_v28, %v2573_v61  ;;  %v3338_v8 = vpack.c.bf16 %v2576_v27, %v2575_v62  ;;  %v2578_v25 = vmax.f32 %v2466_v2, 0.0 }
 0x2bf   :  { %v2580_v57 = vmax.f32 %v2468_v14, 0.0 }
 0x2c0   :  { %2972 = vst [vmem:[%s6022_s3 + $0x1a0] sm:$0xff] %v3337_v53  ;;  %2973 = vst.msk [vmem:[%s6022_s3 + $0x1a8] sm:$0xff] %vm5583_vm4, %v3338_v8  ;;  %v3339_v48 = vpack.c.bf16 %v2578_v25, %v2577_v33 }
 0x2c1   :  { %v3340_v20 = vpack.c.bf16 %v2580_v57, %v2579_v17 }
 0x2c2   :  { %2974 = vst [vmem:[%s6022_s3 + $0x1b0] sm:$0xff] %v3339_v48 }
 0x2c3   :  { %2975 = vst.msk [vmem:[%s6022_s3 + $0x1b8] sm:$0xff] %vm5583_vm4, %v3340_v20 }
 0x2c4   :  { %2980 = vsyncpa [#allocation3], 1 }

// kernel: vanilla_cnn_forward.3
= control target key start
LH: loop header
LB: loop body
LE: loop exit
PB: predicated region body
PF: predicated region fallthrough
CT: control target
= control target key end

     0   :  { %10 = vsyncpa [#allocation3], 0  ;;  %s17015_s0 = inlined_call_operand.vmem [shape: bf16[16,6272], index: 0, kind: input, shape index: {}]   ;;  %s17016_s1 = inlined_call_operand.hbm [shape: bf16[6272,512], index: 1, kind: input, shape index: {}]   ;;  %s17017_s2 = inlined_call_operand.hbm [shape: f32[1,512], index: 2, kind: input, shape index: {}]   ;;  %s17018_s3 = inlined_call_operand.hbm [shape: bf16[512,128], index: 3, kind: input, shape index: {}]   ;;  %s17019_s4 = inlined_call_operand.hbm [shape: f32[1,128], index: 4, kind: input, shape index: {}]   ;;  %s17020_s5 = inlined_call_operand.vmem [shape: f32[16,128], index: 5, kind: output, shape index: {}]  }
   0x1   :  { %11 = vsyncpa [#allocation5], 0 }
   0x2   :  { %12 = vsyncpa [#allocation8], 0  ;;  %s16768_s18 = smov [#allocation4]   ;;  %s16769_s20 = smov [#allocation2]  }
   0x3   :  { %s33_s19 = sshll.u32 %s16768_s18, 4  ;;  %s20_s21 = sshll.u32 %s16769_s20, 4  ;;  %s34_s19 = int_to_ptr.vmem [resolvable:$true] %s33_s19  ;;  %s16807_s21 = int_to_ptr.vmem [resolvable:$true] %s20_s21 }
   0x4   :  { %s16674_s24 = scalar_lea.hbm %s17017_s2, 64 }
   0x5   :  { %p16675_p0 = scmp.ne.s32.totalorder %s17017_s2, %s16674_s24  ;;  %p16678_p1 = scmp.lt.u32.totalorder %s16674_s24, %s17017_s2 }
   0x7   :  { %p16680_p2 = pnand %p16678_p1, %p16675_p0 }
   0x9   :  { %16683 = shalt.err (!%p16680_p2)
}
   0xa   :  { %s16684_s29 = scalar_lea.vmem %s34_s19, 64  ;;  %p16689_p4 = scmp.lt.s32.totalorder %s34_s19, %s34_s19 }
   0xb   :  { %p16685_p3 = scmp.ne.s32.totalorder %s34_s19, %s16684_s29  ;;  %p16690_p5 = scmp.lt.s32.totalorder %s16684_s29, %s16684_s29 }
   0xd   :  { %p16691_p6 = por %p16690_p5, %p16689_p4 }
   0xf   :  { %p16692_p7 = pnand %p16691_p6, %p16685_p3 }
  0x11   :  { %16695 = shalt.err (!%p16692_p7)
}
  0x12   :  { %36 = dma.hbm_to_vmem [thread:$0]  %s17017_s2, 64, %s34_s19, [#allocation5]  }
  0x13   :  { %s16696_s9 = scalar_lea.hbm %s17016_s1, 200704 }
  0x14   :  { %p16697_p8 = scmp.ne.s32.totalorder %s17016_s1, %s16696_s9  ;;  %p16700_p9 = scmp.lt.u32.totalorder %s16696_s9, %s17016_s1 }
  0x16   :  { %p16702_p10 = pnand %p16700_p9, %p16697_p8 }
  0x18   :  { %16705 = shalt.err (!%p16702_p10)
}
  0x19   :  { %s16706_s14 = scalar_lea.vmem %s16807_s21, 200704  ;;  %p16711_p12 = scmp.lt.s32.totalorder %s16807_s21, %s16807_s21 }
  0x1a   :  { %p16707_p11 = scmp.ne.s32.totalorder %s16807_s21, %s16706_s14  ;;  %p16712_p13 = scmp.lt.s32.totalorder %s16706_s14, %s16706_s14 }
  0x1c   :  { %p16713_p0 = por %p16712_p13, %p16711_p12 }
  0x1e   :  { %p16714_p1 = pnand %p16713_p0, %p16707_p11 }
  0x20   :  { %16717 = shalt.err (!%p16714_p1)
}
  0x21   :  { %s16770_s2 = smov 256   ;;  %s16771_s15 = smov 16  }
  0x22   :  { %26 = dma.hbm_to_vmem [thread:$0]  %s17016_s1, 200704, %s16807_s21, [#allocation3], %s16770_s2, %s16770_s2, %s16771_s15  }
  0x23   :  { %s16772_s18 = smov [#allocation6]   ;;  %s16718_s23 = scalar_lea.hbm %s17018_s3, 4096 }
  0x24   :  { %s42_s19 = sshll.u32 %s16772_s18, 4  ;;  %p16719_p2 = scmp.ne.s32.totalorder %s17018_s3, %s16718_s23  ;;  %s43_s19 = int_to_ptr.vmem [resolvable:$true] %s42_s19 }
  0x25   :  { %p16722_p3 = scmp.lt.u32.totalorder %s16718_s23, %s17018_s3 }
  0x27   :  { %p16724_p4 = pnand %p16722_p3, %p16719_p2 }
  0x29   :  { %16727 = shalt.err (!%p16724_p4)
}
  0x2a   :  { %s16728_s28 = scalar_lea.vmem %s43_s19, 4096  ;;  %p16733_p6 = scmp.lt.s32.totalorder %s43_s19, %s43_s19 }
  0x2b   :  { %p16729_p5 = scmp.ne.s32.totalorder %s43_s19, %s16728_s28  ;;  %p16734_p7 = scmp.lt.s32.totalorder %s16728_s28, %s16728_s28 }
  0x2d   :  { %p16735_p8 = por %p16734_p7, %p16733_p6 }
  0x2f   :  { %p16736_p9 = pnand %p16735_p8, %p16729_p5 }
  0x31   :  { %16739 = shalt.err (!%p16736_p9)
}
  0x32   :  { %s16773_s1 = smov 64   ;;  %s16774_s21 = smov 4  }
  0x33   :  { %48 = dma.hbm_to_vmem [thread:$0]  %s17018_s3, 4096, %s43_s19, [#allocation5], %s16773_s1, %s16773_s1, %s16774_s21  }
  0x34   :  { %s16775_s6 = smov [#allocation7]   ;;  %s16740_s10 = scalar_lea.hbm %s17019_s4, 16 }
  0x35   :  { %s55_s7 = sshll.u32 %s16775_s6, 4  ;;  %p16741_p10 = scmp.ne.s32.totalorder %s17019_s4, %s16740_s10  ;;  %s56_s7 = int_to_ptr.vmem [resolvable:$true] %s55_s7 }
  0x36   :  { %p16744_p11 = scmp.lt.u32.totalorder %s16740_s10, %s17019_s4 }
  0x38   :  { %p16746_p12 = pnand %p16744_p11, %p16741_p10 }
  0x3a   :  { %16749 = shalt.err (!%p16746_p12)
}
  0x3b   :  { %s16750_s2 = scalar_lea.vmem %s56_s7, 16  ;;  %s16754_s3 = scalar_lea.vmem %s56_s7, 32 }
  0x3c   :  { %p16751_p13 = scmp.ne.s32.totalorder %s56_s7, %s16750_s2  ;;  %p16755_p0 = scmp.lt.s32.totalorder %s56_s7, %s56_s7 }
  0x3d   :  { %p16756_p1 = scmp.lt.s32.totalorder %s16754_s3, %s16750_s2 }
  0x3f   :  { %p16757_p2 = por %p16756_p1, %p16755_p0 }
  0x41   :  { %p16758_p3 = pnand %p16757_p2, %p16751_p13 }
  0x43   :  { %16761 = shalt.err (!%p16758_p3)
}
  0x44   :  { %58 = dma.hbm_to_vmem [thread:$0]  %s17019_s4, 16, %s56_s7, [#allocation8]  }
  0x45   :  { %16762 = dma.done.wait [#allocation3], 200704  }
  0x46   :  { %16763 = vsyncadd [#allocation3], 4294766592 }
  0x47   :  { %16764 = dma.done.wait [#allocation5], 4160  }
  0x48   :  { %16765 = vsyncadd [#allocation5], 4294963136 }
  0x49   :  { %16766 = dma.done.wait [#allocation8], 16  }
  0x4a   :  { %16767 = vsyncadd [#allocation8], 4294967280  ;;  %v14217_v0 = vld [vmem:[#allocation2 + $0x4] ss:$16 sps:$4 sm:$0xff]   ;;  %v14219_v1 = vld [vmem:[#allocation2 + $0xc] ss:$16 sps:$4 sm:$0xff]  }
  0x4b   :  { %9798 = vmatprep.subr.bf16.mxu0 %v14217_v0  ;;  %v14221_v2 = vld [vmem:[#allocation2] ss:$16 sps:$4 sm:$0xff]   ;;  %v14222_v3 = vld [vmem:[#allocation2 + $0x8] ss:$16 sps:$4 sm:$0xff]   ;;  %10873 = vmatprep.subr.bf16.mxu1 %v14219_v1  ;;  %v14223_v4 = vld [vmem:[#allocation2 + $0x24] ss:$16 sps:$4 sm:$0xff]  }
  0x4c   :  { %9799 = vmatpush1.bf16.msra.mxu0 %v14221_v2  ;;  %10874 = vmatpush1.bf16.msra.mxu1 %v14222_v3  ;;  %v14225_v5 = vld [vmem:[#allocation2 + $0x2c] ss:$16 sps:$4 sm:$0xff]   ;;  %v14227_v6 = vld [vmem:[#allocation2 + $0x20] ss:$16 sps:$4 sm:$0xff]   ;;  %v14228_v7 = vld [vmem:[#allocation2 + $0x28] ss:$16 sps:$4 sm:$0xff]  }
  0x4d   :  { %9800 = vmatprep.subr.bf16.mxu0 %v14223_v4  ;;  %10875 = vmatprep.subr.bf16.mxu1 %v14225_v5  ;;  %v14229_v8 = vld [vmem:[#allocation2 + $0x44] ss:$16 sps:$4 sm:$0xff]   ;;  %v14231_v9 = vld [vmem:[#allocation2 + $0x4c] ss:$16 sps:$4 sm:$0xff]   ;;  %v14233_v10 = vld [vmem:[#allocation2 + $0x40] ss:$16 sps:$4 sm:$0xff]  }
  0x4e   :  { %v14234_v11 = vld [vmem:[#allocation2 + $0x48] ss:$16 sps:$4 sm:$0xff]   ;;  %v14235_v12 = vld [vmem:[#allocation2 + $0x64] ss:$16 sps:$4 sm:$0xff]   ;;  %v14237_v13 = vld [vmem:[#allocation2 + $0x6c] ss:$16 sps:$4 sm:$0xff]  }
  0x4f   :  { %v14239_v14 = vld [vmem:[#allocation2 + $0x60] ss:$16 sps:$4 sm:$0xff]   ;;  %v14240_v15 = vld [vmem:[#allocation2 + $0x68] ss:$16 sps:$4 sm:$0xff]   ;;  %v14241_v16 = vld [vmem:[#allocation2 + $0x84] ss:$16 sps:$4 sm:$0xff]  }
  0x50   :  { %9801 = vmatpush1.bf16.msra.mxu0 %v14227_v6  ;;  %10876 = vmatpush1.bf16.msra.mxu1 %v14228_v7  ;;  %v14243_v17 = vld [vmem:[#allocation2 + $0x8c] ss:$16 sps:$4 sm:$0xff]   ;;  %v14245_v18 = vld [vmem:[#allocation2 + $0x80] ss:$16 sps:$4 sm:$0xff]   ;;  %v14246_v19 = vld [vmem:[#allocation2 + $0x88] ss:$16 sps:$4 sm:$0xff]  }
  0x51   :  { %9802 = vmatprep.subr.bf16.mxu0 %v14229_v8  ;;  %10877 = vmatprep.subr.bf16.mxu1 %v14231_v9  ;;  %v14247_v20 = vld [vmem:[#allocation2 + $0xa4] ss:$16 sps:$4 sm:$0xff]   ;;  %v14249_v21 = vld [vmem:[#allocation2 + $0xac] ss:$16 sps:$4 sm:$0xff]   ;;  %v14251_v22 = vld [vmem:[#allocation2 + $0xa0] ss:$16 sps:$4 sm:$0xff]  }
  0x52   :  { %v14252_v23 = vld [vmem:[#allocation2 + $0xa8] ss:$16 sps:$4 sm:$0xff]   ;;  %v14253_v24 = vld [vmem:[#allocation2 + $0xc4] ss:$16 sps:$4 sm:$0xff]   ;;  %v14255_v25 = vld [vmem:[#allocation2 + $0xcc] ss:$16 sps:$4 sm:$0xff]  }
  0x53   :  { %v14257_v26 = vld [vmem:[#allocation2 + $0xc0] ss:$16 sps:$4 sm:$0xff]   ;;  %v14258_v27 = vld [vmem:[#allocation2 + $0xc8] ss:$16 sps:$4 sm:$0xff]   ;;  %v14259_v28 = vld [vmem:[#allocation2 + $0xe4] ss:$16 sps:$4 sm:$0xff]  }
  0x54   :  { %9803 = vmatpush1.bf16.msra.mxu0 %v14233_v10  ;;  %10878 = vmatpush1.bf16.msra.mxu1 %v14234_v11  ;;  %v14261_v29 = vld [vmem:[#allocation2 + $0xec] ss:$16 sps:$4 sm:$0xff]   ;;  %v14263_v30 = vld [vmem:[#allocation2 + $0xe0] ss:$16 sps:$4 sm:$0xff]   ;;  %v14264_v31 = vld [vmem:[#allocation2 + $0xe8] ss:$16 sps:$4 sm:$0xff]  }
  0x55   :  { %9804 = vmatprep.subr.bf16.mxu0 %v14235_v12  ;;  %10879 = vmatprep.subr.bf16.mxu1 %v14237_v13  ;;  %v14265_v32 = vld [vmem:[#allocation2 + $0x104] ss:$16 sps:$4 sm:$0xff]   ;;  %v14267_v33 = vld [vmem:[#allocation2 + $0x10c] ss:$16 sps:$4 sm:$0xff]   ;;  %v14269_v34 = vld [vmem:[#allocation2 + $0x100] ss:$16 sps:$4 sm:$0xff]  }
  0x56   :  { %v14270_v35 = vld [vmem:[#allocation2 + $0x108] ss:$16 sps:$4 sm:$0xff]   ;;  %v14271_v36 = vld [vmem:[#allocation2 + $0x124] ss:$16 sps:$4 sm:$0xff]   ;;  %v14273_v37 = vld [vmem:[#allocation2 + $0x12c] ss:$16 sps:$4 sm:$0xff]  }
  0x57   :  { %v14275_v38 = vld [vmem:[#allocation2 + $0x120] ss:$16 sps:$4 sm:$0xff]   ;;  %v14276_v39 = vld [vmem:[#allocation2 + $0x128] ss:$16 sps:$4 sm:$0xff]   ;;  %v14277_v40 = vld [vmem:[#allocation2 + $0x144] ss:$16 sps:$4 sm:$0xff]  }
  0x58   :  { %9805 = vmatpush1.bf16.msra.mxu0 %v14239_v14  ;;  %10880 = vmatpush1.bf16.msra.mxu1 %v14240_v15  ;;  %v14279_v41 = vld [vmem:[#allocation2 + $0x14c] ss:$16 sps:$4 sm:$0xff]   ;;  %v14281_v42 = vld [vmem:[#allocation2 + $0x140] ss:$16 sps:$4 sm:$0xff]   ;;  %v14282_v43 = vld [vmem:[#allocation2 + $0x148] ss:$16 sps:$4 sm:$0xff]  }
  0x59   :  { %9806 = vmatprep.subr.bf16.mxu0 %v14241_v16  ;;  %10881 = vmatprep.subr.bf16.mxu1 %v14243_v17  ;;  %v14283_v44 = vld [vmem:[#allocation2 + $0x164] ss:$16 sps:$4 sm:$0xff]   ;;  %v14285_v45 = vld [vmem:[#allocation2 + $0x16c] ss:$16 sps:$4 sm:$0xff]   ;;  %v14287_v46 = vld [vmem:[#allocation2 + $0x160] ss:$16 sps:$4 sm:$0xff]  }
  0x5a   :  { %v14288_v47 = vld [vmem:[#allocation2 + $0x168] ss:$16 sps:$4 sm:$0xff]   ;;  %v14289_v49 = vld [vmem:[#allocation2 + $0x184] ss:$16 sps:$4 sm:$0xff]   ;;  %v14291_v50 = vld [vmem:[#allocation2 + $0x18c] ss:$16 sps:$4 sm:$0xff]  }
  0x5b   :  { %v14315_v48 = vld [vmem:[%s17015_s0 + $0x4] ss:$196 sps:$4 sm:$0xff]   ;;  %v14293_v51 = vld [vmem:[#allocation2 + $0x180] ss:$16 sps:$4 sm:$0xff]   ;;  %v14297_v54 = vld [vmem:[#allocation2 + $0x1ac] ss:$16 sps:$4 sm:$0xff]  }
  0x5c   :  { %9807 = vmatpush1.bf16.msra.mxu0 %v14245_v18  ;;  %10882 = vmatpush1.bf16.msra.mxu1 %v14246_v19  ;;  %v14294_v52 = vld [vmem:[#allocation2 + $0x188] ss:$16 sps:$4 sm:$0xff]   ;;  %v14295_v53 = vld [vmem:[#allocation2 + $0x1a4] ss:$16 sps:$4 sm:$0xff]   ;;  %v14299_v55 = vld [vmem:[#allocation2 + $0x1a0] ss:$16 sps:$4 sm:$0xff]  }
  0x5d   :  { %9808 = vmatprep.subr.bf16.mxu0 %v14247_v20  ;;  %10883 = vmatprep.subr.bf16.mxu1 %v14249_v21  ;;  %v14300_v56 = vld [vmem:[#allocation2 + $0x1a8] ss:$16 sps:$4 sm:$0xff]   ;;  %v14301_v57 = vld [vmem:[#allocation2 + $0x1c4] ss:$16 sps:$4 sm:$0xff]   ;;  %v14303_v58 = vld [vmem:[#allocation2 + $0x1cc] ss:$16 sps:$4 sm:$0xff]  }
  0x5e   :  { %9830 = vmatprep.mubr.bf16.mxu0 %v14315_v48  ;;  %10905 = vmatprep.mubr.bf16.mxu1 %v14315_v48  ;;  %v14305_v59 = vld [vmem:[#allocation2 + $0x1c0] ss:$16 sps:$4 sm:$0xff]   ;;  %v14306_v60 = vld [vmem:[#allocation2 + $0x1c8] ss:$16 sps:$4 sm:$0xff]   ;;  %v14307_v61 = vld [vmem:[#allocation2 + $0x1e4] ss:$16 sps:$4 sm:$0xff]  }
  0x5f   :  { %v14309_v62 = vld [vmem:[#allocation2 + $0x1ec] ss:$16 sps:$4 sm:$0xff]   ;;  %v14311_v63 = vld [vmem:[#allocation2 + $0x1e0] ss:$16 sps:$4 sm:$0xff]   ;;  %v14312_v0 = vld [vmem:[#allocation2 + $0x1e8] ss:$16 sps:$4 sm:$0xff]  }
  0x60   :  { %9809 = vmatpush1.bf16.msra.mxu0 %v14251_v22  ;;  %10884 = vmatpush1.bf16.msra.mxu1 %v14252_v23  ;;  %v14318_v1 = vld [vmem:[#allocation2 + $0x204] ss:$16 sps:$4 sm:$0xff]   ;;  %v14321_v2 = vld [vmem:[#allocation2 + $0x20c] ss:$16 sps:$4 sm:$0xff]   ;;  %v14316_v4 = vld [vmem:[#allocation2 + $0x200] ss:$16 sps:$4 sm:$0xff]  }
  0x61   :  { %9810 = vmatprep.subr.bf16.mxu0 %v14253_v24  ;;  %10885 = vmatprep.subr.bf16.mxu1 %v14255_v25  ;;  %v14313_v3 = vld [vmem:[%s17015_s0] ss:$196 sps:$4 sm:$0xff]   ;;  %v14319_v5 = vld [vmem:[#allocation2 + $0x208] ss:$16 sps:$4 sm:$0xff]   ;;  %v14327_v7 = vld [vmem:[#allocation2 + $0x22c] ss:$16 sps:$4 sm:$0xff]  }
  0x62   :  { %v14324_v6 = vld [vmem:[#allocation2 + $0x224] ss:$16 sps:$4 sm:$0xff]   ;;  %v14322_v8 = vld [vmem:[#allocation2 + $0x220] ss:$16 sps:$4 sm:$0xff]   ;;  %v14325_v9 = vld [vmem:[#allocation2 + $0x228] ss:$16 sps:$4 sm:$0xff]  }
  0x63   :  { %v14330_v10 = vld [vmem:[#allocation2 + $0x244] ss:$16 sps:$4 sm:$0xff]   ;;  %v14333_v11 = vld [vmem:[#allocation2 + $0x24c] ss:$16 sps:$4 sm:$0xff]   ;;  %v14328_v12 = vld [vmem:[#allocation2 + $0x240] ss:$16 sps:$4 sm:$0xff]  }
  0x64   :  { %9811 = vmatpush1.bf16.msra.mxu0 %v14257_v26  ;;  %10886 = vmatpush1.bf16.msra.mxu1 %v14258_v27  ;;  %v14331_v13 = vld [vmem:[#allocation2 + $0x248] ss:$16 sps:$4 sm:$0xff]   ;;  %v14336_v14 = vld [vmem:[#allocation2 + $0x264] ss:$16 sps:$4 sm:$0xff]   ;;  %v14339_v15 = vld [vmem:[#allocation2 + $0x26c] ss:$16 sps:$4 sm:$0xff]  }
  0x65   :  { %9812 = vmatprep.subr.bf16.mxu0 %v14259_v28  ;;  %10887 = vmatprep.subr.bf16.mxu1 %v14261_v29  ;;  %v14334_v16 = vld [vmem:[#allocation2 + $0x260] ss:$16 sps:$4 sm:$0xff]   ;;  %v14337_v17 = vld [vmem:[#allocation2 + $0x268] ss:$16 sps:$4 sm:$0xff]   ;;  %v14342_v18 = vld [vmem:[#allocation2 + $0x284] ss:$16 sps:$4 sm:$0xff]  }
  0x66   :  { %v14345_v19 = vld [vmem:[#allocation2 + $0x28c] ss:$16 sps:$4 sm:$0xff]   ;;  %v14340_v20 = vld [vmem:[#allocation2 + $0x280] ss:$16 sps:$4 sm:$0xff]   ;;  %v14343_v21 = vld [vmem:[#allocation2 + $0x288] ss:$16 sps:$4 sm:$0xff]  }
  0x67   :  { %v14348_v22 = vld [vmem:[#allocation2 + $0x2a4] ss:$16 sps:$4 sm:$0xff]   ;;  %v14351_v23 = vld [vmem:[#allocation2 + $0x2ac] ss:$16 sps:$4 sm:$0xff]   ;;  %v14346_v24 = vld [vmem:[#allocation2 + $0x2a0] ss:$16 sps:$4 sm:$0xff]  }
  0x68   :  { %9813 = vmatpush1.bf16.msra.mxu0 %v14263_v30  ;;  %10888 = vmatpush1.bf16.msra.mxu1 %v14264_v31  ;;  %v14349_v25 = vld [vmem:[#allocation2 + $0x2a8] ss:$16 sps:$4 sm:$0xff]   ;;  %v14354_v26 = vld [vmem:[#allocation2 + $0x2c4] ss:$16 sps:$4 sm:$0xff]   ;;  %v14357_v27 = vld [vmem:[#allocation2 + $0x2cc] ss:$16 sps:$4 sm:$0xff]  }
  0x69   :  { %9814 = vmatprep.subr.bf16.mxu0 %v14265_v32  ;;  %10889 = vmatprep.subr.bf16.mxu1 %v14267_v33  ;;  %v14352_v28 = vld [vmem:[#allocation2 + $0x2c0] ss:$16 sps:$4 sm:$0xff]   ;;  %v14355_v29 = vld [vmem:[#allocation2 + $0x2c8] ss:$16 sps:$4 sm:$0xff]   ;;  %v14360_v31 = vld [vmem:[#allocation2 + $0x2e4] ss:$16 sps:$4 sm:$0xff]  }
  0x6a   :  { %v14414_v30 = vld [vmem:[%s17015_s0 + $0xc] ss:$196 sps:$4 sm:$0xff]  }
  0x6b   :  { %v14363_v32 = vld [vmem:[#allocation2 + $0x2ec] ss:$16 sps:$4 sm:$0xff]   ;;  %v14358_v33 = vld [vmem:[#allocation2 + $0x2e0] ss:$16 sps:$4 sm:$0xff]  }
  0x6c   :  { %9815 = vmatpush1.bf16.msra.mxu0 %v14269_v34  ;;  %10890 = vmatpush1.bf16.msra.mxu1 %v14270_v35  ;;  %v14361_v34 = vld [vmem:[#allocation2 + $0x2e8] ss:$16 sps:$4 sm:$0xff]   ;;  %v14366_v35 = vld [vmem:[#allocation2 + $0x304] ss:$16 sps:$4 sm:$0xff]   ;;  %v14387_v48 = vld [vmem:[#allocation2 + $0x36c] ss:$16 sps:$4 sm:$0xff]  }
  0x6d   :  { %9816 = vmatprep.subr.bf16.mxu0 %v14271_v36  ;;  %10891 = vmatprep.subr.bf16.mxu1 %v14273_v37  ;;  %v14369_v36 = vld [vmem:[#allocation2 + $0x30c] ss:$16 sps:$4 sm:$0xff]   ;;  %v14364_v37 = vld [vmem:[#allocation2 + $0x300] ss:$16 sps:$4 sm:$0xff]  }
  0x70   :  { %9817 = vmatpush1.bf16.msra.mxu0 %v14275_v38  ;;  %10892 = vmatpush1.bf16.msra.mxu1 %v14276_v39  ;;  %v14367_v38 = vld [vmem:[#allocation2 + $0x308] ss:$16 sps:$4 sm:$0xff]   ;;  %v14372_v39 = vld [vmem:[#allocation2 + $0x324] ss:$16 sps:$4 sm:$0xff]  }
  0x71   :  { %9818 = vmatprep.subr.bf16.mxu0 %v14277_v40  ;;  %10893 = vmatprep.subr.bf16.mxu1 %v14279_v41  ;;  %v14375_v40 = vld [vmem:[#allocation2 + $0x32c] ss:$16 sps:$4 sm:$0xff]   ;;  %v14370_v41 = vld [vmem:[#allocation2 + $0x320] ss:$16 sps:$4 sm:$0xff]  }
  0x74   :  { %9819 = vmatpush1.bf16.msra.mxu0 %v14281_v42  ;;  %10894 = vmatpush1.bf16.msra.mxu1 %v14282_v43  ;;  %v14373_v42 = vld [vmem:[#allocation2 + $0x328] ss:$16 sps:$4 sm:$0xff]   ;;  %v14378_v43 = vld [vmem:[#allocation2 + $0x344] ss:$16 sps:$4 sm:$0xff]  }
  0x75   :  { %9820 = vmatprep.subr.bf16.mxu0 %v14283_v44  ;;  %10895 = vmatprep.subr.bf16.mxu1 %v14285_v45  ;;  %v14381_v44 = vld [vmem:[#allocation2 + $0x34c] ss:$16 sps:$4 sm:$0xff]   ;;  %v14376_v45 = vld [vmem:[#allocation2 + $0x340] ss:$16 sps:$4 sm:$0xff]  }
  0x78   :  { %9821 = vmatpush1.bf16.msra.mxu0 %v14287_v46  ;;  %10896 = vmatpush1.bf16.msra.mxu1 %v14288_v47  ;;  %v14379_v46 = vld [vmem:[#allocation2 + $0x348] ss:$16 sps:$4 sm:$0xff]   ;;  %v14384_v47 = vld [vmem:[#allocation2 + $0x364] ss:$16 sps:$4 sm:$0xff]  }
  0x79   :  { %9822 = vmatprep.subr.bf16.mxu0 %v14289_v49  ;;  %10897 = vmatprep.subr.bf16.mxu1 %v14291_v50  ;;  %v14382_v49 = vld [vmem:[#allocation2 + $0x360] ss:$16 sps:$4 sm:$0xff]   ;;  %v14385_v50 = vld [vmem:[#allocation2 + $0x368] ss:$16 sps:$4 sm:$0xff]  }
  0x7c   :  { %9823 = vmatpush1.bf16.msra.mxu0 %v14293_v51  ;;  %10898 = vmatpush1.bf16.msra.mxu1 %v14294_v52  ;;  %v14390_v51 = vld [vmem:[#allocation2 + $0x384] ss:$16 sps:$4 sm:$0xff]   ;;  %v14393_v52 = vld [vmem:[#allocation2 + $0x38c] ss:$16 sps:$4 sm:$0xff]  }
  0x7d   :  { %9824 = vmatprep.subr.bf16.mxu0 %v14295_v53  ;;  %10899 = vmatprep.subr.bf16.mxu1 %v14297_v54  ;;  %v14388_v53 = vld [vmem:[#allocation2 + $0x380] ss:$16 sps:$4 sm:$0xff]   ;;  %v14391_v54 = vld [vmem:[#allocation2 + $0x388] ss:$16 sps:$4 sm:$0xff]  }
  0x80   :  { %9825 = vmatpush1.bf16.msra.mxu0 %v14299_v55  ;;  %10900 = vmatpush1.bf16.msra.mxu1 %v14300_v56  ;;  %v14396_v55 = vld [vmem:[#allocation2 + $0x3a4] ss:$16 sps:$4 sm:$0xff]   ;;  %v14399_v56 = vld [vmem:[#allocation2 + $0x3ac] ss:$16 sps:$4 sm:$0xff]  }
  0x81   :  { %9826 = vmatprep.subr.bf16.mxu0 %v14301_v57  ;;  %10901 = vmatprep.subr.bf16.mxu1 %v14303_v58  ;;  %v14394_v57 = vld [vmem:[#allocation2 + $0x3a0] ss:$16 sps:$4 sm:$0xff]   ;;  %v14397_v58 = vld [vmem:[#allocation2 + $0x3a8] ss:$16 sps:$4 sm:$0xff]  }
  0x84   :  { %9827 = vmatpush1.bf16.msra.mxu0 %v14305_v59  ;;  %10902 = vmatpush1.bf16.msra.mxu1 %v14306_v60  ;;  %v14402_v59 = vld [vmem:[#allocation2 + $0x3c4] ss:$16 sps:$4 sm:$0xff]   ;;  %v14405_v60 = vld [vmem:[#allocation2 + $0x3cc] ss:$16 sps:$4 sm:$0xff]  }
  0x85   :  { %9828 = vmatprep.subr.bf16.mxu0 %v14307_v61  ;;  %10903 = vmatprep.subr.bf16.mxu1 %v14309_v62  ;;  %v14400_v61 = vld [vmem:[#allocation2 + $0x3c0] ss:$16 sps:$4 sm:$0xff]   ;;  %v14403_v62 = vld [vmem:[#allocation2 + $0x3c8] ss:$16 sps:$4 sm:$0xff]  }
  0x88   :  { %9829 = vmatpush1.bf16.msra.mxu0 %v14311_v63  ;;  %10904 = vmatpush1.bf16.msra.mxu1 %v14312_v0  ;;  %v14408_v63 = vld [vmem:[#allocation2 + $0x3e4] ss:$16 sps:$4 sm:$0xff]   ;;  %v14411_v0 = vld [vmem:[#allocation2 + $0x3ec] ss:$16 sps:$4 sm:$0xff]  }
  0x89   :  { %9841 = vmatprep.subr.bf16.mxu0 %v14318_v1  ;;  %10916 = vmatprep.subr.bf16.mxu1 %v14321_v2  ;;  %v14406_v1 = vld [vmem:[#allocation2 + $0x3e0] ss:$16 sps:$4 sm:$0xff]   ;;  %v14409_v2 = vld [vmem:[#allocation2 + $0x3e8] ss:$16 sps:$4 sm:$0xff]  }
  0x8b   :  { %9831 = vmatmul.mubr.bf16.vlgmr.msra.gmra.mrb[0].mxu0 %v14313_v3  ;;  %10906 = vmatmul.mubr.bf16.vlgmr.msra.gmra.mrb[0].mxu1 %v14313_v3  ;;  %v14417_v3 = vld [vmem:[#allocation2 + $0x404] ss:$16 sps:$4 sm:$0xff]  }
  0x8c   :  { %9842 = vmatpush1.bf16.msra.mxu0 %v14316_v4  ;;  %10917 = vmatpush1.bf16.msra.mxu1 %v14319_v5  ;;  %v14420_v4 = vld [vmem:[#allocation2 + $0x40c] ss:$16 sps:$4 sm:$0xff]  }
  0x8d   :  { %9843 = vmatprep.subr.bf16.mxu0 %v14324_v6  ;;  %10918 = vmatprep.subr.bf16.mxu1 %v14327_v7  ;;  %v14412_v5 = vld [vmem:[%s17015_s0 + $0x8] ss:$196 sps:$4 sm:$0xff]   ;;  %v14415_v6 = vld [vmem:[#allocation2 + $0x400] ss:$16 sps:$4 sm:$0xff]  }
  0x8e   :  { %9873 = vmatprep.mubr.bf16.mxu0 %v14414_v30  ;;  %10948 = vmatprep.mubr.bf16.mxu1 %v14414_v30  ;;  %v14418_v7 = vld [vmem:[#allocation2 + $0x408] ss:$16 sps:$4 sm:$0xff]   ;;  %v14456_v30 = vld [vmem:[#allocation2 + $0x4cc] ss:$16 sps:$4 sm:$0xff]  }
  0x90   :  { %9844 = vmatpush1.bf16.msra.mxu0 %v14322_v8  ;;  %10919 = vmatpush1.bf16.msra.mxu1 %v14325_v9  ;;  %v14423_v8 = vld [vmem:[#allocation2 + $0x424] ss:$16 sps:$4 sm:$0xff]   ;;  %v14426_v9 = vld [vmem:[#allocation2 + $0x42c] ss:$16 sps:$4 sm:$0xff]  }
  0x91   :  { %9845 = vmatprep.subr.bf16.mxu0 %v14330_v10  ;;  %10920 = vmatprep.subr.bf16.mxu1 %v14333_v11  ;;  %v14421_v10 = vld [vmem:[#allocation2 + $0x420] ss:$16 sps:$4 sm:$0xff]   ;;  %v14424_v11 = vld [vmem:[#allocation2 + $0x428] ss:$16 sps:$4 sm:$0xff]  }
  0x94   :  { %9846 = vmatpush1.bf16.msra.mxu0 %v14328_v12  ;;  %10921 = vmatpush1.bf16.msra.mxu1 %v14331_v13  ;;  %v14513_v12 = vld [vmem:[%s17015_s0 + $0x14] ss:$196 sps:$4 sm:$0xff]  }
  0x95   :  { %9847 = vmatprep.subr.bf16.mxu0 %v14336_v14  ;;  %10922 = vmatprep.subr.bf16.mxu1 %v14339_v15  ;;  %v14429_v13 = vld [vmem:[#allocation2 + $0x444] ss:$16 sps:$4 sm:$0xff]   ;;  %v14432_v14 = vld [vmem:[#allocation2 + $0x44c] ss:$16 sps:$4 sm:$0xff]   ;;  %v14427_v15 = vld [vmem:[#allocation2 + $0x440] ss:$16 sps:$4 sm:$0xff]  }
  0x98   :  { %9848 = vmatpush1.bf16.msra.mxu0 %v14334_v16  ;;  %10923 = vmatpush1.bf16.msra.mxu1 %v14337_v17  ;;  %v14430_v16 = vld [vmem:[#allocation2 + $0x448] ss:$16 sps:$4 sm:$0xff]   ;;  %v14435_v17 = vld [vmem:[#allocation2 + $0x464] ss:$16 sps:$4 sm:$0xff]  }
  0x99   :  { %9849 = vmatprep.subr.bf16.mxu0 %v14342_v18  ;;  %10924 = vmatprep.subr.bf16.mxu1 %v14345_v19  ;;  %v14438_v18 = vld [vmem:[#allocation2 + $0x46c] ss:$16 sps:$4 sm:$0xff]   ;;  %v14433_v19 = vld [vmem:[#allocation2 + $0x460] ss:$16 sps:$4 sm:$0xff]  }
  0x9c   :  { %9850 = vmatpush1.bf16.msra.mxu0 %v14340_v20  ;;  %10925 = vmatpush1.bf16.msra.mxu1 %v14343_v21  ;;  %v14436_v20 = vld [vmem:[#allocation2 + $0x468] ss:$16 sps:$4 sm:$0xff]   ;;  %v14441_v21 = vld [vmem:[#allocation2 + $0x484] ss:$16 sps:$4 sm:$0xff]  }
  0x9d   :  { %9851 = vmatprep.subr.bf16.mxu0 %v14348_v22  ;;  %10926 = vmatprep.subr.bf16.mxu1 %v14351_v23  ;;  %v14444_v22 = vld [vmem:[#allocation2 + $0x48c] ss:$16 sps:$4 sm:$0xff]   ;;  %v14439_v23 = vld [vmem:[#allocation2 + $0x480] ss:$16 sps:$4 sm:$0xff]  }
  0xa0   :  { %9852 = vmatpush1.bf16.msra.mxu0 %v14346_v24  ;;  %10927 = vmatpush1.bf16.msra.mxu1 %v14349_v25  ;;  %v14442_v24 = vld [vmem:[#allocation2 + $0x488] ss:$16 sps:$4 sm:$0xff]   ;;  %v14447_v25 = vld [vmem:[#allocation2 + $0x4a4] ss:$16 sps:$4 sm:$0xff]  }
  0xa1   :  { %9853 = vmatprep.subr.bf16.mxu0 %v14354_v26  ;;  %10928 = vmatprep.subr.bf16.mxu1 %v14357_v27  ;;  %v14450_v26 = vld [vmem:[#allocation2 + $0x4ac] ss:$16 sps:$4 sm:$0xff]   ;;  %v14445_v27 = vld [vmem:[#allocation2 + $0x4a0] ss:$16 sps:$4 sm:$0xff]  }
  0xa4   :  { %9854 = vmatpush1.bf16.msra.mxu0 %v14352_v28  ;;  %10929 = vmatpush1.bf16.msra.mxu1 %v14355_v29  ;;  %v14448_v28 = vld [vmem:[#allocation2 + $0x4a8] ss:$16 sps:$4 sm:$0xff]   ;;  %v14453_v29 = vld [vmem:[#allocation2 + $0x4c4] ss:$16 sps:$4 sm:$0xff]  }
  0xa5   :  { %9855 = vmatprep.subr.bf16.mxu0 %v14360_v31  ;;  %10930 = vmatprep.subr.bf16.mxu1 %v14363_v32  ;;  %v14451_v31 = vld [vmem:[#allocation2 + $0x4c0] ss:$16 sps:$4 sm:$0xff]   ;;  %v14454_v32 = vld [vmem:[#allocation2 + $0x4c8] ss:$16 sps:$4 sm:$0xff]  }
  0xa8   :  { %9856 = vmatpush1.bf16.msra.mxu0 %v14358_v33  ;;  %10931 = vmatpush1.bf16.msra.mxu1 %v14361_v34  ;;  %v14459_v33 = vld [vmem:[#allocation2 + $0x4e4] ss:$16 sps:$4 sm:$0xff]   ;;  %v14462_v34 = vld [vmem:[#allocation2 + $0x4ec] ss:$16 sps:$4 sm:$0xff]  }
  0xa9   :  { %9857 = vmatprep.subr.bf16.mxu0 %v14366_v35  ;;  %10932 = vmatprep.subr.bf16.mxu1 %v14369_v36  ;;  %v14457_v35 = vld [vmem:[#allocation2 + $0x4e0] ss:$16 sps:$4 sm:$0xff]   ;;  %v14460_v36 = vld [vmem:[#allocation2 + $0x4e8] ss:$16 sps:$4 sm:$0xff]  }
  0xac   :  { %9858 = vmatpush1.bf16.msra.mxu0 %v14364_v37  ;;  %10933 = vmatpush1.bf16.msra.mxu1 %v14367_v38  ;;  %v14465_v37 = vld [vmem:[#allocation2 + $0x504] ss:$16 sps:$4 sm:$0xff]   ;;  %v14468_v38 = vld [vmem:[#allocation2 + $0x50c] ss:$16 sps:$4 sm:$0xff]  }
  0xad   :  { %9859 = vmatprep.subr.bf16.mxu0 %v14372_v39  ;;  %10934 = vmatprep.subr.bf16.mxu1 %v14375_v40  ;;  %v14463_v39 = vld [vmem:[#allocation2 + $0x500] ss:$16 sps:$4 sm:$0xff]   ;;  %v14466_v40 = vld [vmem:[#allocation2 + $0x508] ss:$16 sps:$4 sm:$0xff]  }
  0xb0   :  { %9860 = vmatpush1.bf16.msra.mxu0 %v14370_v41  ;;  %10935 = vmatpush1.bf16.msra.mxu1 %v14373_v42  ;;  %v14471_v41 = vld [vmem:[#allocation2 + $0x524] ss:$16 sps:$4 sm:$0xff]   ;;  %v14474_v42 = vld [vmem:[#allocation2 + $0x52c] ss:$16 sps:$4 sm:$0xff]  }
  0xb1   :  { %9861 = vmatprep.subr.bf16.mxu0 %v14378_v43  ;;  %10936 = vmatprep.subr.bf16.mxu1 %v14381_v44  ;;  %v14469_v43 = vld [vmem:[#allocation2 + $0x520] ss:$16 sps:$4 sm:$0xff]   ;;  %v14472_v44 = vld [vmem:[#allocation2 + $0x528] ss:$16 sps:$4 sm:$0xff]  }
  0xb4   :  { %9862 = vmatpush1.bf16.msra.mxu0 %v14376_v45  ;;  %10937 = vmatpush1.bf16.msra.mxu1 %v14379_v46  ;;  %v14477_v45 = vld [vmem:[#allocation2 + $0x544] ss:$16 sps:$4 sm:$0xff]   ;;  %v14480_v46 = vld [vmem:[#allocation2 + $0x54c] ss:$16 sps:$4 sm:$0xff]  }
  0xb5   :  { %9863 = vmatprep.subr.bf16.mxu0 %v14384_v47  ;;  %10938 = vmatprep.subr.bf16.mxu1 %v14387_v48  ;;  %v14475_v47 = vld [vmem:[#allocation2 + $0x540] ss:$16 sps:$4 sm:$0xff]   ;;  %v14478_v48 = vld [vmem:[#allocation2 + $0x548] ss:$16 sps:$4 sm:$0xff]  }
  0xb8   :  { %9864 = vmatpush1.bf16.msra.mxu0 %v14382_v49  ;;  %10939 = vmatpush1.bf16.msra.mxu1 %v14385_v50  ;;  %v14483_v49 = vld [vmem:[#allocation2 + $0x564] ss:$16 sps:$4 sm:$0xff]   ;;  %v14486_v50 = vld [vmem:[#allocation2 + $0x56c] ss:$16 sps:$4 sm:$0xff]  }
  0xb9   :  { %9865 = vmatprep.subr.bf16.mxu0 %v14390_v51  ;;  %10940 = vmatprep.subr.bf16.mxu1 %v14393_v52  ;;  %v14481_v51 = vld [vmem:[#allocation2 + $0x560] ss:$16 sps:$4 sm:$0xff]   ;;  %v14484_v52 = vld [vmem:[#allocation2 + $0x568] ss:$16 sps:$4 sm:$0xff]  }
  0xbc   :  { %9866 = vmatpush1.bf16.msra.mxu0 %v14388_v53  ;;  %10941 = vmatpush1.bf16.msra.mxu1 %v14391_v54  ;;  %v14489_v53 = vld [vmem:[#allocation2 + $0x584] ss:$16 sps:$4 sm:$0xff]   ;;  %v14492_v54 = vld [vmem:[#allocation2 + $0x58c] ss:$16 sps:$4 sm:$0xff]  }
  0xbd   :  { %9867 = vmatprep.subr.bf16.mxu0 %v14396_v55  ;;  %10942 = vmatprep.subr.bf16.mxu1 %v14399_v56  ;;  %v14487_v55 = vld [vmem:[#allocation2 + $0x580] ss:$16 sps:$4 sm:$0xff]   ;;  %v14490_v56 = vld [vmem:[#allocation2 + $0x588] ss:$16 sps:$4 sm:$0xff]  }
  0xc0   :  { %9868 = vmatpush1.bf16.msra.mxu0 %v14394_v57  ;;  %10943 = vmatpush1.bf16.msra.mxu1 %v14397_v58  ;;  %v14495_v57 = vld [vmem:[#allocation2 + $0x5a4] ss:$16 sps:$4 sm:$0xff]   ;;  %v14498_v58 = vld [vmem:[#allocation2 + $0x5ac] ss:$16 sps:$4 sm:$0xff]  }
  0xc1   :  { %9869 = vmatprep.subr.bf16.mxu0 %v14402_v59  ;;  %10944 = vmatprep.subr.bf16.mxu1 %v14405_v60  ;;  %v14493_v59 = vld [vmem:[#allocation2 + $0x5a0] ss:$16 sps:$4 sm:$0xff]   ;;  %v14496_v60 = vld [vmem:[#allocation2 + $0x5a8] ss:$16 sps:$4 sm:$0xff]  }
  0xc4   :  { %9870 = vmatpush1.bf16.msra.mxu0 %v14400_v61  ;;  %10945 = vmatpush1.bf16.msra.mxu1 %v14403_v62  ;;  %v14501_v61 = vld [vmem:[#allocation2 + $0x5c4] ss:$16 sps:$4 sm:$0xff]   ;;  %v14504_v62 = vld [vmem:[#allocation2 + $0x5cc] ss:$16 sps:$4 sm:$0xff]  }
  0xc5   :  { %9871 = vmatprep.subr.bf16.mxu0 %v14408_v63  ;;  %10946 = vmatprep.subr.bf16.mxu1 %v14411_v0  ;;  %v14499_v63 = vld [vmem:[#allocation2 + $0x5c0] ss:$16 sps:$4 sm:$0xff]   ;;  %v14502_v0 = vld [vmem:[#allocation2 + $0x5c8] ss:$16 sps:$4 sm:$0xff]  }
  0xc8   :  { %9872 = vmatpush1.bf16.msra.mxu0 %v14406_v1  ;;  %10947 = vmatpush1.bf16.msra.mxu1 %v14409_v2  ;;  %v14507_v1 = vld [vmem:[#allocation2 + $0x5e4] ss:$16 sps:$4 sm:$0xff]   ;;  %v14510_v2 = vld [vmem:[#allocation2 + $0x5ec] ss:$16 sps:$4 sm:$0xff]  }
  0xc9   :  { %9884 = vmatprep.subr.bf16.mxu0 %v14417_v3  ;;  %10959 = vmatprep.subr.bf16.mxu1 %v14420_v4  ;;  %v14505_v3 = vld [vmem:[#allocation2 + $0x5e0] ss:$16 sps:$4 sm:$0xff]   ;;  %v14508_v4 = vld [vmem:[#allocation2 + $0x5e8] ss:$16 sps:$4 sm:$0xff]  }
  0xcb   :  { %9874 = vmatmul.mubr.bf16.vlgmr.msra.gmra.mrb[0].mxu0 %v14412_v5  ;;  %10949 = vmatmul.mubr.bf16.vlgmr.msra.gmra.mrb[0].mxu1 %v14412_v5  ;;  %v14516_v5 = vld [vmem:[#allocation2 + $0x604] ss:$16 sps:$4 sm:$0xff]  }
  0xcc   :  { %9885 = vmatpush1.bf16.msra.mxu0 %v14415_v6  ;;  %10960 = vmatpush1.bf16.msra.mxu1 %v14418_v7  ;;  %v14519_v6 = vld [vmem:[#allocation2 + $0x60c] ss:$16 sps:$4 sm:$0xff]   ;;  %v14511_v7 = vld [vmem:[%s17015_s0 + $0x10] ss:$196 sps:$4 sm:$0xff]  }
  0xcd   :  { %9886 = vmatprep.subr.bf16.mxu0 %v14423_v8  ;;  %10961 = vmatprep.subr.bf16.mxu1 %v14426_v9  ;;  %v14514_v8 = vld [vmem:[#allocation2 + $0x600] ss:$16 sps:$4 sm:$0xff]   ;;  %v14517_v9 = vld [vmem:[#allocation2 + $0x608] ss:$16 sps:$4 sm:$0xff]  }
  0xce   :  { %9916 = vmatprep.mubr.bf16.mxu0 %v14513_v12  ;;  %10991 = vmatprep.mubr.bf16.mxu1 %v14513_v12  ;;  %v14612_v12 = vld [vmem:[%s17015_s0 + $0x1c] ss:$196 sps:$4 sm:$0xff]  }
  0xd0   :  { %9887 = vmatpush1.bf16.msra.mxu0 %v14421_v10  ;;  %10962 = vmatpush1.bf16.msra.mxu1 %v14424_v11  ;;  %v14522_v10 = vld [vmem:[#allocation2 + $0x624] ss:$16 sps:$4 sm:$0xff]   ;;  %v14525_v11 = vld [vmem:[#allocation2 + $0x62c] ss:$16 sps:$4 sm:$0xff]  }
  0xd1   :  { %9888 = vmatprep.subr.bf16.mxu0 %v14429_v13  ;;  %10963 = vmatprep.subr.bf16.mxu1 %v14432_v14  ;;  %v14520_v13 = vld [vmem:[#allocation2 + $0x620] ss:$16 sps:$4 sm:$0xff]   ;;  %v14523_v14 = vld [vmem:[#allocation2 + $0x628] ss:$16 sps:$4 sm:$0xff]  }
  0xd4   :  { %9889 = vmatpush1.bf16.msra.mxu0 %v14427_v15  ;;  %10964 = vmatpush1.bf16.msra.mxu1 %v14430_v16  ;;  %v14528_v15 = vld [vmem:[#allocation2 + $0x644] ss:$16 sps:$4 sm:$0xff]   ;;  %v14531_v16 = vld [vmem:[#allocation2 + $0x64c] ss:$16 sps:$4 sm:$0xff]  }
  0xd5   :  { %9890 = vmatprep.subr.bf16.mxu0 %v14435_v17  ;;  %10965 = vmatprep.subr.bf16.mxu1 %v14438_v18  ;;  %v14526_v17 = vld [vmem:[#allocation2 + $0x640] ss:$16 sps:$4 sm:$0xff]   ;;  %v14529_v18 = vld [vmem:[#allocation2 + $0x648] ss:$16 sps:$4 sm:$0xff]  }
  0xd8   :  { %9891 = vmatpush1.bf16.msra.mxu0 %v14433_v19  ;;  %10966 = vmatpush1.bf16.msra.mxu1 %v14436_v20  ;;  %v14534_v19 = vld [vmem:[#allocation2 + $0x664] ss:$16 sps:$4 sm:$0xff]   ;;  %v14537_v20 = vld [vmem:[#allocation2 + $0x66c] ss:$16 sps:$4 sm:$0xff]  }
  0xd9   :  { %9892 = vmatprep.subr.bf16.mxu0 %v14441_v21  ;;  %10967 = vmatprep.subr.bf16.mxu1 %v14444_v22  ;;  %v14532_v21 = vld [vmem:[#allocation2 + $0x660] ss:$16 sps:$4 sm:$0xff]   ;;  %v14535_v22 = vld [vmem:[#allocation2 + $0x668] ss:$16 sps:$4 sm:$0xff]  }
  0xdc   :  { %9893 = vmatpush1.bf16.msra.mxu0 %v14439_v23  ;;  %10968 = vmatpush1.bf16.msra.mxu1 %v14442_v24  ;;  %v14540_v23 = vld [vmem:[#allocation2 + $0x684] ss:$16 sps:$4 sm:$0xff]   ;;  %v14543_v24 = vld [vmem:[#allocation2 + $0x68c] ss:$16 sps:$4 sm:$0xff]  }
  0xdd   :  { %9894 = vmatprep.subr.bf16.mxu0 %v14447_v25  ;;  %10969 = vmatprep.subr.bf16.mxu1 %v14450_v26  ;;  %v14538_v25 = vld [vmem:[#allocation2 + $0x680] ss:$16 sps:$4 sm:$0xff]   ;;  %v14541_v26 = vld [vmem:[#allocation2 + $0x688] ss:$16 sps:$4 sm:$0xff]  }
  0xe0   :  { %9895 = vmatpush1.bf16.msra.mxu0 %v14445_v27  ;;  %10970 = vmatpush1.bf16.msra.mxu1 %v14448_v28  ;;  %v14546_v27 = vld [vmem:[#allocation2 + $0x6a4] ss:$16 sps:$4 sm:$0xff]   ;;  %v14549_v28 = vld [vmem:[#allocation2 + $0x6ac] ss:$16 sps:$4 sm:$0xff]  }
  0xe1   :  { %9896 = vmatprep.subr.bf16.mxu0 %v14453_v29  ;;  %10971 = vmatprep.subr.bf16.mxu1 %v14456_v30  ;;  %v14544_v29 = vld [vmem:[#allocation2 + $0x6a0] ss:$16 sps:$4 sm:$0xff]   ;;  %v14547_v30 = vld [vmem:[#allocation2 + $0x6a8] ss:$16 sps:$4 sm:$0xff]  }
  0xe4   :  { %9897 = vmatpush1.bf16.msra.mxu0 %v14451_v31  ;;  %10972 = vmatpush1.bf16.msra.mxu1 %v14454_v32  ;;  %v14552_v31 = vld [vmem:[#allocation2 + $0x6c4] ss:$16 sps:$4 sm:$0xff]   ;;  %v14555_v32 = vld [vmem:[#allocation2 + $0x6cc] ss:$16 sps:$4 sm:$0xff]  }
  0xe5   :  { %9898 = vmatprep.subr.bf16.mxu0 %v14459_v33  ;;  %10973 = vmatprep.subr.bf16.mxu1 %v14462_v34  ;;  %v14550_v33 = vld [vmem:[#allocation2 + $0x6c0] ss:$16 sps:$4 sm:$0xff]   ;;  %v14553_v34 = vld [vmem:[#allocation2 + $0x6c8] ss:$16 sps:$4 sm:$0xff]  }
  0xe8   :  { %9899 = vmatpush1.bf16.msra.mxu0 %v14457_v35  ;;  %10974 = vmatpush1.bf16.msra.mxu1 %v14460_v36  ;;  %v14558_v35 = vld [vmem:[#allocation2 + $0x6e4] ss:$16 sps:$4 sm:$0xff]   ;;  %v14561_v36 = vld [vmem:[#allocation2 + $0x6ec] ss:$16 sps:$4 sm:$0xff]  }
  0xe9   :  { %9900 = vmatprep.subr.bf16.mxu0 %v14465_v37  ;;  %10975 = vmatprep.subr.bf16.mxu1 %v14468_v38  ;;  %v14556_v37 = vld [vmem:[#allocation2 + $0x6e0] ss:$16 sps:$4 sm:$0xff]   ;;  %v14559_v38 = vld [vmem:[#allocation2 + $0x6e8] ss:$16 sps:$4 sm:$0xff]  }
  0xec   :  { %9901 = vmatpush1.bf16.msra.mxu0 %v14463_v39  ;;  %10976 = vmatpush1.bf16.msra.mxu1 %v14466_v40  ;;  %v14564_v39 = vld [vmem:[#allocation2 + $0x704] ss:$16 sps:$4 sm:$0xff]   ;;  %v14567_v40 = vld [vmem:[#allocation2 + $0x70c] ss:$16 sps:$4 sm:$0xff]  }
  0xed   :  { %9902 = vmatprep.subr.bf16.mxu0 %v14471_v41  ;;  %10977 = vmatprep.subr.bf16.mxu1 %v14474_v42  ;;  %v14562_v41 = vld [vmem:[#allocation2 + $0x700] ss:$16 sps:$4 sm:$0xff]   ;;  %v14565_v42 = vld [vmem:[#allocation2 + $0x708] ss:$16 sps:$4 sm:$0xff]  }
  0xf0   :  { %9903 = vmatpush1.bf16.msra.mxu0 %v14469_v43  ;;  %10978 = vmatpush1.bf16.msra.mxu1 %v14472_v44  ;;  %v14570_v43 = vld [vmem:[#allocation2 + $0x724] ss:$16 sps:$4 sm:$0xff]   ;;  %v14573_v44 = vld [vmem:[#allocation2 + $0x72c] ss:$16 sps:$4 sm:$0xff]  }
  0xf1   :  { %9904 = vmatprep.subr.bf16.mxu0 %v14477_v45  ;;  %10979 = vmatprep.subr.bf16.mxu1 %v14480_v46  ;;  %v14568_v45 = vld [vmem:[#allocation2 + $0x720] ss:$16 sps:$4 sm:$0xff]   ;;  %v14571_v46 = vld [vmem:[#allocation2 + $0x728] ss:$16 sps:$4 sm:$0xff]  }
  0xf4   :  { %9905 = vmatpush1.bf16.msra.mxu0 %v14475_v47  ;;  %10980 = vmatpush1.bf16.msra.mxu1 %v14478_v48  ;;  %v14576_v47 = vld [vmem:[#allocation2 + $0x744] ss:$16 sps:$4 sm:$0xff]   ;;  %v14579_v48 = vld [vmem:[#allocation2 + $0x74c] ss:$16 sps:$4 sm:$0xff]  }
  0xf5   :  { %9906 = vmatprep.subr.bf16.mxu0 %v14483_v49  ;;  %10981 = vmatprep.subr.bf16.mxu1 %v14486_v50  ;;  %v14574_v49 = vld [vmem:[#allocation2 + $0x740] ss:$16 sps:$4 sm:$0xff]   ;;  %v14577_v50 = vld [vmem:[#allocation2 + $0x748] ss:$16 sps:$4 sm:$0xff]  }
  0xf8   :  { %9907 = vmatpush1.bf16.msra.mxu0 %v14481_v51  ;;  %10982 = vmatpush1.bf16.msra.mxu1 %v14484_v52  ;;  %v14582_v51 = vld [vmem:[#allocation2 + $0x764] ss:$16 sps:$4 sm:$0xff]   ;;  %v14585_v52 = vld [vmem:[#allocation2 + $0x76c] ss:$16 sps:$4 sm:$0xff]  }
  0xf9   :  { %9908 = vmatprep.subr.bf16.mxu0 %v14489_v53  ;;  %10983 = vmatprep.subr.bf16.mxu1 %v14492_v54  ;;  %v14580_v53 = vld [vmem:[#allocation2 + $0x760] ss:$16 sps:$4 sm:$0xff]   ;;  %v14583_v54 = vld [vmem:[#allocation2 + $0x768] ss:$16 sps:$4 sm:$0xff]  }
  0xfc   :  { %9909 = vmatpush1.bf16.msra.mxu0 %v14487_v55  ;;  %10984 = vmatpush1.bf16.msra.mxu1 %v14490_v56  ;;  %v14588_v55 = vld [vmem:[#allocation2 + $0x784] ss:$16 sps:$4 sm:$0xff]   ;;  %v14591_v56 = vld [vmem:[#allocation2 + $0x78c] ss:$16 sps:$4 sm:$0xff]  }
  0xfd   :  { %9910 = vmatprep.subr.bf16.mxu0 %v14495_v57  ;;  %10985 = vmatprep.subr.bf16.mxu1 %v14498_v58  ;;  %v14586_v57 = vld [vmem:[#allocation2 + $0x780] ss:$16 sps:$4 sm:$0xff]   ;;  %v14589_v58 = vld [vmem:[#allocation2 + $0x788] ss:$16 sps:$4 sm:$0xff]  }
 0x100   :  { %9911 = vmatpush1.bf16.msra.mxu0 %v14493_v59  ;;  %10986 = vmatpush1.bf16.msra.mxu1 %v14496_v60  ;;  %v14594_v59 = vld [vmem:[#allocation2 + $0x7a4] ss:$16 sps:$4 sm:$0xff]   ;;  %v14597_v60 = vld [vmem:[#allocation2 + $0x7ac] ss:$16 sps:$4 sm:$0xff]  }
 0x101   :  { %9912 = vmatprep.subr.bf16.mxu0 %v14501_v61  ;;  %10987 = vmatprep.subr.bf16.mxu1 %v14504_v62  ;;  %v14592_v61 = vld [vmem:[#allocation2 + $0x7a0] ss:$16 sps:$4 sm:$0xff]   ;;  %v14595_v62 = vld [vmem:[#allocation2 + $0x7a8] ss:$16 sps:$4 sm:$0xff]  }
 0x104   :  { %9913 = vmatpush1.bf16.msra.mxu0 %v14499_v63  ;;  %10988 = vmatpush1.bf16.msra.mxu1 %v14502_v0  ;;  %v14600_v63 = vld [vmem:[#allocation2 + $0x7c4] ss:$16 sps:$4 sm:$0xff]   ;;  %v14603_v0 = vld [vmem:[#allocation2 + $0x7cc] ss:$16 sps:$4 sm:$0xff]  }
 0x105   :  { %9914 = vmatprep.subr.bf16.mxu0 %v14507_v1  ;;  %10989 = vmatprep.subr.bf16.mxu1 %v14510_v2  ;;  %v14598_v1 = vld [vmem:[#allocation2 + $0x7c0] ss:$16 sps:$4 sm:$0xff]   ;;  %v14601_v2 = vld [vmem:[#allocation2 + $0x7c8] ss:$16 sps:$4 sm:$0xff]  }
 0x108   :  { %9915 = vmatpush1.bf16.msra.mxu0 %v14505_v3  ;;  %10990 = vmatpush1.bf16.msra.mxu1 %v14508_v4  ;;  %v14606_v3 = vld [vmem:[#allocation2 + $0x7e4] ss:$16 sps:$4 sm:$0xff]   ;;  %v14609_v4 = vld [vmem:[#allocation2 + $0x7ec] ss:$16 sps:$4 sm:$0xff]  }
 0x109   :  { %9927 = vmatprep.subr.bf16.mxu0 %v14516_v5  ;;  %11002 = vmatprep.subr.bf16.mxu1 %v14519_v6  ;;  %v14604_v5 = vld [vmem:[#allocation2 + $0x7e0] ss:$16 sps:$4 sm:$0xff]   ;;  %v14607_v6 = vld [vmem:[#allocation2 + $0x7e8] ss:$16 sps:$4 sm:$0xff]  }
 0x10b   :  { %9917 = vmatmul.mubr.bf16.vlgmr.msra.gmra.mrb[0].mxu0 %v14511_v7  ;;  %10992 = vmatmul.mubr.bf16.vlgmr.msra.gmra.mrb[0].mxu1 %v14511_v7  ;;  %v14615_v7 = vld [vmem:[#allocation2 + $0x804] ss:$16 sps:$4 sm:$0xff]  }
 0x10c   :  { %9928 = vmatpush1.bf16.msra.mxu0 %v14514_v8  ;;  %11003 = vmatpush1.bf16.msra.mxu1 %v14517_v9  ;;  %v14618_v8 = vld [vmem:[#allocation2 + $0x80c] ss:$16 sps:$4 sm:$0xff]  }
 0x10d   :  { %9929 = vmatprep.subr.bf16.mxu0 %v14522_v10  ;;  %11004 = vmatprep.subr.bf16.mxu1 %v14525_v11  ;;  %v14610_v9 = vld [vmem:[%s17015_s0 + $0x18] ss:$196 sps:$4 sm:$0xff]   ;;  %v14613_v10 = vld [vmem:[#allocation2 + $0x800] ss:$16 sps:$4 sm:$0xff]  }
 0x10e   :  { %9959 = vmatprep.mubr.bf16.mxu0 %v14612_v12  ;;  %11034 = vmatprep.mubr.bf16.mxu1 %v14612_v12  ;;  %v14616_v11 = vld [vmem:[#allocation2 + $0x808] ss:$16 sps:$4 sm:$0xff]   ;;  %v14621_v12 = vld [vmem:[#allocation2 + $0x824] ss:$16 sps:$4 sm:$0xff]  }
 0x110   :  { %9930 = vmatpush1.bf16.msra.mxu0 %v14520_v13  ;;  %11005 = vmatpush1.bf16.msra.mxu1 %v14523_v14  ;;  %v14624_v13 = vld [vmem:[#allocation2 + $0x82c] ss:$16 sps:$4 sm:$0xff]   ;;  %v14711_v14 = vld [vmem:[%s17015_s0 + $0x24] ss:$196 sps:$4 sm:$0xff]  }
 0x111   :  { %9931 = vmatprep.subr.bf16.mxu0 %v14528_v15  ;;  %11006 = vmatprep.subr.bf16.mxu1 %v14531_v16  ;;  %v14619_v15 = vld [vmem:[#allocation2 + $0x820] ss:$16 sps:$4 sm:$0xff]   ;;  %v14622_v16 = vld [vmem:[#allocation2 + $0x828] ss:$16 sps:$4 sm:$0xff]  }
 0x114   :  { %9932 = vmatpush1.bf16.msra.mxu0 %v14526_v17  ;;  %11007 = vmatpush1.bf16.msra.mxu1 %v14529_v18  ;;  %v14627_v17 = vld [vmem:[#allocation2 + $0x844] ss:$16 sps:$4 sm:$0xff]   ;;  %v14630_v18 = vld [vmem:[#allocation2 + $0x84c] ss:$16 sps:$4 sm:$0xff]  }
 0x115   :  { %9933 = vmatprep.subr.bf16.mxu0 %v14534_v19  ;;  %11008 = vmatprep.subr.bf16.mxu1 %v14537_v20  ;;  %v14625_v19 = vld [vmem:[#allocation2 + $0x840] ss:$16 sps:$4 sm:$0xff]   ;;  %v14628_v20 = vld [vmem:[#allocation2 + $0x848] ss:$16 sps:$4 sm:$0xff]  }
 0x118   :  { %9934 = vmatpush1.bf16.msra.mxu0 %v14532_v21  ;;  %11009 = vmatpush1.bf16.msra.mxu1 %v14535_v22  ;;  %v14633_v21 = vld [vmem:[#allocation2 + $0x864] ss:$16 sps:$4 sm:$0xff]   ;;  %v14636_v22 = vld [vmem:[#allocation2 + $0x86c] ss:$16 sps:$4 sm:$0xff]  }
 0x119   :  { %9935 = vmatprep.subr.bf16.mxu0 %v14540_v23  ;;  %11010 = vmatprep.subr.bf16.mxu1 %v14543_v24  ;;  %v14631_v23 = vld [vmem:[#allocation2 + $0x860] ss:$16 sps:$4 sm:$0xff]   ;;  %v14634_v24 = vld [vmem:[#allocation2 + $0x868] ss:$16 sps:$4 sm:$0xff]  }
 0x11c   :  { %9936 = vmatpush1.bf16.msra.mxu0 %v14538_v25  ;;  %11011 = vmatpush1.bf16.msra.mxu1 %v14541_v26  ;;  %v14639_v25 = vld [vmem:[#allocation2 + $0x884] ss:$16 sps:$4 sm:$0xff]   ;;  %v14642_v26 = vld [vmem:[#allocation2 + $0x88c] ss:$16 sps:$4 sm:$0xff]  }
 0x11d   :  { %9937 = vmatprep.subr.bf16.mxu0 %v14546_v27  ;;  %11012 = vmatprep.subr.bf16.mxu1 %v14549_v28  ;;  %v14637_v27 = vld [vmem:[#allocation2 + $0x880] ss:$16 sps:$4 sm:$0xff]   ;;  %v14640_v28 = vld [vmem:[#allocation2 + $0x888] ss:$16 sps:$4 sm:$0xff]  }
 0x120   :  { %9938 = vmatpush1.bf16.msra.mxu0 %v14544_v29  ;;  %11013 = vmatpush1.bf16.msra.mxu1 %v14547_v30  ;;  %v14645_v29 = vld [vmem:[#allocation2 + $0x8a4] ss:$16 sps:$4 sm:$0xff]   ;;  %v14648_v30 = vld [vmem:[#allocation2 + $0x8ac] ss:$16 sps:$4 sm:$0xff]  }
 0x121   :  { %9939 = vmatprep.subr.bf16.mxu0 %v14552_v31  ;;  %11014 = vmatprep.subr.bf16.mxu1 %v14555_v32  ;;  %v14643_v31 = vld [vmem:[#allocation2 + $0x8a0] ss:$16 sps:$4 sm:$0xff]   ;;  %v14646_v32 = vld [vmem:[#allocation2 + $0x8a8] ss:$16 sps:$4 sm:$0xff]  }
 0x124   :  { %9940 = vmatpush1.bf16.msra.mxu0 %v14550_v33  ;;  %11015 = vmatpush1.bf16.msra.mxu1 %v14553_v34  ;;  %v14651_v33 = vld [vmem:[#allocation2 + $0x8c4] ss:$16 sps:$4 sm:$0xff]   ;;  %v14654_v34 = vld [vmem:[#allocation2 + $0x8cc] ss:$16 sps:$4 sm:$0xff]  }
 0x125   :  { %9941 = vmatprep.subr.bf16.mxu0 %v14558_v35  ;;  %11016 = vmatprep.subr.bf16.mxu1 %v14561_v36  ;;  %v14649_v35 = vld [vmem:[#allocation2 + $0x8c0] ss:$16 sps:$4 sm:$0xff]   ;;  %v14652_v36 = vld [vmem:[#allocation2 + $0x8c8] ss:$16 sps:$4 sm:$0xff]  }
 0x128   :  { %9942 = vmatpush1.bf16.msra.mxu0 %v14556_v37  ;;  %11017 = vmatpush1.bf16.msra.mxu1 %v14559_v38  ;;  %v14657_v37 = vld [vmem:[#allocation2 + $0x8e4] ss:$16 sps:$4 sm:$0xff]   ;;  %v14660_v38 = vld [vmem:[#allocation2 + $0x8ec] ss:$16 sps:$4 sm:$0xff]  }
 0x129   :  { %9943 = vmatprep.subr.bf16.mxu0 %v14564_v39  ;;  %11018 = vmatprep.subr.bf16.mxu1 %v14567_v40  ;;  %v14655_v39 = vld [vmem:[#allocation2 + $0x8e0] ss:$16 sps:$4 sm:$0xff]   ;;  %v14658_v40 = vld [vmem:[#allocation2 + $0x8e8] ss:$16 sps:$4 sm:$0xff]  }
 0x12c   :  { %9944 = vmatpush1.bf16.msra.mxu0 %v14562_v41  ;;  %11019 = vmatpush1.bf16.msra.mxu1 %v14565_v42  ;;  %v14663_v41 = vld [vmem:[#allocation2 + $0x904] ss:$16 sps:$4 sm:$0xff]   ;;  %v14666_v42 = vld [vmem:[#allocation2 + $0x90c] ss:$16 sps:$4 sm:$0xff]  }
 0x12d   :  { %9945 = vmatprep.subr.bf16.mxu0 %v14570_v43  ;;  %11020 = vmatprep.subr.bf16.mxu1 %v14573_v44  ;;  %v14661_v43 = vld [vmem:[#allocation2 + $0x900] ss:$16 sps:$4 sm:$0xff]   ;;  %v14664_v44 = vld [vmem:[#allocation2 + $0x908] ss:$16 sps:$4 sm:$0xff]  }
 0x130   :  { %9946 = vmatpush1.bf16.msra.mxu0 %v14568_v45  ;;  %11021 = vmatpush1.bf16.msra.mxu1 %v14571_v46  ;;  %v14669_v45 = vld [vmem:[#allocation2 + $0x924] ss:$16 sps:$4 sm:$0xff]   ;;  %v14672_v46 = vld [vmem:[#allocation2 + $0x92c] ss:$16 sps:$4 sm:$0xff]  }
 0x131   :  { %9947 = vmatprep.subr.bf16.mxu0 %v14576_v47  ;;  %11022 = vmatprep.subr.bf16.mxu1 %v14579_v48  ;;  %v14667_v47 = vld [vmem:[#allocation2 + $0x920] ss:$16 sps:$4 sm:$0xff]   ;;  %v14670_v48 = vld [vmem:[#allocation2 + $0x928] ss:$16 sps:$4 sm:$0xff]  }
 0x134   :  { %9948 = vmatpush1.bf16.msra.mxu0 %v14574_v49  ;;  %11023 = vmatpush1.bf16.msra.mxu1 %v14577_v50  ;;  %v14675_v49 = vld [vmem:[#allocation2 + $0x944] ss:$16 sps:$4 sm:$0xff]   ;;  %v14678_v50 = vld [vmem:[#allocation2 + $0x94c] ss:$16 sps:$4 sm:$0xff]  }
 0x135   :  { %9949 = vmatprep.subr.bf16.mxu0 %v14582_v51  ;;  %11024 = vmatprep.subr.bf16.mxu1 %v14585_v52  ;;  %v14673_v51 = vld [vmem:[#allocation2 + $0x940] ss:$16 sps:$4 sm:$0xff]   ;;  %v14676_v52 = vld [vmem:[#allocation2 + $0x948] ss:$16 sps:$4 sm:$0xff]  }
 0x138   :  { %9950 = vmatpush1.bf16.msra.mxu0 %v14580_v53  ;;  %11025 = vmatpush1.bf16.msra.mxu1 %v14583_v54  ;;  %v14681_v53 = vld [vmem:[#allocation2 + $0x964] ss:$16 sps:$4 sm:$0xff]   ;;  %v14684_v54 = vld [vmem:[#allocation2 + $0x96c] ss:$16 sps:$4 sm:$0xff]  }
 0x139   :  { %9951 = vmatprep.subr.bf16.mxu0 %v14588_v55  ;;  %11026 = vmatprep.subr.bf16.mxu1 %v14591_v56  ;;  %v14679_v55 = vld [vmem:[#allocation2 + $0x960] ss:$16 sps:$4 sm:$0xff]   ;;  %v14682_v56 = vld [vmem:[#allocation2 + $0x968] ss:$16 sps:$4 sm:$0xff]  }
 0x13c   :  { %9952 = vmatpush1.bf16.msra.mxu0 %v14586_v57  ;;  %11027 = vmatpush1.bf16.msra.mxu1 %v14589_v58  ;;  %v14687_v57 = vld [vmem:[#allocation2 + $0x984] ss:$16 sps:$4 sm:$0xff]   ;;  %v14690_v58 = vld [vmem:[#allocation2 + $0x98c] ss:$16 sps:$4 sm:$0xff]  }
 0x13d   :  { %9953 = vmatprep.subr.bf16.mxu0 %v14594_v59  ;;  %11028 = vmatprep.subr.bf16.mxu1 %v14597_v60  ;;  %v14685_v59 = vld [vmem:[#allocation2 + $0x980] ss:$16 sps:$4 sm:$0xff]   ;;  %v14688_v60 = vld [vmem:[#allocation2 + $0x988] ss:$16 sps:$4 sm:$0xff]  }
 0x140   :  { %9954 = vmatpush1.bf16.msra.mxu0 %v14592_v61  ;;  %11029 = vmatpush1.bf16.msra.mxu1 %v14595_v62  ;;  %v14693_v61 = vld [vmem:[#allocation2 + $0x9a4] ss:$16 sps:$4 sm:$0xff]   ;;  %v14696_v62 = vld [vmem:[#allocation2 + $0x9ac] ss:$16 sps:$4 sm:$0xff]  }
 0x141   :  { %9955 = vmatprep.subr.bf16.mxu0 %v14600_v63  ;;  %11030 = vmatprep.subr.bf16.mxu1 %v14603_v0  ;;  %v14691_v63 = vld [vmem:[#allocation2 + $0x9a0] ss:$16 sps:$4 sm:$0xff]   ;;  %v14694_v0 = vld [vmem:[#allocation2 + $0x9a8] ss:$16 sps:$4 sm:$0xff]  }
 0x144   :  { %9956 = vmatpush1.bf16.msra.mxu0 %v14598_v1  ;;  %11031 = vmatpush1.bf16.msra.mxu1 %v14601_v2  ;;  %v14699_v1 = vld [vmem:[#allocation2 + $0x9c4] ss:$16 sps:$4 sm:$0xff]   ;;  %v14702_v2 = vld [vmem:[#allocation2 + $0x9cc] ss:$16 sps:$4 sm:$0xff]  }
 0x145   :  { %9957 = vmatprep.subr.bf16.mxu0 %v14606_v3  ;;  %11032 = vmatprep.subr.bf16.mxu1 %v14609_v4  ;;  %v14697_v3 = vld [vmem:[#allocation2 + $0x9c0] ss:$16 sps:$4 sm:$0xff]   ;;  %v14700_v4 = vld [vmem:[#allocation2 + $0x9c8] ss:$16 sps:$4 sm:$0xff]  }
 0x148   :  { %9958 = vmatpush1.bf16.msra.mxu0 %v14604_v5  ;;  %11033 = vmatpush1.bf16.msra.mxu1 %v14607_v6  ;;  %v14705_v5 = vld [vmem:[#allocation2 + $0x9e4] ss:$16 sps:$4 sm:$0xff]   ;;  %v14708_v6 = vld [vmem:[#allocation2 + $0x9ec] ss:$16 sps:$4 sm:$0xff]  }
 0x149   :  { %9970 = vmatprep.subr.bf16.mxu0 %v14615_v7  ;;  %11045 = vmatprep.subr.bf16.mxu1 %v14618_v8  ;;  %v14703_v7 = vld [vmem:[#allocation2 + $0x9e0] ss:$16 sps:$4 sm:$0xff]   ;;  %v14706_v8 = vld [vmem:[#allocation2 + $0x9e8] ss:$16 sps:$4 sm:$0xff]  }
 0x14b   :  { %9960 = vmatmul.mubr.bf16.vlgmr.msra.gmra.mrb[0].mxu0 %v14610_v9  ;;  %11035 = vmatmul.mubr.bf16.vlgmr.msra.gmra.mrb[0].mxu1 %v14610_v9  ;;  %v14709_v9 = vld [vmem:[%s17015_s0 + $0x20] ss:$196 sps:$4 sm:$0xff]  }
 0x14c   :  { %9971 = vmatpush1.bf16.msra.mxu0 %v14613_v10  ;;  %11046 = vmatpush1.bf16.msra.mxu1 %v14616_v11  ;;  %v14714_v10 = vld [vmem:[#allocation2 + $0xa04] ss:$16 sps:$4 sm:$0xff]   ;;  %v14717_v11 = vld [vmem:[#allocation2 + $0xa0c] ss:$16 sps:$4 sm:$0xff]  }
 0x14d   :  { %9972 = vmatprep.subr.bf16.mxu0 %v14621_v12  ;;  %11047 = vmatprep.subr.bf16.mxu1 %v14624_v13  ;;  %v14712_v12 = vld [vmem:[#allocation2 + $0xa00] ss:$16 sps:$4 sm:$0xff]   ;;  %v14715_v13 = vld [vmem:[#allocation2 + $0xa08] ss:$16 sps:$4 sm:$0xff]  }
 0x14e   :  { %10002 = vmatprep.mubr.bf16.mxu0 %v14711_v14  ;;  %11077 = vmatprep.mubr.bf16.mxu1 %v14711_v14  ;;  %v14720_v14 = vld [vmem:[#allocation2 + $0xa24] ss:$16 sps:$4 sm:$0xff]  }
 0x150   :  { %9973 = vmatpush1.bf16.msra.mxu0 %v14619_v15  ;;  %11048 = vmatpush1.bf16.msra.mxu1 %v14622_v16  ;;  %v14723_v15 = vld [vmem:[#allocation2 + $0xa2c] ss:$16 sps:$4 sm:$0xff]  }
 0x151   :  { %9974 = vmatprep.subr.bf16.mxu0 %v14627_v17  ;;  %11049 = vmatprep.subr.bf16.mxu1 %v14630_v18  ;;  %v14810_v16 = vld [vmem:[%s17015_s0 + $0x2c] ss:$196 sps:$4 sm:$0xff]   ;;  %v14721_v18 = vld [vmem:[#allocation2 + $0xa28] ss:$16 sps:$4 sm:$0xff]  }
 0x152   :  { %v14718_v17 = vld [vmem:[#allocation2 + $0xa20] ss:$16 sps:$4 sm:$0xff]  }
 0x154   :  { %9975 = vmatpush1.bf16.msra.mxu0 %v14625_v19  ;;  %11050 = vmatpush1.bf16.msra.mxu1 %v14628_v20  ;;  %v14726_v19 = vld [vmem:[#allocation2 + $0xa44] ss:$16 sps:$4 sm:$0xff]   ;;  %v14729_v20 = vld [vmem:[#allocation2 + $0xa4c] ss:$16 sps:$4 sm:$0xff]  }
 0x155   :  { %9976 = vmatprep.subr.bf16.mxu0 %v14633_v21  ;;  %11051 = vmatprep.subr.bf16.mxu1 %v14636_v22  ;;  %v14724_v21 = vld [vmem:[#allocation2 + $0xa40] ss:$16 sps:$4 sm:$0xff]   ;;  %v14727_v22 = vld [vmem:[#allocation2 + $0xa48] ss:$16 sps:$4 sm:$0xff]  }
 0x158   :  { %9977 = vmatpush1.bf16.msra.mxu0 %v14631_v23  ;;  %11052 = vmatpush1.bf16.msra.mxu1 %v14634_v24  ;;  %v14732_v23 = vld [vmem:[#allocation2 + $0xa64] ss:$16 sps:$4 sm:$0xff]   ;;  %v14735_v24 = vld [vmem:[#allocation2 + $0xa6c] ss:$16 sps:$4 sm:$0xff]  }
 0x159   :  { %9978 = vmatprep.subr.bf16.mxu0 %v14639_v25  ;;  %11053 = vmatprep.subr.bf16.mxu1 %v14642_v26  ;;  %v14730_v25 = vld [vmem:[#allocation2 + $0xa60] ss:$16 sps:$4 sm:$0xff]   ;;  %v14733_v26 = vld [vmem:[#allocation2 + $0xa68] ss:$16 sps:$4 sm:$0xff]  }
 0x15c   :  { %9979 = vmatpush1.bf16.msra.mxu0 %v14637_v27  ;;  %11054 = vmatpush1.bf16.msra.mxu1 %v14640_v28  ;;  %v14738_v27 = vld [vmem:[#allocation2 + $0xa84] ss:$16 sps:$4 sm:$0xff]   ;;  %v14741_v28 = vld [vmem:[#allocation2 + $0xa8c] ss:$16 sps:$4 sm:$0xff]  }
 0x15d   :  { %9980 = vmatprep.subr.bf16.mxu0 %v14645_v29  ;;  %11055 = vmatprep.subr.bf16.mxu1 %v14648_v30  ;;  %v14736_v29 = vld [vmem:[#allocation2 + $0xa80] ss:$16 sps:$4 sm:$0xff]   ;;  %v14739_v30 = vld [vmem:[#allocation2 + $0xa88] ss:$16 sps:$4 sm:$0xff]  }
 0x160   :  { %9981 = vmatpush1.bf16.msra.mxu0 %v14643_v31  ;;  %11056 = vmatpush1.bf16.msra.mxu1 %v14646_v32  ;;  %v14744_v31 = vld [vmem:[#allocation2 + $0xaa4] ss:$16 sps:$4 sm:$0xff]   ;;  %v14747_v32 = vld [vmem:[#allocation2 + $0xaac] ss:$16 sps:$4 sm:$0xff]  }
 0x161   :  { %9982 = vmatprep.subr.bf16.mxu0 %v14651_v33  ;;  %11057 = vmatprep.subr.bf16.mxu1 %v14654_v34  ;;  %v14742_v33 = vld [vmem:[#allocation2 + $0xaa0] ss:$16 sps:$4 sm:$0xff]   ;;  %v14745_v34 = vld [vmem:[#allocation2 + $0xaa8] ss:$16 sps:$4 sm:$0xff]  }
 0x164   :  { %9983 = vmatpush1.bf16.msra.mxu0 %v14649_v35  ;;  %11058 = vmatpush1.bf16.msra.mxu1 %v14652_v36  ;;  %v14750_v35 = vld [vmem:[#allocation2 + $0xac4] ss:$16 sps:$4 sm:$0xff]   ;;  %v14753_v36 = vld [vmem:[#allocation2 + $0xacc] ss:$16 sps:$4 sm:$0xff]  }
 0x165   :  { %9984 = vmatprep.subr.bf16.mxu0 %v14657_v37  ;;  %11059 = vmatprep.subr.bf16.mxu1 %v14660_v38  ;;  %v14748_v37 = vld [vmem:[#allocation2 + $0xac0] ss:$16 sps:$4 sm:$0xff]   ;;  %v14751_v38 = vld [vmem:[#allocation2 + $0xac8] ss:$16 sps:$4 sm:$0xff]  }
 0x168   :  { %9985 = vmatpush1.bf16.msra.mxu0 %v14655_v39  ;;  %11060 = vmatpush1.bf16.msra.mxu1 %v14658_v40  ;;  %v14756_v39 = vld [vmem:[#allocation2 + $0xae4] ss:$16 sps:$4 sm:$0xff]   ;;  %v14759_v40 = vld [vmem:[#allocation2 + $0xaec] ss:$16 sps:$4 sm:$0xff]  }
 0x169   :  { %9986 = vmatprep.subr.bf16.mxu0 %v14663_v41  ;;  %11061 = vmatprep.subr.bf16.mxu1 %v14666_v42  ;;  %v14754_v41 = vld [vmem:[#allocation2 + $0xae0] ss:$16 sps:$4 sm:$0xff]   ;;  %v14757_v42 = vld [vmem:[#allocation2 + $0xae8] ss:$16 sps:$4 sm:$0xff]  }
 0x16c   :  { %9987 = vmatpush1.bf16.msra.mxu0 %v14661_v43  ;;  %11062 = vmatpush1.bf16.msra.mxu1 %v14664_v44  ;;  %v14762_v43 = vld [vmem:[#allocation2 + $0xb04] ss:$16 sps:$4 sm:$0xff]   ;;  %v14765_v44 = vld [vmem:[#allocation2 + $0xb0c] ss:$16 sps:$4 sm:$0xff]  }
 0x16d   :  { %9988 = vmatprep.subr.bf16.mxu0 %v14669_v45  ;;  %11063 = vmatprep.subr.bf16.mxu1 %v14672_v46  ;;  %v14760_v45 = vld [vmem:[#allocation2 + $0xb00] ss:$16 sps:$4 sm:$0xff]   ;;  %v14763_v46 = vld [vmem:[#allocation2 + $0xb08] ss:$16 sps:$4 sm:$0xff]  }
 0x170   :  { %9989 = vmatpush1.bf16.msra.mxu0 %v14667_v47  ;;  %11064 = vmatpush1.bf16.msra.mxu1 %v14670_v48  ;;  %v14768_v47 = vld [vmem:[#allocation2 + $0xb24] ss:$16 sps:$4 sm:$0xff]   ;;  %v14771_v48 = vld [vmem:[#allocation2 + $0xb2c] ss:$16 sps:$4 sm:$0xff]  }
 0x171   :  { %9990 = vmatprep.subr.bf16.mxu0 %v14675_v49  ;;  %11065 = vmatprep.subr.bf16.mxu1 %v14678_v50  ;;  %v14766_v49 = vld [vmem:[#allocation2 + $0xb20] ss:$16 sps:$4 sm:$0xff]   ;;  %v14769_v50 = vld [vmem:[#allocation2 + $0xb28] ss:$16 sps:$4 sm:$0xff]  }
 0x174   :  { %9991 = vmatpush1.bf16.msra.mxu0 %v14673_v51  ;;  %11066 = vmatpush1.bf16.msra.mxu1 %v14676_v52  ;;  %v14774_v51 = vld [vmem:[#allocation2 + $0xb44] ss:$16 sps:$4 sm:$0xff]   ;;  %v14777_v52 = vld [vmem:[#allocation2 + $0xb4c] ss:$16 sps:$4 sm:$0xff]  }
 0x175   :  { %9992 = vmatprep.subr.bf16.mxu0 %v14681_v53  ;;  %11067 = vmatprep.subr.bf16.mxu1 %v14684_v54  ;;  %v14772_v53 = vld [vmem:[#allocation2 + $0xb40] ss:$16 sps:$4 sm:$0xff]   ;;  %v14775_v54 = vld [vmem:[#allocation2 + $0xb48] ss:$16 sps:$4 sm:$0xff]  }
 0x178   :  { %9993 = vmatpush1.bf16.msra.mxu0 %v14679_v55  ;;  %11068 = vmatpush1.bf16.msra.mxu1 %v14682_v56  ;;  %v14780_v55 = vld [vmem:[#allocation2 + $0xb64] ss:$16 sps:$4 sm:$0xff]   ;;  %v14783_v56 = vld [vmem:[#allocation2 + $0xb6c] ss:$16 sps:$4 sm:$0xff]  }
 0x179   :  { %9994 = vmatprep.subr.bf16.mxu0 %v14687_v57  ;;  %11069 = vmatprep.subr.bf16.mxu1 %v14690_v58  ;;  %v14778_v57 = vld [vmem:[#allocation2 + $0xb60] ss:$16 sps:$4 sm:$0xff]   ;;  %v14781_v58 = vld [vmem:[#allocation2 + $0xb68] ss:$16 sps:$4 sm:$0xff]  }
 0x17c   :  { %9995 = vmatpush1.bf16.msra.mxu0 %v14685_v59  ;;  %11070 = vmatpush1.bf16.msra.mxu1 %v14688_v60  ;;  %v14786_v59 = vld [vmem:[#allocation2 + $0xb84] ss:$16 sps:$4 sm:$0xff]   ;;  %v14789_v60 = vld [vmem:[#allocation2 + $0xb8c] ss:$16 sps:$4 sm:$0xff]  }
 0x17d   :  { %9996 = vmatprep.subr.bf16.mxu0 %v14693_v61  ;;  %11071 = vmatprep.subr.bf16.mxu1 %v14696_v62  ;;  %v14784_v61 = vld [vmem:[#allocation2 + $0xb80] ss:$16 sps:$4 sm:$0xff]   ;;  %v14787_v62 = vld [vmem:[#allocation2 + $0xb88] ss:$16 sps:$4 sm:$0xff]  }
 0x180   :  { %9997 = vmatpush1.bf16.msra.mxu0 %v14691_v63  ;;  %11072 = vmatpush1.bf16.msra.mxu1 %v14694_v0  ;;  %v14792_v63 = vld [vmem:[#allocation2 + $0xba4] ss:$16 sps:$4 sm:$0xff]   ;;  %v14795_v0 = vld [vmem:[#allocation2 + $0xbac] ss:$16 sps:$4 sm:$0xff]  }
 0x181   :  { %9998 = vmatprep.subr.bf16.mxu0 %v14699_v1  ;;  %11073 = vmatprep.subr.bf16.mxu1 %v14702_v2  ;;  %v14790_v1 = vld [vmem:[#allocation2 + $0xba0] ss:$16 sps:$4 sm:$0xff]   ;;  %v14793_v2 = vld [vmem:[#allocation2 + $0xba8] ss:$16 sps:$4 sm:$0xff]  }
 0x184   :  { %9999 = vmatpush1.bf16.msra.mxu0 %v14697_v3  ;;  %11074 = vmatpush1.bf16.msra.mxu1 %v14700_v4  ;;  %v14798_v3 = vld [vmem:[#allocation2 + $0xbc4] ss:$16 sps:$4 sm:$0xff]   ;;  %v14801_v4 = vld [vmem:[#allocation2 + $0xbcc] ss:$16 sps:$4 sm:$0xff]  }
 0x185   :  { %10000 = vmatprep.subr.bf16.mxu0 %v14705_v5  ;;  %11075 = vmatprep.subr.bf16.mxu1 %v14708_v6  ;;  %v14796_v5 = vld [vmem:[#allocation2 + $0xbc0] ss:$16 sps:$4 sm:$0xff]   ;;  %v14799_v6 = vld [vmem:[#allocation2 + $0xbc8] ss:$16 sps:$4 sm:$0xff]  }
 0x188   :  { %10001 = vmatpush1.bf16.msra.mxu0 %v14703_v7  ;;  %11076 = vmatpush1.bf16.msra.mxu1 %v14706_v8  ;;  %v14804_v7 = vld [vmem:[#allocation2 + $0xbe4] ss:$16 sps:$4 sm:$0xff]   ;;  %v14807_v8 = vld [vmem:[#allocation2 + $0xbec] ss:$16 sps:$4 sm:$0xff]  }
 0x189   :  { %10013 = vmatprep.subr.bf16.mxu0 %v14714_v10  ;;  %11088 = vmatprep.subr.bf16.mxu1 %v14717_v11  ;;  %v14805_v10 = vld [vmem:[#allocation2 + $0xbe8] ss:$16 sps:$4 sm:$0xff]  }
 0x18a   :  { %v14808_v11 = vld [vmem:[%s17015_s0 + $0x28] ss:$196 sps:$4 sm:$0xff]  }
 0x18b   :  { %10003 = vmatmul.mubr.bf16.vlgmr.msra.gmra.mrb[0].mxu0 %v14709_v9  ;;  %11078 = vmatmul.mubr.bf16.vlgmr.msra.gmra.mrb[0].mxu1 %v14709_v9  ;;  %v14802_v9 = vld [vmem:[#allocation2 + $0xbe0] ss:$16 sps:$4 sm:$0xff]  }
 0x18c   :  { %10014 = vmatpush1.bf16.msra.mxu0 %v14712_v12  ;;  %11089 = vmatpush1.bf16.msra.mxu1 %v14715_v13  ;;  %v14813_v12 = vld [vmem:[#allocation2 + $0xc04] ss:$16 sps:$4 sm:$0xff]   ;;  %v14816_v13 = vld [vmem:[#allocation2 + $0xc0c] ss:$16 sps:$4 sm:$0xff]  }
 0x18d   :  { %10015 = vmatprep.subr.bf16.mxu0 %v14720_v14  ;;  %11090 = vmatprep.subr.bf16.mxu1 %v14723_v15  ;;  %v14811_v14 = vld [vmem:[#allocation2 + $0xc00] ss:$16 sps:$4 sm:$0xff]   ;;  %v14814_v15 = vld [vmem:[#allocation2 + $0xc08] ss:$16 sps:$4 sm:$0xff]  }
 0x18e   :  { %10045 = vmatprep.mubr.bf16.mxu0 %v14810_v16  ;;  %11120 = vmatprep.mubr.bf16.mxu1 %v14810_v16  ;;  %v14819_v16 = vld [vmem:[#allocation2 + $0xc24] ss:$16 sps:$4 sm:$0xff]  }
 0x190   :  { %10016 = vmatpush1.bf16.msra.mxu0 %v14718_v17  ;;  %11091 = vmatpush1.bf16.msra.mxu1 %v14721_v18  ;;  %v14822_v17 = vld [vmem:[#allocation2 + $0xc2c] ss:$16 sps:$4 sm:$0xff]   ;;  %v14909_v18 = vld [vmem:[%s17015_s0 + $0x34] ss:$196 sps:$4 sm:$0xff]  }
 0x191   :  { %10017 = vmatprep.subr.bf16.mxu0 %v14726_v19  ;;  %11092 = vmatprep.subr.bf16.mxu1 %v14729_v20  ;;  %v14817_v19 = vld [vmem:[#allocation2 + $0xc20] ss:$16 sps:$4 sm:$0xff]   ;;  %v14820_v20 = vld [vmem:[#allocation2 + $0xc28] ss:$16 sps:$4 sm:$0xff]  }
 0x194   :  { %10018 = vmatpush1.bf16.msra.mxu0 %v14724_v21  ;;  %11093 = vmatpush1.bf16.msra.mxu1 %v14727_v22  ;;  %v14825_v21 = vld [vmem:[#allocation2 + $0xc44] ss:$16 sps:$4 sm:$0xff]   ;;  %v14828_v22 = vld [vmem:[#allocation2 + $0xc4c] ss:$16 sps:$4 sm:$0xff]  }
 0x195   :  { %10019 = vmatprep.subr.bf16.mxu0 %v14732_v23  ;;  %11094 = vmatprep.subr.bf16.mxu1 %v14735_v24  ;;  %v14823_v23 = vld [vmem:[#allocation2 + $0xc40] ss:$16 sps:$4 sm:$0xff]   ;;  %v14826_v24 = vld [vmem:[#allocation2 + $0xc48] ss:$16 sps:$4 sm:$0xff]  }
 0x198   :  { %10020 = vmatpush1.bf16.msra.mxu0 %v14730_v25  ;;  %11095 = vmatpush1.bf16.msra.mxu1 %v14733_v26  ;;  %v14831_v25 = vld [vmem:[#allocation2 + $0xc64] ss:$16 sps:$4 sm:$0xff]   ;;  %v14834_v26 = vld [vmem:[#allocation2 + $0xc6c] ss:$16 sps:$4 sm:$0xff]  }
 0x199   :  { %10021 = vmatprep.subr.bf16.mxu0 %v14738_v27  ;;  %11096 = vmatprep.subr.bf16.mxu1 %v14741_v28  ;;  %v14829_v27 = vld [vmem:[#allocation2 + $0xc60] ss:$16 sps:$4 sm:$0xff]   ;;  %v14832_v28 = vld [vmem:[#allocation2 + $0xc68] ss:$16 sps:$4 sm:$0xff]  }
 0x19c   :  { %10022 = vmatpush1.bf16.msra.mxu0 %v14736_v29  ;;  %11097 = vmatpush1.bf16.msra.mxu1 %v14739_v30  ;;  %v14837_v29 = vld [vmem:[#allocation2 + $0xc84] ss:$16 sps:$4 sm:$0xff]   ;;  %v14840_v30 = vld [vmem:[#allocation2 + $0xc8c] ss:$16 sps:$4 sm:$0xff]  }
 0x19d   :  { %10023 = vmatprep.subr.bf16.mxu0 %v14744_v31  ;;  %11098 = vmatprep.subr.bf16.mxu1 %v14747_v32  ;;  %v14835_v31 = vld [vmem:[#allocation2 + $0xc80] ss:$16 sps:$4 sm:$0xff]   ;;  %v14838_v32 = vld [vmem:[#allocation2 + $0xc88] ss:$16 sps:$4 sm:$0xff]  }
 0x1a0   :  { %10024 = vmatpush1.bf16.msra.mxu0 %v14742_v33  ;;  %11099 = vmatpush1.bf16.msra.mxu1 %v14745_v34  ;;  %v14843_v33 = vld [vmem:[#allocation2 + $0xca4] ss:$16 sps:$4 sm:$0xff]   ;;  %v14846_v34 = vld [vmem:[#allocation2 + $0xcac] ss:$16 sps:$4 sm:$0xff]  }
 0x1a1   :  { %10025 = vmatprep.subr.bf16.mxu0 %v14750_v35  ;;  %11100 = vmatprep.subr.bf16.mxu1 %v14753_v36  ;;  %v14841_v35 = vld [vmem:[#allocation2 + $0xca0] ss:$16 sps:$4 sm:$0xff]   ;;  %v14844_v36 = vld [vmem:[#allocation2 + $0xca8] ss:$16 sps:$4 sm:$0xff]  }
 0x1a4   :  { %10026 = vmatpush1.bf16.msra.mxu0 %v14748_v37  ;;  %11101 = vmatpush1.bf16.msra.mxu1 %v14751_v38  ;;  %v14849_v37 = vld [vmem:[#allocation2 + $0xcc4] ss:$16 sps:$4 sm:$0xff]   ;;  %v14852_v38 = vld [vmem:[#allocation2 + $0xccc] ss:$16 sps:$4 sm:$0xff]  }
 0x1a5   :  { %10027 = vmatprep.subr.bf16.mxu0 %v14756_v39  ;;  %11102 = vmatprep.subr.bf16.mxu1 %v14759_v40  ;;  %v14847_v39 = vld [vmem:[#allocation2 + $0xcc0] ss:$16 sps:$4 sm:$0xff]   ;;  %v14850_v40 = vld [vmem:[#allocation2 + $0xcc8] ss:$16 sps:$4 sm:$0xff]  }
 0x1a8   :  { %10028 = vmatpush1.bf16.msra.mxu0 %v14754_v41  ;;  %11103 = vmatpush1.bf16.msra.mxu1 %v14757_v42  ;;  %v14855_v41 = vld [vmem:[#allocation2 + $0xce4] ss:$16 sps:$4 sm:$0xff]   ;;  %v14858_v42 = vld [vmem:[#allocation2 + $0xcec] ss:$16 sps:$4 sm:$0xff]  }
 0x1a9   :  { %10029 = vmatprep.subr.bf16.mxu0 %v14762_v43  ;;  %11104 = vmatprep.subr.bf16.mxu1 %v14765_v44  ;;  %v14853_v43 = vld [vmem:[#allocation2 + $0xce0] ss:$16 sps:$4 sm:$0xff]   ;;  %v14856_v44 = vld [vmem:[#allocation2 + $0xce8] ss:$16 sps:$4 sm:$0xff]  }
 0x1ac   :  { %10030 = vmatpush1.bf16.msra.mxu0 %v14760_v45  ;;  %11105 = vmatpush1.bf16.msra.mxu1 %v14763_v46  ;;  %v14861_v45 = vld [vmem:[#allocation2 + $0xd04] ss:$16 sps:$4 sm:$0xff]   ;;  %v14864_v46 = vld [vmem:[#allocation2 + $0xd0c] ss:$16 sps:$4 sm:$0xff]  }
 0x1ad   :  { %10031 = vmatprep.subr.bf16.mxu0 %v14768_v47  ;;  %11106 = vmatprep.subr.bf16.mxu1 %v14771_v48  ;;  %v14859_v47 = vld [vmem:[#allocation2 + $0xd00] ss:$16 sps:$4 sm:$0xff]   ;;  %v14862_v48 = vld [vmem:[#allocation2 + $0xd08] ss:$16 sps:$4 sm:$0xff]  }
 0x1b0   :  { %10032 = vmatpush1.bf16.msra.mxu0 %v14766_v49  ;;  %11107 = vmatpush1.bf16.msra.mxu1 %v14769_v50  ;;  %v14867_v49 = vld [vmem:[#allocation2 + $0xd24] ss:$16 sps:$4 sm:$0xff]   ;;  %v14870_v50 = vld [vmem:[#allocation2 + $0xd2c] ss:$16 sps:$4 sm:$0xff]  }
 0x1b1   :  { %10033 = vmatprep.subr.bf16.mxu0 %v14774_v51  ;;  %11108 = vmatprep.subr.bf16.mxu1 %v14777_v52  ;;  %v14865_v51 = vld [vmem:[#allocation2 + $0xd20] ss:$16 sps:$4 sm:$0xff]   ;;  %v14868_v52 = vld [vmem:[#allocation2 + $0xd28] ss:$16 sps:$4 sm:$0xff]  }
 0x1b4   :  { %10034 = vmatpush1.bf16.msra.mxu0 %v14772_v53  ;;  %11109 = vmatpush1.bf16.msra.mxu1 %v14775_v54  ;;  %v14873_v53 = vld [vmem:[#allocation2 + $0xd44] ss:$16 sps:$4 sm:$0xff]   ;;  %v14876_v54 = vld [vmem:[#allocation2 + $0xd4c] ss:$16 sps:$4 sm:$0xff]  }
 0x1b5   :  { %10035 = vmatprep.subr.bf16.mxu0 %v14780_v55  ;;  %11110 = vmatprep.subr.bf16.mxu1 %v14783_v56  ;;  %v14871_v55 = vld [vmem:[#allocation2 + $0xd40] ss:$16 sps:$4 sm:$0xff]   ;;  %v14874_v56 = vld [vmem:[#allocation2 + $0xd48] ss:$16 sps:$4 sm:$0xff]  }
 0x1b8   :  { %10036 = vmatpush1.bf16.msra.mxu0 %v14778_v57  ;;  %11111 = vmatpush1.bf16.msra.mxu1 %v14781_v58  ;;  %v14879_v57 = vld [vmem:[#allocation2 + $0xd64] ss:$16 sps:$4 sm:$0xff]   ;;  %v14882_v58 = vld [vmem:[#allocation2 + $0xd6c] ss:$16 sps:$4 sm:$0xff]  }
 0x1b9   :  { %10037 = vmatprep.subr.bf16.mxu0 %v14786_v59  ;;  %11112 = vmatprep.subr.bf16.mxu1 %v14789_v60  ;;  %v14877_v59 = vld [vmem:[#allocation2 + $0xd60] ss:$16 sps:$4 sm:$0xff]   ;;  %v14880_v60 = vld [vmem:[#allocation2 + $0xd68] ss:$16 sps:$4 sm:$0xff]  }
 0x1bc   :  { %10038 = vmatpush1.bf16.msra.mxu0 %v14784_v61  ;;  %11113 = vmatpush1.bf16.msra.mxu1 %v14787_v62  ;;  %v14885_v61 = vld [vmem:[#allocation2 + $0xd84] ss:$16 sps:$4 sm:$0xff]   ;;  %v14888_v62 = vld [vmem:[#allocation2 + $0xd8c] ss:$16 sps:$4 sm:$0xff]  }
 0x1bd   :  { %10039 = vmatprep.subr.bf16.mxu0 %v14792_v63  ;;  %11114 = vmatprep.subr.bf16.mxu1 %v14795_v0  ;;  %v14883_v63 = vld [vmem:[#allocation2 + $0xd80] ss:$16 sps:$4 sm:$0xff]   ;;  %v14886_v0 = vld [vmem:[#allocation2 + $0xd88] ss:$16 sps:$4 sm:$0xff]  }
 0x1c0   :  { %10040 = vmatpush1.bf16.msra.mxu0 %v14790_v1  ;;  %11115 = vmatpush1.bf16.msra.mxu1 %v14793_v2  ;;  %v14891_v1 = vld [vmem:[#allocation2 + $0xda4] ss:$16 sps:$4 sm:$0xff]   ;;  %v14894_v2 = vld [vmem:[#allocation2 + $0xdac] ss:$16 sps:$4 sm:$0xff]  }
 0x1c1   :  { %10041 = vmatprep.subr.bf16.mxu0 %v14798_v3  ;;  %11116 = vmatprep.subr.bf16.mxu1 %v14801_v4  ;;  %v14889_v3 = vld [vmem:[#allocation2 + $0xda0] ss:$16 sps:$4 sm:$0xff]   ;;  %v14892_v4 = vld [vmem:[#allocation2 + $0xda8] ss:$16 sps:$4 sm:$0xff]  }
 0x1c4   :  { %10042 = vmatpush1.bf16.msra.mxu0 %v14796_v5  ;;  %11117 = vmatpush1.bf16.msra.mxu1 %v14799_v6  ;;  %v14897_v5 = vld [vmem:[#allocation2 + $0xdc4] ss:$16 sps:$4 sm:$0xff]   ;;  %v14900_v6 = vld [vmem:[#allocation2 + $0xdcc] ss:$16 sps:$4 sm:$0xff]  }
 0x1c5   :  { %10043 = vmatprep.subr.bf16.mxu0 %v14804_v7  ;;  %11118 = vmatprep.subr.bf16.mxu1 %v14807_v8  ;;  %v14895_v7 = vld [vmem:[#allocation2 + $0xdc0] ss:$16 sps:$4 sm:$0xff]   ;;  %v14898_v8 = vld [vmem:[#allocation2 + $0xdc8] ss:$16 sps:$4 sm:$0xff]  }
 0x1c8   :  { %10044 = vmatpush1.bf16.msra.mxu0 %v14802_v9  ;;  %11119 = vmatpush1.bf16.msra.mxu1 %v14805_v10  ;;  %v14903_v9 = vld [vmem:[#allocation2 + $0xde4] ss:$16 sps:$4 sm:$0xff]   ;;  %v14906_v10 = vld [vmem:[#allocation2 + $0xdec] ss:$16 sps:$4 sm:$0xff]  }
 0x1c9   :  { %10056 = vmatprep.subr.bf16.mxu0 %v14813_v12  ;;  %11131 = vmatprep.subr.bf16.mxu1 %v14816_v13  ;;  %v14904_v12 = vld [vmem:[#allocation2 + $0xde8] ss:$16 sps:$4 sm:$0xff]   ;;  %v14907_v13 = vld [vmem:[%s17015_s0 + $0x30] ss:$196 sps:$4 sm:$0xff]  }
 0x1cb   :  { %10046 = vmatmul.mubr.bf16.vlgmr.msra.gmra.mrb[0].mxu0 %v14808_v11  ;;  %11121 = vmatmul.mubr.bf16.vlgmr.msra.gmra.mrb[0].mxu1 %v14808_v11  ;;  %v14901_v11 = vld [vmem:[#allocation2 + $0xde0] ss:$16 sps:$4 sm:$0xff]  }
 0x1cc   :  { %10057 = vmatpush1.bf16.msra.mxu0 %v14811_v14  ;;  %11132 = vmatpush1.bf16.msra.mxu1 %v14814_v15  ;;  %v14912_v14 = vld [vmem:[#allocation2 + $0xe04] ss:$16 sps:$4 sm:$0xff]   ;;  %v14915_v15 = vld [vmem:[#allocation2 + $0xe0c] ss:$16 sps:$4 sm:$0xff]  }
 0x1cd   :  { %10058 = vmatprep.subr.bf16.mxu0 %v14819_v16  ;;  %11133 = vmatprep.subr.bf16.mxu1 %v14822_v17  ;;  %v14910_v16 = vld [vmem:[#allocation2 + $0xe00] ss:$16 sps:$4 sm:$0xff]   ;;  %v14913_v17 = vld [vmem:[#allocation2 + $0xe08] ss:$16 sps:$4 sm:$0xff]  }
 0x1ce   :  { %10088 = vmatprep.mubr.bf16.mxu0 %v14909_v18  ;;  %11163 = vmatprep.mubr.bf16.mxu1 %v14909_v18  ;;  %v14918_v18 = vld [vmem:[#allocation2 + $0xe24] ss:$16 sps:$4 sm:$0xff]  }
 0x1d0   :  { %10059 = vmatpush1.bf16.msra.mxu0 %v14817_v19  ;;  %11134 = vmatpush1.bf16.msra.mxu1 %v14820_v20  ;;  %v14921_v19 = vld [vmem:[#allocation2 + $0xe2c] ss:$16 sps:$4 sm:$0xff]  }
 0x1d1   :  { %10060 = vmatprep.subr.bf16.mxu0 %v14825_v21  ;;  %11135 = vmatprep.subr.bf16.mxu1 %v14828_v22  ;;  %v15008_v20 = vld [vmem:[%s17015_s0 + $0x3c] ss:$196 sps:$4 sm:$0xff]   ;;  %v14919_v22 = vld [vmem:[#allocation2 + $0xe28] ss:$16 sps:$4 sm:$0xff]  }
 0x1d2   :  { %v14916_v21 = vld [vmem:[#allocation2 + $0xe20] ss:$16 sps:$4 sm:$0xff]  }
 0x1d4   :  { %10061 = vmatpush1.bf16.msra.mxu0 %v14823_v23  ;;  %11136 = vmatpush1.bf16.msra.mxu1 %v14826_v24  ;;  %v14924_v23 = vld [vmem:[#allocation2 + $0xe44] ss:$16 sps:$4 sm:$0xff]   ;;  %v14927_v24 = vld [vmem:[#allocation2 + $0xe4c] ss:$16 sps:$4 sm:$0xff]  }
 0x1d5   :  { %10062 = vmatprep.subr.bf16.mxu0 %v14831_v25  ;;  %11137 = vmatprep.subr.bf16.mxu1 %v14834_v26  ;;  %v14922_v25 = vld [vmem:[#allocation2 + $0xe40] ss:$16 sps:$4 sm:$0xff]   ;;  %v14925_v26 = vld [vmem:[#allocation2 + $0xe48] ss:$16 sps:$4 sm:$0xff]  }
 0x1d8   :  { %10063 = vmatpush1.bf16.msra.mxu0 %v14829_v27  ;;  %11138 = vmatpush1.bf16.msra.mxu1 %v14832_v28  ;;  %v14930_v27 = vld [vmem:[#allocation2 + $0xe64] ss:$16 sps:$4 sm:$0xff]   ;;  %v14933_v28 = vld [vmem:[#allocation2 + $0xe6c] ss:$16 sps:$4 sm:$0xff]  }
 0x1d9   :  { %10064 = vmatprep.subr.bf16.mxu0 %v14837_v29  ;;  %11139 = vmatprep.subr.bf16.mxu1 %v14840_v30  ;;  %v14928_v29 = vld [vmem:[#allocation2 + $0xe60] ss:$16 sps:$4 sm:$0xff]   ;;  %v14931_v30 = vld [vmem:[#allocation2 + $0xe68] ss:$16 sps:$4 sm:$0xff]  }
 0x1dc   :  { %10065 = vmatpush1.bf16.msra.mxu0 %v14835_v31  ;;  %11140 = vmatpush1.bf16.msra.mxu1 %v14838_v32  ;;  %v14936_v31 = vld [vmem:[#allocation2 + $0xe84] ss:$16 sps:$4 sm:$0xff]   ;;  %v14939_v32 = vld [vmem:[#allocation2 + $0xe8c] ss:$16 sps:$4 sm:$0xff]  }
 0x1dd   :  { %10066 = vmatprep.subr.bf16.mxu0 %v14843_v33  ;;  %11141 = vmatprep.subr.bf16.mxu1 %v14846_v34  ;;  %v14934_v33 = vld [vmem:[#allocation2 + $0xe80] ss:$16 sps:$4 sm:$0xff]   ;;  %v14937_v34 = vld [vmem:[#allocation2 + $0xe88] ss:$16 sps:$4 sm:$0xff]  }
 0x1e0   :  { %10067 = vmatpush1.bf16.msra.mxu0 %v14841_v35  ;;  %11142 = vmatpush1.bf16.msra.mxu1 %v14844_v36  ;;  %v14942_v35 = vld [vmem:[#allocation2 + $0xea4] ss:$16 sps:$4 sm:$0xff]   ;;  %v14945_v36 = vld [vmem:[#allocation2 + $0xeac] ss:$16 sps:$4 sm:$0xff]  }
 0x1e1   :  { %10068 = vmatprep.subr.bf16.mxu0 %v14849_v37  ;;  %11143 = vmatprep.subr.bf16.mxu1 %v14852_v38  ;;  %v14940_v37 = vld [vmem:[#allocation2 + $0xea0] ss:$16 sps:$4 sm:$0xff]   ;;  %v14943_v38 = vld [vmem:[#allocation2 + $0xea8] ss:$16 sps:$4 sm:$0xff]  }
 0x1e4   :  { %10069 = vmatpush1.bf16.msra.mxu0 %v14847_v39  ;;  %11144 = vmatpush1.bf16.msra.mxu1 %v14850_v40  ;;  %v14948_v39 = vld [vmem:[#allocation2 + $0xec4] ss:$16 sps:$4 sm:$0xff]   ;;  %v14951_v40 = vld [vmem:[#allocation2 + $0xecc] ss:$16 sps:$4 sm:$0xff]  }
 0x1e5   :  { %10070 = vmatprep.subr.bf16.mxu0 %v14855_v41  ;;  %11145 = vmatprep.subr.bf16.mxu1 %v14858_v42  ;;  %v14946_v41 = vld [vmem:[#allocation2 + $0xec0] ss:$16 sps:$4 sm:$0xff]   ;;  %v14949_v42 = vld [vmem:[#allocation2 + $0xec8] ss:$16 sps:$4 sm:$0xff]  }
 0x1e8   :  { %10071 = vmatpush1.bf16.msra.mxu0 %v14853_v43  ;;  %11146 = vmatpush1.bf16.msra.mxu1 %v14856_v44  ;;  %v14954_v43 = vld [vmem:[#allocation2 + $0xee4] ss:$16 sps:$4 sm:$0xff]   ;;  %v14957_v44 = vld [vmem:[#allocation2 + $0xeec] ss:$16 sps:$4 sm:$0xff]  }
 0x1e9   :  { %10072 = vmatprep.subr.bf16.mxu0 %v14861_v45  ;;  %11147 = vmatprep.subr.bf16.mxu1 %v14864_v46  ;;  %v14952_v45 = vld [vmem:[#allocation2 + $0xee0] ss:$16 sps:$4 sm:$0xff]   ;;  %v14955_v46 = vld [vmem:[#allocation2 + $0xee8] ss:$16 sps:$4 sm:$0xff]  }
 0x1ec   :  { %10073 = vmatpush1.bf16.msra.mxu0 %v14859_v47  ;;  %11148 = vmatpush1.bf16.msra.mxu1 %v14862_v48  ;;  %v14960_v47 = vld [vmem:[#allocation2 + $0xf04] ss:$16 sps:$4 sm:$0xff]   ;;  %v14963_v48 = vld [vmem:[#allocation2 + $0xf0c] ss:$16 sps:$4 sm:$0xff]  }
 0x1ed   :  { %10074 = vmatprep.subr.bf16.mxu0 %v14867_v49  ;;  %11149 = vmatprep.subr.bf16.mxu1 %v14870_v50  ;;  %v14958_v49 = vld [vmem:[#allocation2 + $0xf00] ss:$16 sps:$4 sm:$0xff]   ;;  %v14961_v50 = vld [vmem:[#allocation2 + $0xf08] ss:$16 sps:$4 sm:$0xff]  }
 0x1f0   :  { %10075 = vmatpush1.bf16.msra.mxu0 %v14865_v51  ;;  %11150 = vmatpush1.bf16.msra.mxu1 %v14868_v52  ;;  %v14966_v51 = vld [vmem:[#allocation2 + $0xf24] ss:$16 sps:$4 sm:$0xff]   ;;  %v14969_v52 = vld [vmem:[#allocation2 + $0xf2c] ss:$16 sps:$4 sm:$0xff]  }
 0x1f1   :  { %10076 = vmatprep.subr.bf16.mxu0 %v14873_v53  ;;  %11151 = vmatprep.subr.bf16.mxu1 %v14876_v54  ;;  %v14964_v53 = vld [vmem:[#allocation2 + $0xf20] ss:$16 sps:$4 sm:$0xff]   ;;  %v14967_v54 = vld [vmem:[#allocation2 + $0xf28] ss:$16 sps:$4 sm:$0xff]  }
 0x1f4   :  { %10077 = vmatpush1.bf16.msra.mxu0 %v14871_v55  ;;  %11152 = vmatpush1.bf16.msra.mxu1 %v14874_v56  ;;  %v14972_v55 = vld [vmem:[#allocation2 + $0xf44] ss:$16 sps:$4 sm:$0xff]   ;;  %v14975_v56 = vld [vmem:[#allocation2 + $0xf4c] ss:$16 sps:$4 sm:$0xff]  }
 0x1f5   :  { %10078 = vmatprep.subr.bf16.mxu0 %v14879_v57  ;;  %11153 = vmatprep.subr.bf16.mxu1 %v14882_v58  ;;  %v14970_v57 = vld [vmem:[#allocation2 + $0xf40] ss:$16 sps:$4 sm:$0xff]   ;;  %v14973_v58 = vld [vmem:[#allocation2 + $0xf48] ss:$16 sps:$4 sm:$0xff]  }
 0x1f8   :  { %10079 = vmatpush1.bf16.msra.mxu0 %v14877_v59  ;;  %11154 = vmatpush1.bf16.msra.mxu1 %v14880_v60  ;;  %v14978_v59 = vld [vmem:[#allocation2 + $0xf64] ss:$16 sps:$4 sm:$0xff]   ;;  %v14981_v60 = vld [vmem:[#allocation2 + $0xf6c] ss:$16 sps:$4 sm:$0xff]  }
 0x1f9   :  { %10080 = vmatprep.subr.bf16.mxu0 %v14885_v61  ;;  %11155 = vmatprep.subr.bf16.mxu1 %v14888_v62  ;;  %v14976_v61 = vld [vmem:[#allocation2 + $0xf60] ss:$16 sps:$4 sm:$0xff]   ;;  %v14979_v62 = vld [vmem:[#allocation2 + $0xf68] ss:$16 sps:$4 sm:$0xff]  }
 0x1fc   :  { %10081 = vmatpush1.bf16.msra.mxu0 %v14883_v63  ;;  %11156 = vmatpush1.bf16.msra.mxu1 %v14886_v0  ;;  %v14984_v63 = vld [vmem:[#allocation2 + $0xf84] ss:$16 sps:$4 sm:$0xff]   ;;  %v14987_v0 = vld [vmem:[#allocation2 + $0xf8c] ss:$16 sps:$4 sm:$0xff]  }
 0x1fd   :  { %10082 = vmatprep.subr.bf16.mxu0 %v14891_v1  ;;  %11157 = vmatprep.subr.bf16.mxu1 %v14894_v2  ;;  %v14982_v1 = vld [vmem:[#allocation2 + $0xf80] ss:$16 sps:$4 sm:$0xff]   ;;  %v14985_v2 = vld [vmem:[#allocation2 + $0xf88] ss:$16 sps:$4 sm:$0xff]  }
 0x200   :  { %10083 = vmatpush1.bf16.msra.mxu0 %v14889_v3  ;;  %11158 = vmatpush1.bf16.msra.mxu1 %v14892_v4  ;;  %v14990_v3 = vld [vmem:[#allocation2 + $0xfa4] ss:$16 sps:$4 sm:$0xff]   ;;  %v14993_v4 = vld [vmem:[#allocation2 + $0xfac] ss:$16 sps:$4 sm:$0xff]  }
 0x201   :  { %10084 = vmatprep.subr.bf16.mxu0 %v14897_v5  ;;  %11159 = vmatprep.subr.bf16.mxu1 %v14900_v6  ;;  %v14988_v5 = vld [vmem:[#allocation2 + $0xfa0] ss:$16 sps:$4 sm:$0xff]   ;;  %v14991_v6 = vld [vmem:[#allocation2 + $0xfa8] ss:$16 sps:$4 sm:$0xff]  }
 0x204   :  { %10085 = vmatpush1.bf16.msra.mxu0 %v14895_v7  ;;  %11160 = vmatpush1.bf16.msra.mxu1 %v14898_v8  ;;  %v14996_v7 = vld [vmem:[#allocation2 + $0xfc4] ss:$16 sps:$4 sm:$0xff]   ;;  %v14999_v8 = vld [vmem:[#allocation2 + $0xfcc] ss:$16 sps:$4 sm:$0xff]  }
 0x205   :  { %10086 = vmatprep.subr.bf16.mxu0 %v14903_v9  ;;  %11161 = vmatprep.subr.bf16.mxu1 %v14906_v10  ;;  %v14994_v9 = vld [vmem:[#allocation2 + $0xfc0] ss:$16 sps:$4 sm:$0xff]   ;;  %v14997_v10 = vld [vmem:[#allocation2 + $0xfc8] ss:$16 sps:$4 sm:$0xff]  }
 0x208   :  { %10087 = vmatpush1.bf16.msra.mxu0 %v14901_v11  ;;  %11162 = vmatpush1.bf16.msra.mxu1 %v14904_v12  ;;  %v15002_v11 = vld [vmem:[#allocation2 + $0xfe4] ss:$16 sps:$4 sm:$0xff]   ;;  %v15005_v12 = vld [vmem:[#allocation2 + $0xfec] ss:$16 sps:$4 sm:$0xff]  }
 0x209   :  { %10099 = vmatprep.subr.bf16.mxu0 %v14912_v14  ;;  %11174 = vmatprep.subr.bf16.mxu1 %v14915_v15  ;;  %v15003_v14 = vld [vmem:[#allocation2 + $0xfe8] ss:$16 sps:$4 sm:$0xff]  }
 0x20a   :  { %v15006_v15 = vld [vmem:[%s17015_s0 + $0x38] ss:$196 sps:$4 sm:$0xff]  }
 0x20b   :  { %10089 = vmatmul.mubr.bf16.vlgmr.msra.gmra.mrb[0].mxu0 %v14907_v13  ;;  %11164 = vmatmul.mubr.bf16.vlgmr.msra.gmra.mrb[0].mxu1 %v14907_v13  ;;  %v15000_v13 = vld [vmem:[#allocation2 + $0xfe0] ss:$16 sps:$4 sm:$0xff]  }
 0x20c   :  { %10100 = vmatpush1.bf16.msra.mxu0 %v14910_v16  ;;  %11175 = vmatpush1.bf16.msra.mxu1 %v14913_v17  ;;  %v15011_v16 = vld [vmem:[#allocation2 + $0x1004] ss:$16 sps:$4 sm:$0xff]   ;;  %v15014_v17 = vld [vmem:[#allocation2 + $0x100c] ss:$16 sps:$4 sm:$0xff]  }
 0x20d   :  { %10101 = vmatprep.subr.bf16.mxu0 %v14918_v18  ;;  %11176 = vmatprep.subr.bf16.mxu1 %v14921_v19  ;;  %v15009_v18 = vld [vmem:[#allocation2 + $0x1000] ss:$16 sps:$4 sm:$0xff]   ;;  %v15012_v19 = vld [vmem:[#allocation2 + $0x1008] ss:$16 sps:$4 sm:$0xff]  }
 0x20e   :  { %10131 = vmatprep.mubr.bf16.mxu0 %v15008_v20  ;;  %11206 = vmatprep.mubr.bf16.mxu1 %v15008_v20  ;;  %v15017_v20 = vld [vmem:[#allocation2 + $0x1024] ss:$16 sps:$4 sm:$0xff]  }
 0x210   :  { %10102 = vmatpush1.bf16.msra.mxu0 %v14916_v21  ;;  %11177 = vmatpush1.bf16.msra.mxu1 %v14919_v22  ;;  %v15020_v21 = vld [vmem:[#allocation2 + $0x102c] ss:$16 sps:$4 sm:$0xff]   ;;  %v15107_v22 = vld [vmem:[%s17015_s0 + $0x44] ss:$196 sps:$4 sm:$0xff]  }
 0x211   :  { %10103 = vmatprep.subr.bf16.mxu0 %v14924_v23  ;;  %11178 = vmatprep.subr.bf16.mxu1 %v14927_v24  ;;  %v15015_v23 = vld [vmem:[#allocation2 + $0x1020] ss:$16 sps:$4 sm:$0xff]   ;;  %v15018_v24 = vld [vmem:[#allocation2 + $0x1028] ss:$16 sps:$4 sm:$0xff]  }
 0x214   :  { %10104 = vmatpush1.bf16.msra.mxu0 %v14922_v25  ;;  %11179 = vmatpush1.bf16.msra.mxu1 %v14925_v26  ;;  %v15023_v25 = vld [vmem:[#allocation2 + $0x1044] ss:$16 sps:$4 sm:$0xff]   ;;  %v15026_v26 = vld [vmem:[#allocation2 + $0x104c] ss:$16 sps:$4 sm:$0xff]  }
 0x215   :  { %10105 = vmatprep.subr.bf16.mxu0 %v14930_v27  ;;  %11180 = vmatprep.subr.bf16.mxu1 %v14933_v28  ;;  %v15021_v27 = vld [vmem:[#allocation2 + $0x1040] ss:$16 sps:$4 sm:$0xff]   ;;  %v15024_v28 = vld [vmem:[#allocation2 + $0x1048] ss:$16 sps:$4 sm:$0xff]  }
 0x218   :  { %10106 = vmatpush1.bf16.msra.mxu0 %v14928_v29  ;;  %11181 = vmatpush1.bf16.msra.mxu1 %v14931_v30  ;;  %v15029_v29 = vld [vmem:[#allocation2 + $0x1064] ss:$16 sps:$4 sm:$0xff]   ;;  %v15032_v30 = vld [vmem:[#allocation2 + $0x106c] ss:$16 sps:$4 sm:$0xff]  }
 0x219   :  { %10107 = vmatprep.subr.bf16.mxu0 %v14936_v31  ;;  %11182 = vmatprep.subr.bf16.mxu1 %v14939_v32  ;;  %v15027_v31 = vld [vmem:[#allocation2 + $0x1060] ss:$16 sps:$4 sm:$0xff]   ;;  %v15030_v32 = vld [vmem:[#allocation2 + $0x1068] ss:$16 sps:$4 sm:$0xff]  }
 0x21c   :  { %10108 = vmatpush1.bf16.msra.mxu0 %v14934_v33  ;;  %11183 = vmatpush1.bf16.msra.mxu1 %v14937_v34  ;;  %v15035_v33 = vld [vmem:[#allocation2 + $0x1084] ss:$16 sps:$4 sm:$0xff]   ;;  %v15038_v34 = vld [vmem:[#allocation2 + $0x108c] ss:$16 sps:$4 sm:$0xff]  }
 0x21d   :  { %10109 = vmatprep.subr.bf16.mxu0 %v14942_v35  ;;  %11184 = vmatprep.subr.bf16.mxu1 %v14945_v36  ;;  %v15033_v35 = vld [vmem:[#allocation2 + $0x1080] ss:$16 sps:$4 sm:$0xff]   ;;  %v15036_v36 = vld [vmem:[#allocation2 + $0x1088] ss:$16 sps:$4 sm:$0xff]  }
 0x220   :  { %10110 = vmatpush1.bf16.msra.mxu0 %v14940_v37  ;;  %11185 = vmatpush1.bf16.msra.mxu1 %v14943_v38  ;;  %v15041_v37 = vld [vmem:[#allocation2 + $0x10a4] ss:$16 sps:$4 sm:$0xff]   ;;  %v15044_v38 = vld [vmem:[#allocation2 + $0x10ac] ss:$16 sps:$4 sm:$0xff]  }
 0x221   :  { %10111 = vmatprep.subr.bf16.mxu0 %v14948_v39  ;;  %11186 = vmatprep.subr.bf16.mxu1 %v14951_v40  ;;  %v15039_v39 = vld [vmem:[#allocation2 + $0x10a0] ss:$16 sps:$4 sm:$0xff]   ;;  %v15042_v40 = vld [vmem:[#allocation2 + $0x10a8] ss:$16 sps:$4 sm:$0xff]  }
 0x224   :  { %10112 = vmatpush1.bf16.msra.mxu0 %v14946_v41  ;;  %11187 = vmatpush1.bf16.msra.mxu1 %v14949_v42  ;;  %v15047_v41 = vld [vmem:[#allocation2 + $0x10c4] ss:$16 sps:$4 sm:$0xff]   ;;  %v15050_v42 = vld [vmem:[#allocation2 + $0x10cc] ss:$16 sps:$4 sm:$0xff]  }
 0x225   :  { %10113 = vmatprep.subr.bf16.mxu0 %v14954_v43  ;;  %11188 = vmatprep.subr.bf16.mxu1 %v14957_v44  ;;  %v15045_v43 = vld [vmem:[#allocation2 + $0x10c0] ss:$16 sps:$4 sm:$0xff]   ;;  %v15048_v44 = vld [vmem:[#allocation2 + $0x10c8] ss:$16 sps:$4 sm:$0xff]  }
 0x228   :  { %10114 = vmatpush1.bf16.msra.mxu0 %v14952_v45  ;;  %11189 = vmatpush1.bf16.msra.mxu1 %v14955_v46  ;;  %v15053_v45 = vld [vmem:[#allocation2 + $0x10e4] ss:$16 sps:$4 sm:$0xff]   ;;  %v15056_v46 = vld [vmem:[#allocation2 + $0x10ec] ss:$16 sps:$4 sm:$0xff]  }
 0x229   :  { %10115 = vmatprep.subr.bf16.mxu0 %v14960_v47  ;;  %11190 = vmatprep.subr.bf16.mxu1 %v14963_v48  ;;  %v15051_v47 = vld [vmem:[#allocation2 + $0x10e0] ss:$16 sps:$4 sm:$0xff]   ;;  %v15054_v48 = vld [vmem:[#allocation2 + $0x10e8] ss:$16 sps:$4 sm:$0xff]  }
 0x22c   :  { %10116 = vmatpush1.bf16.msra.mxu0 %v14958_v49  ;;  %11191 = vmatpush1.bf16.msra.mxu1 %v14961_v50  ;;  %v15059_v49 = vld [vmem:[#allocation2 + $0x1104] ss:$16 sps:$4 sm:$0xff]   ;;  %v15062_v50 = vld [vmem:[#allocation2 + $0x110c] ss:$16 sps:$4 sm:$0xff]  }
 0x22d   :  { %10117 = vmatprep.subr.bf16.mxu0 %v14966_v51  ;;  %11192 = vmatprep.subr.bf16.mxu1 %v14969_v52  ;;  %v15057_v51 = vld [vmem:[#allocation2 + $0x1100] ss:$16 sps:$4 sm:$0xff]   ;;  %v15060_v52 = vld [vmem:[#allocation2 + $0x1108] ss:$16 sps:$4 sm:$0xff]  }
 0x230   :  { %10118 = vmatpush1.bf16.msra.mxu0 %v14964_v53  ;;  %11193 = vmatpush1.bf16.msra.mxu1 %v14967_v54  ;;  %v15065_v53 = vld [vmem:[#allocation2 + $0x1124] ss:$16 sps:$4 sm:$0xff]   ;;  %v15068_v54 = vld [vmem:[#allocation2 + $0x112c] ss:$16 sps:$4 sm:$0xff]  }
 0x231   :  { %10119 = vmatprep.subr.bf16.mxu0 %v14972_v55  ;;  %11194 = vmatprep.subr.bf16.mxu1 %v14975_v56  ;;  %v15063_v55 = vld [vmem:[#allocation2 + $0x1120] ss:$16 sps:$4 sm:$0xff]   ;;  %v15066_v56 = vld [vmem:[#allocation2 + $0x1128] ss:$16 sps:$4 sm:$0xff]  }
 0x234   :  { %10120 = vmatpush1.bf16.msra.mxu0 %v14970_v57  ;;  %11195 = vmatpush1.bf16.msra.mxu1 %v14973_v58  ;;  %v15071_v57 = vld [vmem:[#allocation2 + $0x1144] ss:$16 sps:$4 sm:$0xff]   ;;  %v15074_v58 = vld [vmem:[#allocation2 + $0x114c] ss:$16 sps:$4 sm:$0xff]  }
 0x235   :  { %10121 = vmatprep.subr.bf16.mxu0 %v14978_v59  ;;  %11196 = vmatprep.subr.bf16.mxu1 %v14981_v60  ;;  %v15069_v59 = vld [vmem:[#allocation2 + $0x1140] ss:$16 sps:$4 sm:$0xff]   ;;  %v15072_v60 = vld [vmem:[#allocation2 + $0x1148] ss:$16 sps:$4 sm:$0xff]  }
 0x238   :  { %10122 = vmatpush1.bf16.msra.mxu0 %v14976_v61  ;;  %11197 = vmatpush1.bf16.msra.mxu1 %v14979_v62  ;;  %v15077_v61 = vld [vmem:[#allocation2 + $0x1164] ss:$16 sps:$4 sm:$0xff]   ;;  %v15080_v62 = vld [vmem:[#allocation2 + $0x116c] ss:$16 sps:$4 sm:$0xff]  }
 0x239   :  { %10123 = vmatprep.subr.bf16.mxu0 %v14984_v63  ;;  %11198 = vmatprep.subr.bf16.mxu1 %v14987_v0  ;;  %v15075_v63 = vld [vmem:[#allocation2 + $0x1160] ss:$16 sps:$4 sm:$0xff]   ;;  %v15078_v0 = vld [vmem:[#allocation2 + $0x1168] ss:$16 sps:$4 sm:$0xff]  }
 0x23c   :  { %10124 = vmatpush1.bf16.msra.mxu0 %v14982_v1  ;;  %11199 = vmatpush1.bf16.msra.mxu1 %v14985_v2  ;;  %v15083_v1 = vld [vmem:[#allocation2 + $0x1184] ss:$16 sps:$4 sm:$0xff]   ;;  %v15086_v2 = vld [vmem:[#allocation2 + $0x118c] ss:$16 sps:$4 sm:$0xff]  }
 0x23d   :  { %10125 = vmatprep.subr.bf16.mxu0 %v14990_v3  ;;  %11200 = vmatprep.subr.bf16.mxu1 %v14993_v4  ;;  %v15081_v3 = vld [vmem:[#allocation2 + $0x1180] ss:$16 sps:$4 sm:$0xff]   ;;  %v15084_v4 = vld [vmem:[#allocation2 + $0x1188] ss:$16 sps:$4 sm:$0xff]  }
 0x240   :  { %10126 = vmatpush1.bf16.msra.mxu0 %v14988_v5  ;;  %11201 = vmatpush1.bf16.msra.mxu1 %v14991_v6  ;;  %v15089_v5 = vld [vmem:[#allocation2 + $0x11a4] ss:$16 sps:$4 sm:$0xff]   ;;  %v15092_v6 = vld [vmem:[#allocation2 + $0x11ac] ss:$16 sps:$4 sm:$0xff]  }
 0x241   :  { %10127 = vmatprep.subr.bf16.mxu0 %v14996_v7  ;;  %11202 = vmatprep.subr.bf16.mxu1 %v14999_v8  ;;  %v15087_v7 = vld [vmem:[#allocation2 + $0x11a0] ss:$16 sps:$4 sm:$0xff]   ;;  %v15090_v8 = vld [vmem:[#allocation2 + $0x11a8] ss:$16 sps:$4 sm:$0xff]  }
 0x244   :  { %10128 = vmatpush1.bf16.msra.mxu0 %v14994_v9  ;;  %11203 = vmatpush1.bf16.msra.mxu1 %v14997_v10  ;;  %v15095_v9 = vld [vmem:[#allocation2 + $0x11c4] ss:$16 sps:$4 sm:$0xff]   ;;  %v15098_v10 = vld [vmem:[#allocation2 + $0x11cc] ss:$16 sps:$4 sm:$0xff]  }
 0x245   :  { %10129 = vmatprep.subr.bf16.mxu0 %v15002_v11  ;;  %11204 = vmatprep.subr.bf16.mxu1 %v15005_v12  ;;  %v15093_v11 = vld [vmem:[#allocation2 + $0x11c0] ss:$16 sps:$4 sm:$0xff]   ;;  %v15096_v12 = vld [vmem:[#allocation2 + $0x11c8] ss:$16 sps:$4 sm:$0xff]  }
 0x248   :  { %10130 = vmatpush1.bf16.msra.mxu0 %v15000_v13  ;;  %11205 = vmatpush1.bf16.msra.mxu1 %v15003_v14  ;;  %v15101_v13 = vld [vmem:[#allocation2 + $0x11e4] ss:$16 sps:$4 sm:$0xff]   ;;  %v15104_v14 = vld [vmem:[#allocation2 + $0x11ec] ss:$16 sps:$4 sm:$0xff]  }
 0x249   :  { %10142 = vmatprep.subr.bf16.mxu0 %v15011_v16  ;;  %11217 = vmatprep.subr.bf16.mxu1 %v15014_v17  ;;  %v15102_v16 = vld [vmem:[#allocation2 + $0x11e8] ss:$16 sps:$4 sm:$0xff]   ;;  %v15105_v17 = vld [vmem:[%s17015_s0 + $0x40] ss:$196 sps:$4 sm:$0xff]  }
 0x24b   :  { %10132 = vmatmul.mubr.bf16.vlgmr.msra.gmra.mrb[0].mxu0 %v15006_v15  ;;  %11207 = vmatmul.mubr.bf16.vlgmr.msra.gmra.mrb[0].mxu1 %v15006_v15  ;;  %v15099_v15 = vld [vmem:[#allocation2 + $0x11e0] ss:$16 sps:$4 sm:$0xff]  }
 0x24c   :  { %10143 = vmatpush1.bf16.msra.mxu0 %v15009_v18  ;;  %11218 = vmatpush1.bf16.msra.mxu1 %v15012_v19  ;;  %v15110_v18 = vld [vmem:[#allocation2 + $0x1204] ss:$16 sps:$4 sm:$0xff]   ;;  %v15113_v19 = vld [vmem:[#allocation2 + $0x120c] ss:$16 sps:$4 sm:$0xff]  }
 0x24d   :  { %10144 = vmatprep.subr.bf16.mxu0 %v15017_v20  ;;  %11219 = vmatprep.subr.bf16.mxu1 %v15020_v21  ;;  %v15108_v20 = vld [vmem:[#allocation2 + $0x1200] ss:$16 sps:$4 sm:$0xff]   ;;  %v15111_v21 = vld [vmem:[#allocation2 + $0x1208] ss:$16 sps:$4 sm:$0xff]  }
 0x24e   :  { %10174 = vmatprep.mubr.bf16.mxu0 %v15107_v22  ;;  %11249 = vmatprep.mubr.bf16.mxu1 %v15107_v22  ;;  %v15116_v22 = vld [vmem:[#allocation2 + $0x1224] ss:$16 sps:$4 sm:$0xff]  }
 0x250   :  { %10145 = vmatpush1.bf16.msra.mxu0 %v15015_v23  ;;  %11220 = vmatpush1.bf16.msra.mxu1 %v15018_v24  ;;  %v15119_v23 = vld [vmem:[#allocation2 + $0x122c] ss:$16 sps:$4 sm:$0xff]  }
 0x251   :  { %10146 = vmatprep.subr.bf16.mxu0 %v15023_v25  ;;  %11221 = vmatprep.subr.bf16.mxu1 %v15026_v26  ;;  %v15206_v24 = vld [vmem:[%s17015_s0 + $0x4c] ss:$196 sps:$4 sm:$0xff]   ;;  %v15117_v26 = vld [vmem:[#allocation2 + $0x1228] ss:$16 sps:$4 sm:$0xff]  }
 0x252   :  { %v15114_v25 = vld [vmem:[#allocation2 + $0x1220] ss:$16 sps:$4 sm:$0xff]  }
 0x254   :  { %10147 = vmatpush1.bf16.msra.mxu0 %v15021_v27  ;;  %11222 = vmatpush1.bf16.msra.mxu1 %v15024_v28  ;;  %v15122_v27 = vld [vmem:[#allocation2 + $0x1244] ss:$16 sps:$4 sm:$0xff]   ;;  %v15125_v28 = vld [vmem:[#allocation2 + $0x124c] ss:$16 sps:$4 sm:$0xff]  }
 0x255   :  { %10148 = vmatprep.subr.bf16.mxu0 %v15029_v29  ;;  %11223 = vmatprep.subr.bf16.mxu1 %v15032_v30  ;;  %v15120_v29 = vld [vmem:[#allocation2 + $0x1240] ss:$16 sps:$4 sm:$0xff]   ;;  %v15123_v30 = vld [vmem:[#allocation2 + $0x1248] ss:$16 sps:$4 sm:$0xff]  }
 0x258   :  { %10149 = vmatpush1.bf16.msra.mxu0 %v15027_v31  ;;  %11224 = vmatpush1.bf16.msra.mxu1 %v15030_v32  ;;  %v15128_v31 = vld [vmem:[#allocation2 + $0x1264] ss:$16 sps:$4 sm:$0xff]   ;;  %v15131_v32 = vld [vmem:[#allocation2 + $0x126c] ss:$16 sps:$4 sm:$0xff]  }
 0x259   :  { %10150 = vmatprep.subr.bf16.mxu0 %v15035_v33  ;;  %11225 = vmatprep.subr.bf16.mxu1 %v15038_v34  ;;  %v15126_v33 = vld [vmem:[#allocation2 + $0x1260] ss:$16 sps:$4 sm:$0xff]   ;;  %v15129_v34 = vld [vmem:[#allocation2 + $0x1268] ss:$16 sps:$4 sm:$0xff]  }
 0x25c   :  { %10151 = vmatpush1.bf16.msra.mxu0 %v15033_v35  ;;  %11226 = vmatpush1.bf16.msra.mxu1 %v15036_v36  ;;  %v15134_v35 = vld [vmem:[#allocation2 + $0x1284] ss:$16 sps:$4 sm:$0xff]   ;;  %v15137_v36 = vld [vmem:[#allocation2 + $0x128c] ss:$16 sps:$4 sm:$0xff]  }
 0x25d   :  { %10152 = vmatprep.subr.bf16.mxu0 %v15041_v37  ;;  %11227 = vmatprep.subr.bf16.mxu1 %v15044_v38  ;;  %v15132_v37 = vld [vmem:[#allocation2 + $0x1280] ss:$16 sps:$4 sm:$0xff]   ;;  %v15135_v38 = vld [vmem:[#allocation2 + $0x1288] ss:$16 sps:$4 sm:$0xff]  }
 0x260   :  { %10153 = vmatpush1.bf16.msra.mxu0 %v15039_v39  ;;  %11228 = vmatpush1.bf16.msra.mxu1 %v15042_v40  ;;  %v15140_v39 = vld [vmem:[#allocation2 + $0x12a4] ss:$16 sps:$4 sm:$0xff]   ;;  %v15143_v40 = vld [vmem:[#allocation2 + $0x12ac] ss:$16 sps:$4 sm:$0xff]  }
 0x261   :  { %10154 = vmatprep.subr.bf16.mxu0 %v15047_v41  ;;  %11229 = vmatprep.subr.bf16.mxu1 %v15050_v42  ;;  %v15138_v41 = vld [vmem:[#allocation2 + $0x12a0] ss:$16 sps:$4 sm:$0xff]   ;;  %v15141_v42 = vld [vmem:[#allocation2 + $0x12a8] ss:$16 sps:$4 sm:$0xff]  }
 0x264   :  { %10155 = vmatpush1.bf16.msra.mxu0 %v15045_v43  ;;  %11230 = vmatpush1.bf16.msra.mxu1 %v15048_v44  ;;  %v15146_v43 = vld [vmem:[#allocation2 + $0x12c4] ss:$16 sps:$4 sm:$0xff]   ;;  %v15149_v44 = vld [vmem:[#allocation2 + $0x12cc] ss:$16 sps:$4 sm:$0xff]  }
 0x265   :  { %10156 = vmatprep.subr.bf16.mxu0 %v15053_v45  ;;  %11231 = vmatprep.subr.bf16.mxu1 %v15056_v46  ;;  %v15144_v45 = vld [vmem:[#allocation2 + $0x12c0] ss:$16 sps:$4 sm:$0xff]   ;;  %v15147_v46 = vld [vmem:[#allocation2 + $0x12c8] ss:$16 sps:$4 sm:$0xff]  }
 0x268   :  { %10157 = vmatpush1.bf16.msra.mxu0 %v15051_v47  ;;  %11232 = vmatpush1.bf16.msra.mxu1 %v15054_v48  ;;  %v15152_v47 = vld [vmem:[#allocation2 + $0x12e4] ss:$16 sps:$4 sm:$0xff]   ;;  %v15155_v48 = vld [vmem:[#allocation2 + $0x12ec] ss:$16 sps:$4 sm:$0xff]  }
 0x269   :  { %10158 = vmatprep.subr.bf16.mxu0 %v15059_v49  ;;  %11233 = vmatprep.subr.bf16.mxu1 %v15062_v50  ;;  %v15150_v49 = vld [vmem:[#allocation2 + $0x12e0] ss:$16 sps:$4 sm:$0xff]   ;;  %v15153_v50 = vld [vmem:[#allocation2 + $0x12e8] ss:$16 sps:$4 sm:$0xff]  }
 0x26c   :  { %10159 = vmatpush1.bf16.msra.mxu0 %v15057_v51  ;;  %11234 = vmatpush1.bf16.msra.mxu1 %v15060_v52  ;;  %v15158_v51 = vld [vmem:[#allocation2 + $0x1304] ss:$16 sps:$4 sm:$0xff]   ;;  %v15161_v52 = vld [vmem:[#allocation2 + $0x130c] ss:$16 sps:$4 sm:$0xff]  }
 0x26d   :  { %10160 = vmatprep.subr.bf16.mxu0 %v15065_v53  ;;  %11235 = vmatprep.subr.bf16.mxu1 %v15068_v54  ;;  %v15156_v53 = vld [vmem:[#allocation2 + $0x1300] ss:$16 sps:$4 sm:$0xff]   ;;  %v15159_v54 = vld [vmem:[#allocation2 + $0x1308] ss:$16 sps:$4 sm:$0xff]  }
 0x270   :  { %10161 = vmatpush1.bf16.msra.mxu0 %v15063_v55  ;;  %11236 = vmatpush1.bf16.msra.mxu1 %v15066_v56  ;;  %v15164_v55 = vld [vmem:[#allocation2 + $0x1324] ss:$16 sps:$4 sm:$0xff]   ;;  %v15167_v56 = vld [vmem:[#allocation2 + $0x132c] ss:$16 sps:$4 sm:$0xff]  }
 0x271   :  { %10162 = vmatprep.subr.bf16.mxu0 %v15071_v57  ;;  %11237 = vmatprep.subr.bf16.mxu1 %v15074_v58  ;;  %v15162_v57 = vld [vmem:[#allocation2 + $0x1320] ss:$16 sps:$4 sm:$0xff]   ;;  %v15165_v58 = vld [vmem:[#allocation2 + $0x1328] ss:$16 sps:$4 sm:$0xff]  }
 0x274   :  { %10163 = vmatpush1.bf16.msra.mxu0 %v15069_v59  ;;  %11238 = vmatpush1.bf16.msra.mxu1 %v15072_v60  ;;  %v15170_v59 = vld [vmem:[#allocation2 + $0x1344] ss:$16 sps:$4 sm:$0xff]   ;;  %v15173_v60 = vld [vmem:[#allocation2 + $0x134c] ss:$16 sps:$4 sm:$0xff]  }
 0x275   :  { %10164 = vmatprep.subr.bf16.mxu0 %v15077_v61  ;;  %11239 = vmatprep.subr.bf16.mxu1 %v15080_v62  ;;  %v15168_v61 = vld [vmem:[#allocation2 + $0x1340] ss:$16 sps:$4 sm:$0xff]   ;;  %v15171_v62 = vld [vmem:[#allocation2 + $0x1348] ss:$16 sps:$4 sm:$0xff]  }
 0x278   :  { %10165 = vmatpush1.bf16.msra.mxu0 %v15075_v63  ;;  %11240 = vmatpush1.bf16.msra.mxu1 %v15078_v0  ;;  %v15176_v63 = vld [vmem:[#allocation2 + $0x1364] ss:$16 sps:$4 sm:$0xff]   ;;  %v15179_v0 = vld [vmem:[#allocation2 + $0x136c] ss:$16 sps:$4 sm:$0xff]  }
 0x279   :  { %10166 = vmatprep.subr.bf16.mxu0 %v15083_v1  ;;  %11241 = vmatprep.subr.bf16.mxu1 %v15086_v2  ;;  %v15174_v1 = vld [vmem:[#allocation2 + $0x1360] ss:$16 sps:$4 sm:$0xff]   ;;  %v15177_v2 = vld [vmem:[#allocation2 + $0x1368] ss:$16 sps:$4 sm:$0xff]  }
 0x27c   :  { %10167 = vmatpush1.bf16.msra.mxu0 %v15081_v3  ;;  %11242 = vmatpush1.bf16.msra.mxu1 %v15084_v4  ;;  %v15182_v3 = vld [vmem:[#allocation2 + $0x1384] ss:$16 sps:$4 sm:$0xff]   ;;  %v15185_v4 = vld [vmem:[#allocation2 + $0x138c] ss:$16 sps:$4 sm:$0xff]  }
 0x27d   :  { %10168 = vmatprep.subr.bf16.mxu0 %v15089_v5  ;;  %11243 = vmatprep.subr.bf16.mxu1 %v15092_v6  ;;  %v15180_v5 = vld [vmem:[#allocation2 + $0x1380] ss:$16 sps:$4 sm:$0xff]   ;;  %v15183_v6 = vld [vmem:[#allocation2 + $0x1388] ss:$16 sps:$4 sm:$0xff]  }
 0x280   :  { %10169 = vmatpush1.bf16.msra.mxu0 %v15087_v7  ;;  %11244 = vmatpush1.bf16.msra.mxu1 %v15090_v8  ;;  %v15188_v7 = vld [vmem:[#allocation2 + $0x13a4] ss:$16 sps:$4 sm:$0xff]   ;;  %v15191_v8 = vld [vmem:[#allocation2 + $0x13ac] ss:$16 sps:$4 sm:$0xff]  }
 0x281   :  { %10170 = vmatprep.subr.bf16.mxu0 %v15095_v9  ;;  %11245 = vmatprep.subr.bf16.mxu1 %v15098_v10  ;;  %v15186_v9 = vld [vmem:[#allocation2 + $0x13a0] ss:$16 sps:$4 sm:$0xff]   ;;  %v15189_v10 = vld [vmem:[#allocation2 + $0x13a8] ss:$16 sps:$4 sm:$0xff]  }
 0x284   :  { %10171 = vmatpush1.bf16.msra.mxu0 %v15093_v11  ;;  %11246 = vmatpush1.bf16.msra.mxu1 %v15096_v12  ;;  %v15194_v11 = vld [vmem:[#allocation2 + $0x13c4] ss:$16 sps:$4 sm:$0xff]   ;;  %v15197_v12 = vld [vmem:[#allocation2 + $0x13cc] ss:$16 sps:$4 sm:$0xff]  }
 0x285   :  { %10172 = vmatprep.subr.bf16.mxu0 %v15101_v13  ;;  %11247 = vmatprep.subr.bf16.mxu1 %v15104_v14  ;;  %v15192_v13 = vld [vmem:[#allocation2 + $0x13c0] ss:$16 sps:$4 sm:$0xff]   ;;  %v15195_v14 = vld [vmem:[#allocation2 + $0x13c8] ss:$16 sps:$4 sm:$0xff]  }
 0x288   :  { %10173 = vmatpush1.bf16.msra.mxu0 %v15099_v15  ;;  %11248 = vmatpush1.bf16.msra.mxu1 %v15102_v16  ;;  %v15200_v15 = vld [vmem:[#allocation2 + $0x13e4] ss:$16 sps:$4 sm:$0xff]   ;;  %v15203_v16 = vld [vmem:[#allocation2 + $0x13ec] ss:$16 sps:$4 sm:$0xff]  }
 0x289   :  { %10185 = vmatprep.subr.bf16.mxu0 %v15110_v18  ;;  %11260 = vmatprep.subr.bf16.mxu1 %v15113_v19  ;;  %v15201_v18 = vld [vmem:[#allocation2 + $0x13e8] ss:$16 sps:$4 sm:$0xff]  }
 0x28a   :  { %v15204_v19 = vld [vmem:[%s17015_s0 + $0x48] ss:$196 sps:$4 sm:$0xff]  }
 0x28b   :  { %10175 = vmatmul.mubr.bf16.vlgmr.msra.gmra.mrb[0].mxu0 %v15105_v17  ;;  %11250 = vmatmul.mubr.bf16.vlgmr.msra.gmra.mrb[0].mxu1 %v15105_v17  ;;  %v15198_v17 = vld [vmem:[#allocation2 + $0x13e0] ss:$16 sps:$4 sm:$0xff]  }
 0x28c   :  { %10186 = vmatpush1.bf16.msra.mxu0 %v15108_v20  ;;  %11261 = vmatpush1.bf16.msra.mxu1 %v15111_v21  ;;  %v15209_v20 = vld [vmem:[#allocation2 + $0x1404] ss:$16 sps:$4 sm:$0xff]   ;;  %v15212_v21 = vld [vmem:[#allocation2 + $0x140c] ss:$16 sps:$4 sm:$0xff]  }
 0x28d   :  { %10187 = vmatprep.subr.bf16.mxu0 %v15116_v22  ;;  %11262 = vmatprep.subr.bf16.mxu1 %v15119_v23  ;;  %v15207_v22 = vld [vmem:[#allocation2 + $0x1400] ss:$16 sps:$4 sm:$0xff]   ;;  %v15210_v23 = vld [vmem:[#allocation2 + $0x1408] ss:$16 sps:$4 sm:$0xff]  }
 0x28e   :  { %10217 = vmatprep.mubr.bf16.mxu0 %v15206_v24  ;;  %11292 = vmatprep.mubr.bf16.mxu1 %v15206_v24  ;;  %v15215_v24 = vld [vmem:[#allocation2 + $0x1424] ss:$16 sps:$4 sm:$0xff]  }
 0x290   :  { %10188 = vmatpush1.bf16.msra.mxu0 %v15114_v25  ;;  %11263 = vmatpush1.bf16.msra.mxu1 %v15117_v26  ;;  %v15218_v25 = vld [vmem:[#allocation2 + $0x142c] ss:$16 sps:$4 sm:$0xff]   ;;  %v15305_v26 = vld [vmem:[%s17015_s0 + $0x54] ss:$196 sps:$4 sm:$0xff]  }
 0x291   :  { %10189 = vmatprep.subr.bf16.mxu0 %v15122_v27  ;;  %11264 = vmatprep.subr.bf16.mxu1 %v15125_v28  ;;  %v15213_v27 = vld [vmem:[#allocation2 + $0x1420] ss:$16 sps:$4 sm:$0xff]   ;;  %v15216_v28 = vld [vmem:[#allocation2 + $0x1428] ss:$16 sps:$4 sm:$0xff]  }
 0x294   :  { %10190 = vmatpush1.bf16.msra.mxu0 %v15120_v29  ;;  %11265 = vmatpush1.bf16.msra.mxu1 %v15123_v30  ;;  %v15221_v29 = vld [vmem:[#allocation2 + $0x1444] ss:$16 sps:$4 sm:$0xff]   ;;  %v15224_v30 = vld [vmem:[#allocation2 + $0x144c] ss:$16 sps:$4 sm:$0xff]  }
 0x295   :  { %10191 = vmatprep.subr.bf16.mxu0 %v15128_v31  ;;  %11266 = vmatprep.subr.bf16.mxu1 %v15131_v32  ;;  %v15219_v31 = vld [vmem:[#allocation2 + $0x1440] ss:$16 sps:$4 sm:$0xff]   ;;  %v15222_v32 = vld [vmem:[#allocation2 + $0x1448] ss:$16 sps:$4 sm:$0xff]  }
 0x298   :  { %10192 = vmatpush1.bf16.msra.mxu0 %v15126_v33  ;;  %11267 = vmatpush1.bf16.msra.mxu1 %v15129_v34  ;;  %v15227_v33 = vld [vmem:[#allocation2 + $0x1464] ss:$16 sps:$4 sm:$0xff]   ;;  %v15230_v34 = vld [vmem:[#allocation2 + $0x146c] ss:$16 sps:$4 sm:$0xff]  }
 0x299   :  { %10193 = vmatprep.subr.bf16.mxu0 %v15134_v35  ;;  %11268 = vmatprep.subr.bf16.mxu1 %v15137_v36  ;;  %v15225_v35 = vld [vmem:[#allocation2 + $0x1460] ss:$16 sps:$4 sm:$0xff]   ;;  %v15228_v36 = vld [vmem:[#allocation2 + $0x1468] ss:$16 sps:$4 sm:$0xff]  }
 0x29c   :  { %10194 = vmatpush1.bf16.msra.mxu0 %v15132_v37  ;;  %11269 = vmatpush1.bf16.msra.mxu1 %v15135_v38  ;;  %v15233_v37 = vld [vmem:[#allocation2 + $0x1484] ss:$16 sps:$4 sm:$0xff]   ;;  %v15236_v38 = vld [vmem:[#allocation2 + $0x148c] ss:$16 sps:$4 sm:$0xff]  }
 0x29d   :  { %10195 = vmatprep.subr.bf16.mxu0 %v15140_v39  ;;  %11270 = vmatprep.subr.bf16.mxu1 %v15143_v40  ;;  %v15231_v39 = vld [vmem:[#allocation2 + $0x1480] ss:$16 sps:$4 sm:$0xff]   ;;  %v15234_v40 = vld [vmem:[#allocation2 + $0x1488] ss:$16 sps:$4 sm:$0xff]  }
 0x2a0   :  { %10196 = vmatpush1.bf16.msra.mxu0 %v15138_v41  ;;  %11271 = vmatpush1.bf16.msra.mxu1 %v15141_v42  ;;  %v15239_v41 = vld [vmem:[#allocation2 + $0x14a4] ss:$16 sps:$4 sm:$0xff]   ;;  %v15242_v42 = vld [vmem:[#allocation2 + $0x14ac] ss:$16 sps:$4 sm:$0xff]  }
 0x2a1   :  { %10197 = vmatprep.subr.bf16.mxu0 %v15146_v43  ;;  %11272 = vmatprep.subr.bf16.mxu1 %v15149_v44  ;;  %v15237_v43 = vld [vmem:[#allocation2 + $0x14a0] ss:$16 sps:$4 sm:$0xff]   ;;  %v15240_v44 = vld [vmem:[#allocation2 + $0x14a8] ss:$16 sps:$4 sm:$0xff]  }
 0x2a4   :  { %10198 = vmatpush1.bf16.msra.mxu0 %v15144_v45  ;;  %11273 = vmatpush1.bf16.msra.mxu1 %v15147_v46  ;;  %v15245_v45 = vld [vmem:[#allocation2 + $0x14c4] ss:$16 sps:$4 sm:$0xff]   ;;  %v15248_v46 = vld [vmem:[#allocation2 + $0x14cc] ss:$16 sps:$4 sm:$0xff]  }
 0x2a5   :  { %10199 = vmatprep.subr.bf16.mxu0 %v15152_v47  ;;  %11274 = vmatprep.subr.bf16.mxu1 %v15155_v48  ;;  %v15243_v47 = vld [vmem:[#allocation2 + $0x14c0] ss:$16 sps:$4 sm:$0xff]   ;;  %v15246_v48 = vld [vmem:[#allocation2 + $0x14c8] ss:$16 sps:$4 sm:$0xff]  }
 0x2a8   :  { %10200 = vmatpush1.bf16.msra.mxu0 %v15150_v49  ;;  %11275 = vmatpush1.bf16.msra.mxu1 %v15153_v50  ;;  %v15251_v49 = vld [vmem:[#allocation2 + $0x14e4] ss:$16 sps:$4 sm:$0xff]   ;;  %v15254_v50 = vld [vmem:[#allocation2 + $0x14ec] ss:$16 sps:$4 sm:$0xff]  }
 0x2a9   :  { %10201 = vmatprep.subr.bf16.mxu0 %v15158_v51  ;;  %11276 = vmatprep.subr.bf16.mxu1 %v15161_v52  ;;  %v15249_v51 = vld [vmem:[#allocation2 + $0x14e0] ss:$16 sps:$4 sm:$0xff]   ;;  %v15252_v52 = vld [vmem:[#allocation2 + $0x14e8] ss:$16 sps:$4 sm:$0xff]  }
 0x2ac   :  { %10202 = vmatpush1.bf16.msra.mxu0 %v15156_v53  ;;  %11277 = vmatpush1.bf16.msra.mxu1 %v15159_v54  ;;  %v15257_v53 = vld [vmem:[#allocation2 + $0x1504] ss:$16 sps:$4 sm:$0xff]   ;;  %v15260_v54 = vld [vmem:[#allocation2 + $0x150c] ss:$16 sps:$4 sm:$0xff]  }
 0x2ad   :  { %10203 = vmatprep.subr.bf16.mxu0 %v15164_v55  ;;  %11278 = vmatprep.subr.bf16.mxu1 %v15167_v56  ;;  %v15255_v55 = vld [vmem:[#allocation2 + $0x1500] ss:$16 sps:$4 sm:$0xff]   ;;  %v15258_v56 = vld [vmem:[#allocation2 + $0x1508] ss:$16 sps:$4 sm:$0xff]  }
 0x2b0   :  { %10204 = vmatpush1.bf16.msra.mxu0 %v15162_v57  ;;  %11279 = vmatpush1.bf16.msra.mxu1 %v15165_v58  ;;  %v15263_v57 = vld [vmem:[#allocation2 + $0x1524] ss:$16 sps:$4 sm:$0xff]   ;;  %v15266_v58 = vld [vmem:[#allocation2 + $0x152c] ss:$16 sps:$4 sm:$0xff]  }
 0x2b1   :  { %10205 = vmatprep.subr.bf16.mxu0 %v15170_v59  ;;  %11280 = vmatprep.subr.bf16.mxu1 %v15173_v60  ;;  %v15261_v59 = vld [vmem:[#allocation2 + $0x1520] ss:$16 sps:$4 sm:$0xff]   ;;  %v15264_v60 = vld [vmem:[#allocation2 + $0x1528] ss:$16 sps:$4 sm:$0xff]  }
 0x2b4   :  { %10206 = vmatpush1.bf16.msra.mxu0 %v15168_v61  ;;  %11281 = vmatpush1.bf16.msra.mxu1 %v15171_v62  ;;  %v15269_v61 = vld [vmem:[#allocation2 + $0x1544] ss:$16 sps:$4 sm:$0xff]   ;;  %v15272_v62 = vld [vmem:[#allocation2 + $0x154c] ss:$16 sps:$4 sm:$0xff]  }
 0x2b5   :  { %10207 = vmatprep.subr.bf16.mxu0 %v15176_v63  ;;  %11282 = vmatprep.subr.bf16.mxu1 %v15179_v0  ;;  %v15267_v63 = vld [vmem:[#allocation2 + $0x1540] ss:$16 sps:$4 sm:$0xff]   ;;  %v15270_v0 = vld [vmem:[#allocation2 + $0x1548] ss:$16 sps:$4 sm:$0xff]  }
 0x2b8   :  { %10208 = vmatpush1.bf16.msra.mxu0 %v15174_v1  ;;  %11283 = vmatpush1.bf16.msra.mxu1 %v15177_v2  ;;  %v15275_v1 = vld [vmem:[#allocation2 + $0x1564] ss:$16 sps:$4 sm:$0xff]   ;;  %v15278_v2 = vld [vmem:[#allocation2 + $0x156c] ss:$16 sps:$4 sm:$0xff]  }
 0x2b9   :  { %10209 = vmatprep.subr.bf16.mxu0 %v15182_v3  ;;  %11284 = vmatprep.subr.bf16.mxu1 %v15185_v4  ;;  %v15273_v3 = vld [vmem:[#allocation2 + $0x1560] ss:$16 sps:$4 sm:$0xff]   ;;  %v15276_v4 = vld [vmem:[#allocation2 + $0x1568] ss:$16 sps:$4 sm:$0xff]  }
 0x2bc   :  { %10210 = vmatpush1.bf16.msra.mxu0 %v15180_v5  ;;  %11285 = vmatpush1.bf16.msra.mxu1 %v15183_v6  ;;  %v15281_v5 = vld [vmem:[#allocation2 + $0x1584] ss:$16 sps:$4 sm:$0xff]   ;;  %v15284_v6 = vld [vmem:[#allocation2 + $0x158c] ss:$16 sps:$4 sm:$0xff]  }
 0x2bd   :  { %10211 = vmatprep.subr.bf16.mxu0 %v15188_v7  ;;  %11286 = vmatprep.subr.bf16.mxu1 %v15191_v8  ;;  %v15279_v7 = vld [vmem:[#allocation2 + $0x1580] ss:$16 sps:$4 sm:$0xff]   ;;  %v15282_v8 = vld [vmem:[#allocation2 + $0x1588] ss:$16 sps:$4 sm:$0xff]  }
 0x2c0   :  { %10212 = vmatpush1.bf16.msra.mxu0 %v15186_v9  ;;  %11287 = vmatpush1.bf16.msra.mxu1 %v15189_v10  ;;  %v15287_v9 = vld [vmem:[#allocation2 + $0x15a4] ss:$16 sps:$4 sm:$0xff]   ;;  %v15290_v10 = vld [vmem:[#allocation2 + $0x15ac] ss:$16 sps:$4 sm:$0xff]  }
 0x2c1   :  { %10213 = vmatprep.subr.bf16.mxu0 %v15194_v11  ;;  %11288 = vmatprep.subr.bf16.mxu1 %v15197_v12  ;;  %v15285_v11 = vld [vmem:[#allocation2 + $0x15a0] ss:$16 sps:$4 sm:$0xff]   ;;  %v15288_v12 = vld [vmem:[#allocation2 + $0x15a8] ss:$16 sps:$4 sm:$0xff]  }
 0x2c4   :  { %10214 = vmatpush1.bf16.msra.mxu0 %v15192_v13  ;;  %11289 = vmatpush1.bf16.msra.mxu1 %v15195_v14  ;;  %v15293_v13 = vld [vmem:[#allocation2 + $0x15c4] ss:$16 sps:$4 sm:$0xff]   ;;  %v15296_v14 = vld [vmem:[#allocation2 + $0x15cc] ss:$16 sps:$4 sm:$0xff]  }
 0x2c5   :  { %10215 = vmatprep.subr.bf16.mxu0 %v15200_v15  ;;  %11290 = vmatprep.subr.bf16.mxu1 %v15203_v16  ;;  %v15291_v15 = vld [vmem:[#allocation2 + $0x15c0] ss:$16 sps:$4 sm:$0xff]   ;;  %v15294_v16 = vld [vmem:[#allocation2 + $0x15c8] ss:$16 sps:$4 sm:$0xff]  }
 0x2c8   :  { %10216 = vmatpush1.bf16.msra.mxu0 %v15198_v17  ;;  %11291 = vmatpush1.bf16.msra.mxu1 %v15201_v18  ;;  %v15299_v17 = vld [vmem:[#allocation2 + $0x15e4] ss:$16 sps:$4 sm:$0xff]   ;;  %v15302_v18 = vld [vmem:[#allocation2 + $0x15ec] ss:$16 sps:$4 sm:$0xff]  }
 0x2c9   :  { %10228 = vmatprep.subr.bf16.mxu0 %v15209_v20  ;;  %11303 = vmatprep.subr.bf16.mxu1 %v15212_v21  ;;  %v15300_v20 = vld [vmem:[#allocation2 + $0x15e8] ss:$16 sps:$4 sm:$0xff]   ;;  %v15303_v21 = vld [vmem:[%s17015_s0 + $0x50] ss:$196 sps:$4 sm:$0xff]  }
 0x2cb   :  { %10218 = vmatmul.mubr.bf16.vlgmr.msra.gmra.mrb[0].mxu0 %v15204_v19  ;;  %11293 = vmatmul.mubr.bf16.vlgmr.msra.gmra.mrb[0].mxu1 %v15204_v19  ;;  %v15297_v19 = vld [vmem:[#allocation2 + $0x15e0] ss:$16 sps:$4 sm:$0xff]  }
 0x2cc   :  { %10229 = vmatpush1.bf16.msra.mxu0 %v15207_v22  ;;  %11304 = vmatpush1.bf16.msra.mxu1 %v15210_v23  ;;  %v15308_v22 = vld [vmem:[#allocation2 + $0x1604] ss:$16 sps:$4 sm:$0xff]   ;;  %v15311_v23 = vld [vmem:[#allocation2 + $0x160c] ss:$16 sps:$4 sm:$0xff]  }
 0x2cd   :  { %10230 = vmatprep.subr.bf16.mxu0 %v15215_v24  ;;  %11305 = vmatprep.subr.bf16.mxu1 %v15218_v25  ;;  %v15306_v24 = vld [vmem:[#allocation2 + $0x1600] ss:$16 sps:$4 sm:$0xff]   ;;  %v15309_v25 = vld [vmem:[#allocation2 + $0x1608] ss:$16 sps:$4 sm:$0xff]  }
 0x2ce   :  { %10260 = vmatprep.mubr.bf16.mxu0 %v15305_v26  ;;  %11335 = vmatprep.mubr.bf16.mxu1 %v15305_v26  ;;  %v15314_v26 = vld [vmem:[#allocation2 + $0x1624] ss:$16 sps:$4 sm:$0xff]  }
 0x2d0   :  { %10231 = vmatpush1.bf16.msra.mxu0 %v15213_v27  ;;  %11306 = vmatpush1.bf16.msra.mxu1 %v15216_v28  ;;  %v15317_v27 = vld [vmem:[#allocation2 + $0x162c] ss:$16 sps:$4 sm:$0xff]  }
 0x2d1   :  { %10232 = vmatprep.subr.bf16.mxu0 %v15221_v29  ;;  %11307 = vmatprep.subr.bf16.mxu1 %v15224_v30  ;;  %v15404_v28 = vld [vmem:[%s17015_s0 + $0x5c] ss:$196 sps:$4 sm:$0xff]   ;;  %v15315_v30 = vld [vmem:[#allocation2 + $0x1628] ss:$16 sps:$4 sm:$0xff]  }
 0x2d2   :  { %v15312_v29 = vld [vmem:[#allocation2 + $0x1620] ss:$16 sps:$4 sm:$0xff]  }
 0x2d4   :  { %10233 = vmatpush1.bf16.msra.mxu0 %v15219_v31  ;;  %11308 = vmatpush1.bf16.msra.mxu1 %v15222_v32  ;;  %v15320_v31 = vld [vmem:[#allocation2 + $0x1644] ss:$16 sps:$4 sm:$0xff]   ;;  %v15323_v32 = vld [vmem:[#allocation2 + $0x164c] ss:$16 sps:$4 sm:$0xff]  }
 0x2d5   :  { %10234 = vmatprep.subr.bf16.mxu0 %v15227_v33  ;;  %11309 = vmatprep.subr.bf16.mxu1 %v15230_v34  ;;  %v15318_v33 = vld [vmem:[#allocation2 + $0x1640] ss:$16 sps:$4 sm:$0xff]   ;;  %v15321_v34 = vld [vmem:[#allocation2 + $0x1648] ss:$16 sps:$4 sm:$0xff]  }
 0x2d8   :  { %10235 = vmatpush1.bf16.msra.mxu0 %v15225_v35  ;;  %11310 = vmatpush1.bf16.msra.mxu1 %v15228_v36  ;;  %v15326_v35 = vld [vmem:[#allocation2 + $0x1664] ss:$16 sps:$4 sm:$0xff]   ;;  %v15329_v36 = vld [vmem:[#allocation2 + $0x166c] ss:$16 sps:$4 sm:$0xff]  }
 0x2d9   :  { %10236 = vmatprep.subr.bf16.mxu0 %v15233_v37  ;;  %11311 = vmatprep.subr.bf16.mxu1 %v15236_v38  ;;  %v15324_v37 = vld [vmem:[#allocation2 + $0x1660] ss:$16 sps:$4 sm:$0xff]   ;;  %v15327_v38 = vld [vmem:[#allocation2 + $0x1668] ss:$16 sps:$4 sm:$0xff]  }
 0x2dc   :  { %10237 = vmatpush1.bf16.msra.mxu0 %v15231_v39  ;;  %11312 = vmatpush1.bf16.msra.mxu1 %v15234_v40  ;;  %v15332_v39 = vld [vmem:[#allocation2 + $0x1684] ss:$16 sps:$4 sm:$0xff]   ;;  %v15335_v40 = vld [vmem:[#allocation2 + $0x168c] ss:$16 sps:$4 sm:$0xff]  }
 0x2dd   :  { %10238 = vmatprep.subr.bf16.mxu0 %v15239_v41  ;;  %11313 = vmatprep.subr.bf16.mxu1 %v15242_v42  ;;  %v15330_v41 = vld [vmem:[#allocation2 + $0x1680] ss:$16 sps:$4 sm:$0xff]   ;;  %v15333_v42 = vld [vmem:[#allocation2 + $0x1688] ss:$16 sps:$4 sm:$0xff]  }
 0x2e0   :  { %10239 = vmatpush1.bf16.msra.mxu0 %v15237_v43  ;;  %11314 = vmatpush1.bf16.msra.mxu1 %v15240_v44  ;;  %v15338_v43 = vld [vmem:[#allocation2 + $0x16a4] ss:$16 sps:$4 sm:$0xff]   ;;  %v15341_v44 = vld [vmem:[#allocation2 + $0x16ac] ss:$16 sps:$4 sm:$0xff]  }
 0x2e1   :  { %10240 = vmatprep.subr.bf16.mxu0 %v15245_v45  ;;  %11315 = vmatprep.subr.bf16.mxu1 %v15248_v46  ;;  %v15336_v45 = vld [vmem:[#allocation2 + $0x16a0] ss:$16 sps:$4 sm:$0xff]   ;;  %v15339_v46 = vld [vmem:[#allocation2 + $0x16a8] ss:$16 sps:$4 sm:$0xff]  }
 0x2e4   :  { %10241 = vmatpush1.bf16.msra.mxu0 %v15243_v47  ;;  %11316 = vmatpush1.bf16.msra.mxu1 %v15246_v48  ;;  %v15344_v47 = vld [vmem:[#allocation2 + $0x16c4] ss:$16 sps:$4 sm:$0xff]   ;;  %v15347_v48 = vld [vmem:[#allocation2 + $0x16cc] ss:$16 sps:$4 sm:$0xff]  }
 0x2e5   :  { %10242 = vmatprep.subr.bf16.mxu0 %v15251_v49  ;;  %11317 = vmatprep.subr.bf16.mxu1 %v15254_v50  ;;  %v15342_v49 = vld [vmem:[#allocation2 + $0x16c0] ss:$16 sps:$4 sm:$0xff]   ;;  %v15345_v50 = vld [vmem:[#allocation2 + $0x16c8] ss:$16 sps:$4 sm:$0xff]  }
 0x2e8   :  { %10243 = vmatpush1.bf16.msra.mxu0 %v15249_v51  ;;  %11318 = vmatpush1.bf16.msra.mxu1 %v15252_v52  ;;  %v15350_v51 = vld [vmem:[#allocation2 + $0x16e4] ss:$16 sps:$4 sm:$0xff]   ;;  %v15353_v52 = vld [vmem:[#allocation2 + $0x16ec] ss:$16 sps:$4 sm:$0xff]  }
 0x2e9   :  { %10244 = vmatprep.subr.bf16.mxu0 %v15257_v53  ;;  %11319 = vmatprep.subr.bf16.mxu1 %v15260_v54  ;;  %v15348_v53 = vld [vmem:[#allocation2 + $0x16e0] ss:$16 sps:$4 sm:$0xff]   ;;  %v15351_v54 = vld [vmem:[#allocation2 + $0x16e8] ss:$16 sps:$4 sm:$0xff]  }
 0x2ec   :  { %10245 = vmatpush1.bf16.msra.mxu0 %v15255_v55  ;;  %11320 = vmatpush1.bf16.msra.mxu1 %v15258_v56  ;;  %v15356_v55 = vld [vmem:[#allocation2 + $0x1704] ss:$16 sps:$4 sm:$0xff]   ;;  %v15359_v56 = vld [vmem:[#allocation2 + $0x170c] ss:$16 sps:$4 sm:$0xff]  }
 0x2ed   :  { %10246 = vmatprep.subr.bf16.mxu0 %v15263_v57  ;;  %11321 = vmatprep.subr.bf16.mxu1 %v15266_v58  ;;  %v15354_v57 = vld [vmem:[#allocation2 + $0x1700] ss:$16 sps:$4 sm:$0xff]   ;;  %v15357_v58 = vld [vmem:[#allocation2 + $0x1708] ss:$16 sps:$4 sm:$0xff]  }
 0x2f0   :  { %10247 = vmatpush1.bf16.msra.mxu0 %v15261_v59  ;;  %11322 = vmatpush1.bf16.msra.mxu1 %v15264_v60  ;;  %v15362_v59 = vld [vmem:[#allocation2 + $0x1724] ss:$16 sps:$4 sm:$0xff]   ;;  %v15365_v60 = vld [vmem:[#allocation2 + $0x172c] ss:$16 sps:$4 sm:$0xff]  }
 0x2f1   :  { %10248 = vmatprep.subr.bf16.mxu0 %v15269_v61  ;;  %11323 = vmatprep.subr.bf16.mxu1 %v15272_v62  ;;  %v15360_v61 = vld [vmem:[#allocation2 + $0x1720] ss:$16 sps:$4 sm:$0xff]   ;;  %v15363_v62 = vld [vmem:[#allocation2 + $0x1728] ss:$16 sps:$4 sm:$0xff]  }
 0x2f4   :  { %10249 = vmatpush1.bf16.msra.mxu0 %v15267_v63  ;;  %11324 = vmatpush1.bf16.msra.mxu1 %v15270_v0  ;;  %v15368_v63 = vld [vmem:[#allocation2 + $0x1744] ss:$16 sps:$4 sm:$0xff]   ;;  %v15371_v0 = vld [vmem:[#allocation2 + $0x174c] ss:$16 sps:$4 sm:$0xff]  }
 0x2f5   :  { %10250 = vmatprep.subr.bf16.mxu0 %v15275_v1  ;;  %11325 = vmatprep.subr.bf16.mxu1 %v15278_v2  ;;  %v15366_v1 = vld [vmem:[#allocation2 + $0x1740] ss:$16 sps:$4 sm:$0xff]   ;;  %v15369_v2 = vld [vmem:[#allocation2 + $0x1748] ss:$16 sps:$4 sm:$0xff]  }
 0x2f8   :  { %10251 = vmatpush1.bf16.msra.mxu0 %v15273_v3  ;;  %11326 = vmatpush1.bf16.msra.mxu1 %v15276_v4  ;;  %v15374_v3 = vld [vmem:[#allocation2 + $0x1764] ss:$16 sps:$4 sm:$0xff]   ;;  %v15377_v4 = vld [vmem:[#allocation2 + $0x176c] ss:$16 sps:$4 sm:$0xff]  }
 0x2f9   :  { %10252 = vmatprep.subr.bf16.mxu0 %v15281_v5  ;;  %11327 = vmatprep.subr.bf16.mxu1 %v15284_v6  ;;  %v15372_v5 = vld [vmem:[#allocation2 + $0x1760] ss:$16 sps:$4 sm:$0xff]   ;;  %v15375_v6 = vld [vmem:[#allocation2 + $0x1768] ss:$16 sps:$4 sm:$0xff]  }
 0x2fc   :  { %10253 = vmatpush1.bf16.msra.mxu0 %v15279_v7  ;;  %11328 = vmatpush1.bf16.msra.mxu1 %v15282_v8  ;;  %v15380_v7 = vld [vmem:[#allocation2 + $0x1784] ss:$16 sps:$4 sm:$0xff]   ;;  %v15383_v8 = vld [vmem:[#allocation2 + $0x178c] ss:$16 sps:$4 sm:$0xff]  }
 0x2fd   :  { %10254 = vmatprep.subr.bf16.mxu0 %v15287_v9  ;;  %11329 = vmatprep.subr.bf16.mxu1 %v15290_v10  ;;  %v15378_v9 = vld [vmem:[#allocation2 + $0x1780] ss:$16 sps:$4 sm:$0xff]   ;;  %v15381_v10 = vld [vmem:[#allocation2 + $0x1788] ss:$16 sps:$4 sm:$0xff]  }
 0x300   :  { %10255 = vmatpush1.bf16.msra.mxu0 %v15285_v11  ;;  %11330 = vmatpush1.bf16.msra.mxu1 %v15288_v12  ;;  %v15386_v11 = vld [vmem:[#allocation2 + $0x17a4] ss:$16 sps:$4 sm:$0xff]   ;;  %v15389_v12 = vld [vmem:[#allocation2 + $0x17ac] ss:$16 sps:$4 sm:$0xff]  }
 0x301   :  { %10256 = vmatprep.subr.bf16.mxu0 %v15293_v13  ;;  %11331 = vmatprep.subr.bf16.mxu1 %v15296_v14  ;;  %v15384_v13 = vld [vmem:[#allocation2 + $0x17a0] ss:$16 sps:$4 sm:$0xff]   ;;  %v15387_v14 = vld [vmem:[#allocation2 + $0x17a8] ss:$16 sps:$4 sm:$0xff]  }
 0x304   :  { %10257 = vmatpush1.bf16.msra.mxu0 %v15291_v15  ;;  %11332 = vmatpush1.bf16.msra.mxu1 %v15294_v16  ;;  %v15392_v15 = vld [vmem:[#allocation2 + $0x17c4] ss:$16 sps:$4 sm:$0xff]   ;;  %v15395_v16 = vld [vmem:[#allocation2 + $0x17cc] ss:$16 sps:$4 sm:$0xff]  }
 0x305   :  { %10258 = vmatprep.subr.bf16.mxu0 %v15299_v17  ;;  %11333 = vmatprep.subr.bf16.mxu1 %v15302_v18  ;;  %v15390_v17 = vld [vmem:[#allocation2 + $0x17c0] ss:$16 sps:$4 sm:$0xff]   ;;  %v15393_v18 = vld [vmem:[#allocation2 + $0x17c8] ss:$16 sps:$4 sm:$0xff]  }
 0x308   :  { %10259 = vmatpush1.bf16.msra.mxu0 %v15297_v19  ;;  %11334 = vmatpush1.bf16.msra.mxu1 %v15300_v20  ;;  %v15398_v19 = vld [vmem:[#allocation2 + $0x17e4] ss:$16 sps:$4 sm:$0xff]   ;;  %v15401_v20 = vld [vmem:[#allocation2 + $0x17ec] ss:$16 sps:$4 sm:$0xff]  }
 0x309   :  { %10271 = vmatprep.subr.bf16.mxu0 %v15308_v22  ;;  %11346 = vmatprep.subr.bf16.mxu1 %v15311_v23  ;;  %v15399_v22 = vld [vmem:[#allocation2 + $0x17e8] ss:$16 sps:$4 sm:$0xff]  }
 0x30a   :  { %v15402_v23 = vld [vmem:[%s17015_s0 + $0x58] ss:$196 sps:$4 sm:$0xff]  }
 0x30b   :  { %10261 = vmatmul.mubr.bf16.vlgmr.msra.gmra.mrb[0].mxu0 %v15303_v21  ;;  %11336 = vmatmul.mubr.bf16.vlgmr.msra.gmra.mrb[0].mxu1 %v15303_v21  ;;  %v15396_v21 = vld [vmem:[#allocation2 + $0x17e0] ss:$16 sps:$4 sm:$0xff]  }
 0x30c   :  { %10272 = vmatpush1.bf16.msra.mxu0 %v15306_v24  ;;  %11347 = vmatpush1.bf16.msra.mxu1 %v15309_v25  ;;  %v15407_v24 = vld [vmem:[#allocation2 + $0x1804] ss:$16 sps:$4 sm:$0xff]   ;;  %v15410_v25 = vld [vmem:[#allocation2 + $0x180c] ss:$16 sps:$4 sm:$0xff]  }
 0x30d   :  { %10273 = vmatprep.subr.bf16.mxu0 %v15314_v26  ;;  %11348 = vmatprep.subr.bf16.mxu1 %v15317_v27  ;;  %v15405_v26 = vld [vmem:[#allocation2 + $0x1800] ss:$16 sps:$4 sm:$0xff]   ;;  %v15408_v27 = vld [vmem:[#allocation2 + $0x1808] ss:$16 sps:$4 sm:$0xff]  }
 0x30e   :  { %10303 = vmatprep.mubr.bf16.mxu0 %v15404_v28  ;;  %11378 = vmatprep.mubr.bf16.mxu1 %v15404_v28  ;;  %v15413_v28 = vld [vmem:[#allocation2 + $0x1824] ss:$16 sps:$4 sm:$0xff]  }
 0x310   :  { %10274 = vmatpush1.bf16.msra.mxu0 %v15312_v29  ;;  %11349 = vmatpush1.bf16.msra.mxu1 %v15315_v30  ;;  %v15416_v29 = vld [vmem:[#allocation2 + $0x182c] ss:$16 sps:$4 sm:$0xff]   ;;  %v15503_v30 = vld [vmem:[%s17015_s0 + $0x64] ss:$196 sps:$4 sm:$0xff]  }
 0x311   :  { %10275 = vmatprep.subr.bf16.mxu0 %v15320_v31  ;;  %11350 = vmatprep.subr.bf16.mxu1 %v15323_v32  ;;  %v15411_v31 = vld [vmem:[#allocation2 + $0x1820] ss:$16 sps:$4 sm:$0xff]   ;;  %v15414_v32 = vld [vmem:[#allocation2 + $0x1828] ss:$16 sps:$4 sm:$0xff]  }
 0x314   :  { %10276 = vmatpush1.bf16.msra.mxu0 %v15318_v33  ;;  %11351 = vmatpush1.bf16.msra.mxu1 %v15321_v34  ;;  %v15419_v33 = vld [vmem:[#allocation2 + $0x1844] ss:$16 sps:$4 sm:$0xff]   ;;  %v15422_v34 = vld [vmem:[#allocation2 + $0x184c] ss:$16 sps:$4 sm:$0xff]  }
 0x315   :  { %10277 = vmatprep.subr.bf16.mxu0 %v15326_v35  ;;  %11352 = vmatprep.subr.bf16.mxu1 %v15329_v36  ;;  %v15417_v35 = vld [vmem:[#allocation2 + $0x1840] ss:$16 sps:$4 sm:$0xff]   ;;  %v15420_v36 = vld [vmem:[#allocation2 + $0x1848] ss:$16 sps:$4 sm:$0xff]  }
 0x318   :  { %10278 = vmatpush1.bf16.msra.mxu0 %v15324_v37  ;;  %11353 = vmatpush1.bf16.msra.mxu1 %v15327_v38  ;;  %v15425_v37 = vld [vmem:[#allocation2 + $0x1864] ss:$16 sps:$4 sm:$0xff]   ;;  %v15428_v38 = vld [vmem:[#allocation2 + $0x186c] ss:$16 sps:$4 sm:$0xff]  }
 0x319   :  { %10279 = vmatprep.subr.bf16.mxu0 %v15332_v39  ;;  %11354 = vmatprep.subr.bf16.mxu1 %v15335_v40  ;;  %v15423_v39 = vld [vmem:[#allocation2 + $0x1860] ss:$16 sps:$4 sm:$0xff]   ;;  %v15426_v40 = vld [vmem:[#allocation2 + $0x1868] ss:$16 sps:$4 sm:$0xff]  }
 0x31c   :  { %10280 = vmatpush1.bf16.msra.mxu0 %v15330_v41  ;;  %11355 = vmatpush1.bf16.msra.mxu1 %v15333_v42  ;;  %v15431_v41 = vld [vmem:[#allocation2 + $0x1884] ss:$16 sps:$4 sm:$0xff]   ;;  %v15434_v42 = vld [vmem:[#allocation2 + $0x188c] ss:$16 sps:$4 sm:$0xff]  }
 0x31d   :  { %10281 = vmatprep.subr.bf16.mxu0 %v15338_v43  ;;  %11356 = vmatprep.subr.bf16.mxu1 %v15341_v44  ;;  %v15429_v43 = vld [vmem:[#allocation2 + $0x1880] ss:$16 sps:$4 sm:$0xff]   ;;  %v15432_v44 = vld [vmem:[#allocation2 + $0x1888] ss:$16 sps:$4 sm:$0xff]  }
 0x320   :  { %10282 = vmatpush1.bf16.msra.mxu0 %v15336_v45  ;;  %11357 = vmatpush1.bf16.msra.mxu1 %v15339_v46  ;;  %v15437_v45 = vld [vmem:[#allocation2 + $0x18a4] ss:$16 sps:$4 sm:$0xff]   ;;  %v15440_v46 = vld [vmem:[#allocation2 + $0x18ac] ss:$16 sps:$4 sm:$0xff]  }
 0x321   :  { %10283 = vmatprep.subr.bf16.mxu0 %v15344_v47  ;;  %11358 = vmatprep.subr.bf16.mxu1 %v15347_v48  ;;  %v15435_v47 = vld [vmem:[#allocation2 + $0x18a0] ss:$16 sps:$4 sm:$0xff]   ;;  %v15438_v48 = vld [vmem:[#allocation2 + $0x18a8] ss:$16 sps:$4 sm:$0xff]  }
 0x324   :  { %10284 = vmatpush1.bf16.msra.mxu0 %v15342_v49  ;;  %11359 = vmatpush1.bf16.msra.mxu1 %v15345_v50  ;;  %v15443_v49 = vld [vmem:[#allocation2 + $0x18c4] ss:$16 sps:$4 sm:$0xff]   ;;  %v15446_v50 = vld [vmem:[#allocation2 + $0x18cc] ss:$16 sps:$4 sm:$0xff]  }
 0x325   :  { %10285 = vmatprep.subr.bf16.mxu0 %v15350_v51  ;;  %11360 = vmatprep.subr.bf16.mxu1 %v15353_v52  ;;  %v15441_v51 = vld [vmem:[#allocation2 + $0x18c0] ss:$16 sps:$4 sm:$0xff]   ;;  %v15444_v52 = vld [vmem:[#allocation2 + $0x18c8] ss:$16 sps:$4 sm:$0xff]  }
 0x328   :  { %10286 = vmatpush1.bf16.msra.mxu0 %v15348_v53  ;;  %11361 = vmatpush1.bf16.msra.mxu1 %v15351_v54  ;;  %v15449_v53 = vld [vmem:[#allocation2 + $0x18e4] ss:$16 sps:$4 sm:$0xff]   ;;  %v15452_v54 = vld [vmem:[#allocation2 + $0x18ec] ss:$16 sps:$4 sm:$0xff]  }
 0x329   :  { %10287 = vmatprep.subr.bf16.mxu0 %v15356_v55  ;;  %11362 = vmatprep.subr.bf16.mxu1 %v15359_v56  ;;  %v15447_v55 = vld [vmem:[#allocation2 + $0x18e0] ss:$16 sps:$4 sm:$0xff]   ;;  %v15450_v56 = vld [vmem:[#allocation2 + $0x18e8] ss:$16 sps:$4 sm:$0xff]  }
 0x32c   :  { %10288 = vmatpush1.bf16.msra.mxu0 %v15354_v57  ;;  %11363 = vmatpush1.bf16.msra.mxu1 %v15357_v58  ;;  %v15455_v57 = vld [vmem:[#allocation2 + $0x1904] ss:$16 sps:$4 sm:$0xff]   ;;  %v15458_v58 = vld [vmem:[#allocation2 + $0x190c] ss:$16 sps:$4 sm:$0xff]  }
 0x32d   :  { %10289 = vmatprep.subr.bf16.mxu0 %v15362_v59  ;;  %11364 = vmatprep.subr.bf16.mxu1 %v15365_v60  ;;  %v15453_v59 = vld [vmem:[#allocation2 + $0x1900] ss:$16 sps:$4 sm:$0xff]   ;;  %v15456_v60 = vld [vmem:[#allocation2 + $0x1908] ss:$16 sps:$4 sm:$0xff]  }
 0x330   :  { %10290 = vmatpush1.bf16.msra.mxu0 %v15360_v61  ;;  %11365 = vmatpush1.bf16.msra.mxu1 %v15363_v62  ;;  %v15461_v61 = vld [vmem:[#allocation2 + $0x1924] ss:$16 sps:$4 sm:$0xff]   ;;  %v15464_v62 = vld [vmem:[#allocation2 + $0x192c] ss:$16 sps:$4 sm:$0xff]  }
 0x331   :  { %10291 = vmatprep.subr.bf16.mxu0 %v15368_v63  ;;  %11366 = vmatprep.subr.bf16.mxu1 %v15371_v0  ;;  %v15459_v63 = vld [vmem:[#allocation2 + $0x1920] ss:$16 sps:$4 sm:$0xff]   ;;  %v15462_v0 = vld [vmem:[#allocation2 + $0x1928] ss:$16 sps:$4 sm:$0xff]  }
 0x334   :  { %10292 = vmatpush1.bf16.msra.mxu0 %v15366_v1  ;;  %11367 = vmatpush1.bf16.msra.mxu1 %v15369_v2  ;;  %v15467_v1 = vld [vmem:[#allocation2 + $0x1944] ss:$16 sps:$4 sm:$0xff]   ;;  %v15470_v2 = vld [vmem:[#allocation2 + $0x194c] ss:$16 sps:$4 sm:$0xff]  }
 0x335   :  { %10293 = vmatprep.subr.bf16.mxu0 %v15374_v3  ;;  %11368 = vmatprep.subr.bf16.mxu1 %v15377_v4  ;;  %v15465_v3 = vld [vmem:[#allocation2 + $0x1940] ss:$16 sps:$4 sm:$0xff]   ;;  %v15468_v4 = vld [vmem:[#allocation2 + $0x1948] ss:$16 sps:$4 sm:$0xff]  }
 0x338   :  { %10294 = vmatpush1.bf16.msra.mxu0 %v15372_v5  ;;  %11369 = vmatpush1.bf16.msra.mxu1 %v15375_v6  ;;  %v15473_v5 = vld [vmem:[#allocation2 + $0x1964] ss:$16 sps:$4 sm:$0xff]   ;;  %v15476_v6 = vld [vmem:[#allocation2 + $0x196c] ss:$16 sps:$4 sm:$0xff]  }
 0x339   :  { %10295 = vmatprep.subr.bf16.mxu0 %v15380_v7  ;;  %11370 = vmatprep.subr.bf16.mxu1 %v15383_v8  ;;  %v15471_v7 = vld [vmem:[#allocation2 + $0x1960] ss:$16 sps:$4 sm:$0xff]   ;;  %v15474_v8 = vld [vmem:[#allocation2 + $0x1968] ss:$16 sps:$4 sm:$0xff]  }
 0x33c   :  { %10296 = vmatpush1.bf16.msra.mxu0 %v15378_v9  ;;  %11371 = vmatpush1.bf16.msra.mxu1 %v15381_v10  ;;  %v15479_v9 = vld [vmem:[#allocation2 + $0x1984] ss:$16 sps:$4 sm:$0xff]   ;;  %v15482_v10 = vld [vmem:[#allocation2 + $0x198c] ss:$16 sps:$4 sm:$0xff]  }
 0x33d   :  { %10297 = vmatprep.subr.bf16.mxu0 %v15386_v11  ;;  %11372 = vmatprep.subr.bf16.mxu1 %v15389_v12  ;;  %v15477_v11 = vld [vmem:[#allocation2 + $0x1980] ss:$16 sps:$4 sm:$0xff]   ;;  %v15480_v12 = vld [vmem:[#allocation2 + $0x1988] ss:$16 sps:$4 sm:$0xff]  }
 0x340   :  { %10298 = vmatpush1.bf16.msra.mxu0 %v15384_v13  ;;  %11373 = vmatpush1.bf16.msra.mxu1 %v15387_v14  ;;  %v15485_v13 = vld [vmem:[#allocation2 + $0x19a4] ss:$16 sps:$4 sm:$0xff]   ;;  %v15488_v14 = vld [vmem:[#allocation2 + $0x19ac] ss:$16 sps:$4 sm:$0xff]  }
 0x341   :  { %10299 = vmatprep.subr.bf16.mxu0 %v15392_v15  ;;  %11374 = vmatprep.subr.bf16.mxu1 %v15395_v16  ;;  %v15483_v15 = vld [vmem:[#allocation2 + $0x19a0] ss:$16 sps:$4 sm:$0xff]   ;;  %v15486_v16 = vld [vmem:[#allocation2 + $0x19a8] ss:$16 sps:$4 sm:$0xff]  }
 0x344   :  { %10300 = vmatpush1.bf16.msra.mxu0 %v15390_v17  ;;  %11375 = vmatpush1.bf16.msra.mxu1 %v15393_v18  ;;  %v15491_v17 = vld [vmem:[#allocation2 + $0x19c4] ss:$16 sps:$4 sm:$0xff]   ;;  %v15494_v18 = vld [vmem:[#allocation2 + $0x19cc] ss:$16 sps:$4 sm:$0xff]  }
 0x345   :  { %10301 = vmatprep.subr.bf16.mxu0 %v15398_v19  ;;  %11376 = vmatprep.subr.bf16.mxu1 %v15401_v20  ;;  %v15489_v19 = vld [vmem:[#allocation2 + $0x19c0] ss:$16 sps:$4 sm:$0xff]   ;;  %v15492_v20 = vld [vmem:[#allocation2 + $0x19c8] ss:$16 sps:$4 sm:$0xff]  }
 0x348   :  { %10302 = vmatpush1.bf16.msra.mxu0 %v15396_v21  ;;  %11377 = vmatpush1.bf16.msra.mxu1 %v15399_v22  ;;  %v15497_v21 = vld [vmem:[#allocation2 + $0x19e4] ss:$16 sps:$4 sm:$0xff]   ;;  %v15500_v22 = vld [vmem:[#allocation2 + $0x19ec] ss:$16 sps:$4 sm:$0xff]  }
 0x349   :  { %10314 = vmatprep.subr.bf16.mxu0 %v15407_v24  ;;  %11389 = vmatprep.subr.bf16.mxu1 %v15410_v25  ;;  %v15498_v24 = vld [vmem:[#allocation2 + $0x19e8] ss:$16 sps:$4 sm:$0xff]   ;;  %v15501_v25 = vld [vmem:[%s17015_s0 + $0x60] ss:$196 sps:$4 sm:$0xff]  }
 0x34b   :  { %10304 = vmatmul.mubr.bf16.vlgmr.msra.gmra.mrb[0].mxu0 %v15402_v23  ;;  %11379 = vmatmul.mubr.bf16.vlgmr.msra.gmra.mrb[0].mxu1 %v15402_v23  ;;  %v15495_v23 = vld [vmem:[#allocation2 + $0x19e0] ss:$16 sps:$4 sm:$0xff]  }
 0x34c   :  { %10315 = vmatpush1.bf16.msra.mxu0 %v15405_v26  ;;  %11390 = vmatpush1.bf16.msra.mxu1 %v15408_v27  ;;  %v15506_v26 = vld [vmem:[#allocation2 + $0x1a04] ss:$16 sps:$4 sm:$0xff]   ;;  %v15509_v27 = vld [vmem:[#allocation2 + $0x1a0c] ss:$16 sps:$4 sm:$0xff]  }
 0x34d   :  { %10316 = vmatprep.subr.bf16.mxu0 %v15413_v28  ;;  %11391 = vmatprep.subr.bf16.mxu1 %v15416_v29  ;;  %v15504_v28 = vld [vmem:[#allocation2 + $0x1a00] ss:$16 sps:$4 sm:$0xff]   ;;  %v15507_v29 = vld [vmem:[#allocation2 + $0x1a08] ss:$16 sps:$4 sm:$0xff]  }
 0x34e   :  { %10346 = vmatprep.mubr.bf16.mxu0 %v15503_v30  ;;  %11421 = vmatprep.mubr.bf16.mxu1 %v15503_v30  ;;  %v15512_v30 = vld [vmem:[#allocation2 + $0x1a24] ss:$16 sps:$4 sm:$0xff]  }
 0x350   :  { %10317 = vmatpush1.bf16.msra.mxu0 %v15411_v31  ;;  %11392 = vmatpush1.bf16.msra.mxu1 %v15414_v32  ;;  %v15515_v31 = vld [vmem:[#allocation2 + $0x1a2c] ss:$16 sps:$4 sm:$0xff]  }
 0x351   :  { %10318 = vmatprep.subr.bf16.mxu0 %v15419_v33  ;;  %11393 = vmatprep.subr.bf16.mxu1 %v15422_v34  ;;  %v15602_v32 = vld [vmem:[%s17015_s0 + $0x6c] ss:$196 sps:$4 sm:$0xff]   ;;  %v15513_v34 = vld [vmem:[#allocation2 + $0x1a28] ss:$16 sps:$4 sm:$0xff]  }
 0x352   :  { %v15510_v33 = vld [vmem:[#allocation2 + $0x1a20] ss:$16 sps:$4 sm:$0xff]  }
 0x354   :  { %10319 = vmatpush1.bf16.msra.mxu0 %v15417_v35  ;;  %11394 = vmatpush1.bf16.msra.mxu1 %v15420_v36  ;;  %v15518_v35 = vld [vmem:[#allocation2 + $0x1a44] ss:$16 sps:$4 sm:$0xff]   ;;  %v15521_v36 = vld [vmem:[#allocation2 + $0x1a4c] ss:$16 sps:$4 sm:$0xff]  }
 0x355   :  { %10320 = vmatprep.subr.bf16.mxu0 %v15425_v37  ;;  %11395 = vmatprep.subr.bf16.mxu1 %v15428_v38  ;;  %v15516_v37 = vld [vmem:[#allocation2 + $0x1a40] ss:$16 sps:$4 sm:$0xff]   ;;  %v15519_v38 = vld [vmem:[#allocation2 + $0x1a48] ss:$16 sps:$4 sm:$0xff]  }
 0x358   :  { %10321 = vmatpush1.bf16.msra.mxu0 %v15423_v39  ;;  %11396 = vmatpush1.bf16.msra.mxu1 %v15426_v40  ;;  %v15524_v39 = vld [vmem:[#allocation2 + $0x1a64] ss:$16 sps:$4 sm:$0xff]   ;;  %v15527_v40 = vld [vmem:[#allocation2 + $0x1a6c] ss:$16 sps:$4 sm:$0xff]  }
 0x359   :  { %10322 = vmatprep.subr.bf16.mxu0 %v15431_v41  ;;  %11397 = vmatprep.subr.bf16.mxu1 %v15434_v42  ;;  %v15522_v41 = vld [vmem:[#allocation2 + $0x1a60] ss:$16 sps:$4 sm:$0xff]   ;;  %v15525_v42 = vld [vmem:[#allocation2 + $0x1a68] ss:$16 sps:$4 sm:$0xff]  }
 0x35c   :  { %10323 = vmatpush1.bf16.msra.mxu0 %v15429_v43  ;;  %11398 = vmatpush1.bf16.msra.mxu1 %v15432_v44  ;;  %v15530_v43 = vld [vmem:[#allocation2 + $0x1a84] ss:$16 sps:$4 sm:$0xff]   ;;  %v15533_v44 = vld [vmem:[#allocation2 + $0x1a8c] ss:$16 sps:$4 sm:$0xff]  }
 0x35d   :  { %10324 = vmatprep.subr.bf16.mxu0 %v15437_v45  ;;  %11399 = vmatprep.subr.bf16.mxu1 %v15440_v46  ;;  %v15528_v45 = vld [vmem:[#allocation2 + $0x1a80] ss:$16 sps:$4 sm:$0xff]   ;;  %v15531_v46 = vld [vmem:[#allocation2 + $0x1a88] ss:$16 sps:$4 sm:$0xff]  }
 0x360   :  { %10325 = vmatpush1.bf16.msra.mxu0 %v15435_v47  ;;  %11400 = vmatpush1.bf16.msra.mxu1 %v15438_v48  ;;  %v15536_v47 = vld [vmem:[#allocation2 + $0x1aa4] ss:$16 sps:$4 sm:$0xff]   ;;  %v15539_v48 = vld [vmem:[#allocation2 + $0x1aac] ss:$16 sps:$4 sm:$0xff]  }
 0x361   :  { %10326 = vmatprep.subr.bf16.mxu0 %v15443_v49  ;;  %11401 = vmatprep.subr.bf16.mxu1 %v15446_v50  ;;  %v15534_v49 = vld [vmem:[#allocation2 + $0x1aa0] ss:$16 sps:$4 sm:$0xff]   ;;  %v15537_v50 = vld [vmem:[#allocation2 + $0x1aa8] ss:$16 sps:$4 sm:$0xff]  }
 0x364   :  { %10327 = vmatpush1.bf16.msra.mxu0 %v15441_v51  ;;  %11402 = vmatpush1.bf16.msra.mxu1 %v15444_v52  ;;  %v15542_v51 = vld [vmem:[#allocation2 + $0x1ac4] ss:$16 sps:$4 sm:$0xff]   ;;  %v15545_v52 = vld [vmem:[#allocation2 + $0x1acc] ss:$16 sps:$4 sm:$0xff]  }
 0x365   :  { %10328 = vmatprep.subr.bf16.mxu0 %v15449_v53  ;;  %11403 = vmatprep.subr.bf16.mxu1 %v15452_v54  ;;  %v15540_v53 = vld [vmem:[#allocation2 + $0x1ac0] ss:$16 sps:$4 sm:$0xff]   ;;  %v15543_v54 = vld [vmem:[#allocation2 + $0x1ac8] ss:$16 sps:$4 sm:$0xff]  }
 0x368   :  { %10329 = vmatpush1.bf16.msra.mxu0 %v15447_v55  ;;  %11404 = vmatpush1.bf16.msra.mxu1 %v15450_v56  ;;  %v15548_v55 = vld [vmem:[#allocation2 + $0x1ae4] ss:$16 sps:$4 sm:$0xff]   ;;  %v15551_v56 = vld [vmem:[#allocation2 + $0x1aec] ss:$16 sps:$4 sm:$0xff]  }
 0x369   :  { %10330 = vmatprep.subr.bf16.mxu0 %v15455_v57  ;;  %11405 = vmatprep.subr.bf16.mxu1 %v15458_v58  ;;  %v15546_v57 = vld [vmem:[#allocation2 + $0x1ae0] ss:$16 sps:$4 sm:$0xff]   ;;  %v15549_v58 = vld [vmem:[#allocation2 + $0x1ae8] ss:$16 sps:$4 sm:$0xff]  }
 0x36c   :  { %10331 = vmatpush1.bf16.msra.mxu0 %v15453_v59  ;;  %11406 = vmatpush1.bf16.msra.mxu1 %v15456_v60  ;;  %v15554_v59 = vld [vmem:[#allocation2 + $0x1b04] ss:$16 sps:$4 sm:$0xff]   ;;  %v15557_v60 = vld [vmem:[#allocation2 + $0x1b0c] ss:$16 sps:$4 sm:$0xff]  }
 0x36d   :  { %10332 = vmatprep.subr.bf16.mxu0 %v15461_v61  ;;  %11407 = vmatprep.subr.bf16.mxu1 %v15464_v62  ;;  %v15552_v61 = vld [vmem:[#allocation2 + $0x1b00] ss:$16 sps:$4 sm:$0xff]   ;;  %v15555_v62 = vld [vmem:[#allocation2 + $0x1b08] ss:$16 sps:$4 sm:$0xff]  }
 0x370   :  { %10333 = vmatpush1.bf16.msra.mxu0 %v15459_v63  ;;  %11408 = vmatpush1.bf16.msra.mxu1 %v15462_v0  ;;  %v15560_v63 = vld [vmem:[#allocation2 + $0x1b24] ss:$16 sps:$4 sm:$0xff]   ;;  %v15563_v0 = vld [vmem:[#allocation2 + $0x1b2c] ss:$16 sps:$4 sm:$0xff]  }
 0x371   :  { %10334 = vmatprep.subr.bf16.mxu0 %v15467_v1  ;;  %11409 = vmatprep.subr.bf16.mxu1 %v15470_v2  ;;  %v15558_v1 = vld [vmem:[#allocation2 + $0x1b20] ss:$16 sps:$4 sm:$0xff]   ;;  %v15561_v2 = vld [vmem:[#allocation2 + $0x1b28] ss:$16 sps:$4 sm:$0xff]  }
 0x374   :  { %10335 = vmatpush1.bf16.msra.mxu0 %v15465_v3  ;;  %11410 = vmatpush1.bf16.msra.mxu1 %v15468_v4  ;;  %v15566_v3 = vld [vmem:[#allocation2 + $0x1b44] ss:$16 sps:$4 sm:$0xff]   ;;  %v15569_v4 = vld [vmem:[#allocation2 + $0x1b4c] ss:$16 sps:$4 sm:$0xff]  }
 0x375   :  { %10336 = vmatprep.subr.bf16.mxu0 %v15473_v5  ;;  %11411 = vmatprep.subr.bf16.mxu1 %v15476_v6  ;;  %v15564_v5 = vld [vmem:[#allocation2 + $0x1b40] ss:$16 sps:$4 sm:$0xff]   ;;  %v15567_v6 = vld [vmem:[#allocation2 + $0x1b48] ss:$16 sps:$4 sm:$0xff]  }
 0x378   :  { %10337 = vmatpush1.bf16.msra.mxu0 %v15471_v7  ;;  %11412 = vmatpush1.bf16.msra.mxu1 %v15474_v8  ;;  %v15572_v7 = vld [vmem:[#allocation2 + $0x1b64] ss:$16 sps:$4 sm:$0xff]   ;;  %v15575_v8 = vld [vmem:[#allocation2 + $0x1b6c] ss:$16 sps:$4 sm:$0xff]  }
 0x379   :  { %10338 = vmatprep.subr.bf16.mxu0 %v15479_v9  ;;  %11413 = vmatprep.subr.bf16.mxu1 %v15482_v10  ;;  %v15570_v9 = vld [vmem:[#allocation2 + $0x1b60] ss:$16 sps:$4 sm:$0xff]   ;;  %v15573_v10 = vld [vmem:[#allocation2 + $0x1b68] ss:$16 sps:$4 sm:$0xff]  }
 0x37c   :  { %10339 = vmatpush1.bf16.msra.mxu0 %v15477_v11  ;;  %11414 = vmatpush1.bf16.msra.mxu1 %v15480_v12  ;;  %v15578_v11 = vld [vmem:[#allocation2 + $0x1b84] ss:$16 sps:$4 sm:$0xff]   ;;  %v15581_v12 = vld [vmem:[#allocation2 + $0x1b8c] ss:$16 sps:$4 sm:$0xff]  }
 0x37d   :  { %10340 = vmatprep.subr.bf16.mxu0 %v15485_v13  ;;  %11415 = vmatprep.subr.bf16.mxu1 %v15488_v14  ;;  %v15576_v13 = vld [vmem:[#allocation2 + $0x1b80] ss:$16 sps:$4 sm:$0xff]   ;;  %v15579_v14 = vld [vmem:[#allocation2 + $0x1b88] ss:$16 sps:$4 sm:$0xff]  }
 0x380   :  { %10341 = vmatpush1.bf16.msra.mxu0 %v15483_v15  ;;  %11416 = vmatpush1.bf16.msra.mxu1 %v15486_v16  ;;  %v15584_v15 = vld [vmem:[#allocation2 + $0x1ba4] ss:$16 sps:$4 sm:$0xff]   ;;  %v15587_v16 = vld [vmem:[#allocation2 + $0x1bac] ss:$16 sps:$4 sm:$0xff]  }
 0x381   :  { %10342 = vmatprep.subr.bf16.mxu0 %v15491_v17  ;;  %11417 = vmatprep.subr.bf16.mxu1 %v15494_v18  ;;  %v15582_v17 = vld [vmem:[#allocation2 + $0x1ba0] ss:$16 sps:$4 sm:$0xff]   ;;  %v15585_v18 = vld [vmem:[#allocation2 + $0x1ba8] ss:$16 sps:$4 sm:$0xff]  }
 0x384   :  { %10343 = vmatpush1.bf16.msra.mxu0 %v15489_v19  ;;  %11418 = vmatpush1.bf16.msra.mxu1 %v15492_v20  ;;  %v15590_v19 = vld [vmem:[#allocation2 + $0x1bc4] ss:$16 sps:$4 sm:$0xff]   ;;  %v15593_v20 = vld [vmem:[#allocation2 + $0x1bcc] ss:$16 sps:$4 sm:$0xff]  }
 0x385   :  { %10344 = vmatprep.subr.bf16.mxu0 %v15497_v21  ;;  %11419 = vmatprep.subr.bf16.mxu1 %v15500_v22  ;;  %v15588_v21 = vld [vmem:[#allocation2 + $0x1bc0] ss:$16 sps:$4 sm:$0xff]   ;;  %v15591_v22 = vld [vmem:[#allocation2 + $0x1bc8] ss:$16 sps:$4 sm:$0xff]  }
 0x388   :  { %10345 = vmatpush1.bf16.msra.mxu0 %v15495_v23  ;;  %11420 = vmatpush1.bf16.msra.mxu1 %v15498_v24  ;;  %v15596_v23 = vld [vmem:[#allocation2 + $0x1be4] ss:$16 sps:$4 sm:$0xff]   ;;  %v15599_v24 = vld [vmem:[#allocation2 + $0x1bec] ss:$16 sps:$4 sm:$0xff]  }
 0x389   :  { %10357 = vmatprep.subr.bf16.mxu0 %v15506_v26  ;;  %11432 = vmatprep.subr.bf16.mxu1 %v15509_v27  ;;  %v15597_v26 = vld [vmem:[#allocation2 + $0x1be8] ss:$16 sps:$4 sm:$0xff]  }
 0x38a   :  { %v15600_v27 = vld [vmem:[%s17015_s0 + $0x68] ss:$196 sps:$4 sm:$0xff]  }
 0x38b   :  { %10347 = vmatmul.mubr.bf16.vlgmr.msra.gmra.mrb[0].mxu0 %v15501_v25  ;;  %11422 = vmatmul.mubr.bf16.vlgmr.msra.gmra.mrb[0].mxu1 %v15501_v25  ;;  %v15594_v25 = vld [vmem:[#allocation2 + $0x1be0] ss:$16 sps:$4 sm:$0xff]  }
 0x38c   :  { %10358 = vmatpush1.bf16.msra.mxu0 %v15504_v28  ;;  %11433 = vmatpush1.bf16.msra.mxu1 %v15507_v29  ;;  %v15605_v28 = vld [vmem:[#allocation2 + $0x1c04] ss:$16 sps:$4 sm:$0xff]   ;;  %v15608_v29 = vld [vmem:[#allocation2 + $0x1c0c] ss:$16 sps:$4 sm:$0xff]  }
 0x38d   :  { %10359 = vmatprep.subr.bf16.mxu0 %v15512_v30  ;;  %11434 = vmatprep.subr.bf16.mxu1 %v15515_v31  ;;  %v15603_v30 = vld [vmem:[#allocation2 + $0x1c00] ss:$16 sps:$4 sm:$0xff]   ;;  %v15606_v31 = vld [vmem:[#allocation2 + $0x1c08] ss:$16 sps:$4 sm:$0xff]  }
 0x38e   :  { %10389 = vmatprep.mubr.bf16.mxu0 %v15602_v32  ;;  %11464 = vmatprep.mubr.bf16.mxu1 %v15602_v32  ;;  %v15611_v32 = vld [vmem:[#allocation2 + $0x1c24] ss:$16 sps:$4 sm:$0xff]  }
 0x390   :  { %10360 = vmatpush1.bf16.msra.mxu0 %v15510_v33  ;;  %11435 = vmatpush1.bf16.msra.mxu1 %v15513_v34  ;;  %v15614_v33 = vld [vmem:[#allocation2 + $0x1c2c] ss:$16 sps:$4 sm:$0xff]   ;;  %v15701_v34 = vld [vmem:[%s17015_s0 + $0x74] ss:$196 sps:$4 sm:$0xff]  }
 0x391   :  { %10361 = vmatprep.subr.bf16.mxu0 %v15518_v35  ;;  %11436 = vmatprep.subr.bf16.mxu1 %v15521_v36  ;;  %v15609_v35 = vld [vmem:[#allocation2 + $0x1c20] ss:$16 sps:$4 sm:$0xff]   ;;  %v15612_v36 = vld [vmem:[#allocation2 + $0x1c28] ss:$16 sps:$4 sm:$0xff]  }
 0x394   :  { %10362 = vmatpush1.bf16.msra.mxu0 %v15516_v37  ;;  %11437 = vmatpush1.bf16.msra.mxu1 %v15519_v38  ;;  %v15617_v37 = vld [vmem:[#allocation2 + $0x1c44] ss:$16 sps:$4 sm:$0xff]   ;;  %v15620_v38 = vld [vmem:[#allocation2 + $0x1c4c] ss:$16 sps:$4 sm:$0xff]  }
 0x395   :  { %10363 = vmatprep.subr.bf16.mxu0 %v15524_v39  ;;  %11438 = vmatprep.subr.bf16.mxu1 %v15527_v40  ;;  %v15615_v39 = vld [vmem:[#allocation2 + $0x1c40] ss:$16 sps:$4 sm:$0xff]   ;;  %v15618_v40 = vld [vmem:[#allocation2 + $0x1c48] ss:$16 sps:$4 sm:$0xff]  }
 0x398   :  { %10364 = vmatpush1.bf16.msra.mxu0 %v15522_v41  ;;  %11439 = vmatpush1.bf16.msra.mxu1 %v15525_v42  ;;  %v15623_v41 = vld [vmem:[#allocation2 + $0x1c64] ss:$16 sps:$4 sm:$0xff]   ;;  %v15626_v42 = vld [vmem:[#allocation2 + $0x1c6c] ss:$16 sps:$4 sm:$0xff]  }
 0x399   :  { %10365 = vmatprep.subr.bf16.mxu0 %v15530_v43  ;;  %11440 = vmatprep.subr.bf16.mxu1 %v15533_v44  ;;  %v15621_v43 = vld [vmem:[#allocation2 + $0x1c60] ss:$16 sps:$4 sm:$0xff]   ;;  %v15624_v44 = vld [vmem:[#allocation2 + $0x1c68] ss:$16 sps:$4 sm:$0xff]  }
 0x39c   :  { %10366 = vmatpush1.bf16.msra.mxu0 %v15528_v45  ;;  %11441 = vmatpush1.bf16.msra.mxu1 %v15531_v46  ;;  %v15629_v45 = vld [vmem:[#allocation2 + $0x1c84] ss:$16 sps:$4 sm:$0xff]   ;;  %v15632_v46 = vld [vmem:[#allocation2 + $0x1c8c] ss:$16 sps:$4 sm:$0xff]  }
 0x39d   :  { %10367 = vmatprep.subr.bf16.mxu0 %v15536_v47  ;;  %11442 = vmatprep.subr.bf16.mxu1 %v15539_v48  ;;  %v15627_v47 = vld [vmem:[#allocation2 + $0x1c80] ss:$16 sps:$4 sm:$0xff]   ;;  %v15630_v48 = vld [vmem:[#allocation2 + $0x1c88] ss:$16 sps:$4 sm:$0xff]  }
 0x3a0   :  { %10368 = vmatpush1.bf16.msra.mxu0 %v15534_v49  ;;  %11443 = vmatpush1.bf16.msra.mxu1 %v15537_v50  ;;  %v15635_v49 = vld [vmem:[#allocation2 + $0x1ca4] ss:$16 sps:$4 sm:$0xff]   ;;  %v15638_v50 = vld [vmem:[#allocation2 + $0x1cac] ss:$16 sps:$4 sm:$0xff]  }
 0x3a1   :  { %10369 = vmatprep.subr.bf16.mxu0 %v15542_v51  ;;  %11444 = vmatprep.subr.bf16.mxu1 %v15545_v52  ;;  %v15633_v51 = vld [vmem:[#allocation2 + $0x1ca0] ss:$16 sps:$4 sm:$0xff]   ;;  %v15636_v52 = vld [vmem:[#allocation2 + $0x1ca8] ss:$16 sps:$4 sm:$0xff]  }
 0x3a4   :  { %10370 = vmatpush1.bf16.msra.mxu0 %v15540_v53  ;;  %11445 = vmatpush1.bf16.msra.mxu1 %v15543_v54  ;;  %v15641_v53 = vld [vmem:[#allocation2 + $0x1cc4] ss:$16 sps:$4 sm:$0xff]   ;;  %v15644_v54 = vld [vmem:[#allocation2 + $0x1ccc] ss:$16 sps:$4 sm:$0xff]  }
 0x3a5   :  { %10371 = vmatprep.subr.bf16.mxu0 %v15548_v55  ;;  %11446 = vmatprep.subr.bf16.mxu1 %v15551_v56  ;;  %v15639_v55 = vld [vmem:[#allocation2 + $0x1cc0] ss:$16 sps:$4 sm:$0xff]   ;;  %v15642_v56 = vld [vmem:[#allocation2 + $0x1cc8] ss:$16 sps:$4 sm:$0xff]  }
 0x3a8   :  { %10372 = vmatpush1.bf16.msra.mxu0 %v15546_v57  ;;  %11447 = vmatpush1.bf16.msra.mxu1 %v15549_v58  ;;  %v15647_v57 = vld [vmem:[#allocation2 + $0x1ce4] ss:$16 sps:$4 sm:$0xff]   ;;  %v15650_v58 = vld [vmem:[#allocation2 + $0x1cec] ss:$16 sps:$4 sm:$0xff]  }
 0x3a9   :  { %10373 = vmatprep.subr.bf16.mxu0 %v15554_v59  ;;  %11448 = vmatprep.subr.bf16.mxu1 %v15557_v60  ;;  %v15645_v59 = vld [vmem:[#allocation2 + $0x1ce0] ss:$16 sps:$4 sm:$0xff]   ;;  %v15648_v60 = vld [vmem:[#allocation2 + $0x1ce8] ss:$16 sps:$4 sm:$0xff]  }
 0x3ac   :  { %10374 = vmatpush1.bf16.msra.mxu0 %v15552_v61  ;;  %11449 = vmatpush1.bf16.msra.mxu1 %v15555_v62  ;;  %v15653_v61 = vld [vmem:[#allocation2 + $0x1d04] ss:$16 sps:$4 sm:$0xff]   ;;  %v15656_v62 = vld [vmem:[#allocation2 + $0x1d0c] ss:$16 sps:$4 sm:$0xff]  }
 0x3ad   :  { %10375 = vmatprep.subr.bf16.mxu0 %v15560_v63  ;;  %11450 = vmatprep.subr.bf16.mxu1 %v15563_v0  ;;  %v15651_v63 = vld [vmem:[#allocation2 + $0x1d00] ss:$16 sps:$4 sm:$0xff]   ;;  %v15654_v0 = vld [vmem:[#allocation2 + $0x1d08] ss:$16 sps:$4 sm:$0xff]  }
 0x3b0   :  { %10376 = vmatpush1.bf16.msra.mxu0 %v15558_v1  ;;  %11451 = vmatpush1.bf16.msra.mxu1 %v15561_v2  ;;  %v15659_v1 = vld [vmem:[#allocation2 + $0x1d24] ss:$16 sps:$4 sm:$0xff]   ;;  %v15662_v2 = vld [vmem:[#allocation2 + $0x1d2c] ss:$16 sps:$4 sm:$0xff]  }
 0x3b1   :  { %10377 = vmatprep.subr.bf16.mxu0 %v15566_v3  ;;  %11452 = vmatprep.subr.bf16.mxu1 %v15569_v4  ;;  %v15657_v3 = vld [vmem:[#allocation2 + $0x1d20] ss:$16 sps:$4 sm:$0xff]   ;;  %v15660_v4 = vld [vmem:[#allocation2 + $0x1d28] ss:$16 sps:$4 sm:$0xff]  }
 0x3b4   :  { %10378 = vmatpush1.bf16.msra.mxu0 %v15564_v5  ;;  %11453 = vmatpush1.bf16.msra.mxu1 %v15567_v6  ;;  %v15665_v5 = vld [vmem:[#allocation2 + $0x1d44] ss:$16 sps:$4 sm:$0xff]   ;;  %v15668_v6 = vld [vmem:[#allocation2 + $0x1d4c] ss:$16 sps:$4 sm:$0xff]  }
 0x3b5   :  { %10379 = vmatprep.subr.bf16.mxu0 %v15572_v7  ;;  %11454 = vmatprep.subr.bf16.mxu1 %v15575_v8  ;;  %v15663_v7 = vld [vmem:[#allocation2 + $0x1d40] ss:$16 sps:$4 sm:$0xff]   ;;  %v15666_v8 = vld [vmem:[#allocation2 + $0x1d48] ss:$16 sps:$4 sm:$0xff]  }
 0x3b8   :  { %10380 = vmatpush1.bf16.msra.mxu0 %v15570_v9  ;;  %11455 = vmatpush1.bf16.msra.mxu1 %v15573_v10  ;;  %v15671_v9 = vld [vmem:[#allocation2 + $0x1d64] ss:$16 sps:$4 sm:$0xff]   ;;  %v15674_v10 = vld [vmem:[#allocation2 + $0x1d6c] ss:$16 sps:$4 sm:$0xff]  }
 0x3b9   :  { %10381 = vmatprep.subr.bf16.mxu0 %v15578_v11  ;;  %11456 = vmatprep.subr.bf16.mxu1 %v15581_v12  ;;  %v15669_v11 = vld [vmem:[#allocation2 + $0x1d60] ss:$16 sps:$4 sm:$0xff]   ;;  %v15672_v12 = vld [vmem:[#allocation2 + $0x1d68] ss:$16 sps:$4 sm:$0xff]  }
 0x3bc   :  { %10382 = vmatpush1.bf16.msra.mxu0 %v15576_v13  ;;  %11457 = vmatpush1.bf16.msra.mxu1 %v15579_v14  ;;  %v15677_v13 = vld [vmem:[#allocation2 + $0x1d84] ss:$16 sps:$4 sm:$0xff]   ;;  %v15680_v14 = vld [vmem:[#allocation2 + $0x1d8c] ss:$16 sps:$4 sm:$0xff]  }
 0x3bd   :  { %10383 = vmatprep.subr.bf16.mxu0 %v15584_v15  ;;  %11458 = vmatprep.subr.bf16.mxu1 %v15587_v16  ;;  %v15675_v15 = vld [vmem:[#allocation2 + $0x1d80] ss:$16 sps:$4 sm:$0xff]   ;;  %v15678_v16 = vld [vmem:[#allocation2 + $0x1d88] ss:$16 sps:$4 sm:$0xff]  }
 0x3c0   :  { %10384 = vmatpush1.bf16.msra.mxu0 %v15582_v17  ;;  %11459 = vmatpush1.bf16.msra.mxu1 %v15585_v18  ;;  %v15683_v17 = vld [vmem:[#allocation2 + $0x1da4] ss:$16 sps:$4 sm:$0xff]   ;;  %v15686_v18 = vld [vmem:[#allocation2 + $0x1dac] ss:$16 sps:$4 sm:$0xff]  }
 0x3c1   :  { %10385 = vmatprep.subr.bf16.mxu0 %v15590_v19  ;;  %11460 = vmatprep.subr.bf16.mxu1 %v15593_v20  ;;  %v15681_v19 = vld [vmem:[#allocation2 + $0x1da0] ss:$16 sps:$4 sm:$0xff]   ;;  %v15684_v20 = vld [vmem:[#allocation2 + $0x1da8] ss:$16 sps:$4 sm:$0xff]  }
 0x3c4   :  { %10386 = vmatpush1.bf16.msra.mxu0 %v15588_v21  ;;  %11461 = vmatpush1.bf16.msra.mxu1 %v15591_v22  ;;  %v15689_v21 = vld [vmem:[#allocation2 + $0x1dc4] ss:$16 sps:$4 sm:$0xff]   ;;  %v15692_v22 = vld [vmem:[#allocation2 + $0x1dcc] ss:$16 sps:$4 sm:$0xff]  }
 0x3c5   :  { %10387 = vmatprep.subr.bf16.mxu0 %v15596_v23  ;;  %11462 = vmatprep.subr.bf16.mxu1 %v15599_v24  ;;  %v15687_v23 = vld [vmem:[#allocation2 + $0x1dc0] ss:$16 sps:$4 sm:$0xff]   ;;  %v15690_v24 = vld [vmem:[#allocation2 + $0x1dc8] ss:$16 sps:$4 sm:$0xff]  }
 0x3c8   :  { %10388 = vmatpush1.bf16.msra.mxu0 %v15594_v25  ;;  %11463 = vmatpush1.bf16.msra.mxu1 %v15597_v26  ;;  %v15695_v25 = vld [vmem:[#allocation2 + $0x1de4] ss:$16 sps:$4 sm:$0xff]   ;;  %v15698_v26 = vld [vmem:[#allocation2 + $0x1dec] ss:$16 sps:$4 sm:$0xff]  }
 0x3c9   :  { %10400 = vmatprep.subr.bf16.mxu0 %v15605_v28  ;;  %11475 = vmatprep.subr.bf16.mxu1 %v15608_v29  ;;  %v15696_v28 = vld [vmem:[#allocation2 + $0x1de8] ss:$16 sps:$4 sm:$0xff]   ;;  %v15704_v29 = vld [vmem:[#allocation2 + $0x1e04] ss:$16 sps:$4 sm:$0xff]  }
 0x3cb   :  { %10390 = vmatmul.mubr.bf16.vlgmr.msra.gmra.mrb[0].mxu0 %v15600_v27  ;;  %11465 = vmatmul.mubr.bf16.vlgmr.msra.gmra.mrb[0].mxu1 %v15600_v27  ;;  %v15693_v27 = vld [vmem:[#allocation2 + $0x1de0] ss:$16 sps:$4 sm:$0xff]  }
 0x3cc   :  { %10401 = vmatpush1.bf16.msra.mxu0 %v15603_v30  ;;  %11476 = vmatpush1.bf16.msra.mxu1 %v15606_v31  ;;  %v15707_v30 = vld [vmem:[#allocation2 + $0x1e0c] ss:$16 sps:$4 sm:$0xff]   ;;  %v15699_v31 = vld [vmem:[%s17015_s0 + $0x70] ss:$196 sps:$4 sm:$0xff]  }
 0x3cd   :  { %10402 = vmatprep.subr.bf16.mxu0 %v15611_v32  ;;  %11477 = vmatprep.subr.bf16.mxu1 %v15614_v33  ;;  %v15702_v32 = vld [vmem:[#allocation2 + $0x1e00] ss:$16 sps:$4 sm:$0xff]   ;;  %v15705_v33 = vld [vmem:[#allocation2 + $0x1e08] ss:$16 sps:$4 sm:$0xff]  }
 0x3ce   :  { %10432 = vmatprep.mubr.bf16.mxu0 %v15701_v34  ;;  %11507 = vmatprep.mubr.bf16.mxu1 %v15701_v34  ;;  %v15710_v34 = vld [vmem:[#allocation2 + $0x1e24] ss:$16 sps:$4 sm:$0xff]  }
 0x3d0   :  { %10403 = vmatpush1.bf16.msra.mxu0 %v15609_v35  ;;  %11478 = vmatpush1.bf16.msra.mxu1 %v15612_v36  ;;  %v15713_v35 = vld [vmem:[#allocation2 + $0x1e2c] ss:$16 sps:$4 sm:$0xff]  }
 0x3d1   :  { %10404 = vmatprep.subr.bf16.mxu0 %v15617_v37  ;;  %11479 = vmatprep.subr.bf16.mxu1 %v15620_v38  ;;  %v15800_v36 = vld [vmem:[%s17015_s0 + $0x7c] ss:$196 sps:$4 sm:$0xff]   ;;  %v15711_v38 = vld [vmem:[#allocation2 + $0x1e28] ss:$16 sps:$4 sm:$0xff]  }
 0x3d2   :  { %v15708_v37 = vld [vmem:[#allocation2 + $0x1e20] ss:$16 sps:$4 sm:$0xff]  }
 0x3d4   :  { %10405 = vmatpush1.bf16.msra.mxu0 %v15615_v39  ;;  %11480 = vmatpush1.bf16.msra.mxu1 %v15618_v40  ;;  %v15716_v39 = vld [vmem:[#allocation2 + $0x1e44] ss:$16 sps:$4 sm:$0xff]   ;;  %v15719_v40 = vld [vmem:[#allocation2 + $0x1e4c] ss:$16 sps:$4 sm:$0xff]  }
 0x3d5   :  { %10406 = vmatprep.subr.bf16.mxu0 %v15623_v41  ;;  %11481 = vmatprep.subr.bf16.mxu1 %v15626_v42  ;;  %v15714_v41 = vld [vmem:[#allocation2 + $0x1e40] ss:$16 sps:$4 sm:$0xff]   ;;  %v15717_v42 = vld [vmem:[#allocation2 + $0x1e48] ss:$16 sps:$4 sm:$0xff]  }
 0x3d8   :  { %10407 = vmatpush1.bf16.msra.mxu0 %v15621_v43  ;;  %11482 = vmatpush1.bf16.msra.mxu1 %v15624_v44  ;;  %v15722_v43 = vld [vmem:[#allocation2 + $0x1e64] ss:$16 sps:$4 sm:$0xff]   ;;  %v15725_v44 = vld [vmem:[#allocation2 + $0x1e6c] ss:$16 sps:$4 sm:$0xff]  }
 0x3d9   :  { %10408 = vmatprep.subr.bf16.mxu0 %v15629_v45  ;;  %11483 = vmatprep.subr.bf16.mxu1 %v15632_v46  ;;  %v15720_v45 = vld [vmem:[#allocation2 + $0x1e60] ss:$16 sps:$4 sm:$0xff]   ;;  %v15723_v46 = vld [vmem:[#allocation2 + $0x1e68] ss:$16 sps:$4 sm:$0xff]  }
 0x3dc   :  { %10409 = vmatpush1.bf16.msra.mxu0 %v15627_v47  ;;  %11484 = vmatpush1.bf16.msra.mxu1 %v15630_v48  ;;  %v15728_v47 = vld [vmem:[#allocation2 + $0x1e84] ss:$16 sps:$4 sm:$0xff]   ;;  %v15731_v48 = vld [vmem:[#allocation2 + $0x1e8c] ss:$16 sps:$4 sm:$0xff]  }
 0x3dd   :  { %10410 = vmatprep.subr.bf16.mxu0 %v15635_v49  ;;  %11485 = vmatprep.subr.bf16.mxu1 %v15638_v50  ;;  %v15726_v49 = vld [vmem:[#allocation2 + $0x1e80] ss:$16 sps:$4 sm:$0xff]   ;;  %v15729_v50 = vld [vmem:[#allocation2 + $0x1e88] ss:$16 sps:$4 sm:$0xff]  }
 0x3e0   :  { %10411 = vmatpush1.bf16.msra.mxu0 %v15633_v51  ;;  %11486 = vmatpush1.bf16.msra.mxu1 %v15636_v52  ;;  %v15734_v51 = vld [vmem:[#allocation2 + $0x1ea4] ss:$16 sps:$4 sm:$0xff]   ;;  %v15737_v52 = vld [vmem:[#allocation2 + $0x1eac] ss:$16 sps:$4 sm:$0xff]  }
 0x3e1   :  { %10412 = vmatprep.subr.bf16.mxu0 %v15641_v53  ;;  %11487 = vmatprep.subr.bf16.mxu1 %v15644_v54  ;;  %v15732_v53 = vld [vmem:[#allocation2 + $0x1ea0] ss:$16 sps:$4 sm:$0xff]   ;;  %v15735_v54 = vld [vmem:[#allocation2 + $0x1ea8] ss:$16 sps:$4 sm:$0xff]  }
 0x3e4   :  { %10413 = vmatpush1.bf16.msra.mxu0 %v15639_v55  ;;  %11488 = vmatpush1.bf16.msra.mxu1 %v15642_v56  ;;  %v15740_v55 = vld [vmem:[#allocation2 + $0x1ec4] ss:$16 sps:$4 sm:$0xff]   ;;  %v15743_v56 = vld [vmem:[#allocation2 + $0x1ecc] ss:$16 sps:$4 sm:$0xff]  }
 0x3e5   :  { %10414 = vmatprep.subr.bf16.mxu0 %v15647_v57  ;;  %11489 = vmatprep.subr.bf16.mxu1 %v15650_v58  ;;  %v15738_v57 = vld [vmem:[#allocation2 + $0x1ec0] ss:$16 sps:$4 sm:$0xff]   ;;  %v15741_v58 = vld [vmem:[#allocation2 + $0x1ec8] ss:$16 sps:$4 sm:$0xff]  }
 0x3e8   :  { %10415 = vmatpush1.bf16.msra.mxu0 %v15645_v59  ;;  %11490 = vmatpush1.bf16.msra.mxu1 %v15648_v60  ;;  %v15746_v59 = vld [vmem:[#allocation2 + $0x1ee4] ss:$16 sps:$4 sm:$0xff]   ;;  %v15749_v60 = vld [vmem:[#allocation2 + $0x1eec] ss:$16 sps:$4 sm:$0xff]  }
 0x3e9   :  { %10416 = vmatprep.subr.bf16.mxu0 %v15653_v61  ;;  %11491 = vmatprep.subr.bf16.mxu1 %v15656_v62  ;;  %v15744_v61 = vld [vmem:[#allocation2 + $0x1ee0] ss:$16 sps:$4 sm:$0xff]   ;;  %v15747_v62 = vld [vmem:[#allocation2 + $0x1ee8] ss:$16 sps:$4 sm:$0xff]  }
 0x3ec   :  { %10417 = vmatpush1.bf16.msra.mxu0 %v15651_v63  ;;  %11492 = vmatpush1.bf16.msra.mxu1 %v15654_v0  ;;  %v15752_v63 = vld [vmem:[#allocation2 + $0x1f04] ss:$16 sps:$4 sm:$0xff]   ;;  %v15755_v0 = vld [vmem:[#allocation2 + $0x1f0c] ss:$16 sps:$4 sm:$0xff]  }
 0x3ed   :  { %10418 = vmatprep.subr.bf16.mxu0 %v15659_v1  ;;  %11493 = vmatprep.subr.bf16.mxu1 %v15662_v2  ;;  %v15750_v1 = vld [vmem:[#allocation2 + $0x1f00] ss:$16 sps:$4 sm:$0xff]   ;;  %v15753_v2 = vld [vmem:[#allocation2 + $0x1f08] ss:$16 sps:$4 sm:$0xff]  }
 0x3f0   :  { %10419 = vmatpush1.bf16.msra.mxu0 %v15657_v3  ;;  %11494 = vmatpush1.bf16.msra.mxu1 %v15660_v4  ;;  %v15758_v3 = vld [vmem:[#allocation2 + $0x1f24] ss:$16 sps:$4 sm:$0xff]   ;;  %v15761_v4 = vld [vmem:[#allocation2 + $0x1f2c] ss:$16 sps:$4 sm:$0xff]  }
 0x3f1   :  { %10420 = vmatprep.subr.bf16.mxu0 %v15665_v5  ;;  %11495 = vmatprep.subr.bf16.mxu1 %v15668_v6  ;;  %v15756_v5 = vld [vmem:[#allocation2 + $0x1f20] ss:$16 sps:$4 sm:$0xff]   ;;  %v15759_v6 = vld [vmem:[#allocation2 + $0x1f28] ss:$16 sps:$4 sm:$0xff]  }
 0x3f4   :  { %10421 = vmatpush1.bf16.msra.mxu0 %v15663_v7  ;;  %11496 = vmatpush1.bf16.msra.mxu1 %v15666_v8  ;;  %v15764_v7 = vld [vmem:[#allocation2 + $0x1f44] ss:$16 sps:$4 sm:$0xff]   ;;  %v15767_v8 = vld [vmem:[#allocation2 + $0x1f4c] ss:$16 sps:$4 sm:$0xff]  }
 0x3f5   :  { %10422 = vmatprep.subr.bf16.mxu0 %v15671_v9  ;;  %11497 = vmatprep.subr.bf16.mxu1 %v15674_v10  ;;  %v15762_v9 = vld [vmem:[#allocation2 + $0x1f40] ss:$16 sps:$4 sm:$0xff]   ;;  %v15765_v10 = vld [vmem:[#allocation2 + $0x1f48] ss:$16 sps:$4 sm:$0xff]  }
 0x3f8   :  { %10423 = vmatpush1.bf16.msra.mxu0 %v15669_v11  ;;  %11498 = vmatpush1.bf16.msra.mxu1 %v15672_v12  ;;  %v15770_v11 = vld [vmem:[#allocation2 + $0x1f64] ss:$16 sps:$4 sm:$0xff]   ;;  %v15773_v12 = vld [vmem:[#allocation2 + $0x1f6c] ss:$16 sps:$4 sm:$0xff]  }
 0x3f9   :  { %10424 = vmatprep.subr.bf16.mxu0 %v15677_v13  ;;  %11499 = vmatprep.subr.bf16.mxu1 %v15680_v14  ;;  %v15768_v13 = vld [vmem:[#allocation2 + $0x1f60] ss:$16 sps:$4 sm:$0xff]   ;;  %v15771_v14 = vld [vmem:[#allocation2 + $0x1f68] ss:$16 sps:$4 sm:$0xff]  }
 0x3fc   :  { %10425 = vmatpush1.bf16.msra.mxu0 %v15675_v15  ;;  %11500 = vmatpush1.bf16.msra.mxu1 %v15678_v16  ;;  %v15776_v15 = vld [vmem:[#allocation2 + $0x1f84] ss:$16 sps:$4 sm:$0xff]   ;;  %v15779_v16 = vld [vmem:[#allocation2 + $0x1f8c] ss:$16 sps:$4 sm:$0xff]  }
 0x3fd   :  { %10426 = vmatprep.subr.bf16.mxu0 %v15683_v17  ;;  %11501 = vmatprep.subr.bf16.mxu1 %v15686_v18  ;;  %v15774_v17 = vld [vmem:[#allocation2 + $0x1f80] ss:$16 sps:$4 sm:$0xff]   ;;  %v15777_v18 = vld [vmem:[#allocation2 + $0x1f88] ss:$16 sps:$4 sm:$0xff]  }
 0x400   :  { %10427 = vmatpush1.bf16.msra.mxu0 %v15681_v19  ;;  %11502 = vmatpush1.bf16.msra.mxu1 %v15684_v20  ;;  %v15782_v19 = vld [vmem:[#allocation2 + $0x1fa4] ss:$16 sps:$4 sm:$0xff]   ;;  %v15785_v20 = vld [vmem:[#allocation2 + $0x1fac] ss:$16 sps:$4 sm:$0xff]  }
 0x401   :  { %10428 = vmatprep.subr.bf16.mxu0 %v15689_v21  ;;  %11503 = vmatprep.subr.bf16.mxu1 %v15692_v22  ;;  %v15780_v21 = vld [vmem:[#allocation2 + $0x1fa0] ss:$16 sps:$4 sm:$0xff]   ;;  %v15783_v22 = vld [vmem:[#allocation2 + $0x1fa8] ss:$16 sps:$4 sm:$0xff]  }
 0x404   :  { %10429 = vmatpush1.bf16.msra.mxu0 %v15687_v23  ;;  %11504 = vmatpush1.bf16.msra.mxu1 %v15690_v24  ;;  %v15788_v23 = vld [vmem:[#allocation2 + $0x1fc4] ss:$16 sps:$4 sm:$0xff]   ;;  %v15791_v24 = vld [vmem:[#allocation2 + $0x1fcc] ss:$16 sps:$4 sm:$0xff]  }
 0x405   :  { %10430 = vmatprep.subr.bf16.mxu0 %v15695_v25  ;;  %11505 = vmatprep.subr.bf16.mxu1 %v15698_v26  ;;  %v15786_v25 = vld [vmem:[#allocation2 + $0x1fc0] ss:$16 sps:$4 sm:$0xff]   ;;  %v15789_v26 = vld [vmem:[#allocation2 + $0x1fc8] ss:$16 sps:$4 sm:$0xff]  }
 0x408   :  { %10431 = vmatpush1.bf16.msra.mxu0 %v15693_v27  ;;  %11506 = vmatpush1.bf16.msra.mxu1 %v15696_v28  ;;  %v15794_v27 = vld [vmem:[#allocation2 + $0x1fe4] ss:$16 sps:$4 sm:$0xff]   ;;  %v15797_v28 = vld [vmem:[#allocation2 + $0x1fec] ss:$16 sps:$4 sm:$0xff]  }
 0x409   :  { %10443 = vmatprep.subr.bf16.mxu0 %v15704_v29  ;;  %11518 = vmatprep.subr.bf16.mxu1 %v15707_v30  ;;  %v15792_v29 = vld [vmem:[#allocation2 + $0x1fe0] ss:$16 sps:$4 sm:$0xff]   ;;  %v15795_v30 = vld [vmem:[#allocation2 + $0x1fe8] ss:$16 sps:$4 sm:$0xff]  }
 0x40b   :  { %10433 = vmatmul.mubr.bf16.vlgmr.msra.gmra.mrb[0].mxu0 %v15699_v31  ;;  %11508 = vmatmul.mubr.bf16.vlgmr.msra.gmra.mrb[0].mxu1 %v15699_v31  ;;  %v15803_v31 = vld [vmem:[#allocation2 + $0x2004] ss:$16 sps:$4 sm:$0xff]  }
 0x40c   :  { %10444 = vmatpush1.bf16.msra.mxu0 %v15702_v32  ;;  %11519 = vmatpush1.bf16.msra.mxu1 %v15705_v33  ;;  %v15806_v32 = vld [vmem:[#allocation2 + $0x200c] ss:$16 sps:$4 sm:$0xff]  }
 0x40d   :  { %10445 = vmatprep.subr.bf16.mxu0 %v15710_v34  ;;  %11520 = vmatprep.subr.bf16.mxu1 %v15713_v35  ;;  %v15798_v33 = vld [vmem:[%s17015_s0 + $0x78] ss:$196 sps:$4 sm:$0xff]   ;;  %v15801_v34 = vld [vmem:[#allocation2 + $0x2000] ss:$16 sps:$4 sm:$0xff]  }
 0x40e   :  { %10475 = vmatprep.mubr.bf16.mxu0 %v15800_v36  ;;  %11550 = vmatprep.mubr.bf16.mxu1 %v15800_v36  ;;  %v15804_v35 = vld [vmem:[#allocation2 + $0x2008] ss:$16 sps:$4 sm:$0xff]   ;;  %v15809_v36 = vld [vmem:[#allocation2 + $0x2024] ss:$16 sps:$4 sm:$0xff]  }
 0x410   :  { %10446 = vmatpush1.bf16.msra.mxu0 %v15708_v37  ;;  %11521 = vmatpush1.bf16.msra.mxu1 %v15711_v38  ;;  %v15812_v37 = vld [vmem:[#allocation2 + $0x202c] ss:$16 sps:$4 sm:$0xff]   ;;  %v15899_v38 = vld [vmem:[%s17015_s0 + $0x84] ss:$196 sps:$4 sm:$0xff]  }
 0x411   :  { %10447 = vmatprep.subr.bf16.mxu0 %v15716_v39  ;;  %11522 = vmatprep.subr.bf16.mxu1 %v15719_v40  ;;  %v15807_v39 = vld [vmem:[#allocation2 + $0x2020] ss:$16 sps:$4 sm:$0xff]   ;;  %v15810_v40 = vld [vmem:[#allocation2 + $0x2028] ss:$16 sps:$4 sm:$0xff]  }
 0x414   :  { %10448 = vmatpush1.bf16.msra.mxu0 %v15714_v41  ;;  %11523 = vmatpush1.bf16.msra.mxu1 %v15717_v42  ;;  %v15815_v41 = vld [vmem:[#allocation2 + $0x2044] ss:$16 sps:$4 sm:$0xff]   ;;  %v15818_v42 = vld [vmem:[#allocation2 + $0x204c] ss:$16 sps:$4 sm:$0xff]  }
 0x415   :  { %10449 = vmatprep.subr.bf16.mxu0 %v15722_v43  ;;  %11524 = vmatprep.subr.bf16.mxu1 %v15725_v44  ;;  %v15813_v43 = vld [vmem:[#allocation2 + $0x2040] ss:$16 sps:$4 sm:$0xff]   ;;  %v15816_v44 = vld [vmem:[#allocation2 + $0x2048] ss:$16 sps:$4 sm:$0xff]  }
 0x418   :  { %10450 = vmatpush1.bf16.msra.mxu0 %v15720_v45  ;;  %11525 = vmatpush1.bf16.msra.mxu1 %v15723_v46  ;;  %v15821_v45 = vld [vmem:[#allocation2 + $0x2064] ss:$16 sps:$4 sm:$0xff]   ;;  %v15824_v46 = vld [vmem:[#allocation2 + $0x206c] ss:$16 sps:$4 sm:$0xff]  }
 0x419   :  { %10451 = vmatprep.subr.bf16.mxu0 %v15728_v47  ;;  %11526 = vmatprep.subr.bf16.mxu1 %v15731_v48  ;;  %v15819_v47 = vld [vmem:[#allocation2 + $0x2060] ss:$16 sps:$4 sm:$0xff]   ;;  %v15822_v48 = vld [vmem:[#allocation2 + $0x2068] ss:$16 sps:$4 sm:$0xff]  }
 0x41c   :  { %10452 = vmatpush1.bf16.msra.mxu0 %v15726_v49  ;;  %11527 = vmatpush1.bf16.msra.mxu1 %v15729_v50  ;;  %v15827_v49 = vld [vmem:[#allocation2 + $0x2084] ss:$16 sps:$4 sm:$0xff]   ;;  %v15830_v50 = vld [vmem:[#allocation2 + $0x208c] ss:$16 sps:$4 sm:$0xff]  }
 0x41d   :  { %10453 = vmatprep.subr.bf16.mxu0 %v15734_v51  ;;  %11528 = vmatprep.subr.bf16.mxu1 %v15737_v52  ;;  %v15825_v51 = vld [vmem:[#allocation2 + $0x2080] ss:$16 sps:$4 sm:$0xff]   ;;  %v15828_v52 = vld [vmem:[#allocation2 + $0x2088] ss:$16 sps:$4 sm:$0xff]  }
 0x420   :  { %10454 = vmatpush1.bf16.msra.mxu0 %v15732_v53  ;;  %11529 = vmatpush1.bf16.msra.mxu1 %v15735_v54  ;;  %v15833_v53 = vld [vmem:[#allocation2 + $0x20a4] ss:$16 sps:$4 sm:$0xff]   ;;  %v15836_v54 = vld [vmem:[#allocation2 + $0x20ac] ss:$16 sps:$4 sm:$0xff]  }
 0x421   :  { %10455 = vmatprep.subr.bf16.mxu0 %v15740_v55  ;;  %11530 = vmatprep.subr.bf16.mxu1 %v15743_v56  ;;  %v15831_v55 = vld [vmem:[#allocation2 + $0x20a0] ss:$16 sps:$4 sm:$0xff]   ;;  %v15834_v56 = vld [vmem:[#allocation2 + $0x20a8] ss:$16 sps:$4 sm:$0xff]  }
 0x424   :  { %10456 = vmatpush1.bf16.msra.mxu0 %v15738_v57  ;;  %11531 = vmatpush1.bf16.msra.mxu1 %v15741_v58  ;;  %v15839_v57 = vld [vmem:[#allocation2 + $0x20c4] ss:$16 sps:$4 sm:$0xff]   ;;  %v15842_v58 = vld [vmem:[#allocation2 + $0x20cc] ss:$16 sps:$4 sm:$0xff]  }
 0x425   :  { %10457 = vmatprep.subr.bf16.mxu0 %v15746_v59  ;;  %11532 = vmatprep.subr.bf16.mxu1 %v15749_v60  ;;  %v15837_v59 = vld [vmem:[#allocation2 + $0x20c0] ss:$16 sps:$4 sm:$0xff]   ;;  %v15840_v60 = vld [vmem:[#allocation2 + $0x20c8] ss:$16 sps:$4 sm:$0xff]  }
 0x428   :  { %10458 = vmatpush1.bf16.msra.mxu0 %v15744_v61  ;;  %11533 = vmatpush1.bf16.msra.mxu1 %v15747_v62  ;;  %v15845_v61 = vld [vmem:[#allocation2 + $0x20e4] ss:$16 sps:$4 sm:$0xff]   ;;  %v15848_v62 = vld [vmem:[#allocation2 + $0x20ec] ss:$16 sps:$4 sm:$0xff]  }
 0x429   :  { %10459 = vmatprep.subr.bf16.mxu0 %v15752_v63  ;;  %11534 = vmatprep.subr.bf16.mxu1 %v15755_v0  ;;  %v15843_v63 = vld [vmem:[#allocation2 + $0x20e0] ss:$16 sps:$4 sm:$0xff]   ;;  %v15846_v0 = vld [vmem:[#allocation2 + $0x20e8] ss:$16 sps:$4 sm:$0xff]  }
 0x42c   :  { %10460 = vmatpush1.bf16.msra.mxu0 %v15750_v1  ;;  %11535 = vmatpush1.bf16.msra.mxu1 %v15753_v2  ;;  %v15851_v1 = vld [vmem:[#allocation2 + $0x2104] ss:$16 sps:$4 sm:$0xff]   ;;  %v15854_v2 = vld [vmem:[#allocation2 + $0x210c] ss:$16 sps:$4 sm:$0xff]  }
 0x42d   :  { %10461 = vmatprep.subr.bf16.mxu0 %v15758_v3  ;;  %11536 = vmatprep.subr.bf16.mxu1 %v15761_v4  ;;  %v15849_v3 = vld [vmem:[#allocation2 + $0x2100] ss:$16 sps:$4 sm:$0xff]   ;;  %v15852_v4 = vld [vmem:[#allocation2 + $0x2108] ss:$16 sps:$4 sm:$0xff]  }
 0x430   :  { %10462 = vmatpush1.bf16.msra.mxu0 %v15756_v5  ;;  %11537 = vmatpush1.bf16.msra.mxu1 %v15759_v6  ;;  %v15857_v5 = vld [vmem:[#allocation2 + $0x2124] ss:$16 sps:$4 sm:$0xff]   ;;  %v15860_v6 = vld [vmem:[#allocation2 + $0x212c] ss:$16 sps:$4 sm:$0xff]  }
 0x431   :  { %10463 = vmatprep.subr.bf16.mxu0 %v15764_v7  ;;  %11538 = vmatprep.subr.bf16.mxu1 %v15767_v8  ;;  %v15855_v7 = vld [vmem:[#allocation2 + $0x2120] ss:$16 sps:$4 sm:$0xff]   ;;  %v15858_v8 = vld [vmem:[#allocation2 + $0x2128] ss:$16 sps:$4 sm:$0xff]  }
 0x434   :  { %10464 = vmatpush1.bf16.msra.mxu0 %v15762_v9  ;;  %11539 = vmatpush1.bf16.msra.mxu1 %v15765_v10  ;;  %v15863_v9 = vld [vmem:[#allocation2 + $0x2144] ss:$16 sps:$4 sm:$0xff]   ;;  %v15866_v10 = vld [vmem:[#allocation2 + $0x214c] ss:$16 sps:$4 sm:$0xff]  }
 0x435   :  { %10465 = vmatprep.subr.bf16.mxu0 %v15770_v11  ;;  %11540 = vmatprep.subr.bf16.mxu1 %v15773_v12  ;;  %v15861_v11 = vld [vmem:[#allocation2 + $0x2140] ss:$16 sps:$4 sm:$0xff]   ;;  %v15864_v12 = vld [vmem:[#allocation2 + $0x2148] ss:$16 sps:$4 sm:$0xff]  }
 0x438   :  { %10466 = vmatpush1.bf16.msra.mxu0 %v15768_v13  ;;  %11541 = vmatpush1.bf16.msra.mxu1 %v15771_v14  ;;  %v15869_v13 = vld [vmem:[#allocation2 + $0x2164] ss:$16 sps:$4 sm:$0xff]   ;;  %v15872_v14 = vld [vmem:[#allocation2 + $0x216c] ss:$16 sps:$4 sm:$0xff]  }
 0x439   :  { %10467 = vmatprep.subr.bf16.mxu0 %v15776_v15  ;;  %11542 = vmatprep.subr.bf16.mxu1 %v15779_v16  ;;  %v15867_v15 = vld [vmem:[#allocation2 + $0x2160] ss:$16 sps:$4 sm:$0xff]   ;;  %v15870_v16 = vld [vmem:[#allocation2 + $0x2168] ss:$16 sps:$4 sm:$0xff]  }
 0x43c   :  { %10468 = vmatpush1.bf16.msra.mxu0 %v15774_v17  ;;  %11543 = vmatpush1.bf16.msra.mxu1 %v15777_v18  ;;  %v15875_v17 = vld [vmem:[#allocation2 + $0x2184] ss:$16 sps:$4 sm:$0xff]   ;;  %v15878_v18 = vld [vmem:[#allocation2 + $0x218c] ss:$16 sps:$4 sm:$0xff]  }
 0x43d   :  { %10469 = vmatprep.subr.bf16.mxu0 %v15782_v19  ;;  %11544 = vmatprep.subr.bf16.mxu1 %v15785_v20  ;;  %v15873_v19 = vld [vmem:[#allocation2 + $0x2180] ss:$16 sps:$4 sm:$0xff]   ;;  %v15876_v20 = vld [vmem:[#allocation2 + $0x2188] ss:$16 sps:$4 sm:$0xff]  }
 0x440   :  { %10470 = vmatpush1.bf16.msra.mxu0 %v15780_v21  ;;  %11545 = vmatpush1.bf16.msra.mxu1 %v15783_v22  ;;  %v15881_v21 = vld [vmem:[#allocation2 + $0x21a4] ss:$16 sps:$4 sm:$0xff]   ;;  %v15884_v22 = vld [vmem:[#allocation2 + $0x21ac] ss:$16 sps:$4 sm:$0xff]  }
 0x441   :  { %10471 = vmatprep.subr.bf16.mxu0 %v15788_v23  ;;  %11546 = vmatprep.subr.bf16.mxu1 %v15791_v24  ;;  %v15879_v23 = vld [vmem:[#allocation2 + $0x21a0] ss:$16 sps:$4 sm:$0xff]   ;;  %v15882_v24 = vld [vmem:[#allocation2 + $0x21a8] ss:$16 sps:$4 sm:$0xff]  }
 0x444   :  { %10472 = vmatpush1.bf16.msra.mxu0 %v15786_v25  ;;  %11547 = vmatpush1.bf16.msra.mxu1 %v15789_v26  ;;  %v15887_v25 = vld [vmem:[#allocation2 + $0x21c4] ss:$16 sps:$4 sm:$0xff]   ;;  %v15890_v26 = vld [vmem:[#allocation2 + $0x21cc] ss:$16 sps:$4 sm:$0xff]  }
 0x445   :  { %10473 = vmatprep.subr.bf16.mxu0 %v15794_v27  ;;  %11548 = vmatprep.subr.bf16.mxu1 %v15797_v28  ;;  %v15885_v27 = vld [vmem:[#allocation2 + $0x21c0] ss:$16 sps:$4 sm:$0xff]   ;;  %v15888_v28 = vld [vmem:[#allocation2 + $0x21c8] ss:$16 sps:$4 sm:$0xff]  }
 0x448   :  { %10474 = vmatpush1.bf16.msra.mxu0 %v15792_v29  ;;  %11549 = vmatpush1.bf16.msra.mxu1 %v15795_v30  ;;  %v15893_v29 = vld [vmem:[#allocation2 + $0x21e4] ss:$16 sps:$4 sm:$0xff]   ;;  %v15896_v30 = vld [vmem:[#allocation2 + $0x21ec] ss:$16 sps:$4 sm:$0xff]  }
 0x449   :  { %10486 = vmatprep.subr.bf16.mxu0 %v15803_v31  ;;  %11561 = vmatprep.subr.bf16.mxu1 %v15806_v32  ;;  %v15891_v31 = vld [vmem:[#allocation2 + $0x21e0] ss:$16 sps:$4 sm:$0xff]   ;;  %v15894_v32 = vld [vmem:[#allocation2 + $0x21e8] ss:$16 sps:$4 sm:$0xff]  }
 0x44b   :  { %10476 = vmatmul.mubr.bf16.vlgmr.msra.gmra.mrb[0].mxu0 %v15798_v33  ;;  %11551 = vmatmul.mubr.bf16.vlgmr.msra.gmra.mrb[0].mxu1 %v15798_v33  ;;  %v15902_v33 = vld [vmem:[#allocation2 + $0x2204] ss:$16 sps:$4 sm:$0xff]  }
 0x44c   :  { %10487 = vmatpush1.bf16.msra.mxu0 %v15801_v34  ;;  %11562 = vmatpush1.bf16.msra.mxu1 %v15804_v35  ;;  %v15905_v34 = vld [vmem:[#allocation2 + $0x220c] ss:$16 sps:$4 sm:$0xff]   ;;  %v15897_v35 = vld [vmem:[%s17015_s0 + $0x80] ss:$196 sps:$4 sm:$0xff]  }
 0x44d   :  { %10488 = vmatprep.subr.bf16.mxu0 %v15809_v36  ;;  %11563 = vmatprep.subr.bf16.mxu1 %v15812_v37  ;;  %v15900_v36 = vld [vmem:[#allocation2 + $0x2200] ss:$16 sps:$4 sm:$0xff]   ;;  %v15903_v37 = vld [vmem:[#allocation2 + $0x2208] ss:$16 sps:$4 sm:$0xff]  }
 0x44e   :  { %10518 = vmatprep.mubr.bf16.mxu0 %v15899_v38  ;;  %11593 = vmatprep.mubr.bf16.mxu1 %v15899_v38  ;;  %v15908_v38 = vld [vmem:[#allocation2 + $0x2224] ss:$16 sps:$4 sm:$0xff]  }
 0x450   :  { %10489 = vmatpush1.bf16.msra.mxu0 %v15807_v39  ;;  %11564 = vmatpush1.bf16.msra.mxu1 %v15810_v40  ;;  %v15911_v39 = vld [vmem:[#allocation2 + $0x222c] ss:$16 sps:$4 sm:$0xff]  }
 0x451   :  { %10490 = vmatprep.subr.bf16.mxu0 %v15815_v41  ;;  %11565 = vmatprep.subr.bf16.mxu1 %v15818_v42  ;;  %v15998_v40 = vld [vmem:[%s17015_s0 + $0x8c] ss:$196 sps:$4 sm:$0xff]   ;;  %v15909_v42 = vld [vmem:[#allocation2 + $0x2228] ss:$16 sps:$4 sm:$0xff]  }
 0x452   :  { %v15906_v41 = vld [vmem:[#allocation2 + $0x2220] ss:$16 sps:$4 sm:$0xff]  }
 0x454   :  { %10491 = vmatpush1.bf16.msra.mxu0 %v15813_v43  ;;  %11566 = vmatpush1.bf16.msra.mxu1 %v15816_v44  ;;  %v15914_v43 = vld [vmem:[#allocation2 + $0x2244] ss:$16 sps:$4 sm:$0xff]   ;;  %v15917_v44 = vld [vmem:[#allocation2 + $0x224c] ss:$16 sps:$4 sm:$0xff]  }
 0x455   :  { %10492 = vmatprep.subr.bf16.mxu0 %v15821_v45  ;;  %11567 = vmatprep.subr.bf16.mxu1 %v15824_v46  ;;  %v15912_v45 = vld [vmem:[#allocation2 + $0x2240] ss:$16 sps:$4 sm:$0xff]   ;;  %v15915_v46 = vld [vmem:[#allocation2 + $0x2248] ss:$16 sps:$4 sm:$0xff]  }
 0x458   :  { %10493 = vmatpush1.bf16.msra.mxu0 %v15819_v47  ;;  %11568 = vmatpush1.bf16.msra.mxu1 %v15822_v48  ;;  %v15920_v47 = vld [vmem:[#allocation2 + $0x2264] ss:$16 sps:$4 sm:$0xff]   ;;  %v15923_v48 = vld [vmem:[#allocation2 + $0x226c] ss:$16 sps:$4 sm:$0xff]  }
 0x459   :  { %10494 = vmatprep.subr.bf16.mxu0 %v15827_v49  ;;  %11569 = vmatprep.subr.bf16.mxu1 %v15830_v50  ;;  %v15918_v49 = vld [vmem:[#allocation2 + $0x2260] ss:$16 sps:$4 sm:$0xff]   ;;  %v15921_v50 = vld [vmem:[#allocation2 + $0x2268] ss:$16 sps:$4 sm:$0xff]  }
 0x45c   :  { %10495 = vmatpush1.bf16.msra.mxu0 %v15825_v51  ;;  %11570 = vmatpush1.bf16.msra.mxu1 %v15828_v52  ;;  %v15926_v51 = vld [vmem:[#allocation2 + $0x2284] ss:$16 sps:$4 sm:$0xff]   ;;  %v15929_v52 = vld [vmem:[#allocation2 + $0x228c] ss:$16 sps:$4 sm:$0xff]  }
 0x45d   :  { %10496 = vmatprep.subr.bf16.mxu0 %v15833_v53  ;;  %11571 = vmatprep.subr.bf16.mxu1 %v15836_v54  ;;  %v15924_v53 = vld [vmem:[#allocation2 + $0x2280] ss:$16 sps:$4 sm:$0xff]   ;;  %v15927_v54 = vld [vmem:[#allocation2 + $0x2288] ss:$16 sps:$4 sm:$0xff]  }
 0x460   :  { %10497 = vmatpush1.bf16.msra.mxu0 %v15831_v55  ;;  %11572 = vmatpush1.bf16.msra.mxu1 %v15834_v56  ;;  %v15932_v55 = vld [vmem:[#allocation2 + $0x22a4] ss:$16 sps:$4 sm:$0xff]   ;;  %v15935_v56 = vld [vmem:[#allocation2 + $0x22ac] ss:$16 sps:$4 sm:$0xff]  }
 0x461   :  { %10498 = vmatprep.subr.bf16.mxu0 %v15839_v57  ;;  %11573 = vmatprep.subr.bf16.mxu1 %v15842_v58  ;;  %v15930_v57 = vld [vmem:[#allocation2 + $0x22a0] ss:$16 sps:$4 sm:$0xff]   ;;  %v15933_v58 = vld [vmem:[#allocation2 + $0x22a8] ss:$16 sps:$4 sm:$0xff]  }
 0x464   :  { %10499 = vmatpush1.bf16.msra.mxu0 %v15837_v59  ;;  %11574 = vmatpush1.bf16.msra.mxu1 %v15840_v60  ;;  %v15938_v59 = vld [vmem:[#allocation2 + $0x22c4] ss:$16 sps:$4 sm:$0xff]   ;;  %v15941_v60 = vld [vmem:[#allocation2 + $0x22cc] ss:$16 sps:$4 sm:$0xff]  }
 0x465   :  { %10500 = vmatprep.subr.bf16.mxu0 %v15845_v61  ;;  %11575 = vmatprep.subr.bf16.mxu1 %v15848_v62  ;;  %v15936_v61 = vld [vmem:[#allocation2 + $0x22c0] ss:$16 sps:$4 sm:$0xff]   ;;  %v15939_v62 = vld [vmem:[#allocation2 + $0x22c8] ss:$16 sps:$4 sm:$0xff]  }
 0x468   :  { %10501 = vmatpush1.bf16.msra.mxu0 %v15843_v63  ;;  %11576 = vmatpush1.bf16.msra.mxu1 %v15846_v0  ;;  %v15944_v63 = vld [vmem:[#allocation2 + $0x22e4] ss:$16 sps:$4 sm:$0xff]   ;;  %v15947_v0 = vld [vmem:[#allocation2 + $0x22ec] ss:$16 sps:$4 sm:$0xff]  }
 0x469   :  { %10502 = vmatprep.subr.bf16.mxu0 %v15851_v1  ;;  %11577 = vmatprep.subr.bf16.mxu1 %v15854_v2  ;;  %v15942_v1 = vld [vmem:[#allocation2 + $0x22e0] ss:$16 sps:$4 sm:$0xff]   ;;  %v15945_v2 = vld [vmem:[#allocation2 + $0x22e8] ss:$16 sps:$4 sm:$0xff]  }
 0x46c   :  { %10503 = vmatpush1.bf16.msra.mxu0 %v15849_v3  ;;  %11578 = vmatpush1.bf16.msra.mxu1 %v15852_v4  ;;  %v15950_v3 = vld [vmem:[#allocation2 + $0x2304] ss:$16 sps:$4 sm:$0xff]   ;;  %v15953_v4 = vld [vmem:[#allocation2 + $0x230c] ss:$16 sps:$4 sm:$0xff]  }
 0x46d   :  { %10504 = vmatprep.subr.bf16.mxu0 %v15857_v5  ;;  %11579 = vmatprep.subr.bf16.mxu1 %v15860_v6  ;;  %v15948_v5 = vld [vmem:[#allocation2 + $0x2300] ss:$16 sps:$4 sm:$0xff]   ;;  %v15951_v6 = vld [vmem:[#allocation2 + $0x2308] ss:$16 sps:$4 sm:$0xff]  }
 0x470   :  { %10505 = vmatpush1.bf16.msra.mxu0 %v15855_v7  ;;  %11580 = vmatpush1.bf16.msra.mxu1 %v15858_v8  ;;  %v15956_v7 = vld [vmem:[#allocation2 + $0x2324] ss:$16 sps:$4 sm:$0xff]   ;;  %v15959_v8 = vld [vmem:[#allocation2 + $0x232c] ss:$16 sps:$4 sm:$0xff]  }
 0x471   :  { %10506 = vmatprep.subr.bf16.mxu0 %v15863_v9  ;;  %11581 = vmatprep.subr.bf16.mxu1 %v15866_v10  ;;  %v15954_v9 = vld [vmem:[#allocation2 + $0x2320] ss:$16 sps:$4 sm:$0xff]   ;;  %v15957_v10 = vld [vmem:[#allocation2 + $0x2328] ss:$16 sps:$4 sm:$0xff]  }
 0x474   :  { %10507 = vmatpush1.bf16.msra.mxu0 %v15861_v11  ;;  %11582 = vmatpush1.bf16.msra.mxu1 %v15864_v12  ;;  %v15962_v11 = vld [vmem:[#allocation2 + $0x2344] ss:$16 sps:$4 sm:$0xff]   ;;  %v15965_v12 = vld [vmem:[#allocation2 + $0x234c] ss:$16 sps:$4 sm:$0xff]  }
 0x475   :  { %10508 = vmatprep.subr.bf16.mxu0 %v15869_v13  ;;  %11583 = vmatprep.subr.bf16.mxu1 %v15872_v14  ;;  %v15960_v13 = vld [vmem:[#allocation2 + $0x2340] ss:$16 sps:$4 sm:$0xff]   ;;  %v15963_v14 = vld [vmem:[#allocation2 + $0x2348] ss:$16 sps:$4 sm:$0xff]  }
 0x478   :  { %10509 = vmatpush1.bf16.msra.mxu0 %v15867_v15  ;;  %11584 = vmatpush1.bf16.msra.mxu1 %v15870_v16  ;;  %v15968_v15 = vld [vmem:[#allocation2 + $0x2364] ss:$16 sps:$4 sm:$0xff]   ;;  %v15971_v16 = vld [vmem:[#allocation2 + $0x236c] ss:$16 sps:$4 sm:$0xff]  }
 0x479   :  { %10510 = vmatprep.subr.bf16.mxu0 %v15875_v17  ;;  %11585 = vmatprep.subr.bf16.mxu1 %v15878_v18  ;;  %v15966_v17 = vld [vmem:[#allocation2 + $0x2360] ss:$16 sps:$4 sm:$0xff]   ;;  %v15969_v18 = vld [vmem:[#allocation2 + $0x2368] ss:$16 sps:$4 sm:$0xff]  }
 0x47c   :  { %10511 = vmatpush1.bf16.msra.mxu0 %v15873_v19  ;;  %11586 = vmatpush1.bf16.msra.mxu1 %v15876_v20  ;;  %v15974_v19 = vld [vmem:[#allocation2 + $0x2384] ss:$16 sps:$4 sm:$0xff]   ;;  %v15977_v20 = vld [vmem:[#allocation2 + $0x238c] ss:$16 sps:$4 sm:$0xff]  }
 0x47d   :  { %10512 = vmatprep.subr.bf16.mxu0 %v15881_v21  ;;  %11587 = vmatprep.subr.bf16.mxu1 %v15884_v22  ;;  %v15972_v21 = vld [vmem:[#allocation2 + $0x2380] ss:$16 sps:$4 sm:$0xff]   ;;  %v15975_v22 = vld [vmem:[#allocation2 + $0x2388] ss:$16 sps:$4 sm:$0xff]  }
 0x480   :  { %10513 = vmatpush1.bf16.msra.mxu0 %v15879_v23  ;;  %11588 = vmatpush1.bf16.msra.mxu1 %v15882_v24  ;;  %v15980_v23 = vld [vmem:[#allocation2 + $0x23a4] ss:$16 sps:$4 sm:$0xff]   ;;  %v15983_v24 = vld [vmem:[#allocation2 + $0x23ac] ss:$16 sps:$4 sm:$0xff]  }
 0x481   :  { %10514 = vmatprep.subr.bf16.mxu0 %v15887_v25  ;;  %11589 = vmatprep.subr.bf16.mxu1 %v15890_v26  ;;  %v15978_v25 = vld [vmem:[#allocation2 + $0x23a0] ss:$16 sps:$4 sm:$0xff]   ;;  %v15981_v26 = vld [vmem:[#allocation2 + $0x23a8] ss:$16 sps:$4 sm:$0xff]  }
 0x484   :  { %10515 = vmatpush1.bf16.msra.mxu0 %v15885_v27  ;;  %11590 = vmatpush1.bf16.msra.mxu1 %v15888_v28  ;;  %v15986_v27 = vld [vmem:[#allocation2 + $0x23c4] ss:$16 sps:$4 sm:$0xff]   ;;  %v15989_v28 = vld [vmem:[#allocation2 + $0x23cc] ss:$16 sps:$4 sm:$0xff]  }
 0x485   :  { %10516 = vmatprep.subr.bf16.mxu0 %v15893_v29  ;;  %11591 = vmatprep.subr.bf16.mxu1 %v15896_v30  ;;  %v15984_v29 = vld [vmem:[#allocation2 + $0x23c0] ss:$16 sps:$4 sm:$0xff]   ;;  %v15987_v30 = vld [vmem:[#allocation2 + $0x23c8] ss:$16 sps:$4 sm:$0xff]  }
 0x488   :  { %10517 = vmatpush1.bf16.msra.mxu0 %v15891_v31  ;;  %11592 = vmatpush1.bf16.msra.mxu1 %v15894_v32  ;;  %v15992_v31 = vld [vmem:[#allocation2 + $0x23e4] ss:$16 sps:$4 sm:$0xff]   ;;  %v15995_v32 = vld [vmem:[#allocation2 + $0x23ec] ss:$16 sps:$4 sm:$0xff]  }
 0x489   :  { %10529 = vmatprep.subr.bf16.mxu0 %v15902_v33  ;;  %11604 = vmatprep.subr.bf16.mxu1 %v15905_v34  ;;  %v15990_v33 = vld [vmem:[#allocation2 + $0x23e0] ss:$16 sps:$4 sm:$0xff]   ;;  %v15993_v34 = vld [vmem:[#allocation2 + $0x23e8] ss:$16 sps:$4 sm:$0xff]  }
 0x48b   :  { %10519 = vmatmul.mubr.bf16.vlgmr.msra.gmra.mrb[0].mxu0 %v15897_v35  ;;  %11594 = vmatmul.mubr.bf16.vlgmr.msra.gmra.mrb[0].mxu1 %v15897_v35  ;;  %v16001_v35 = vld [vmem:[#allocation2 + $0x2404] ss:$16 sps:$4 sm:$0xff]  }
 0x48c   :  { %10530 = vmatpush1.bf16.msra.mxu0 %v15900_v36  ;;  %11605 = vmatpush1.bf16.msra.mxu1 %v15903_v37  ;;  %v16004_v36 = vld [vmem:[#allocation2 + $0x240c] ss:$16 sps:$4 sm:$0xff]  }
 0x48d   :  { %10531 = vmatprep.subr.bf16.mxu0 %v15908_v38  ;;  %11606 = vmatprep.subr.bf16.mxu1 %v15911_v39  ;;  %v15996_v37 = vld [vmem:[%s17015_s0 + $0x88] ss:$196 sps:$4 sm:$0xff]   ;;  %v15999_v38 = vld [vmem:[#allocation2 + $0x2400] ss:$16 sps:$4 sm:$0xff]  }
 0x48e   :  { %10561 = vmatprep.mubr.bf16.mxu0 %v15998_v40  ;;  %11636 = vmatprep.mubr.bf16.mxu1 %v15998_v40  ;;  %v16002_v39 = vld [vmem:[#allocation2 + $0x2408] ss:$16 sps:$4 sm:$0xff]   ;;  %v16007_v40 = vld [vmem:[#allocation2 + $0x2424] ss:$16 sps:$4 sm:$0xff]  }
 0x490   :  { %10532 = vmatpush1.bf16.msra.mxu0 %v15906_v41  ;;  %11607 = vmatpush1.bf16.msra.mxu1 %v15909_v42  ;;  %v16010_v41 = vld [vmem:[#allocation2 + $0x242c] ss:$16 sps:$4 sm:$0xff]   ;;  %v16097_v42 = vld [vmem:[%s17015_s0 + $0x94] ss:$196 sps:$4 sm:$0xff]  }
 0x491   :  { %10533 = vmatprep.subr.bf16.mxu0 %v15914_v43  ;;  %11608 = vmatprep.subr.bf16.mxu1 %v15917_v44  ;;  %v16005_v43 = vld [vmem:[#allocation2 + $0x2420] ss:$16 sps:$4 sm:$0xff]   ;;  %v16008_v44 = vld [vmem:[#allocation2 + $0x2428] ss:$16 sps:$4 sm:$0xff]  }
 0x494   :  { %10534 = vmatpush1.bf16.msra.mxu0 %v15912_v45  ;;  %11609 = vmatpush1.bf16.msra.mxu1 %v15915_v46  ;;  %v16013_v45 = vld [vmem:[#allocation2 + $0x2444] ss:$16 sps:$4 sm:$0xff]   ;;  %v16016_v46 = vld [vmem:[#allocation2 + $0x244c] ss:$16 sps:$4 sm:$0xff]  }
 0x495   :  { %10535 = vmatprep.subr.bf16.mxu0 %v15920_v47  ;;  %11610 = vmatprep.subr.bf16.mxu1 %v15923_v48  ;;  %v16011_v47 = vld [vmem:[#allocation2 + $0x2440] ss:$16 sps:$4 sm:$0xff]   ;;  %v16014_v48 = vld [vmem:[#allocation2 + $0x2448] ss:$16 sps:$4 sm:$0xff]  }
 0x498   :  { %10536 = vmatpush1.bf16.msra.mxu0 %v15918_v49  ;;  %11611 = vmatpush1.bf16.msra.mxu1 %v15921_v50  ;;  %v16019_v49 = vld [vmem:[#allocation2 + $0x2464] ss:$16 sps:$4 sm:$0xff]   ;;  %v16022_v50 = vld [vmem:[#allocation2 + $0x246c] ss:$16 sps:$4 sm:$0xff]  }
 0x499   :  { %10537 = vmatprep.subr.bf16.mxu0 %v15926_v51  ;;  %11612 = vmatprep.subr.bf16.mxu1 %v15929_v52  ;;  %v16017_v51 = vld [vmem:[#allocation2 + $0x2460] ss:$16 sps:$4 sm:$0xff]   ;;  %v16020_v52 = vld [vmem:[#allocation2 + $0x2468] ss:$16 sps:$4 sm:$0xff]  }
 0x49c   :  { %10538 = vmatpush1.bf16.msra.mxu0 %v15924_v53  ;;  %11613 = vmatpush1.bf16.msra.mxu1 %v15927_v54  ;;  %v16025_v53 = vld [vmem:[#allocation2 + $0x2484] ss:$16 sps:$4 sm:$0xff]   ;;  %v16028_v54 = vld [vmem:[#allocation2 + $0x248c] ss:$16 sps:$4 sm:$0xff]  }
 0x49d   :  { %10539 = vmatprep.subr.bf16.mxu0 %v15932_v55  ;;  %11614 = vmatprep.subr.bf16.mxu1 %v15935_v56  ;;  %v16023_v55 = vld [vmem:[#allocation2 + $0x2480] ss:$16 sps:$4 sm:$0xff]   ;;  %v16026_v56 = vld [vmem:[#allocation2 + $0x2488] ss:$16 sps:$4 sm:$0xff]  }
 0x4a0   :  { %10540 = vmatpush1.bf16.msra.mxu0 %v15930_v57  ;;  %11615 = vmatpush1.bf16.msra.mxu1 %v15933_v58  ;;  %v16031_v57 = vld [vmem:[#allocation2 + $0x24a4] ss:$16 sps:$4 sm:$0xff]   ;;  %v16034_v58 = vld [vmem:[#allocation2 + $0x24ac] ss:$16 sps:$4 sm:$0xff]  }
 0x4a1   :  { %10541 = vmatprep.subr.bf16.mxu0 %v15938_v59  ;;  %11616 = vmatprep.subr.bf16.mxu1 %v15941_v60  ;;  %v16029_v59 = vld [vmem:[#allocation2 + $0x24a0] ss:$16 sps:$4 sm:$0xff]   ;;  %v16032_v60 = vld [vmem:[#allocation2 + $0x24a8] ss:$16 sps:$4 sm:$0xff]  }
 0x4a4   :  { %10542 = vmatpush1.bf16.msra.mxu0 %v15936_v61  ;;  %11617 = vmatpush1.bf16.msra.mxu1 %v15939_v62  ;;  %v16037_v61 = vld [vmem:[#allocation2 + $0x24c4] ss:$16 sps:$4 sm:$0xff]   ;;  %v16040_v62 = vld [vmem:[#allocation2 + $0x24cc] ss:$16 sps:$4 sm:$0xff]  }
 0x4a5   :  { %10543 = vmatprep.subr.bf16.mxu0 %v15944_v63  ;;  %11618 = vmatprep.subr.bf16.mxu1 %v15947_v0  ;;  %v16035_v63 = vld [vmem:[#allocation2 + $0x24c0] ss:$16 sps:$4 sm:$0xff]   ;;  %v16038_v0 = vld [vmem:[#allocation2 + $0x24c8] ss:$16 sps:$4 sm:$0xff]  }
 0x4a8   :  { %10544 = vmatpush1.bf16.msra.mxu0 %v15942_v1  ;;  %11619 = vmatpush1.bf16.msra.mxu1 %v15945_v2  ;;  %v16043_v1 = vld [vmem:[#allocation2 + $0x24e4] ss:$16 sps:$4 sm:$0xff]   ;;  %v16046_v2 = vld [vmem:[#allocation2 + $0x24ec] ss:$16 sps:$4 sm:$0xff]  }
 0x4a9   :  { %10545 = vmatprep.subr.bf16.mxu0 %v15950_v3  ;;  %11620 = vmatprep.subr.bf16.mxu1 %v15953_v4  ;;  %v16041_v3 = vld [vmem:[#allocation2 + $0x24e0] ss:$16 sps:$4 sm:$0xff]   ;;  %v16044_v4 = vld [vmem:[#allocation2 + $0x24e8] ss:$16 sps:$4 sm:$0xff]  }
 0x4ac   :  { %10546 = vmatpush1.bf16.msra.mxu0 %v15948_v5  ;;  %11621 = vmatpush1.bf16.msra.mxu1 %v15951_v6  ;;  %v16049_v5 = vld [vmem:[#allocation2 + $0x2504] ss:$16 sps:$4 sm:$0xff]   ;;  %v16052_v6 = vld [vmem:[#allocation2 + $0x250c] ss:$16 sps:$4 sm:$0xff]  }
 0x4ad   :  { %10547 = vmatprep.subr.bf16.mxu0 %v15956_v7  ;;  %11622 = vmatprep.subr.bf16.mxu1 %v15959_v8  ;;  %v16047_v7 = vld [vmem:[#allocation2 + $0x2500] ss:$16 sps:$4 sm:$0xff]   ;;  %v16050_v8 = vld [vmem:[#allocation2 + $0x2508] ss:$16 sps:$4 sm:$0xff]  }
 0x4b0   :  { %10548 = vmatpush1.bf16.msra.mxu0 %v15954_v9  ;;  %11623 = vmatpush1.bf16.msra.mxu1 %v15957_v10  ;;  %v16055_v9 = vld [vmem:[#allocation2 + $0x2524] ss:$16 sps:$4 sm:$0xff]   ;;  %v16058_v10 = vld [vmem:[#allocation2 + $0x252c] ss:$16 sps:$4 sm:$0xff]  }
 0x4b1   :  { %10549 = vmatprep.subr.bf16.mxu0 %v15962_v11  ;;  %11624 = vmatprep.subr.bf16.mxu1 %v15965_v12  ;;  %v16053_v11 = vld [vmem:[#allocation2 + $0x2520] ss:$16 sps:$4 sm:$0xff]   ;;  %v16056_v12 = vld [vmem:[#allocation2 + $0x2528] ss:$16 sps:$4 sm:$0xff]  }
 0x4b4   :  { %10550 = vmatpush1.bf16.msra.mxu0 %v15960_v13  ;;  %11625 = vmatpush1.bf16.msra.mxu1 %v15963_v14  ;;  %v16061_v13 = vld [vmem:[#allocation2 + $0x2544] ss:$16 sps:$4 sm:$0xff]   ;;  %v16064_v14 = vld [vmem:[#allocation2 + $0x254c] ss:$16 sps:$4 sm:$0xff]  }
 0x4b5   :  { %10551 = vmatprep.subr.bf16.mxu0 %v15968_v15  ;;  %11626 = vmatprep.subr.bf16.mxu1 %v15971_v16  ;;  %v16059_v15 = vld [vmem:[#allocation2 + $0x2540] ss:$16 sps:$4 sm:$0xff]   ;;  %v16062_v16 = vld [vmem:[#allocation2 + $0x2548] ss:$16 sps:$4 sm:$0xff]  }
 0x4b8   :  { %10552 = vmatpush1.bf16.msra.mxu0 %v15966_v17  ;;  %11627 = vmatpush1.bf16.msra.mxu1 %v15969_v18  ;;  %v16067_v17 = vld [vmem:[#allocation2 + $0x2564] ss:$16 sps:$4 sm:$0xff]   ;;  %v16070_v18 = vld [vmem:[#allocation2 + $0x256c] ss:$16 sps:$4 sm:$0xff]  }
 0x4b9   :  { %10553 = vmatprep.subr.bf16.mxu0 %v15974_v19  ;;  %11628 = vmatprep.subr.bf16.mxu1 %v15977_v20  ;;  %v16065_v19 = vld [vmem:[#allocation2 + $0x2560] ss:$16 sps:$4 sm:$0xff]   ;;  %v16068_v20 = vld [vmem:[#allocation2 + $0x2568] ss:$16 sps:$4 sm:$0xff]  }
 0x4bc   :  { %10554 = vmatpush1.bf16.msra.mxu0 %v15972_v21  ;;  %11629 = vmatpush1.bf16.msra.mxu1 %v15975_v22  ;;  %v16073_v21 = vld [vmem:[#allocation2 + $0x2584] ss:$16 sps:$4 sm:$0xff]   ;;  %v16076_v22 = vld [vmem:[#allocation2 + $0x258c] ss:$16 sps:$4 sm:$0xff]  }
 0x4bd   :  { %10555 = vmatprep.subr.bf16.mxu0 %v15980_v23  ;;  %11630 = vmatprep.subr.bf16.mxu1 %v15983_v24  ;;  %v16071_v23 = vld [vmem:[#allocation2 + $0x2580] ss:$16 sps:$4 sm:$0xff]   ;;  %v16074_v24 = vld [vmem:[#allocation2 + $0x2588] ss:$16 sps:$4 sm:$0xff]  }
 0x4c0   :  { %10556 = vmatpush1.bf16.msra.mxu0 %v15978_v25  ;;  %11631 = vmatpush1.bf16.msra.mxu1 %v15981_v26  ;;  %v16079_v25 = vld [vmem:[#allocation2 + $0x25a4] ss:$16 sps:$4 sm:$0xff]   ;;  %v16082_v26 = vld [vmem:[#allocation2 + $0x25ac] ss:$16 sps:$4 sm:$0xff]  }
 0x4c1   :  { %10557 = vmatprep.subr.bf16.mxu0 %v15986_v27  ;;  %11632 = vmatprep.subr.bf16.mxu1 %v15989_v28  ;;  %v16077_v27 = vld [vmem:[#allocation2 + $0x25a0] ss:$16 sps:$4 sm:$0xff]   ;;  %v16080_v28 = vld [vmem:[#allocation2 + $0x25a8] ss:$16 sps:$4 sm:$0xff]  }
 0x4c4   :  { %10558 = vmatpush1.bf16.msra.mxu0 %v15984_v29  ;;  %11633 = vmatpush1.bf16.msra.mxu1 %v15987_v30  ;;  %v16085_v29 = vld [vmem:[#allocation2 + $0x25c4] ss:$16 sps:$4 sm:$0xff]   ;;  %v16088_v30 = vld [vmem:[#allocation2 + $0x25cc] ss:$16 sps:$4 sm:$0xff]  }
 0x4c5   :  { %10559 = vmatprep.subr.bf16.mxu0 %v15992_v31  ;;  %11634 = vmatprep.subr.bf16.mxu1 %v15995_v32  ;;  %v16083_v31 = vld [vmem:[#allocation2 + $0x25c0] ss:$16 sps:$4 sm:$0xff]   ;;  %v16086_v32 = vld [vmem:[#allocation2 + $0x25c8] ss:$16 sps:$4 sm:$0xff]  }
 0x4c8   :  { %10560 = vmatpush1.bf16.msra.mxu0 %v15990_v33  ;;  %11635 = vmatpush1.bf16.msra.mxu1 %v15993_v34  ;;  %v16091_v33 = vld [vmem:[#allocation2 + $0x25e4] ss:$16 sps:$4 sm:$0xff]   ;;  %v16094_v34 = vld [vmem:[#allocation2 + $0x25ec] ss:$16 sps:$4 sm:$0xff]  }
 0x4c9   :  { %10572 = vmatprep.subr.bf16.mxu0 %v16001_v35  ;;  %11647 = vmatprep.subr.bf16.mxu1 %v16004_v36  ;;  %v16089_v35 = vld [vmem:[#allocation2 + $0x25e0] ss:$16 sps:$4 sm:$0xff]   ;;  %v16092_v36 = vld [vmem:[#allocation2 + $0x25e8] ss:$16 sps:$4 sm:$0xff]  }
 0x4cb   :  { %10562 = vmatmul.mubr.bf16.vlgmr.msra.gmra.mrb[0].mxu0 %v15996_v37  ;;  %11637 = vmatmul.mubr.bf16.vlgmr.msra.gmra.mrb[0].mxu1 %v15996_v37  ;;  %v16100_v37 = vld [vmem:[#allocation2 + $0x2604] ss:$16 sps:$4 sm:$0xff]  }
 0x4cc   :  { %10573 = vmatpush1.bf16.msra.mxu0 %v15999_v38  ;;  %11648 = vmatpush1.bf16.msra.mxu1 %v16002_v39  ;;  %v16103_v38 = vld [vmem:[#allocation2 + $0x260c] ss:$16 sps:$4 sm:$0xff]   ;;  %v16095_v39 = vld [vmem:[%s17015_s0 + $0x90] ss:$196 sps:$4 sm:$0xff]  }
 0x4cd   :  { %10574 = vmatprep.subr.bf16.mxu0 %v16007_v40  ;;  %11649 = vmatprep.subr.bf16.mxu1 %v16010_v41  ;;  %v16098_v40 = vld [vmem:[#allocation2 + $0x2600] ss:$16 sps:$4 sm:$0xff]   ;;  %v16101_v41 = vld [vmem:[#allocation2 + $0x2608] ss:$16 sps:$4 sm:$0xff]  }
 0x4ce   :  { %10604 = vmatprep.mubr.bf16.mxu0 %v16097_v42  ;;  %11679 = vmatprep.mubr.bf16.mxu1 %v16097_v42  ;;  %v16106_v42 = vld [vmem:[#allocation2 + $0x2624] ss:$16 sps:$4 sm:$0xff]  }
 0x4d0   :  { %10575 = vmatpush1.bf16.msra.mxu0 %v16005_v43  ;;  %11650 = vmatpush1.bf16.msra.mxu1 %v16008_v44  ;;  %v16109_v43 = vld [vmem:[#allocation2 + $0x262c] ss:$16 sps:$4 sm:$0xff]  }
 0x4d1   :  { %10576 = vmatprep.subr.bf16.mxu0 %v16013_v45  ;;  %11651 = vmatprep.subr.bf16.mxu1 %v16016_v46  ;;  %v16196_v44 = vld [vmem:[%s17015_s0 + $0x9c] ss:$196 sps:$4 sm:$0xff]   ;;  %v16107_v46 = vld [vmem:[#allocation2 + $0x2628] ss:$16 sps:$4 sm:$0xff]  }
 0x4d2   :  { %v16104_v45 = vld [vmem:[#allocation2 + $0x2620] ss:$16 sps:$4 sm:$0xff]  }
 0x4d4   :  { %10577 = vmatpush1.bf16.msra.mxu0 %v16011_v47  ;;  %11652 = vmatpush1.bf16.msra.mxu1 %v16014_v48  ;;  %v16112_v47 = vld [vmem:[#allocation2 + $0x2644] ss:$16 sps:$4 sm:$0xff]   ;;  %v16115_v48 = vld [vmem:[#allocation2 + $0x264c] ss:$16 sps:$4 sm:$0xff]  }
 0x4d5   :  { %10578 = vmatprep.subr.bf16.mxu0 %v16019_v49  ;;  %11653 = vmatprep.subr.bf16.mxu1 %v16022_v50  ;;  %v16110_v49 = vld [vmem:[#allocation2 + $0x2640] ss:$16 sps:$4 sm:$0xff]   ;;  %v16113_v50 = vld [vmem:[#allocation2 + $0x2648] ss:$16 sps:$4 sm:$0xff]  }
 0x4d8   :  { %10579 = vmatpush1.bf16.msra.mxu0 %v16017_v51  ;;  %11654 = vmatpush1.bf16.msra.mxu1 %v16020_v52  ;;  %v16118_v51 = vld [vmem:[#allocation2 + $0x2664] ss:$16 sps:$4 sm:$0xff]   ;;  %v16121_v52 = vld [vmem:[#allocation2 + $0x266c] ss:$16 sps:$4 sm:$0xff]  }
 0x4d9   :  { %10580 = vmatprep.subr.bf16.mxu0 %v16025_v53  ;;  %11655 = vmatprep.subr.bf16.mxu1 %v16028_v54  ;;  %v16116_v53 = vld [vmem:[#allocation2 + $0x2660] ss:$16 sps:$4 sm:$0xff]   ;;  %v16119_v54 = vld [vmem:[#allocation2 + $0x2668] ss:$16 sps:$4 sm:$0xff]  }
 0x4dc   :  { %10581 = vmatpush1.bf16.msra.mxu0 %v16023_v55  ;;  %11656 = vmatpush1.bf16.msra.mxu1 %v16026_v56  ;;  %v16124_v55 = vld [vmem:[#allocation2 + $0x2684] ss:$16 sps:$4 sm:$0xff]   ;;  %v16127_v56 = vld [vmem:[#allocation2 + $0x268c] ss:$16 sps:$4 sm:$0xff]  }
 0x4dd   :  { %10582 = vmatprep.subr.bf16.mxu0 %v16031_v57  ;;  %11657 = vmatprep.subr.bf16.mxu1 %v16034_v58  ;;  %v16122_v57 = vld [vmem:[#allocation2 + $0x2680] ss:$16 sps:$4 sm:$0xff]   ;;  %v16125_v58 = vld [vmem:[#allocation2 + $0x2688] ss:$16 sps:$4 sm:$0xff]  }
 0x4e0   :  { %10583 = vmatpush1.bf16.msra.mxu0 %v16029_v59  ;;  %11658 = vmatpush1.bf16.msra.mxu1 %v16032_v60  ;;  %v16130_v59 = vld [vmem:[#allocation2 + $0x26a4] ss:$16 sps:$4 sm:$0xff]   ;;  %v16133_v60 = vld [vmem:[#allocation2 + $0x26ac] ss:$16 sps:$4 sm:$0xff]  }
 0x4e1   :  { %10584 = vmatprep.subr.bf16.mxu0 %v16037_v61  ;;  %11659 = vmatprep.subr.bf16.mxu1 %v16040_v62  ;;  %v16128_v61 = vld [vmem:[#allocation2 + $0x26a0] ss:$16 sps:$4 sm:$0xff]   ;;  %v16131_v62 = vld [vmem:[#allocation2 + $0x26a8] ss:$16 sps:$4 sm:$0xff]  }
 0x4e4   :  { %10585 = vmatpush1.bf16.msra.mxu0 %v16035_v63  ;;  %11660 = vmatpush1.bf16.msra.mxu1 %v16038_v0  ;;  %v16136_v63 = vld [vmem:[#allocation2 + $0x26c4] ss:$16 sps:$4 sm:$0xff]   ;;  %v16139_v0 = vld [vmem:[#allocation2 + $0x26cc] ss:$16 sps:$4 sm:$0xff]  }
 0x4e5   :  { %10586 = vmatprep.subr.bf16.mxu0 %v16043_v1  ;;  %11661 = vmatprep.subr.bf16.mxu1 %v16046_v2  ;;  %v16134_v1 = vld [vmem:[#allocation2 + $0x26c0] ss:$16 sps:$4 sm:$0xff]   ;;  %v16137_v2 = vld [vmem:[#allocation2 + $0x26c8] ss:$16 sps:$4 sm:$0xff]  }
 0x4e8   :  { %10587 = vmatpush1.bf16.msra.mxu0 %v16041_v3  ;;  %11662 = vmatpush1.bf16.msra.mxu1 %v16044_v4  ;;  %v16142_v3 = vld [vmem:[#allocation2 + $0x26e4] ss:$16 sps:$4 sm:$0xff]   ;;  %v16145_v4 = vld [vmem:[#allocation2 + $0x26ec] ss:$16 sps:$4 sm:$0xff]  }
 0x4e9   :  { %10588 = vmatprep.subr.bf16.mxu0 %v16049_v5  ;;  %11663 = vmatprep.subr.bf16.mxu1 %v16052_v6  ;;  %v16140_v5 = vld [vmem:[#allocation2 + $0x26e0] ss:$16 sps:$4 sm:$0xff]   ;;  %v16143_v6 = vld [vmem:[#allocation2 + $0x26e8] ss:$16 sps:$4 sm:$0xff]  }
 0x4ec   :  { %10589 = vmatpush1.bf16.msra.mxu0 %v16047_v7  ;;  %11664 = vmatpush1.bf16.msra.mxu1 %v16050_v8  ;;  %v16148_v7 = vld [vmem:[#allocation2 + $0x2704] ss:$16 sps:$4 sm:$0xff]   ;;  %v16151_v8 = vld [vmem:[#allocation2 + $0x270c] ss:$16 sps:$4 sm:$0xff]  }
 0x4ed   :  { %10590 = vmatprep.subr.bf16.mxu0 %v16055_v9  ;;  %11665 = vmatprep.subr.bf16.mxu1 %v16058_v10  ;;  %v16146_v9 = vld [vmem:[#allocation2 + $0x2700] ss:$16 sps:$4 sm:$0xff]   ;;  %v16149_v10 = vld [vmem:[#allocation2 + $0x2708] ss:$16 sps:$4 sm:$0xff]  }
 0x4f0   :  { %10591 = vmatpush1.bf16.msra.mxu0 %v16053_v11  ;;  %11666 = vmatpush1.bf16.msra.mxu1 %v16056_v12  ;;  %v16154_v11 = vld [vmem:[#allocation2 + $0x2724] ss:$16 sps:$4 sm:$0xff]   ;;  %v16157_v12 = vld [vmem:[#allocation2 + $0x272c] ss:$16 sps:$4 sm:$0xff]  }
 0x4f1   :  { %10592 = vmatprep.subr.bf16.mxu0 %v16061_v13  ;;  %11667 = vmatprep.subr.bf16.mxu1 %v16064_v14  ;;  %v16152_v13 = vld [vmem:[#allocation2 + $0x2720] ss:$16 sps:$4 sm:$0xff]   ;;  %v16155_v14 = vld [vmem:[#allocation2 + $0x2728] ss:$16 sps:$4 sm:$0xff]  }
 0x4f4   :  { %10593 = vmatpush1.bf16.msra.mxu0 %v16059_v15  ;;  %11668 = vmatpush1.bf16.msra.mxu1 %v16062_v16  ;;  %v16160_v15 = vld [vmem:[#allocation2 + $0x2744] ss:$16 sps:$4 sm:$0xff]   ;;  %v16163_v16 = vld [vmem:[#allocation2 + $0x274c] ss:$16 sps:$4 sm:$0xff]  }
 0x4f5   :  { %10594 = vmatprep.subr.bf16.mxu0 %v16067_v17  ;;  %11669 = vmatprep.subr.bf16.mxu1 %v16070_v18  ;;  %v16158_v17 = vld [vmem:[#allocation2 + $0x2740] ss:$16 sps:$4 sm:$0xff]   ;;  %v16161_v18 = vld [vmem:[#allocation2 + $0x2748] ss:$16 sps:$4 sm:$0xff]  }
 0x4f8   :  { %10595 = vmatpush1.bf16.msra.mxu0 %v16065_v19  ;;  %11670 = vmatpush1.bf16.msra.mxu1 %v16068_v20  ;;  %v16166_v19 = vld [vmem:[#allocation2 + $0x2764] ss:$16 sps:$4 sm:$0xff]   ;;  %v16169_v20 = vld [vmem:[#allocation2 + $0x276c] ss:$16 sps:$4 sm:$0xff]  }
 0x4f9   :  { %10596 = vmatprep.subr.bf16.mxu0 %v16073_v21  ;;  %11671 = vmatprep.subr.bf16.mxu1 %v16076_v22  ;;  %v16164_v21 = vld [vmem:[#allocation2 + $0x2760] ss:$16 sps:$4 sm:$0xff]   ;;  %v16167_v22 = vld [vmem:[#allocation2 + $0x2768] ss:$16 sps:$4 sm:$0xff]  }
 0x4fc   :  { %10597 = vmatpush1.bf16.msra.mxu0 %v16071_v23  ;;  %11672 = vmatpush1.bf16.msra.mxu1 %v16074_v24  ;;  %v16172_v23 = vld [vmem:[#allocation2 + $0x2784] ss:$16 sps:$4 sm:$0xff]   ;;  %v16175_v24 = vld [vmem:[#allocation2 + $0x278c] ss:$16 sps:$4 sm:$0xff]  }
 0x4fd   :  { %10598 = vmatprep.subr.bf16.mxu0 %v16079_v25  ;;  %11673 = vmatprep.subr.bf16.mxu1 %v16082_v26  ;;  %v16170_v25 = vld [vmem:[#allocation2 + $0x2780] ss:$16 sps:$4 sm:$0xff]   ;;  %v16173_v26 = vld [vmem:[#allocation2 + $0x2788] ss:$16 sps:$4 sm:$0xff]  }
 0x500   :  { %10599 = vmatpush1.bf16.msra.mxu0 %v16077_v27  ;;  %11674 = vmatpush1.bf16.msra.mxu1 %v16080_v28  ;;  %v16178_v27 = vld [vmem:[#allocation2 + $0x27a4] ss:$16 sps:$4 sm:$0xff]   ;;  %v16181_v28 = vld [vmem:[#allocation2 + $0x27ac] ss:$16 sps:$4 sm:$0xff]  }
 0x501   :  { %10600 = vmatprep.subr.bf16.mxu0 %v16085_v29  ;;  %11675 = vmatprep.subr.bf16.mxu1 %v16088_v30  ;;  %v16176_v29 = vld [vmem:[#allocation2 + $0x27a0] ss:$16 sps:$4 sm:$0xff]   ;;  %v16179_v30 = vld [vmem:[#allocation2 + $0x27a8] ss:$16 sps:$4 sm:$0xff]  }
 0x504   :  { %10601 = vmatpush1.bf16.msra.mxu0 %v16083_v31  ;;  %11676 = vmatpush1.bf16.msra.mxu1 %v16086_v32  ;;  %v16184_v31 = vld [vmem:[#allocation2 + $0x27c4] ss:$16 sps:$4 sm:$0xff]   ;;  %v16187_v32 = vld [vmem:[#allocation2 + $0x27cc] ss:$16 sps:$4 sm:$0xff]  }
 0x505   :  { %10602 = vmatprep.subr.bf16.mxu0 %v16091_v33  ;;  %11677 = vmatprep.subr.bf16.mxu1 %v16094_v34  ;;  %v16182_v33 = vld [vmem:[#allocation2 + $0x27c0] ss:$16 sps:$4 sm:$0xff]   ;;  %v16185_v34 = vld [vmem:[#allocation2 + $0x27c8] ss:$16 sps:$4 sm:$0xff]  }
 0x508   :  { %10603 = vmatpush1.bf16.msra.mxu0 %v16089_v35  ;;  %11678 = vmatpush1.bf16.msra.mxu1 %v16092_v36  ;;  %v16190_v35 = vld [vmem:[#allocation2 + $0x27e4] ss:$16 sps:$4 sm:$0xff]   ;;  %v16193_v36 = vld [vmem:[#allocation2 + $0x27ec] ss:$16 sps:$4 sm:$0xff]  }
 0x509   :  { %10615 = vmatprep.subr.bf16.mxu0 %v16100_v37  ;;  %11690 = vmatprep.subr.bf16.mxu1 %v16103_v38  ;;  %v16188_v37 = vld [vmem:[#allocation2 + $0x27e0] ss:$16 sps:$4 sm:$0xff]   ;;  %v16191_v38 = vld [vmem:[#allocation2 + $0x27e8] ss:$16 sps:$4 sm:$0xff]  }
 0x50b   :  { %10605 = vmatmul.mubr.bf16.vlgmr.msra.gmra.mrb[0].mxu0 %v16095_v39  ;;  %11680 = vmatmul.mubr.bf16.vlgmr.msra.gmra.mrb[0].mxu1 %v16095_v39  ;;  %v16199_v39 = vld [vmem:[#allocation2 + $0x2804] ss:$16 sps:$4 sm:$0xff]  }
 0x50c   :  { %10616 = vmatpush1.bf16.msra.mxu0 %v16098_v40  ;;  %11691 = vmatpush1.bf16.msra.mxu1 %v16101_v41  ;;  %v16202_v40 = vld [vmem:[#allocation2 + $0x280c] ss:$16 sps:$4 sm:$0xff]  }
 0x50d   :  { %10617 = vmatprep.subr.bf16.mxu0 %v16106_v42  ;;  %11692 = vmatprep.subr.bf16.mxu1 %v16109_v43  ;;  %v16194_v41 = vld [vmem:[%s17015_s0 + $0x98] ss:$196 sps:$4 sm:$0xff]   ;;  %v16197_v42 = vld [vmem:[#allocation2 + $0x2800] ss:$16 sps:$4 sm:$0xff]  }
 0x50e   :  { %10647 = vmatprep.mubr.bf16.mxu0 %v16196_v44  ;;  %11722 = vmatprep.mubr.bf16.mxu1 %v16196_v44  ;;  %v16200_v43 = vld [vmem:[#allocation2 + $0x2808] ss:$16 sps:$4 sm:$0xff]   ;;  %v16205_v44 = vld [vmem:[#allocation2 + $0x2824] ss:$16 sps:$4 sm:$0xff]  }
 0x510   :  { %10618 = vmatpush1.bf16.msra.mxu0 %v16104_v45  ;;  %11693 = vmatpush1.bf16.msra.mxu1 %v16107_v46  ;;  %v16208_v45 = vld [vmem:[#allocation2 + $0x282c] ss:$16 sps:$4 sm:$0xff]   ;;  %v16295_v46 = vld [vmem:[%s17015_s0 + $0xa4] ss:$196 sps:$4 sm:$0xff]  }
 0x511   :  { %10619 = vmatprep.subr.bf16.mxu0 %v16112_v47  ;;  %11694 = vmatprep.subr.bf16.mxu1 %v16115_v48  ;;  %v16203_v47 = vld [vmem:[#allocation2 + $0x2820] ss:$16 sps:$4 sm:$0xff]   ;;  %v16206_v48 = vld [vmem:[#allocation2 + $0x2828] ss:$16 sps:$4 sm:$0xff]  }
 0x514   :  { %10620 = vmatpush1.bf16.msra.mxu0 %v16110_v49  ;;  %11695 = vmatpush1.bf16.msra.mxu1 %v16113_v50  ;;  %v16211_v49 = vld [vmem:[#allocation2 + $0x2844] ss:$16 sps:$4 sm:$0xff]   ;;  %v16214_v50 = vld [vmem:[#allocation2 + $0x284c] ss:$16 sps:$4 sm:$0xff]  }
 0x515   :  { %10621 = vmatprep.subr.bf16.mxu0 %v16118_v51  ;;  %11696 = vmatprep.subr.bf16.mxu1 %v16121_v52  ;;  %v16209_v51 = vld [vmem:[#allocation2 + $0x2840] ss:$16 sps:$4 sm:$0xff]   ;;  %v16212_v52 = vld [vmem:[#allocation2 + $0x2848] ss:$16 sps:$4 sm:$0xff]  }
 0x518   :  { %10622 = vmatpush1.bf16.msra.mxu0 %v16116_v53  ;;  %11697 = vmatpush1.bf16.msra.mxu1 %v16119_v54  ;;  %v16217_v53 = vld [vmem:[#allocation2 + $0x2864] ss:$16 sps:$4 sm:$0xff]   ;;  %v16220_v54 = vld [vmem:[#allocation2 + $0x286c] ss:$16 sps:$4 sm:$0xff]  }
 0x519   :  { %10623 = vmatprep.subr.bf16.mxu0 %v16124_v55  ;;  %11698 = vmatprep.subr.bf16.mxu1 %v16127_v56  ;;  %v16215_v55 = vld [vmem:[#allocation2 + $0x2860] ss:$16 sps:$4 sm:$0xff]   ;;  %v16218_v56 = vld [vmem:[#allocation2 + $0x2868] ss:$16 sps:$4 sm:$0xff]  }
 0x51c   :  { %10624 = vmatpush1.bf16.msra.mxu0 %v16122_v57  ;;  %11699 = vmatpush1.bf16.msra.mxu1 %v16125_v58  ;;  %v16223_v57 = vld [vmem:[#allocation2 + $0x2884] ss:$16 sps:$4 sm:$0xff]   ;;  %v16226_v58 = vld [vmem:[#allocation2 + $0x288c] ss:$16 sps:$4 sm:$0xff]  }
 0x51d   :  { %10625 = vmatprep.subr.bf16.mxu0 %v16130_v59  ;;  %11700 = vmatprep.subr.bf16.mxu1 %v16133_v60  ;;  %v16221_v59 = vld [vmem:[#allocation2 + $0x2880] ss:$16 sps:$4 sm:$0xff]   ;;  %v16224_v60 = vld [vmem:[#allocation2 + $0x2888] ss:$16 sps:$4 sm:$0xff]  }
 0x520   :  { %10626 = vmatpush1.bf16.msra.mxu0 %v16128_v61  ;;  %11701 = vmatpush1.bf16.msra.mxu1 %v16131_v62  ;;  %v16229_v61 = vld [vmem:[#allocation2 + $0x28a4] ss:$16 sps:$4 sm:$0xff]   ;;  %v16232_v62 = vld [vmem:[#allocation2 + $0x28ac] ss:$16 sps:$4 sm:$0xff]  }
 0x521   :  { %10627 = vmatprep.subr.bf16.mxu0 %v16136_v63  ;;  %11702 = vmatprep.subr.bf16.mxu1 %v16139_v0  ;;  %v16227_v63 = vld [vmem:[#allocation2 + $0x28a0] ss:$16 sps:$4 sm:$0xff]   ;;  %v16230_v0 = vld [vmem:[#allocation2 + $0x28a8] ss:$16 sps:$4 sm:$0xff]  }
 0x524   :  { %10628 = vmatpush1.bf16.msra.mxu0 %v16134_v1  ;;  %11703 = vmatpush1.bf16.msra.mxu1 %v16137_v2  ;;  %v16235_v1 = vld [vmem:[#allocation2 + $0x28c4] ss:$16 sps:$4 sm:$0xff]   ;;  %v16238_v2 = vld [vmem:[#allocation2 + $0x28cc] ss:$16 sps:$4 sm:$0xff]  }
 0x525   :  { %10629 = vmatprep.subr.bf16.mxu0 %v16142_v3  ;;  %11704 = vmatprep.subr.bf16.mxu1 %v16145_v4  ;;  %v16233_v3 = vld [vmem:[#allocation2 + $0x28c0] ss:$16 sps:$4 sm:$0xff]   ;;  %v16236_v4 = vld [vmem:[#allocation2 + $0x28c8] ss:$16 sps:$4 sm:$0xff]  }
 0x528   :  { %10630 = vmatpush1.bf16.msra.mxu0 %v16140_v5  ;;  %11705 = vmatpush1.bf16.msra.mxu1 %v16143_v6  ;;  %v16241_v5 = vld [vmem:[#allocation2 + $0x28e4] ss:$16 sps:$4 sm:$0xff]   ;;  %v16244_v6 = vld [vmem:[#allocation2 + $0x28ec] ss:$16 sps:$4 sm:$0xff]  }
 0x529   :  { %10631 = vmatprep.subr.bf16.mxu0 %v16148_v7  ;;  %11706 = vmatprep.subr.bf16.mxu1 %v16151_v8  ;;  %v16239_v7 = vld [vmem:[#allocation2 + $0x28e0] ss:$16 sps:$4 sm:$0xff]   ;;  %v16242_v8 = vld [vmem:[#allocation2 + $0x28e8] ss:$16 sps:$4 sm:$0xff]  }
 0x52c   :  { %10632 = vmatpush1.bf16.msra.mxu0 %v16146_v9  ;;  %11707 = vmatpush1.bf16.msra.mxu1 %v16149_v10  ;;  %v16247_v9 = vld [vmem:[#allocation2 + $0x2904] ss:$16 sps:$4 sm:$0xff]   ;;  %v16250_v10 = vld [vmem:[#allocation2 + $0x290c] ss:$16 sps:$4 sm:$0xff]  }
 0x52d   :  { %10633 = vmatprep.subr.bf16.mxu0 %v16154_v11  ;;  %11708 = vmatprep.subr.bf16.mxu1 %v16157_v12  ;;  %v16245_v11 = vld [vmem:[#allocation2 + $0x2900] ss:$16 sps:$4 sm:$0xff]   ;;  %v16248_v12 = vld [vmem:[#allocation2 + $0x2908] ss:$16 sps:$4 sm:$0xff]  }
 0x530   :  { %10634 = vmatpush1.bf16.msra.mxu0 %v16152_v13  ;;  %11709 = vmatpush1.bf16.msra.mxu1 %v16155_v14  ;;  %v16253_v13 = vld [vmem:[#allocation2 + $0x2924] ss:$16 sps:$4 sm:$0xff]   ;;  %v16256_v14 = vld [vmem:[#allocation2 + $0x292c] ss:$16 sps:$4 sm:$0xff]  }
 0x531   :  { %10635 = vmatprep.subr.bf16.mxu0 %v16160_v15  ;;  %11710 = vmatprep.subr.bf16.mxu1 %v16163_v16  ;;  %v16251_v15 = vld [vmem:[#allocation2 + $0x2920] ss:$16 sps:$4 sm:$0xff]   ;;  %v16254_v16 = vld [vmem:[#allocation2 + $0x2928] ss:$16 sps:$4 sm:$0xff]  }
 0x534   :  { %10636 = vmatpush1.bf16.msra.mxu0 %v16158_v17  ;;  %11711 = vmatpush1.bf16.msra.mxu1 %v16161_v18  ;;  %v16259_v17 = vld [vmem:[#allocation2 + $0x2944] ss:$16 sps:$4 sm:$0xff]   ;;  %v16262_v18 = vld [vmem:[#allocation2 + $0x294c] ss:$16 sps:$4 sm:$0xff]  }
 0x535   :  { %10637 = vmatprep.subr.bf16.mxu0 %v16166_v19  ;;  %11712 = vmatprep.subr.bf16.mxu1 %v16169_v20  ;;  %v16257_v19 = vld [vmem:[#allocation2 + $0x2940] ss:$16 sps:$4 sm:$0xff]   ;;  %v16260_v20 = vld [vmem:[#allocation2 + $0x2948] ss:$16 sps:$4 sm:$0xff]  }
 0x538   :  { %10638 = vmatpush1.bf16.msra.mxu0 %v16164_v21  ;;  %11713 = vmatpush1.bf16.msra.mxu1 %v16167_v22  ;;  %v16265_v21 = vld [vmem:[#allocation2 + $0x2964] ss:$16 sps:$4 sm:$0xff]   ;;  %v16268_v22 = vld [vmem:[#allocation2 + $0x296c] ss:$16 sps:$4 sm:$0xff]  }
 0x539   :  { %10639 = vmatprep.subr.bf16.mxu0 %v16172_v23  ;;  %11714 = vmatprep.subr.bf16.mxu1 %v16175_v24  ;;  %v16263_v23 = vld [vmem:[#allocation2 + $0x2960] ss:$16 sps:$4 sm:$0xff]   ;;  %v16266_v24 = vld [vmem:[#allocation2 + $0x2968] ss:$16 sps:$4 sm:$0xff]  }
 0x53c   :  { %10640 = vmatpush1.bf16.msra.mxu0 %v16170_v25  ;;  %11715 = vmatpush1.bf16.msra.mxu1 %v16173_v26  ;;  %v16271_v25 = vld [vmem:[#allocation2 + $0x2984] ss:$16 sps:$4 sm:$0xff]   ;;  %v16274_v26 = vld [vmem:[#allocation2 + $0x298c] ss:$16 sps:$4 sm:$0xff]  }
 0x53d   :  { %10641 = vmatprep.subr.bf16.mxu0 %v16178_v27  ;;  %11716 = vmatprep.subr.bf16.mxu1 %v16181_v28  ;;  %v16269_v27 = vld [vmem:[#allocation2 + $0x2980] ss:$16 sps:$4 sm:$0xff]   ;;  %v16272_v28 = vld [vmem:[#allocation2 + $0x2988] ss:$16 sps:$4 sm:$0xff]  }
 0x540   :  { %10642 = vmatpush1.bf16.msra.mxu0 %v16176_v29  ;;  %11717 = vmatpush1.bf16.msra.mxu1 %v16179_v30  ;;  %v16277_v29 = vld [vmem:[#allocation2 + $0x29a4] ss:$16 sps:$4 sm:$0xff]   ;;  %v16280_v30 = vld [vmem:[#allocation2 + $0x29ac] ss:$16 sps:$4 sm:$0xff]  }
 0x541   :  { %10643 = vmatprep.subr.bf16.mxu0 %v16184_v31  ;;  %11718 = vmatprep.subr.bf16.mxu1 %v16187_v32  ;;  %v16275_v31 = vld [vmem:[#allocation2 + $0x29a0] ss:$16 sps:$4 sm:$0xff]   ;;  %v16278_v32 = vld [vmem:[#allocation2 + $0x29a8] ss:$16 sps:$4 sm:$0xff]  }
 0x544   :  { %10644 = vmatpush1.bf16.msra.mxu0 %v16182_v33  ;;  %11719 = vmatpush1.bf16.msra.mxu1 %v16185_v34  ;;  %v16283_v33 = vld [vmem:[#allocation2 + $0x29c4] ss:$16 sps:$4 sm:$0xff]   ;;  %v16286_v34 = vld [vmem:[#allocation2 + $0x29cc] ss:$16 sps:$4 sm:$0xff]  }
 0x545   :  { %10645 = vmatprep.subr.bf16.mxu0 %v16190_v35  ;;  %11720 = vmatprep.subr.bf16.mxu1 %v16193_v36  ;;  %v16281_v35 = vld [vmem:[#allocation2 + $0x29c0] ss:$16 sps:$4 sm:$0xff]   ;;  %v16284_v36 = vld [vmem:[#allocation2 + $0x29c8] ss:$16 sps:$4 sm:$0xff]  }
 0x548   :  { %10646 = vmatpush1.bf16.msra.mxu0 %v16188_v37  ;;  %11721 = vmatpush1.bf16.msra.mxu1 %v16191_v38  ;;  %v16289_v37 = vld [vmem:[#allocation2 + $0x29e4] ss:$16 sps:$4 sm:$0xff]   ;;  %v16292_v38 = vld [vmem:[#allocation2 + $0x29ec] ss:$16 sps:$4 sm:$0xff]  }
 0x549   :  { %10658 = vmatprep.subr.bf16.mxu0 %v16199_v39  ;;  %11733 = vmatprep.subr.bf16.mxu1 %v16202_v40  ;;  %v16287_v39 = vld [vmem:[#allocation2 + $0x29e0] ss:$16 sps:$4 sm:$0xff]   ;;  %v16290_v40 = vld [vmem:[#allocation2 + $0x29e8] ss:$16 sps:$4 sm:$0xff]  }
 0x54b   :  { %10648 = vmatmul.mubr.bf16.vlgmr.msra.gmra.mrb[0].mxu0 %v16194_v41  ;;  %11723 = vmatmul.mubr.bf16.vlgmr.msra.gmra.mrb[0].mxu1 %v16194_v41  ;;  %v16298_v41 = vld [vmem:[#allocation2 + $0x2a04] ss:$16 sps:$4 sm:$0xff]  }
 0x54c   :  { %10659 = vmatpush1.bf16.msra.mxu0 %v16197_v42  ;;  %11734 = vmatpush1.bf16.msra.mxu1 %v16200_v43  ;;  %v16301_v42 = vld [vmem:[#allocation2 + $0x2a0c] ss:$16 sps:$4 sm:$0xff]   ;;  %v16293_v43 = vld [vmem:[%s17015_s0 + $0xa0] ss:$196 sps:$4 sm:$0xff]  }
 0x54d   :  { %10660 = vmatprep.subr.bf16.mxu0 %v16205_v44  ;;  %11735 = vmatprep.subr.bf16.mxu1 %v16208_v45  ;;  %v16296_v44 = vld [vmem:[#allocation2 + $0x2a00] ss:$16 sps:$4 sm:$0xff]   ;;  %v16299_v45 = vld [vmem:[#allocation2 + $0x2a08] ss:$16 sps:$4 sm:$0xff]  }
 0x54e   :  { %10690 = vmatprep.mubr.bf16.mxu0 %v16295_v46  ;;  %11765 = vmatprep.mubr.bf16.mxu1 %v16295_v46  ;;  %v16304_v46 = vld [vmem:[#allocation2 + $0x2a24] ss:$16 sps:$4 sm:$0xff]  }
 0x550   :  { %10661 = vmatpush1.bf16.msra.mxu0 %v16203_v47  ;;  %11736 = vmatpush1.bf16.msra.mxu1 %v16206_v48  ;;  %v16307_v47 = vld [vmem:[#allocation2 + $0x2a2c] ss:$16 sps:$4 sm:$0xff]  }
 0x551   :  { %10662 = vmatprep.subr.bf16.mxu0 %v16211_v49  ;;  %11737 = vmatprep.subr.bf16.mxu1 %v16214_v50  ;;  %v16394_v48 = vld [vmem:[%s17015_s0 + $0xac] ss:$196 sps:$4 sm:$0xff]   ;;  %v16305_v50 = vld [vmem:[#allocation2 + $0x2a28] ss:$16 sps:$4 sm:$0xff]  }
 0x552   :  { %v16302_v49 = vld [vmem:[#allocation2 + $0x2a20] ss:$16 sps:$4 sm:$0xff]  }
 0x554   :  { %10663 = vmatpush1.bf16.msra.mxu0 %v16209_v51  ;;  %11738 = vmatpush1.bf16.msra.mxu1 %v16212_v52  ;;  %v16310_v51 = vld [vmem:[#allocation2 + $0x2a44] ss:$16 sps:$4 sm:$0xff]   ;;  %v16313_v52 = vld [vmem:[#allocation2 + $0x2a4c] ss:$16 sps:$4 sm:$0xff]  }
 0x555   :  { %10664 = vmatprep.subr.bf16.mxu0 %v16217_v53  ;;  %11739 = vmatprep.subr.bf16.mxu1 %v16220_v54  ;;  %v16308_v53 = vld [vmem:[#allocation2 + $0x2a40] ss:$16 sps:$4 sm:$0xff]   ;;  %v16311_v54 = vld [vmem:[#allocation2 + $0x2a48] ss:$16 sps:$4 sm:$0xff]  }
 0x558   :  { %10665 = vmatpush1.bf16.msra.mxu0 %v16215_v55  ;;  %11740 = vmatpush1.bf16.msra.mxu1 %v16218_v56  ;;  %v16316_v55 = vld [vmem:[#allocation2 + $0x2a64] ss:$16 sps:$4 sm:$0xff]   ;;  %v16319_v56 = vld [vmem:[#allocation2 + $0x2a6c] ss:$16 sps:$4 sm:$0xff]  }
 0x559   :  { %10666 = vmatprep.subr.bf16.mxu0 %v16223_v57  ;;  %11741 = vmatprep.subr.bf16.mxu1 %v16226_v58  ;;  %v16314_v57 = vld [vmem:[#allocation2 + $0x2a60] ss:$16 sps:$4 sm:$0xff]   ;;  %v16317_v58 = vld [vmem:[#allocation2 + $0x2a68] ss:$16 sps:$4 sm:$0xff]  }
 0x55c   :  { %10667 = vmatpush1.bf16.msra.mxu0 %v16221_v59  ;;  %11742 = vmatpush1.bf16.msra.mxu1 %v16224_v60  ;;  %v16322_v59 = vld [vmem:[#allocation2 + $0x2a84] ss:$16 sps:$4 sm:$0xff]   ;;  %v16325_v60 = vld [vmem:[#allocation2 + $0x2a8c] ss:$16 sps:$4 sm:$0xff]  }
 0x55d   :  { %10668 = vmatprep.subr.bf16.mxu0 %v16229_v61  ;;  %11743 = vmatprep.subr.bf16.mxu1 %v16232_v62  ;;  %v16320_v61 = vld [vmem:[#allocation2 + $0x2a80] ss:$16 sps:$4 sm:$0xff]   ;;  %v16323_v62 = vld [vmem:[#allocation2 + $0x2a88] ss:$16 sps:$4 sm:$0xff]  }
 0x560   :  { %10669 = vmatpush1.bf16.msra.mxu0 %v16227_v63  ;;  %11744 = vmatpush1.bf16.msra.mxu1 %v16230_v0  ;;  %v16328_v63 = vld [vmem:[#allocation2 + $0x2aa4] ss:$16 sps:$4 sm:$0xff]   ;;  %v16331_v0 = vld [vmem:[#allocation2 + $0x2aac] ss:$16 sps:$4 sm:$0xff]  }
 0x561   :  { %10670 = vmatprep.subr.bf16.mxu0 %v16235_v1  ;;  %11745 = vmatprep.subr.bf16.mxu1 %v16238_v2  ;;  %v16326_v1 = vld [vmem:[#allocation2 + $0x2aa0] ss:$16 sps:$4 sm:$0xff]   ;;  %v16329_v2 = vld [vmem:[#allocation2 + $0x2aa8] ss:$16 sps:$4 sm:$0xff]  }
 0x564   :  { %10671 = vmatpush1.bf16.msra.mxu0 %v16233_v3  ;;  %11746 = vmatpush1.bf16.msra.mxu1 %v16236_v4  ;;  %v16334_v3 = vld [vmem:[#allocation2 + $0x2ac4] ss:$16 sps:$4 sm:$0xff]   ;;  %v16337_v4 = vld [vmem:[#allocation2 + $0x2acc] ss:$16 sps:$4 sm:$0xff]  }
 0x565   :  { %10672 = vmatprep.subr.bf16.mxu0 %v16241_v5  ;;  %11747 = vmatprep.subr.bf16.mxu1 %v16244_v6  ;;  %v16332_v5 = vld [vmem:[#allocation2 + $0x2ac0] ss:$16 sps:$4 sm:$0xff]   ;;  %v16335_v6 = vld [vmem:[#allocation2 + $0x2ac8] ss:$16 sps:$4 sm:$0xff]  }
 0x568   :  { %10673 = vmatpush1.bf16.msra.mxu0 %v16239_v7  ;;  %11748 = vmatpush1.bf16.msra.mxu1 %v16242_v8  ;;  %v16340_v7 = vld [vmem:[#allocation2 + $0x2ae4] ss:$16 sps:$4 sm:$0xff]   ;;  %v16343_v8 = vld [vmem:[#allocation2 + $0x2aec] ss:$16 sps:$4 sm:$0xff]  }
 0x569   :  { %10674 = vmatprep.subr.bf16.mxu0 %v16247_v9  ;;  %11749 = vmatprep.subr.bf16.mxu1 %v16250_v10  ;;  %v16338_v9 = vld [vmem:[#allocation2 + $0x2ae0] ss:$16 sps:$4 sm:$0xff]   ;;  %v16341_v10 = vld [vmem:[#allocation2 + $0x2ae8] ss:$16 sps:$4 sm:$0xff]  }
 0x56c   :  { %10675 = vmatpush1.bf16.msra.mxu0 %v16245_v11  ;;  %11750 = vmatpush1.bf16.msra.mxu1 %v16248_v12  ;;  %v16346_v11 = vld [vmem:[#allocation2 + $0x2b04] ss:$16 sps:$4 sm:$0xff]   ;;  %v16349_v12 = vld [vmem:[#allocation2 + $0x2b0c] ss:$16 sps:$4 sm:$0xff]  }
 0x56d   :  { %10676 = vmatprep.subr.bf16.mxu0 %v16253_v13  ;;  %11751 = vmatprep.subr.bf16.mxu1 %v16256_v14  ;;  %v16344_v13 = vld [vmem:[#allocation2 + $0x2b00] ss:$16 sps:$4 sm:$0xff]   ;;  %v16347_v14 = vld [vmem:[#allocation2 + $0x2b08] ss:$16 sps:$4 sm:$0xff]  }
 0x570   :  { %10677 = vmatpush1.bf16.msra.mxu0 %v16251_v15  ;;  %11752 = vmatpush1.bf16.msra.mxu1 %v16254_v16  ;;  %v16352_v15 = vld [vmem:[#allocation2 + $0x2b24] ss:$16 sps:$4 sm:$0xff]   ;;  %v16355_v16 = vld [vmem:[#allocation2 + $0x2b2c] ss:$16 sps:$4 sm:$0xff]  }
 0x571   :  { %10678 = vmatprep.subr.bf16.mxu0 %v16259_v17  ;;  %11753 = vmatprep.subr.bf16.mxu1 %v16262_v18  ;;  %v16350_v17 = vld [vmem:[#allocation2 + $0x2b20] ss:$16 sps:$4 sm:$0xff]   ;;  %v16353_v18 = vld [vmem:[#allocation2 + $0x2b28] ss:$16 sps:$4 sm:$0xff]  }
 0x574   :  { %10679 = vmatpush1.bf16.msra.mxu0 %v16257_v19  ;;  %11754 = vmatpush1.bf16.msra.mxu1 %v16260_v20  ;;  %v16358_v19 = vld [vmem:[#allocation2 + $0x2b44] ss:$16 sps:$4 sm:$0xff]   ;;  %v16361_v20 = vld [vmem:[#allocation2 + $0x2b4c] ss:$16 sps:$4 sm:$0xff]  }
 0x575   :  { %10680 = vmatprep.subr.bf16.mxu0 %v16265_v21  ;;  %11755 = vmatprep.subr.bf16.mxu1 %v16268_v22  ;;  %v16356_v21 = vld [vmem:[#allocation2 + $0x2b40] ss:$16 sps:$4 sm:$0xff]   ;;  %v16359_v22 = vld [vmem:[#allocation2 + $0x2b48] ss:$16 sps:$4 sm:$0xff]  }
 0x578   :  { %10681 = vmatpush1.bf16.msra.mxu0 %v16263_v23  ;;  %11756 = vmatpush1.bf16.msra.mxu1 %v16266_v24  ;;  %v16364_v23 = vld [vmem:[#allocation2 + $0x2b64] ss:$16 sps:$4 sm:$0xff]   ;;  %v16367_v24 = vld [vmem:[#allocation2 + $0x2b6c] ss:$16 sps:$4 sm:$0xff]  }
 0x579   :  { %10682 = vmatprep.subr.bf16.mxu0 %v16271_v25  ;;  %11757 = vmatprep.subr.bf16.mxu1 %v16274_v26  ;;  %v16362_v25 = vld [vmem:[#allocation2 + $0x2b60] ss:$16 sps:$4 sm:$0xff]   ;;  %v16365_v26 = vld [vmem:[#allocation2 + $0x2b68] ss:$16 sps:$4 sm:$0xff]  }
 0x57c   :  { %10683 = vmatpush1.bf16.msra.mxu0 %v16269_v27  ;;  %11758 = vmatpush1.bf16.msra.mxu1 %v16272_v28  ;;  %v16370_v27 = vld [vmem:[#allocation2 + $0x2b84] ss:$16 sps:$4 sm:$0xff]   ;;  %v16373_v28 = vld [vmem:[#allocation2 + $0x2b8c] ss:$16 sps:$4 sm:$0xff]  }
 0x57d   :  { %10684 = vmatprep.subr.bf16.mxu0 %v16277_v29  ;;  %11759 = vmatprep.subr.bf16.mxu1 %v16280_v30  ;;  %v16368_v29 = vld [vmem:[#allocation2 + $0x2b80] ss:$16 sps:$4 sm:$0xff]   ;;  %v16371_v30 = vld [vmem:[#allocation2 + $0x2b88] ss:$16 sps:$4 sm:$0xff]  }
 0x580   :  { %10685 = vmatpush1.bf16.msra.mxu0 %v16275_v31  ;;  %11760 = vmatpush1.bf16.msra.mxu1 %v16278_v32  ;;  %v16376_v31 = vld [vmem:[#allocation2 + $0x2ba4] ss:$16 sps:$4 sm:$0xff]   ;;  %v16379_v32 = vld [vmem:[#allocation2 + $0x2bac] ss:$16 sps:$4 sm:$0xff]  }
 0x581   :  { %10686 = vmatprep.subr.bf16.mxu0 %v16283_v33  ;;  %11761 = vmatprep.subr.bf16.mxu1 %v16286_v34  ;;  %v16374_v33 = vld [vmem:[#allocation2 + $0x2ba0] ss:$16 sps:$4 sm:$0xff]   ;;  %v16377_v34 = vld [vmem:[#allocation2 + $0x2ba8] ss:$16 sps:$4 sm:$0xff]  }
 0x584   :  { %10687 = vmatpush1.bf16.msra.mxu0 %v16281_v35  ;;  %11762 = vmatpush1.bf16.msra.mxu1 %v16284_v36  ;;  %v16382_v35 = vld [vmem:[#allocation2 + $0x2bc4] ss:$16 sps:$4 sm:$0xff]   ;;  %v16385_v36 = vld [vmem:[#allocation2 + $0x2bcc] ss:$16 sps:$4 sm:$0xff]  }
 0x585   :  { %10688 = vmatprep.subr.bf16.mxu0 %v16289_v37  ;;  %11763 = vmatprep.subr.bf16.mxu1 %v16292_v38  ;;  %v16380_v37 = vld [vmem:[#allocation2 + $0x2bc0] ss:$16 sps:$4 sm:$0xff]   ;;  %v16383_v38 = vld [vmem:[#allocation2 + $0x2bc8] ss:$16 sps:$4 sm:$0xff]  }
 0x588   :  { %10689 = vmatpush1.bf16.msra.mxu0 %v16287_v39  ;;  %11764 = vmatpush1.bf16.msra.mxu1 %v16290_v40  ;;  %v16388_v39 = vld [vmem:[#allocation2 + $0x2be4] ss:$16 sps:$4 sm:$0xff]   ;;  %v16391_v40 = vld [vmem:[#allocation2 + $0x2bec] ss:$16 sps:$4 sm:$0xff]  }
 0x589   :  { %10701 = vmatprep.subr.bf16.mxu0 %v16298_v41  ;;  %11776 = vmatprep.subr.bf16.mxu1 %v16301_v42  ;;  %v16386_v41 = vld [vmem:[#allocation2 + $0x2be0] ss:$16 sps:$4 sm:$0xff]   ;;  %v16389_v42 = vld [vmem:[#allocation2 + $0x2be8] ss:$16 sps:$4 sm:$0xff]  }
 0x58b   :  { %10691 = vmatmul.mubr.bf16.vlgmr.msra.gmra.mrb[0].mxu0 %v16293_v43  ;;  %11766 = vmatmul.mubr.bf16.vlgmr.msra.gmra.mrb[0].mxu1 %v16293_v43  ;;  %v16397_v43 = vld [vmem:[#allocation2 + $0x2c04] ss:$16 sps:$4 sm:$0xff]  }
 0x58c   :  { %10702 = vmatpush1.bf16.msra.mxu0 %v16296_v44  ;;  %11777 = vmatpush1.bf16.msra.mxu1 %v16299_v45  ;;  %v16400_v44 = vld [vmem:[#allocation2 + $0x2c0c] ss:$16 sps:$4 sm:$0xff]  }
 0x58d   :  { %10703 = vmatprep.subr.bf16.mxu0 %v16304_v46  ;;  %11778 = vmatprep.subr.bf16.mxu1 %v16307_v47  ;;  %v16392_v45 = vld [vmem:[%s17015_s0 + $0xa8] ss:$196 sps:$4 sm:$0xff]   ;;  %v16395_v46 = vld [vmem:[#allocation2 + $0x2c00] ss:$16 sps:$4 sm:$0xff]  }
 0x58e   :  { %10733 = vmatprep.mubr.bf16.mxu0 %v16394_v48  ;;  %11808 = vmatprep.mubr.bf16.mxu1 %v16394_v48  ;;  %v16398_v47 = vld [vmem:[#allocation2 + $0x2c08] ss:$16 sps:$4 sm:$0xff]   ;;  %v16403_v48 = vld [vmem:[#allocation2 + $0x2c24] ss:$16 sps:$4 sm:$0xff]  }
 0x590   :  { %10704 = vmatpush1.bf16.msra.mxu0 %v16302_v49  ;;  %11779 = vmatpush1.bf16.msra.mxu1 %v16305_v50  ;;  %v16406_v49 = vld [vmem:[#allocation2 + $0x2c2c] ss:$16 sps:$4 sm:$0xff]   ;;  %v16493_v50 = vld [vmem:[%s17015_s0 + $0xb4] ss:$196 sps:$4 sm:$0xff]  }
 0x591   :  { %10705 = vmatprep.subr.bf16.mxu0 %v16310_v51  ;;  %11780 = vmatprep.subr.bf16.mxu1 %v16313_v52  ;;  %v16401_v51 = vld [vmem:[#allocation2 + $0x2c20] ss:$16 sps:$4 sm:$0xff]   ;;  %v16404_v52 = vld [vmem:[#allocation2 + $0x2c28] ss:$16 sps:$4 sm:$0xff]  }
 0x594   :  { %10706 = vmatpush1.bf16.msra.mxu0 %v16308_v53  ;;  %11781 = vmatpush1.bf16.msra.mxu1 %v16311_v54  ;;  %v16409_v53 = vld [vmem:[#allocation2 + $0x2c44] ss:$16 sps:$4 sm:$0xff]   ;;  %v16412_v54 = vld [vmem:[#allocation2 + $0x2c4c] ss:$16 sps:$4 sm:$0xff]  }
 0x595   :  { %10707 = vmatprep.subr.bf16.mxu0 %v16316_v55  ;;  %11782 = vmatprep.subr.bf16.mxu1 %v16319_v56  ;;  %v16407_v55 = vld [vmem:[#allocation2 + $0x2c40] ss:$16 sps:$4 sm:$0xff]   ;;  %v16410_v56 = vld [vmem:[#allocation2 + $0x2c48] ss:$16 sps:$4 sm:$0xff]  }
 0x598   :  { %10708 = vmatpush1.bf16.msra.mxu0 %v16314_v57  ;;  %11783 = vmatpush1.bf16.msra.mxu1 %v16317_v58  ;;  %v16415_v57 = vld [vmem:[#allocation2 + $0x2c64] ss:$16 sps:$4 sm:$0xff]   ;;  %v16418_v58 = vld [vmem:[#allocation2 + $0x2c6c] ss:$16 sps:$4 sm:$0xff]  }
 0x599   :  { %10709 = vmatprep.subr.bf16.mxu0 %v16322_v59  ;;  %11784 = vmatprep.subr.bf16.mxu1 %v16325_v60  ;;  %v16413_v59 = vld [vmem:[#allocation2 + $0x2c60] ss:$16 sps:$4 sm:$0xff]   ;;  %v16416_v60 = vld [vmem:[#allocation2 + $0x2c68] ss:$16 sps:$4 sm:$0xff]  }
 0x59c   :  { %10710 = vmatpush1.bf16.msra.mxu0 %v16320_v61  ;;  %11785 = vmatpush1.bf16.msra.mxu1 %v16323_v62  ;;  %v16421_v61 = vld [vmem:[#allocation2 + $0x2c84] ss:$16 sps:$4 sm:$0xff]   ;;  %v16424_v62 = vld [vmem:[#allocation2 + $0x2c8c] ss:$16 sps:$4 sm:$0xff]  }
 0x59d   :  { %10711 = vmatprep.subr.bf16.mxu0 %v16328_v63  ;;  %11786 = vmatprep.subr.bf16.mxu1 %v16331_v0  ;;  %v16419_v63 = vld [vmem:[#allocation2 + $0x2c80] ss:$16 sps:$4 sm:$0xff]   ;;  %v16422_v0 = vld [vmem:[#allocation2 + $0x2c88] ss:$16 sps:$4 sm:$0xff]  }
 0x5a0   :  { %10712 = vmatpush1.bf16.msra.mxu0 %v16326_v1  ;;  %11787 = vmatpush1.bf16.msra.mxu1 %v16329_v2  ;;  %v16427_v1 = vld [vmem:[#allocation2 + $0x2ca4] ss:$16 sps:$4 sm:$0xff]   ;;  %v16430_v2 = vld [vmem:[#allocation2 + $0x2cac] ss:$16 sps:$4 sm:$0xff]  }
 0x5a1   :  { %10713 = vmatprep.subr.bf16.mxu0 %v16334_v3  ;;  %11788 = vmatprep.subr.bf16.mxu1 %v16337_v4  ;;  %v16425_v3 = vld [vmem:[#allocation2 + $0x2ca0] ss:$16 sps:$4 sm:$0xff]   ;;  %v16428_v4 = vld [vmem:[#allocation2 + $0x2ca8] ss:$16 sps:$4 sm:$0xff]  }
 0x5a4   :  { %10714 = vmatpush1.bf16.msra.mxu0 %v16332_v5  ;;  %11789 = vmatpush1.bf16.msra.mxu1 %v16335_v6  ;;  %v16433_v5 = vld [vmem:[#allocation2 + $0x2cc4] ss:$16 sps:$4 sm:$0xff]   ;;  %v16436_v6 = vld [vmem:[#allocation2 + $0x2ccc] ss:$16 sps:$4 sm:$0xff]  }
 0x5a5   :  { %10715 = vmatprep.subr.bf16.mxu0 %v16340_v7  ;;  %11790 = vmatprep.subr.bf16.mxu1 %v16343_v8  ;;  %v16431_v7 = vld [vmem:[#allocation2 + $0x2cc0] ss:$16 sps:$4 sm:$0xff]   ;;  %v16434_v8 = vld [vmem:[#allocation2 + $0x2cc8] ss:$16 sps:$4 sm:$0xff]  }
 0x5a8   :  { %10716 = vmatpush1.bf16.msra.mxu0 %v16338_v9  ;;  %11791 = vmatpush1.bf16.msra.mxu1 %v16341_v10  ;;  %v16439_v9 = vld [vmem:[#allocation2 + $0x2ce4] ss:$16 sps:$4 sm:$0xff]   ;;  %v16442_v10 = vld [vmem:[#allocation2 + $0x2cec] ss:$16 sps:$4 sm:$0xff]  }
 0x5a9   :  { %10717 = vmatprep.subr.bf16.mxu0 %v16346_v11  ;;  %11792 = vmatprep.subr.bf16.mxu1 %v16349_v12  ;;  %v16437_v11 = vld [vmem:[#allocation2 + $0x2ce0] ss:$16 sps:$4 sm:$0xff]   ;;  %v16440_v12 = vld [vmem:[#allocation2 + $0x2ce8] ss:$16 sps:$4 sm:$0xff]  }
 0x5ac   :  { %10718 = vmatpush1.bf16.msra.mxu0 %v16344_v13  ;;  %11793 = vmatpush1.bf16.msra.mxu1 %v16347_v14  ;;  %v16445_v13 = vld [vmem:[#allocation2 + $0x2d04] ss:$16 sps:$4 sm:$0xff]   ;;  %v16448_v14 = vld [vmem:[#allocation2 + $0x2d0c] ss:$16 sps:$4 sm:$0xff]  }
 0x5ad   :  { %10719 = vmatprep.subr.bf16.mxu0 %v16352_v15  ;;  %11794 = vmatprep.subr.bf16.mxu1 %v16355_v16  ;;  %v16443_v15 = vld [vmem:[#allocation2 + $0x2d00] ss:$16 sps:$4 sm:$0xff]   ;;  %v16446_v16 = vld [vmem:[#allocation2 + $0x2d08] ss:$16 sps:$4 sm:$0xff]  }
 0x5b0   :  { %10720 = vmatpush1.bf16.msra.mxu0 %v16350_v17  ;;  %11795 = vmatpush1.bf16.msra.mxu1 %v16353_v18  ;;  %v16451_v17 = vld [vmem:[#allocation2 + $0x2d24] ss:$16 sps:$4 sm:$0xff]   ;;  %v16454_v18 = vld [vmem:[#allocation2 + $0x2d2c] ss:$16 sps:$4 sm:$0xff]  }
 0x5b1   :  { %10721 = vmatprep.subr.bf16.mxu0 %v16358_v19  ;;  %11796 = vmatprep.subr.bf16.mxu1 %v16361_v20  ;;  %v16449_v19 = vld [vmem:[#allocation2 + $0x2d20] ss:$16 sps:$4 sm:$0xff]   ;;  %v16452_v20 = vld [vmem:[#allocation2 + $0x2d28] ss:$16 sps:$4 sm:$0xff]  }
 0x5b4   :  { %10722 = vmatpush1.bf16.msra.mxu0 %v16356_v21  ;;  %11797 = vmatpush1.bf16.msra.mxu1 %v16359_v22  ;;  %v16457_v21 = vld [vmem:[#allocation2 + $0x2d44] ss:$16 sps:$4 sm:$0xff]   ;;  %v16460_v22 = vld [vmem:[#allocation2 + $0x2d4c] ss:$16 sps:$4 sm:$0xff]  }
 0x5b5   :  { %10723 = vmatprep.subr.bf16.mxu0 %v16364_v23  ;;  %11798 = vmatprep.subr.bf16.mxu1 %v16367_v24  ;;  %v16455_v23 = vld [vmem:[#allocation2 + $0x2d40] ss:$16 sps:$4 sm:$0xff]   ;;  %v16458_v24 = vld [vmem:[#allocation2 + $0x2d48] ss:$16 sps:$4 sm:$0xff]  }
 0x5b8   :  { %10724 = vmatpush1.bf16.msra.mxu0 %v16362_v25  ;;  %11799 = vmatpush1.bf16.msra.mxu1 %v16365_v26  ;;  %v16463_v25 = vld [vmem:[#allocation2 + $0x2d64] ss:$16 sps:$4 sm:$0xff]   ;;  %v16466_v26 = vld [vmem:[#allocation2 + $0x2d6c] ss:$16 sps:$4 sm:$0xff]  }
 0x5b9   :  { %10725 = vmatprep.subr.bf16.mxu0 %v16370_v27  ;;  %11800 = vmatprep.subr.bf16.mxu1 %v16373_v28  ;;  %v16461_v27 = vld [vmem:[#allocation2 + $0x2d60] ss:$16 sps:$4 sm:$0xff]   ;;  %v16464_v28 = vld [vmem:[#allocation2 + $0x2d68] ss:$16 sps:$4 sm:$0xff]  }
 0x5bc   :  { %10726 = vmatpush1.bf16.msra.mxu0 %v16368_v29  ;;  %11801 = vmatpush1.bf16.msra.mxu1 %v16371_v30  ;;  %v16469_v29 = vld [vmem:[#allocation2 + $0x2d84] ss:$16 sps:$4 sm:$0xff]   ;;  %v16472_v30 = vld [vmem:[#allocation2 + $0x2d8c] ss:$16 sps:$4 sm:$0xff]  }
 0x5bd   :  { %10727 = vmatprep.subr.bf16.mxu0 %v16376_v31  ;;  %11802 = vmatprep.subr.bf16.mxu1 %v16379_v32  ;;  %v16467_v31 = vld [vmem:[#allocation2 + $0x2d80] ss:$16 sps:$4 sm:$0xff]   ;;  %v16470_v32 = vld [vmem:[#allocation2 + $0x2d88] ss:$16 sps:$4 sm:$0xff]  }
 0x5c0   :  { %10728 = vmatpush1.bf16.msra.mxu0 %v16374_v33  ;;  %11803 = vmatpush1.bf16.msra.mxu1 %v16377_v34  ;;  %v16475_v33 = vld [vmem:[#allocation2 + $0x2da4] ss:$16 sps:$4 sm:$0xff]   ;;  %v16478_v34 = vld [vmem:[#allocation2 + $0x2dac] ss:$16 sps:$4 sm:$0xff]  }
 0x5c1   :  { %10729 = vmatprep.subr.bf16.mxu0 %v16382_v35  ;;  %11804 = vmatprep.subr.bf16.mxu1 %v16385_v36  ;;  %v16473_v35 = vld [vmem:[#allocation2 + $0x2da0] ss:$16 sps:$4 sm:$0xff]   ;;  %v16476_v36 = vld [vmem:[#allocation2 + $0x2da8] ss:$16 sps:$4 sm:$0xff]  }
 0x5c4   :  { %10730 = vmatpush1.bf16.msra.mxu0 %v16380_v37  ;;  %11805 = vmatpush1.bf16.msra.mxu1 %v16383_v38  ;;  %v16481_v37 = vld [vmem:[#allocation2 + $0x2dc4] ss:$16 sps:$4 sm:$0xff]   ;;  %v16484_v38 = vld [vmem:[#allocation2 + $0x2dcc] ss:$16 sps:$4 sm:$0xff]  }
 0x5c5   :  { %10731 = vmatprep.subr.bf16.mxu0 %v16388_v39  ;;  %11806 = vmatprep.subr.bf16.mxu1 %v16391_v40  ;;  %v16479_v39 = vld [vmem:[#allocation2 + $0x2dc0] ss:$16 sps:$4 sm:$0xff]   ;;  %v16482_v40 = vld [vmem:[#allocation2 + $0x2dc8] ss:$16 sps:$4 sm:$0xff]  }
 0x5c8   :  { %10732 = vmatpush1.bf16.msra.mxu0 %v16386_v41  ;;  %11807 = vmatpush1.bf16.msra.mxu1 %v16389_v42  ;;  %v16487_v41 = vld [vmem:[#allocation2 + $0x2de4] ss:$16 sps:$4 sm:$0xff]   ;;  %v16490_v42 = vld [vmem:[#allocation2 + $0x2dec] ss:$16 sps:$4 sm:$0xff]  }
 0x5c9   :  { %10744 = vmatprep.subr.bf16.mxu0 %v16397_v43  ;;  %11819 = vmatprep.subr.bf16.mxu1 %v16400_v44  ;;  %v16485_v43 = vld [vmem:[#allocation2 + $0x2de0] ss:$16 sps:$4 sm:$0xff]   ;;  %v16488_v44 = vld [vmem:[#allocation2 + $0x2de8] ss:$16 sps:$4 sm:$0xff]  }
 0x5cb   :  { %10734 = vmatmul.mubr.bf16.vlgmr.msra.gmra.mrb[0].mxu0 %v16392_v45  ;;  %11809 = vmatmul.mubr.bf16.vlgmr.msra.gmra.mrb[0].mxu1 %v16392_v45  ;;  %v16496_v45 = vld [vmem:[#allocation2 + $0x2e04] ss:$16 sps:$4 sm:$0xff]  }
 0x5cc   :  { %10745 = vmatpush1.bf16.msra.mxu0 %v16395_v46  ;;  %11820 = vmatpush1.bf16.msra.mxu1 %v16398_v47  ;;  %v16499_v46 = vld [vmem:[#allocation2 + $0x2e0c] ss:$16 sps:$4 sm:$0xff]   ;;  %v16491_v47 = vld [vmem:[%s17015_s0 + $0xb0] ss:$196 sps:$4 sm:$0xff]  }
 0x5cd   :  { %10746 = vmatprep.subr.bf16.mxu0 %v16403_v48  ;;  %11821 = vmatprep.subr.bf16.mxu1 %v16406_v49  ;;  %v16494_v48 = vld [vmem:[#allocation2 + $0x2e00] ss:$16 sps:$4 sm:$0xff]   ;;  %v16497_v49 = vld [vmem:[#allocation2 + $0x2e08] ss:$16 sps:$4 sm:$0xff]  }
 0x5ce   :  { %10776 = vmatprep.mubr.bf16.mxu0 %v16493_v50  ;;  %11851 = vmatprep.mubr.bf16.mxu1 %v16493_v50  ;;  %v16502_v50 = vld [vmem:[#allocation2 + $0x2e24] ss:$16 sps:$4 sm:$0xff]  }
 0x5d0   :  { %10747 = vmatpush1.bf16.msra.mxu0 %v16401_v51  ;;  %11822 = vmatpush1.bf16.msra.mxu1 %v16404_v52  ;;  %v16505_v51 = vld [vmem:[#allocation2 + $0x2e2c] ss:$16 sps:$4 sm:$0xff]  }
 0x5d1   :  { %10748 = vmatprep.subr.bf16.mxu0 %v16409_v53  ;;  %11823 = vmatprep.subr.bf16.mxu1 %v16412_v54  ;;  %v16592_v52 = vld [vmem:[%s17015_s0 + $0xbc] ss:$196 sps:$4 sm:$0xff]   ;;  %v16503_v54 = vld [vmem:[#allocation2 + $0x2e28] ss:$16 sps:$4 sm:$0xff]  }
 0x5d2   :  { %v16500_v53 = vld [vmem:[#allocation2 + $0x2e20] ss:$16 sps:$4 sm:$0xff]  }
 0x5d4   :  { %10749 = vmatpush1.bf16.msra.mxu0 %v16407_v55  ;;  %11824 = vmatpush1.bf16.msra.mxu1 %v16410_v56  ;;  %v16508_v55 = vld [vmem:[#allocation2 + $0x2e44] ss:$16 sps:$4 sm:$0xff]   ;;  %v16511_v56 = vld [vmem:[#allocation2 + $0x2e4c] ss:$16 sps:$4 sm:$0xff]  }
 0x5d5   :  { %10750 = vmatprep.subr.bf16.mxu0 %v16415_v57  ;;  %11825 = vmatprep.subr.bf16.mxu1 %v16418_v58  ;;  %v16506_v57 = vld [vmem:[#allocation2 + $0x2e40] ss:$16 sps:$4 sm:$0xff]   ;;  %v16509_v58 = vld [vmem:[#allocation2 + $0x2e48] ss:$16 sps:$4 sm:$0xff]  }
 0x5d8   :  { %10751 = vmatpush1.bf16.msra.mxu0 %v16413_v59  ;;  %11826 = vmatpush1.bf16.msra.mxu1 %v16416_v60  ;;  %v16514_v59 = vld [vmem:[#allocation2 + $0x2e64] ss:$16 sps:$4 sm:$0xff]   ;;  %v16517_v60 = vld [vmem:[#allocation2 + $0x2e6c] ss:$16 sps:$4 sm:$0xff]  }
 0x5d9   :  { %10752 = vmatprep.subr.bf16.mxu0 %v16421_v61  ;;  %11827 = vmatprep.subr.bf16.mxu1 %v16424_v62  ;;  %v16512_v61 = vld [vmem:[#allocation2 + $0x2e60] ss:$16 sps:$4 sm:$0xff]   ;;  %v16515_v62 = vld [vmem:[#allocation2 + $0x2e68] ss:$16 sps:$4 sm:$0xff]  }
 0x5dc   :  { %10753 = vmatpush1.bf16.msra.mxu0 %v16419_v63  ;;  %11828 = vmatpush1.bf16.msra.mxu1 %v16422_v0  ;;  %v16520_v63 = vld [vmem:[#allocation2 + $0x2e84] ss:$16 sps:$4 sm:$0xff]   ;;  %v16523_v0 = vld [vmem:[#allocation2 + $0x2e8c] ss:$16 sps:$4 sm:$0xff]  }
 0x5dd   :  { %10754 = vmatprep.subr.bf16.mxu0 %v16427_v1  ;;  %11829 = vmatprep.subr.bf16.mxu1 %v16430_v2  ;;  %v16518_v1 = vld [vmem:[#allocation2 + $0x2e80] ss:$16 sps:$4 sm:$0xff]   ;;  %v16521_v2 = vld [vmem:[#allocation2 + $0x2e88] ss:$16 sps:$4 sm:$0xff]  }
 0x5e0   :  { %10755 = vmatpush1.bf16.msra.mxu0 %v16425_v3  ;;  %11830 = vmatpush1.bf16.msra.mxu1 %v16428_v4  ;;  %v16526_v3 = vld [vmem:[#allocation2 + $0x2ea4] ss:$16 sps:$4 sm:$0xff]   ;;  %v16529_v4 = vld [vmem:[#allocation2 + $0x2eac] ss:$16 sps:$4 sm:$0xff]  }
 0x5e1   :  { %10756 = vmatprep.subr.bf16.mxu0 %v16433_v5  ;;  %11831 = vmatprep.subr.bf16.mxu1 %v16436_v6  ;;  %v16524_v5 = vld [vmem:[#allocation2 + $0x2ea0] ss:$16 sps:$4 sm:$0xff]   ;;  %v16527_v6 = vld [vmem:[#allocation2 + $0x2ea8] ss:$16 sps:$4 sm:$0xff]  }
 0x5e4   :  { %10757 = vmatpush1.bf16.msra.mxu0 %v16431_v7  ;;  %11832 = vmatpush1.bf16.msra.mxu1 %v16434_v8  ;;  %v16532_v7 = vld [vmem:[#allocation2 + $0x2ec4] ss:$16 sps:$4 sm:$0xff]   ;;  %v16535_v8 = vld [vmem:[#allocation2 + $0x2ecc] ss:$16 sps:$4 sm:$0xff]  }
 0x5e5   :  { %10758 = vmatprep.subr.bf16.mxu0 %v16439_v9  ;;  %11833 = vmatprep.subr.bf16.mxu1 %v16442_v10  ;;  %v16530_v9 = vld [vmem:[#allocation2 + $0x2ec0] ss:$16 sps:$4 sm:$0xff]   ;;  %v16533_v10 = vld [vmem:[#allocation2 + $0x2ec8] ss:$16 sps:$4 sm:$0xff]  }
 0x5e8   :  { %10759 = vmatpush1.bf16.msra.mxu0 %v16437_v11  ;;  %11834 = vmatpush1.bf16.msra.mxu1 %v16440_v12  ;;  %v16538_v11 = vld [vmem:[#allocation2 + $0x2ee4] ss:$16 sps:$4 sm:$0xff]   ;;  %v16541_v12 = vld [vmem:[#allocation2 + $0x2eec] ss:$16 sps:$4 sm:$0xff]  }
 0x5e9   :  { %10760 = vmatprep.subr.bf16.mxu0 %v16445_v13  ;;  %11835 = vmatprep.subr.bf16.mxu1 %v16448_v14  ;;  %v16536_v13 = vld [vmem:[#allocation2 + $0x2ee0] ss:$16 sps:$4 sm:$0xff]   ;;  %v16539_v14 = vld [vmem:[#allocation2 + $0x2ee8] ss:$16 sps:$4 sm:$0xff]  }
 0x5ec   :  { %10761 = vmatpush1.bf16.msra.mxu0 %v16443_v15  ;;  %11836 = vmatpush1.bf16.msra.mxu1 %v16446_v16  ;;  %v16544_v15 = vld [vmem:[#allocation2 + $0x2f04] ss:$16 sps:$4 sm:$0xff]   ;;  %v16547_v16 = vld [vmem:[#allocation2 + $0x2f0c] ss:$16 sps:$4 sm:$0xff]  }
 0x5ed   :  { %10762 = vmatprep.subr.bf16.mxu0 %v16451_v17  ;;  %11837 = vmatprep.subr.bf16.mxu1 %v16454_v18  ;;  %v16542_v17 = vld [vmem:[#allocation2 + $0x2f00] ss:$16 sps:$4 sm:$0xff]   ;;  %v16545_v18 = vld [vmem:[#allocation2 + $0x2f08] ss:$16 sps:$4 sm:$0xff]  }
 0x5f0   :  { %10763 = vmatpush1.bf16.msra.mxu0 %v16449_v19  ;;  %11838 = vmatpush1.bf16.msra.mxu1 %v16452_v20  ;;  %v16550_v19 = vld [vmem:[#allocation2 + $0x2f24] ss:$16 sps:$4 sm:$0xff]   ;;  %v16553_v20 = vld [vmem:[#allocation2 + $0x2f2c] ss:$16 sps:$4 sm:$0xff]  }
 0x5f1   :  { %10764 = vmatprep.subr.bf16.mxu0 %v16457_v21  ;;  %11839 = vmatprep.subr.bf16.mxu1 %v16460_v22  ;;  %v16548_v21 = vld [vmem:[#allocation2 + $0x2f20] ss:$16 sps:$4 sm:$0xff]   ;;  %v16551_v22 = vld [vmem:[#allocation2 + $0x2f28] ss:$16 sps:$4 sm:$0xff]  }
 0x5f4   :  { %10765 = vmatpush1.bf16.msra.mxu0 %v16455_v23  ;;  %11840 = vmatpush1.bf16.msra.mxu1 %v16458_v24  ;;  %v16556_v23 = vld [vmem:[#allocation2 + $0x2f44] ss:$16 sps:$4 sm:$0xff]   ;;  %v16559_v24 = vld [vmem:[#allocation2 + $0x2f4c] ss:$16 sps:$4 sm:$0xff]  }
 0x5f5   :  { %10766 = vmatprep.subr.bf16.mxu0 %v16463_v25  ;;  %11841 = vmatprep.subr.bf16.mxu1 %v16466_v26  ;;  %v16554_v25 = vld [vmem:[#allocation2 + $0x2f40] ss:$16 sps:$4 sm:$0xff]   ;;  %v16557_v26 = vld [vmem:[#allocation2 + $0x2f48] ss:$16 sps:$4 sm:$0xff]  }
 0x5f8   :  { %10767 = vmatpush1.bf16.msra.mxu0 %v16461_v27  ;;  %11842 = vmatpush1.bf16.msra.mxu1 %v16464_v28  ;;  %v16562_v27 = vld [vmem:[#allocation2 + $0x2f64] ss:$16 sps:$4 sm:$0xff]   ;;  %v16565_v28 = vld [vmem:[#allocation2 + $0x2f6c] ss:$16 sps:$4 sm:$0xff]  }
 0x5f9   :  { %10768 = vmatprep.subr.bf16.mxu0 %v16469_v29  ;;  %11843 = vmatprep.subr.bf16.mxu1 %v16472_v30  ;;  %v16560_v29 = vld [vmem:[#allocation2 + $0x2f60] ss:$16 sps:$4 sm:$0xff]   ;;  %v16563_v30 = vld [vmem:[#allocation2 + $0x2f68] ss:$16 sps:$4 sm:$0xff]  }
 0x5fc   :  { %10769 = vmatpush1.bf16.msra.mxu0 %v16467_v31  ;;  %11844 = vmatpush1.bf16.msra.mxu1 %v16470_v32  ;;  %v16568_v31 = vld [vmem:[#allocation2 + $0x2f84] ss:$16 sps:$4 sm:$0xff]   ;;  %v16571_v32 = vld [vmem:[#allocation2 + $0x2f8c] ss:$16 sps:$4 sm:$0xff]  }
 0x5fd   :  { %10770 = vmatprep.subr.bf16.mxu0 %v16475_v33  ;;  %11845 = vmatprep.subr.bf16.mxu1 %v16478_v34  ;;  %v16566_v33 = vld [vmem:[#allocation2 + $0x2f80] ss:$16 sps:$4 sm:$0xff]   ;;  %v16569_v34 = vld [vmem:[#allocation2 + $0x2f88] ss:$16 sps:$4 sm:$0xff]  }
 0x600   :  { %10771 = vmatpush1.bf16.msra.mxu0 %v16473_v35  ;;  %11846 = vmatpush1.bf16.msra.mxu1 %v16476_v36  ;;  %v16574_v35 = vld [vmem:[#allocation2 + $0x2fa4] ss:$16 sps:$4 sm:$0xff]   ;;  %v16577_v36 = vld [vmem:[#allocation2 + $0x2fac] ss:$16 sps:$4 sm:$0xff]  }
 0x601   :  { %10772 = vmatprep.subr.bf16.mxu0 %v16481_v37  ;;  %11847 = vmatprep.subr.bf16.mxu1 %v16484_v38  ;;  %v16572_v37 = vld [vmem:[#allocation2 + $0x2fa0] ss:$16 sps:$4 sm:$0xff]   ;;  %v16575_v38 = vld [vmem:[#allocation2 + $0x2fa8] ss:$16 sps:$4 sm:$0xff]  }
 0x604   :  { %10773 = vmatpush1.bf16.msra.mxu0 %v16479_v39  ;;  %11848 = vmatpush1.bf16.msra.mxu1 %v16482_v40  ;;  %v16580_v39 = vld [vmem:[#allocation2 + $0x2fc4] ss:$16 sps:$4 sm:$0xff]   ;;  %v16583_v40 = vld [vmem:[#allocation2 + $0x2fcc] ss:$16 sps:$4 sm:$0xff]  }
 0x605   :  { %10774 = vmatprep.subr.bf16.mxu0 %v16487_v41  ;;  %11849 = vmatprep.subr.bf16.mxu1 %v16490_v42  ;;  %v16578_v41 = vld [vmem:[#allocation2 + $0x2fc0] ss:$16 sps:$4 sm:$0xff]   ;;  %v16581_v42 = vld [vmem:[#allocation2 + $0x2fc8] ss:$16 sps:$4 sm:$0xff]  }
 0x608   :  { %10775 = vmatpush1.bf16.msra.mxu0 %v16485_v43  ;;  %11850 = vmatpush1.bf16.msra.mxu1 %v16488_v44  ;;  %v16586_v43 = vld [vmem:[#allocation2 + $0x2fe4] ss:$16 sps:$4 sm:$0xff]   ;;  %v16589_v44 = vld [vmem:[#allocation2 + $0x2fec] ss:$16 sps:$4 sm:$0xff]  }
 0x609   :  { %10787 = vmatprep.subr.bf16.mxu0 %v16496_v45  ;;  %11862 = vmatprep.subr.bf16.mxu1 %v16499_v46  ;;  %v16584_v45 = vld [vmem:[#allocation2 + $0x2fe0] ss:$16 sps:$4 sm:$0xff]   ;;  %v16587_v46 = vld [vmem:[#allocation2 + $0x2fe8] ss:$16 sps:$4 sm:$0xff]  }
 0x60b   :  { %10777 = vmatmul.mubr.bf16.vlgmr.msra.gmra.mrb[0].mxu0 %v16491_v47  ;;  %11852 = vmatmul.mubr.bf16.vlgmr.msra.gmra.mrb[0].mxu1 %v16491_v47  ;;  %v16595_v47 = vld [vmem:[#allocation2 + $0x3004] ss:$16 sps:$4 sm:$0xff]  }
 0x60c   :  { %10788 = vmatpush1.bf16.msra.mxu0 %v16494_v48  ;;  %11863 = vmatpush1.bf16.msra.mxu1 %v16497_v49  ;;  %v16598_v48 = vld [vmem:[#allocation2 + $0x300c] ss:$16 sps:$4 sm:$0xff]  }
 0x60d   :  { %10789 = vmatprep.subr.bf16.mxu0 %v16502_v50  ;;  %11864 = vmatprep.subr.bf16.mxu1 %v16505_v51  ;;  %v16590_v49 = vld [vmem:[%s17015_s0 + $0xb8] ss:$196 sps:$4 sm:$0xff]   ;;  %v16593_v50 = vld [vmem:[#allocation2 + $0x3000] ss:$16 sps:$4 sm:$0xff]  }
 0x60e   :  { %10819 = vmatprep.mubr.bf16.mxu0 %v16592_v52  ;;  %11894 = vmatprep.mubr.bf16.mxu1 %v16592_v52  ;;  %v16596_v51 = vld [vmem:[#allocation2 + $0x3008] ss:$16 sps:$4 sm:$0xff]   ;;  %v16601_v52 = vld [vmem:[#allocation2 + $0x3024] ss:$16 sps:$4 sm:$0xff]  }
 0x610   :  { %10790 = vmatpush1.bf16.msra.mxu0 %v16500_v53  ;;  %11865 = vmatpush1.bf16.msra.mxu1 %v16503_v54  ;;  %v16604_v53 = vld [vmem:[#allocation2 + $0x302c] ss:$16 sps:$4 sm:$0xff]   ;;  %v16599_v54 = vld [vmem:[#allocation2 + $0x3020] ss:$16 sps:$4 sm:$0xff]  }
 0x611   :  { %10791 = vmatprep.subr.bf16.mxu0 %v16508_v55  ;;  %11866 = vmatprep.subr.bf16.mxu1 %v16511_v56  ;;  %v16602_v55 = vld [vmem:[#allocation2 + $0x3028] ss:$16 sps:$4 sm:$0xff]   ;;  %v16607_v56 = vld [vmem:[#allocation2 + $0x3044] ss:$16 sps:$4 sm:$0xff]  }
 0x614   :  { %10792 = vmatpush1.bf16.msra.mxu0 %v16506_v57  ;;  %11867 = vmatpush1.bf16.msra.mxu1 %v16509_v58  ;;  %v16610_v57 = vld [vmem:[#allocation2 + $0x304c] ss:$16 sps:$4 sm:$0xff]   ;;  %v16776_v58 = vmov 0  }
 0x615   :  { %10793 = vmatprep.subr.bf16.mxu0 %v16514_v59  ;;  %11868 = vmatprep.subr.bf16.mxu1 %v16517_v60  ;;  %v16605_v59 = vld [vmem:[#allocation2 + $0x3040] ss:$16 sps:$4 sm:$0xff]   ;;  %v16608_v60 = vld [vmem:[#allocation2 + $0x3048] ss:$16 sps:$4 sm:$0xff]  }
 0x618   :  { %10794 = vmatpush1.bf16.msra.mxu0 %v16512_v61  ;;  %11869 = vmatpush1.bf16.msra.mxu1 %v16515_v62  ;;  %v16613_v61 = vld [vmem:[#allocation2 + $0x3064] ss:$16 sps:$4 sm:$0xff]   ;;  %v16616_v62 = vld [vmem:[#allocation2 + $0x306c] ss:$16 sps:$4 sm:$0xff]  }
 0x619   :  { %10795 = vmatprep.subr.bf16.mxu0 %v16520_v63  ;;  %11870 = vmatprep.subr.bf16.mxu1 %v16523_v0  ;;  %v16611_v63 = vld [vmem:[#allocation2 + $0x3060] ss:$16 sps:$4 sm:$0xff]   ;;  %v16614_v0 = vld [vmem:[#allocation2 + $0x3068] ss:$16 sps:$4 sm:$0xff]  }
 0x61c   :  { %10796 = vmatpush1.bf16.msra.mxu0 %v16518_v1  ;;  %11871 = vmatpush1.bf16.msra.mxu1 %v16521_v2  ;;  %v16619_v1 = vld [vmem:[#allocation2 + $0x3084] ss:$16 sps:$4 sm:$0xff]   ;;  %v16622_v2 = vld [vmem:[#allocation2 + $0x308c] ss:$16 sps:$4 sm:$0xff]  }
 0x61d   :  { %10797 = vmatprep.subr.bf16.mxu0 %v16526_v3  ;;  %11872 = vmatprep.subr.bf16.mxu1 %v16529_v4  ;;  %v16617_v3 = vld [vmem:[#allocation2 + $0x3080] ss:$16 sps:$4 sm:$0xff]   ;;  %v16620_v4 = vld [vmem:[#allocation2 + $0x3088] ss:$16 sps:$4 sm:$0xff]  }
 0x620   :  { %10798 = vmatpush1.bf16.msra.mxu0 %v16524_v5  ;;  %11873 = vmatpush1.bf16.msra.mxu1 %v16527_v6  ;;  %v16625_v5 = vld [vmem:[#allocation2 + $0x30a4] ss:$16 sps:$4 sm:$0xff]   ;;  %v16628_v6 = vld [vmem:[#allocation2 + $0x30ac] ss:$16 sps:$4 sm:$0xff]  }
 0x621   :  { %10799 = vmatprep.subr.bf16.mxu0 %v16532_v7  ;;  %11874 = vmatprep.subr.bf16.mxu1 %v16535_v8  ;;  %v16623_v7 = vld [vmem:[#allocation2 + $0x30a0] ss:$16 sps:$4 sm:$0xff]   ;;  %v16626_v8 = vld [vmem:[#allocation2 + $0x30a8] ss:$16 sps:$4 sm:$0xff]  }
 0x624   :  { %10800 = vmatpush1.bf16.msra.mxu0 %v16530_v9  ;;  %11875 = vmatpush1.bf16.msra.mxu1 %v16533_v10  ;;  %v16631_v9 = vld [vmem:[#allocation2 + $0x30c4] ss:$16 sps:$4 sm:$0xff]   ;;  %v16634_v10 = vld [vmem:[#allocation2 + $0x30cc] ss:$16 sps:$4 sm:$0xff]  }
 0x625   :  { %10801 = vmatprep.subr.bf16.mxu0 %v16538_v11  ;;  %11876 = vmatprep.subr.bf16.mxu1 %v16541_v12  ;;  %v16629_v11 = vld [vmem:[#allocation2 + $0x30c0] ss:$16 sps:$4 sm:$0xff]   ;;  %v16632_v12 = vld [vmem:[#allocation2 + $0x30c8] ss:$16 sps:$4 sm:$0xff]  }
 0x628   :  { %10802 = vmatpush1.bf16.msra.mxu0 %v16536_v13  ;;  %11877 = vmatpush1.bf16.msra.mxu1 %v16539_v14  ;;  %v16637_v13 = vld [vmem:[#allocation2 + $0x30e4] ss:$16 sps:$4 sm:$0xff]   ;;  %v16640_v14 = vld [vmem:[#allocation2 + $0x30ec] ss:$16 sps:$4 sm:$0xff]  }
 0x629   :  { %10803 = vmatprep.subr.bf16.mxu0 %v16544_v15  ;;  %11878 = vmatprep.subr.bf16.mxu1 %v16547_v16  ;;  %v16635_v15 = vld [vmem:[#allocation2 + $0x30e0] ss:$16 sps:$4 sm:$0xff]   ;;  %v16638_v16 = vld [vmem:[#allocation2 + $0x30e8] ss:$16 sps:$4 sm:$0xff]  }
 0x62c   :  { %10804 = vmatpush1.bf16.msra.mxu0 %v16542_v17  ;;  %11879 = vmatpush1.bf16.msra.mxu1 %v16545_v18  ;;  %v16642_v17 = vld [vmem:[#allocation6 + $0x40] sm:$0xff]  }
 0x62d   :  { %10805 = vmatprep.subr.bf16.mxu0 %v16550_v19  ;;  %11880 = vmatprep.subr.bf16.mxu1 %v16553_v20  ;;  %v16643_v18 = vld [vmem:[#allocation6 + $0xc0] sm:$0xff]  }
 0x62e   :  { %v16641_v19 = vld [vmem:[%s17015_s0 + $0xc0] ss:$196 sps:$4 sm:$0xff]  }
 0x62f   :  { %v16644_v20 = vld [vmem:[#allocation6] sm:$0xff]  }
 0x630   :  { %10806 = vmatpush1.bf16.msra.mxu0 %v16548_v21  ;;  %11881 = vmatpush1.bf16.msra.mxu1 %v16551_v22  ;;  %v16645_v21 = vld [vmem:[#allocation6 + $0x80] sm:$0xff]   ;;  %v16646_v22 = vld [vmem:[#allocation6 + $0x48] sm:$0xff]  }
 0x631   :  { %10807 = vmatprep.subr.bf16.mxu0 %v16556_v23  ;;  %11882 = vmatprep.subr.bf16.mxu1 %v16559_v24  ;;  %v16647_v23 = vld [vmem:[#allocation6 + $0xc8] sm:$0xff]  }
 0x632   :  { %v16648_v24 = vld [vmem:[#allocation6 + $0x8] sm:$0xff]  }
 0x634   :  { %10808 = vmatpush1.bf16.msra.mxu0 %v16554_v25  ;;  %11883 = vmatpush1.bf16.msra.mxu1 %v16557_v26  ;;  %v16649_v25 = vld [vmem:[#allocation6 + $0x88] sm:$0xff]   ;;  %v16650_v26 = vld [vmem:[#allocation6 + $0x50] sm:$0xff]  }
 0x635   :  { %10809 = vmatprep.subr.bf16.mxu0 %v16562_v27  ;;  %11884 = vmatprep.subr.bf16.mxu1 %v16565_v28  ;;  %v16651_v27 = vld [vmem:[#allocation6 + $0xd0] sm:$0xff]  }
 0x636   :  { %v16652_v28 = vld [vmem:[#allocation6 + $0x10] sm:$0xff]  }
 0x638   :  { %10810 = vmatpush1.bf16.msra.mxu0 %v16560_v29  ;;  %11885 = vmatpush1.bf16.msra.mxu1 %v16563_v30  ;;  %v16653_v29 = vld [vmem:[#allocation6 + $0x90] sm:$0xff]   ;;  %v16654_v30 = vld [vmem:[#allocation6 + $0x58] sm:$0xff]  }
 0x639   :  { %10811 = vmatprep.subr.bf16.mxu0 %v16568_v31  ;;  %11886 = vmatprep.subr.bf16.mxu1 %v16571_v32  ;;  %v16655_v31 = vld [vmem:[#allocation6 + $0xd8] sm:$0xff]  }
 0x63a   :  { %v16656_v32 = vld [vmem:[#allocation6 + $0x18] sm:$0xff]  }
 0x63c   :  { %10812 = vmatpush1.bf16.msra.mxu0 %v16566_v33  ;;  %11887 = vmatpush1.bf16.msra.mxu1 %v16569_v34  ;;  %v16657_v33 = vld [vmem:[#allocation6 + $0x98] sm:$0xff]   ;;  %v16658_v34 = vld [vmem:[#allocation6 + $0x60] sm:$0xff]  }
 0x63d   :  { %10813 = vmatprep.subr.bf16.mxu0 %v16574_v35  ;;  %11888 = vmatprep.subr.bf16.mxu1 %v16577_v36  ;;  %v16659_v35 = vld [vmem:[#allocation6 + $0xe0] sm:$0xff]  }
 0x63e   :  { %v16660_v36 = vld [vmem:[#allocation6 + $0x20] sm:$0xff]  }
 0x640   :  { %10814 = vmatpush1.bf16.msra.mxu0 %v16572_v37  ;;  %11889 = vmatpush1.bf16.msra.mxu1 %v16575_v38  ;;  %v16661_v37 = vld [vmem:[#allocation6 + $0xa0] sm:$0xff]   ;;  %v16662_v38 = vld [vmem:[#allocation6 + $0x68] sm:$0xff]  }
 0x641   :  { %10815 = vmatprep.subr.bf16.mxu0 %v16580_v39  ;;  %11890 = vmatprep.subr.bf16.mxu1 %v16583_v40  ;;  %v16663_v39 = vld [vmem:[#allocation6 + $0xe8] sm:$0xff]  }
 0x642   :  { %v16664_v40 = vld [vmem:[#allocation6 + $0x28] sm:$0xff]  }
 0x644   :  { %10816 = vmatpush1.bf16.msra.mxu0 %v16578_v41  ;;  %11891 = vmatpush1.bf16.msra.mxu1 %v16581_v42  ;;  %v16665_v41 = vld [vmem:[#allocation6 + $0xa8] sm:$0xff]   ;;  %v16666_v42 = vld [vmem:[#allocation6 + $0x70] sm:$0xff]  }
 0x645   :  { %10817 = vmatprep.subr.bf16.mxu0 %v16586_v43  ;;  %11892 = vmatprep.subr.bf16.mxu1 %v16589_v44  ;;  %v16667_v43 = vld [vmem:[#allocation6 + $0xf0] sm:$0xff]  }
 0x646   :  { %v16668_v44 = vld [vmem:[#allocation6 + $0x30] sm:$0xff]  }
 0x648   :  { %10818 = vmatpush1.bf16.msra.mxu0 %v16584_v45  ;;  %11893 = vmatpush1.bf16.msra.mxu1 %v16587_v46  ;;  %v16669_v45 = vld [vmem:[#allocation6 + $0xb0] sm:$0xff]   ;;  %v16670_v46 = vld [vmem:[#allocation6 + $0x78] sm:$0xff]  }
 0x649   :  { %10830 = vmatprep.subr.bf16.mxu0 %v16595_v47  ;;  %11905 = vmatprep.subr.bf16.mxu1 %v16598_v48  ;;  %v16671_v47 = vld [vmem:[#allocation6 + $0xf8] sm:$0xff]  }
 0x64a   :  { %v16672_v48 = vld [vmem:[#allocation6 + $0x38] sm:$0xff]  }
 0x64b   :  { %10820 = vmatmul.mubr.bf16.vlgmr.msra.gmra.mrb[0].mxu0 %v16590_v49  ;;  %11895 = vmatmul.mubr.bf16.vlgmr.msra.gmra.mrb[0].mxu1 %v16590_v49  ;;  %v16673_v49 = vld [vmem:[#allocation6 + $0xb8] sm:$0xff]  }
 0x64c   :  { %10831 = vmatpush1.bf16.msra.mxu0 %v16593_v50  ;;  %11906 = vmatpush1.bf16.msra.mxu1 %v16596_v51  ;;  %v1692_v50 = vlaneseq }
 0x64d   :  { %10832 = vmatprep.subr.bf16.mxu0 %v16601_v52  ;;  %11907 = vmatprep.subr.bf16.mxu1 %v16604_v53 }
 0x64e   :  { %10862 = vmatprep.mubr.bf16.mxu0 %v16776_v58  ;;  %11937 = vmatprep.mubr.bf16.mxu1 %v16776_v58  ;;  %v1693_v51 = vshrl.u32 %v1692_v50, 7 }
 0x650   :  { %10833 = vmatpush1.bf16.msra.mxu0 %v16599_v54  ;;  %11908 = vmatpush1.bf16.msra.mxu1 %v16602_v55  ;;  %v1694_v52 = vsub.s32 0, %v1693_v51  ;;  %v1702_v53 = vsub.s32 2, %v1693_v51  ;;  %v1690_v54 = vld [vmem:[#allocation4] sm:$0xf]  ;;  %v1698_v55 = vsub.s32 1, %v1693_v51 }
 0x651   :  { %10834 = vmatprep.subr.bf16.mxu0 %v16607_v56  ;;  %11909 = vmatprep.subr.bf16.mxu1 %v16610_v57  ;;  %v1706_v56 = vsub.s32 3, %v1693_v51 }
 0x652   :  { %v1695_v57 = vrot.slane %v1690_v54, %v1694_v52  ;;  %v1703_v58 = vrot.slane %v1690_v54, %v1702_v53 }
 0x654   :  { %10835 = vmatpush1.bf16.msra.mxu0 %v16605_v59  ;;  %11910 = vmatpush1.bf16.msra.mxu1 %v16608_v60  ;;  %v1699_v59 = vrot.slane %v1690_v54, %v1698_v55  ;;  %v1707_v60 = vrot.slane %v1690_v54, %v1706_v56 }
 0x655   :  { %10836 = vmatprep.subr.bf16.mxu0 %v16613_v61  ;;  %11911 = vmatprep.subr.bf16.mxu1 %v16616_v62 }
 0x658   :  { %10837 = vmatpush1.bf16.msra.mxu0 %v16611_v63  ;;  %11912 = vmatpush1.bf16.msra.mxu1 %v16614_v0 }
 0x659   :  { %10838 = vmatprep.subr.bf16.mxu0 %v16619_v1  ;;  %11913 = vmatprep.subr.bf16.mxu1 %v16622_v2 }
 0x65c   :  { %10839 = vmatpush1.bf16.msra.mxu0 %v16617_v3  ;;  %11914 = vmatpush1.bf16.msra.mxu1 %v16620_v4 }
 0x65d   :  { %10840 = vmatprep.subr.bf16.mxu0 %v16625_v5  ;;  %11915 = vmatprep.subr.bf16.mxu1 %v16628_v6 }
 0x660   :  { %10841 = vmatpush1.bf16.msra.mxu0 %v16623_v7  ;;  %11916 = vmatpush1.bf16.msra.mxu1 %v16626_v8 }
 0x661   :  { %10842 = vmatprep.subr.bf16.mxu0 %v16631_v9  ;;  %11917 = vmatprep.subr.bf16.mxu1 %v16634_v10 }
 0x664   :  { %10843 = vmatpush1.bf16.msra.mxu0 %v16629_v11  ;;  %11918 = vmatpush1.bf16.msra.mxu1 %v16632_v12 }
 0x665   :  { %10844 = vmatprep.subr.bf16.mxu0 %v16637_v13  ;;  %11919 = vmatprep.subr.bf16.mxu1 %v16640_v14 }
 0x668   :  { %10845 = vmatpush1.bf16.msra.mxu0 %v16635_v15  ;;  %11920 = vmatpush1.bf16.msra.mxu1 %v16638_v16 }
 0x669   :  { %13964 = vmatprep.subr.bf16.mxu0 %v16642_v17  ;;  %13986 = vmatprep.subr.bf16.mxu1 %v16643_v18 }
 0x66b   :  { %10863 = vmatmul.mubr.bf16.vlgmr.msra.gmra.mrb[0].mxu0 %v16641_v19  ;;  %11938 = vmatmul.mubr.bf16.vlgmr.msra.gmra.mrb[0].mxu1 %v16641_v19 }
 0x66c   :  { %13965 = vmatpush3.bf16.msra.mxu0 %v16644_v20  ;;  %13987 = vmatpush3.bf16.msra.mxu1 %v16645_v21 }
 0x66d   :  { %13966 = vmatprep.subr.bf16.mxu0 %v16646_v22  ;;  %13988 = vmatprep.subr.bf16.mxu1 %v16647_v23 }
 0x670   :  { %13967 = vmatpush3.bf16.msra.mxu0 %v16648_v24  ;;  %13989 = vmatpush3.bf16.msra.mxu1 %v16649_v25 }
 0x671   :  { %13968 = vmatprep.subr.bf16.mxu0 %v16650_v26  ;;  %13990 = vmatprep.subr.bf16.mxu1 %v16651_v27  ;;  %v13931_v27 = vld [vmem:[#allocation7] ss:$0 sm:$0xff] }
 0x674   :  { %13969 = vmatpush3.bf16.msra.mxu0 %v16652_v28  ;;  %13991 = vmatpush3.bf16.msra.mxu1 %v16653_v29 }
 0x675   :  { %13970 = vmatprep.subr.bf16.mxu0 %v16654_v30  ;;  %13992 = vmatprep.subr.bf16.mxu1 %v16655_v31 }
 0x678   :  { %13971 = vmatpush3.bf16.msra.mxu0 %v16656_v32  ;;  %13993 = vmatpush3.bf16.msra.mxu1 %v16657_v33 }
 0x679   :  { %13972 = vmatprep.subr.bf16.mxu0 %v16658_v34  ;;  %13994 = vmatprep.subr.bf16.mxu1 %v16659_v35 }
 0x67c   :  { %13973 = vmatpush3.bf16.msra.mxu0 %v16660_v36  ;;  %13995 = vmatpush3.bf16.msra.mxu1 %v16661_v37 }
 0x67d   :  { %13974 = vmatprep.subr.bf16.mxu0 %v16662_v38  ;;  %13996 = vmatprep.subr.bf16.mxu1 %v16663_v39 }
 0x680   :  { %13975 = vmatpush3.bf16.msra.mxu0 %v16664_v40  ;;  %13997 = vmatpush3.bf16.msra.mxu1 %v16665_v41 }
 0x681   :  { %13976 = vmatprep.subr.bf16.mxu0 %v16666_v42  ;;  %13998 = vmatprep.subr.bf16.mxu1 %v16667_v43 }
 0x684   :  { %13977 = vmatpush3.bf16.msra.mxu0 %v16668_v44  ;;  %13999 = vmatpush3.bf16.msra.mxu1 %v16669_v45 }
 0x685   :  { %13978 = vmatprep.subr.bf16.mxu0 %v16670_v46  ;;  %14000 = vmatprep.subr.bf16.mxu1 %v16671_v47 }
 0x688   :  { %13979 = vmatpush3.bf16.msra.mxu0 %v16672_v48  ;;  %14001 = vmatpush3.bf16.msra.mxu1 %v16673_v49 }
 0x73e   :  { %v10864_v61 = vpop.f32.mrb[0].mxu0  ;;  %v11939_v62 = vpop.f32.mrb[0].mxu1 }
 0x73f   :  { %v14008_v63 = vadd.f32 %v10864_v61, %v1695_v57  ;;  %v14012_v0 = vadd.f32 %v11939_v62, %v1703_v58  ;;  %v10866_v1 = vpop.f32.mrb[1].mxu0  ;;  %v11941_v2 = vpop.f32.mrb[1].mxu1 }
 0x740   :  { %v14009_v3 = vadd.f32 %v10866_v1, %v1699_v59  ;;  %v14013_v4 = vadd.f32 %v11941_v2, %v1707_v60  ;;  %v10868_v5 = vpop.f32.mrb[2].mxu0  ;;  %v11943_v6 = vpop.f32.mrb[2].mxu1 }
 0x741   :  { %v14010_v7 = vadd.f32 %v10868_v5, %v1695_v57  ;;  %v14014_v8 = vadd.f32 %v11943_v6, %v1703_v58  ;;  %v10870_v9 = vpop.f32.mrb[3].mxu0  ;;  %v11945_v10 = vpop.f32.mrb[3].mxu1  ;;  %v11948_v13 = vmax.f32 %v14008_v63, 0.0  ;;  %v11950_v14 = vmax.f32 %v14012_v0, 0.0 }
 0x742   :  { %v14011_v11 = vadd.f32 %v10870_v9, %v1699_v59  ;;  %v14015_v12 = vadd.f32 %v11945_v10, %v1707_v60  ;;  %v11949_v17 = vmax.f32 %v14009_v3, 0.0  ;;  %v11951_v18 = vmax.f32 %v14013_v4, 0.0 }
 0x743   :  { %v11952_v15 = vmax.f32 %v14010_v7, 0.0  ;;  %v11954_v16 = vmax.f32 %v14014_v8, 0.0 }
 0x744   :  { %v11953_v19 = vmax.f32 %v14011_v11, 0.0  ;;  %v11955_v20 = vmax.f32 %v14015_v12, 0.0 }
 0x745   :  { %v11956_v21 = vpack.c.bf16 %v11952_v15, %v11948_v13  ;;  %v11958_v22 = vpack.c.bf16 %v11954_v16, %v11950_v14 }
 0x746   :  { %v11957_v23 = vpack.c.bf16 %v11953_v19, %v11949_v17  ;;  %v11959_v24 = vpack.c.bf16 %v11955_v20, %v11951_v18 }
 0x748   :  { %12255 = vmatprep.mubr.bf16.mxu0 %v11957_v23  ;;  %12296 = vmatprep.mubr.bf16.mxu1 %v11959_v24 }
 0x749   :  { %12256 = vmatmul.mubr.bf16.vlgmr.msra.gmra.mrb[4].mxu0 %v11956_v21  ;;  %12297 = vmatmul.mubr.bf16.vlgmr.msra.gmra.mrb[4].mxu1 %v11958_v22 }
 0x81c   :  { %v13980_v25 = vpop.f32.mrb[4].mxu0  ;;  %v14002_v26 = vpop.f32.mrb[4].mxu1 }
 0x81d   :  { %v13981_v28 = vpop.f32.mrb[5].mxu0  ;;  %v14003_v29 = vpop.f32.mrb[5].mxu1 }
 0x81e   :  { %v13982_v30 = vadd.f32 %v13981_v28, %v13980_v25  ;;  %v14004_v31 = vadd.f32 %v14003_v29, %v14002_v26  ;;  %v13983_v32 = vpop.f32.mrb[6].mxu0  ;;  %v14005_v33 = vpop.f32.mrb[6].mxu1 }
 0x81f   :  { %v13984_v34 = vpop.f32.mrb[7].mxu0  ;;  %v14006_v35 = vpop.f32.mrb[7].mxu1 }
 0x820   :  { %v12258_v36 = vadd.f32 %v13982_v30, %v13931_v27  ;;  %v13985_v37 = vadd.f32 %v13984_v34, %v13983_v32  ;;  %v14007_v38 = vadd.f32 %v14006_v35, %v14005_v33 }
 0x822   :  { %v12299_v39 = vadd.f32 %v14004_v31, %v12258_v36  ;;  %v12261_v40 = vadd.f32 %v13985_v37, %v13931_v27 }
 0x824   :  { %12305 = vst [vmem:[%s17020_s5] sm:$0xff] %v12299_v39  ;;  %v12302_v41 = vadd.f32 %v14007_v38, %v12261_v40 }
 0x826   :  { %12306 = vst [vmem:[%s17020_s5 + $0x8] sm:$0xff] %v12302_v41 }
 0x827   :  { %12311 = vsyncpa [#allocation3], 1 }
 0x828   :  { %12312 = vsyncpa [#allocation5], 1 }
 0x829   :  { %12313 = vsyncpa [#allocation8], 1 }

</bundles_post_ra>
